<compile_context>
chip_gen: v6e
topology: v6e:2x2x1
jax: 0.10.0
libtpu: 0.0.40
codegen_flags: <defaults>
</compile_context>

<pallas_src>
import functools
import math

import jax
import jax.numpy as jnp
from jax.experimental import pallas as pl
from jax.experimental.pallas import tpu as pltpu


# ----------------------------------------------------------------------------
# In-kernel building blocks (operate on jnp values, not Refs)
# ----------------------------------------------------------------------------

def _bf16(x):
    return x.astype(jnp.bfloat16)


def _add_ln(x, y, g, b):
    """Residual add + LayerNorm; statistics in f32."""
    z = x + y
    mu = jnp.mean(z, axis=-1, keepdims=True)
    var = jnp.mean(jnp.square(z - mu), axis=-1, keepdims=True)
    return (z - mu) * jax.lax.rsqrt(var + 1e-5) * g + b


def _ffn(x, w1, b1, w2, b2):
    h = jnp.dot(_bf16(x), w1, preferred_element_type=jnp.float32) + b1
    h = jnp.maximum(h, 0.0)
    return jnp.dot(_bf16(h), w2, preferred_element_type=jnp.float32) + b2


def _mha(x_q, bias, wqkv_h, bqkv_h, wo_h, bo, num_heads, x_kv=None):
    """Multi-head attention, batched over (head, batch).

    x_q:    (B, Sq, D) f32       queries input
    x_kv:   (B, Sk, D) f32 or None (None -> self-attention, fused QKV matmul)
    bias:   additive mask bias broadcastable to (B, Sq, Sk), 0 / -1e9
    wqkv_h: (3H, D, hd) bf16     head-major packed Q,K,V weights
    bqkv_h: (3H, 1, hd) f32
    wo_h:   (H, hd, D)  bf16     head-major output projection
    bo:     (1, D)      f32

    All head handling is done with leading-dim broadcasts + batched einsums
    (no lane slicing, no stack/concat, no transposes inside the kernel); the
    output projection is a per-head matmul summed over heads (== concat + Wo).
    """
    H = num_heads
    B, Sq, D = x_q.shape
    hd = D // H
    G = H * B
    scale = 1.0 / math.sqrt(hd)
    self_attn = x_kv is None
    if self_attn:
        x_kv = x_q
    Sk = x_kv.shape[1]

    def proj(x, w, bvec):
        # x: (B, S, D) f32; w: (n, D, hd) bf16; bvec: (n, 1, hd) f32
        n, S = w.shape[0], x.shape[1]
        xb = jnp.broadcast_to(_bf16(x)[None], (n, B, S, D)).reshape(n * B, S, D)
        wb = jnp.broadcast_to(w[:, None], (n, B, D, hd)).reshape(n * B, D, hd)
        bb = jnp.broadcast_to(bvec[:, None], (n, B, 1, hd)).reshape(n * B, 1, hd)
        return jnp.einsum('gsd,gdf->gsf', xb, wb,
                          preferred_element_type=jnp.float32) + bb

    if self_attn:
        qkv = proj(x_q, wqkv_h, bqkv_h)                 # (3G, Sq, hd): fused QKV
        q, k, v = qkv[:G], qkv[G:2 * G], qkv[2 * G:]
    else:
        q = proj(x_q, wqkv_h[:H], bqkv_h[:H])           # (G, Sq, hd)
        kv = proj(x_kv, wqkv_h[H:], bqkv_h[H:])         # (2G, Sk, hd): fused KV
        k, v = kv[:G], kv[G:]

    s = jnp.einsum('gqd,gkd->gqk', _bf16(q), _bf16(k),
                   preferred_element_type=jnp.float32) * scale   # (G, Sq, Sk)
    s = (s.reshape(H, B, Sq, Sk) + bias[None]).reshape(G, Sq, Sk)

    m = jnp.max(s, axis=-1, keepdims=True)
    e = jnp.exp(s - m)
    p = e / jnp.sum(e, axis=-1, keepdims=True)          # exact softmax

    ctx = jnp.einsum('gqk,gkd->gqd', _bf16(p), _bf16(v),
                     preferred_element_type=jnp.float32)         # (G, Sq, hd)
    wob = jnp.broadcast_to(wo_h[:, None], (H, B, hd, D)).reshape(G, hd, D)
    o = jnp.einsum('gqd,gdf->gqf', _bf16(ctx), wob,
                   preferred_element_type=jnp.float32)           # (G, Sq, D)
    return jnp.sum(o.reshape(H, B, Sq, D), axis=0) + bo          # (B, Sq, D)


# ----------------------------------------------------------------------------
# The single fused kernel
# ----------------------------------------------------------------------------

def _fused_forward_kernel(
        src_ref, tgt_ref, src_kbias_ref, pe_ref,
        enc_emb_w_ref, dec_emb_w_ref, emb_b_ref,
        enc_wqkv_ref, enc_bqkv_ref, enc_wo_ref,
        enc_w1_ref, enc_b1_ref, enc_w2_ref, enc_vecs_ref,
        dec_swqkv_ref, dec_sbqkv_ref, dec_swo_ref,
        dec_cwqkv_ref, dec_cbqkv_ref, dec_cwo_ref,
        dec_w1_ref, dec_b1_ref, dec_w2_ref, dec_vecs_ref,
        fc_w_ref, fc_b_ref,
        out_ref, *, num_heads, num_layers):
    B, Ss, F = src_ref.shape
    St = tgt_ref.shape[1]
    D = emb_b_ref.shape[1]
    H = num_heads

    src = src_ref[...]
    tgt = tgt_ref[...]
    pe = pe_ref[...]
    emb_b = emb_b_ref[...]                               # (2, D): [enc_b, dec_b]
    src_kbias = src_kbias_ref[...]                       # (B, 1, Ss) additive, 0/-1e9

    # Decoder self-attention mask built in-kernel: causal & tgt query validity
    # (matches torch generate_mask).  Built once as an additive bias.
    tgt_valid = jnp.min(jnp.where(tgt >= -1.0, 1.0, 0.0),
                        axis=-1, keepdims=True)          # (B, St, 1) 1/0
    row = jax.lax.broadcasted_iota(jnp.int32, (St, St), 0)
    col = jax.lax.broadcasted_iota(jnp.int32, (St, St), 1)
    causal = (col <= row).astype(jnp.float32)            # (St, St)
    self_bias = (causal[None, :, :] * tgt_valid - 1.0) * 1e9   # (B, St, St)

    def embed(x, S, emb_w, b_row):
        # linear embedding of continuous features + positional encoding, fused
        h = jnp.dot(_bf16(x.reshape(B * S, F)), emb_w,
                    preferred_element_type=jnp.float32) + b_row
        h = h.reshape(B, S, D) + pe[:S][None]
        return h.reshape(B * S, D)

    # ---------------- encoder stack ----------------
    x = embed(src, Ss, enc_emb_w_ref[...], emb_b[0:1, :])
    for l in range(num_layers):
        vecs = enc_vecs_ref[l]                           # (6, D): bo,g1,b1,b2,g2,b2
        a = _mha(x.reshape(B, Ss, D), src_kbias,
                 enc_wqkv_ref[l], enc_bqkv_ref[l], enc_wo_ref[l],
                 vecs[0:1, :], H)
        x = _add_ln(x, a.reshape(B * Ss, D), vecs[1:2, :], vecs[2:3, :])
        f = _ffn(x, enc_w1_ref[l], enc_b1_ref[l], enc_w2_ref[l], vecs[3:4, :])
        x = _add_ln(x, f, vecs[4:5, :], vecs[5:6, :])
    enc_out = x.reshape(B, Ss, D)

    # ---------------- decoder stack ----------------
    y = embed(tgt, St, dec_emb_w_ref[...], emb_b[1:2, :])
    for l in range(num_layers):
        vecs = dec_vecs_ref[l]                           # (9, D)
        a = _mha(y.reshape(B, St, D), self_bias,
                 dec_swqkv_ref[l], dec_sbqkv_ref[l], dec_swo_ref[l],
                 vecs[0:1, :], H)
        y = _add_ln(y, a.reshape(B * St, D), vecs[1:2, :], vecs[2:3, :])
        c = _mha(y.reshape(B, St, D), src_kbias,
                 dec_cwqkv_ref[l], dec_cbqkv_ref[l], dec_cwo_ref[l],
                 vecs[3:4, :], H, x_kv=enc_out)
        y = _add_ln(y, c.reshape(B * St, D), vecs[4:5, :], vecs[5:6, :])
        f = _ffn(y, dec_w1_ref[l], dec_b1_ref[l], dec_w2_ref[l], vecs[6:7, :])
        y = _add_ln(y, f, vecs[7:8, :], vecs[8:9, :])

    # ---------------- final projection (128-lane-dense output) --------------
    out = jnp.dot(_bf16(y), fc_w_ref[...],
                  preferred_element_type=jnp.float32) + fc_b_ref[...]
    out_ref[...] = out.reshape(B, St, fc_w_ref.shape[1])


# ----------------------------------------------------------------------------
# pallas_call wrapper
# ----------------------------------------------------------------------------

def ribonanza_forward(params, src, tgt=None, *, num_heads, num_layers,
                      tgt_vocab_size):
    if tgt is None:
        # torch: src.where(src < -4, 1.0) -> keep src where src < -4, else 1.0
        tgt = jnp.where(src < -4.0, src, 1.0)

    B, Ss, _ = src.shape
    St = tgt.shape[1]

    # src key-padding mask as a tiny additive-bias row in LANE layout, built
    # once outside the kernel (fuses with the tgt default under jit); all
    # other masks are built in-kernel.
    src_valid = jnp.all(src >= -1.0, axis=-1)                        # (B, Ss)
    src_kbias = jnp.where(src_valid, 0.0, -1e9).astype(jnp.float32)
    src_kbias = src_kbias.reshape(B, 1, Ss)

    kernel = functools.partial(_fused_forward_kernel,
                               num_heads=num_heads, num_layers=num_layers)
    vmem = pltpu.MemorySpace.VMEM
    n_in = 26
    out_padded = pl.pallas_call(
        kernel,
        out_shape=jax.ShapeDtypeStruct((B, St, params["fc_w"].shape[1]),
                                       jnp.float32),
        in_specs=[pl.BlockSpec(memory_space=vmem)] * n_in,
        out_specs=pl.BlockSpec(memory_space=vmem),
    )(src, tgt, src_kbias, params["pe"],
      params["enc_emb_w"], params["dec_emb_w"], params["emb_b"],
      params["enc_wqkv"], params["enc_bqkv"], params["enc_wo"],
      params["enc_w1"], params["enc_b1"], params["enc_w2"], params["enc_vecs"],
      params["dec_swqkv"], params["dec_sbqkv"], params["dec_swo"],
      params["dec_cwqkv"], params["dec_cbqkv"], params["dec_cwo"],
      params["dec_w1"], params["dec_b1"], params["dec_w2"], params["dec_vecs"],
      params["fc_w"], params["fc_b"])
    return out_padded[:, :, :tgt_vocab_size]


# ----------------------------------------------------------------------------
# Parameter construction (packed / pre-cast / pre-padded at init)
# ----------------------------------------------------------------------------

def sinusoidal_pe(max_len, d_model):
    pos = jnp.arange(max_len, dtype=jnp.float32)[:, None]
    i = jnp.arange(0, d_model, 2, dtype=jnp.float32)[None, :]
    angle = pos / jnp.power(10000.0, i / d_model)
    pe = jnp.zeros((max_len, d_model), jnp.float32)
    pe = pe.at[:, 0::2].set(jnp.sin(angle))
    pe = pe.at[:, 1::2].set(jnp.cos(angle))
    return pe


class _KeyGen:
    def __init__(self, key):
        self.key = key

    def __call__(self):
        self.key, sub = jax.random.split(self.key)
        return sub


def _attn_pack(kg, d_model, num_heads):
    """Head-major packed attention params: (3H,D,hd), (3H,1,hd), (H,hd,D), (D,)."""
    D, H = d_model, num_heads
    hd = D // H

    def lin():
        return (jax.random.normal(kg(), (D, D), jnp.float32) * 0.05,
                jnp.zeros((D,), jnp.float32))

    wq, bq = lin(); wk, bk = lin(); wv, bv = lin(); wo, bo = lin()
    heads = lambda w: jnp.transpose(w.reshape(D, H, hd), (1, 0, 2))   # (H, D, hd)
    wqkv_h = jnp.concatenate([heads(wq), heads(wk), heads(wv)],
                             axis=0).astype(jnp.bfloat16)             # (3H, D, hd)
    bqkv_h = jnp.concatenate([bq.reshape(H, 1, hd), bk.reshape(H, 1, hd),
                              bv.reshape(H, 1, hd)], axis=0)          # (3H, 1, hd)
    wo_h = wo.reshape(H, hd, D).astype(jnp.bfloat16)                  # (H, hd, D)
    return wqkv_h, bqkv_h, wo_h, bo


def init_params(key, src_vocab_size, tgt_vocab_size, d_model, num_heads,
                num_layers, d_ff, max_seq_length):
    assert d_model % num_heads == 0
    kg = _KeyGen(key)
    D, Dff, L, F = d_model, d_ff, num_layers, src_vocab_size

    def ffn_pack():
        w1 = (jax.random.normal(kg(), (D, Dff)) * 0.05).astype(jnp.bfloat16)
        b1 = jnp.zeros((1, Dff), jnp.float32)
        w2 = (jax.random.normal(kg(), (Dff, D)) * 0.05).astype(jnp.bfloat16)
        b2 = jnp.zeros((D,), jnp.float32)
        return w1, b1, w2, b2

    ones = jnp.ones((D,), jnp.float32)
    zeros = jnp.zeros((D,), jnp.float32)

    enc = dict(wqkv=[], bqkv=[], wo=[], w1=[], b1=[], w2=[], vecs=[])
    dec = dict(swqkv=[], sbqkv=[], swo=[], cwqkv=[], cbqkv=[], cwo=[],
               w1=[], b1=[], w2=[], vecs=[])
    for _ in range(L):
        wqkv, bqkv, wo_h, bo = _attn_pack(kg, D, num_heads)
        w1, b1, w2, b2 = ffn_pack()
        enc["wqkv"].append(wqkv); enc["bqkv"].append(bqkv); enc["wo"].append(wo_h)
        enc["w1"].append(w1); enc["b1"].append(b1); enc["w2"].append(w2)
        # packed vector rows: [bo, ln1_g, ln1_b, b2, ln2_g, ln2_b]
        enc["vecs"].append(jnp.stack([bo, ones, zeros, b2, ones, zeros], 0))

        swqkv, sbqkv, swo, sbo = _attn_pack(kg, D, num_heads)
        cwqkv, cbqkv, cwo, cbo = _attn_pack(kg, D, num_heads)
        w1, b1, w2, b2 = ffn_pack()
        dec["swqkv"].append(swqkv); dec["sbqkv"].append(sbqkv); dec["swo"].append(swo)
        dec["cwqkv"].append(cwqkv); dec["cbqkv"].append(cbqkv); dec["cwo"].append(cwo)
        dec["w1"].append(w1); dec["b1"].append(b1); dec["w2"].append(w2)
        # rows: [self_bo, ln1_g, ln1_b, cross_bo, ln2_g, ln2_b, b2, ln3_g, ln3_b]
        dec["vecs"].append(jnp.stack([sbo, ones, zeros, cbo, ones, zeros,
                                      b2, ones, zeros], 0))

    # fc projection pre-padded to a 128-lane-dense width once at init.
    fc_w = jax.random.normal(kg(), (D, tgt_vocab_size), jnp.float32) * 0.05
    fc_b = jnp.zeros((tgt_vocab_size,), jnp.float32)
    dp = ((tgt_vocab_size + 127) // 128) * 128
    fc_w_p = jnp.zeros((D, dp), jnp.float32).at[:, :tgt_vocab_size].set(fc_w)
    fc_b_p = jnp.zeros((1, dp), jnp.float32).at[:, :tgt_vocab_size].set(fc_b[None, :])

    return {
        "pe": sinusoidal_pe(max_seq_length, D),
        "enc_emb_w": (jax.random.normal(kg(), (F, D)) * 0.05).astype(jnp.bfloat16),
        "dec_emb_w": (jax.random.normal(kg(), (F, D)) * 0.05).astype(jnp.bfloat16),
        "emb_b": jnp.zeros((2, D), jnp.float32),          # rows: [enc_b, dec_b]
        "enc_wqkv": jnp.stack(enc["wqkv"]), "enc_bqkv": jnp.stack(enc["bqkv"]),
        "enc_wo": jnp.stack(enc["wo"]), "enc_w1": jnp.stack(enc["w1"]),
        "enc_b1": jnp.stack(enc["b1"]), "enc_w2": jnp.stack(enc["w2"]),
        "enc_vecs": jnp.stack(enc["vecs"]),
        "dec_swqkv": jnp.stack(dec["swqkv"]), "dec_sbqkv": jnp.stack(dec["sbqkv"]),
        "dec_swo": jnp.stack(dec["swo"]),
        "dec_cwqkv": jnp.stack(dec["cwqkv"]), "dec_cbqkv": jnp.stack(dec["cbqkv"]),
        "dec_cwo": jnp.stack(dec["cwo"]),
        "dec_w1": jnp.stack(dec["w1"]), "dec_b1": jnp.stack(dec["b1"]),
        "dec_w2": jnp.stack(dec["w2"]), "dec_vecs": jnp.stack(dec["vecs"]),
        "fc_w": fc_w_p.astype(jnp.bfloat16), "fc_b": fc_b_p,
    }


if __name__ == "__main__":
    # Small, forward-consistent config.
    B, S = 2, 8
    src_vocab_size = 4          # treated as continuous input feature dim
    tgt_vocab_size = 5
    d_model, num_heads, num_layers, d_ff = 32, 4, 2, 64
    max_seq_length = 16
    dropout = 0.1               # eval mode -> identity

    key = jax.random.PRNGKey(0)
    k_param, k_src = jax.random.split(key)
    params = init_params(k_param, src_vocab_size, tgt_vocab_size, d_model,
                         num_heads, num_layers, d_ff, max_seq_length)

    src = jax.random.normal(k_src, (B, S, src_vocab_size), jnp.float32)
    # Mark the last position of batch 1 as padding (values < -1) to exercise masks.
    src = src.at[1, -1, :].set(-5.0)

    fwd = jax.jit(functools.partial(ribonanza_forward, num_heads=num_heads,
                                    num_layers=num_layers,
                                    tgt_vocab_size=tgt_vocab_size))
    out = fwd(params, src)
    out = jax.block_until_ready(out)
    assert out.shape == (B, S, tgt_vocab_size), out.shape
    assert bool(jnp.all(jnp.isfinite(out)))
    print("KERNEL_OK")
</pallas_src>

<mosaic_0001>
module attributes {stable_mosaic.version = 11 : i64} {
  func.func @_fused_forward_kernel(%arg0: memref<2x8x4xf32, #tpu.memory_space<vmem>>, %arg1: memref<2x8x4xf32, #tpu.memory_space<vmem>>, %arg2: memref<2x1x8xf32, #tpu.memory_space<vmem>>, %arg3: memref<16x32xf32, #tpu.memory_space<vmem>>, %arg4: memref<4x32xbf16, #tpu.memory_space<vmem>>, %arg5: memref<4x32xbf16, #tpu.memory_space<vmem>>, %arg6: memref<2x32xf32, #tpu.memory_space<vmem>>, %arg7: memref<2x12x32x8xbf16, #tpu.memory_space<vmem>>, %arg8: memref<2x12x1x8xf32, #tpu.memory_space<vmem>>, %arg9: memref<2x4x8x32xbf16, #tpu.memory_space<vmem>>, %arg10: memref<2x32x64xbf16, #tpu.memory_space<vmem>>, %arg11: memref<2x1x64xf32, #tpu.memory_space<vmem>>, %arg12: memref<2x64x32xbf16, #tpu.memory_space<vmem>>, %arg13: memref<2x6x32xf32, #tpu.memory_space<vmem>>, %arg14: memref<2x12x32x8xbf16, #tpu.memory_space<vmem>>, %arg15: memref<2x12x1x8xf32, #tpu.memory_space<vmem>>, %arg16: memref<2x4x8x32xbf16, #tpu.memory_space<vmem>>, %arg17: memref<2x12x32x8xbf16, #tpu.memory_space<vmem>>, %arg18: memref<2x12x1x8xf32, #tpu.memory_space<vmem>>, %arg19: memref<2x4x8x32xbf16, #tpu.memory_space<vmem>>, %arg20: memref<2x32x64xbf16, #tpu.memory_space<vmem>>, %arg21: memref<2x1x64xf32, #tpu.memory_space<vmem>>, %arg22: memref<2x64x32xbf16, #tpu.memory_space<vmem>>, %arg23: memref<2x9x32xf32, #tpu.memory_space<vmem>>, %arg24: memref<32x128xbf16, #tpu.memory_space<vmem>>, %arg25: memref<1x128xf32, #tpu.memory_space<vmem>>, %arg26: memref<2x8x128xf32, #tpu.memory_space<vmem>>) attributes {dimension_semantics = [], scalar_prefetch = 0 : i64, scratch_operands = 0 : i64, tpu.core_type = #tpu.core_type<tc>} {
    %c0 = arith.constant 0 : index
    %c0_0 = arith.constant 0 : index
    %c0_1 = arith.constant 0 : index
    %0 = vector.load %arg0[%c0, %c0_0, %c0_1] : memref<2x8x4xf32, #tpu.memory_space<vmem>>, vector<2x8x4xf32>
    %c0_2 = arith.constant 0 : index
    %c0_3 = arith.constant 0 : index
    %c0_4 = arith.constant 0 : index
    %1 = vector.load %arg1[%c0_2, %c0_3, %c0_4] : memref<2x8x4xf32, #tpu.memory_space<vmem>>, vector<2x8x4xf32>
    %c0_5 = arith.constant 0 : index
    %c0_6 = arith.constant 0 : index
    %2 = vector.load %arg3[%c0_5, %c0_6] : memref<16x32xf32, #tpu.memory_space<vmem>>, vector<16x32xf32>
    %c0_7 = arith.constant 0 : index
    %c0_8 = arith.constant 0 : index
    %3 = vector.load %arg6[%c0_7, %c0_8] : memref<2x32xf32, #tpu.memory_space<vmem>>, vector<2x32xf32>
    %c0_9 = arith.constant 0 : index
    %c0_10 = arith.constant 0 : index
    %c0_11 = arith.constant 0 : index
    %4 = vector.load %arg2[%c0_9, %c0_10, %c0_11] : memref<2x1x8xf32, #tpu.memory_space<vmem>>, vector<2x1x8xf32>
    %cst = arith.constant -1.000000e+00 : f32
    %5 = vector.broadcast %cst : f32 to vector<2x8x4xf32>
    %6 = arith.cmpf oge, %1, %5 : vector<2x8x4xf32>
    %cst_12 = arith.constant 1.000000e+00 : f32
    %cst_13 = arith.constant 0.000000e+00 : f32
    %7 = vector.broadcast %cst_12 : f32 to vector<2x8x4xf32>
    %8 = vector.broadcast %cst_13 : f32 to vector<2x8x4xf32>
    %9 = arith.select %6, %7, %8 : vector<2x8x4xi1>, vector<2x8x4xf32>
    %cst_14 = arith.constant dense<0x7F800000> : vector<2x8xf32>
    %10 = vector.multi_reduction <minimumf>, %9, %cst_14 [2] : vector<2x8x4xf32> to vector<2x8xf32>
    %11 = vector.shape_cast %10 : vector<2x8xf32> to vector<2x8x1xf32>
    %12 = tpu.iota {dimensions = array<i32: 0>} : vector<8x8xi32>
    %13 = tpu.iota {dimensions = array<i32: 1>} : vector<8x8xi32>
    %14 = arith.cmpi sle, %13, %12 : vector<8x8xi32>
    %15 = arith.extui %14 : vector<8x8xi1> to vector<8x8xi32>
    %16 = arith.sitofp %15 : vector<8x8xi32> to vector<8x8xf32>
    %17 = vector.shape_cast %16 : vector<8x8xf32> to vector<1x8x8xf32>
    %18 = vector.broadcast %17 : vector<1x8x8xf32> to vector<2x8x8xf32>
    %19 = vector.broadcast %11 : vector<2x8x1xf32> to vector<2x8x8xf32>
    %20 = arith.mulf %18, %19 : vector<2x8x8xf32>
    %cst_15 = arith.constant 1.000000e+00 : f32
    %21 = vector.broadcast %cst_15 : f32 to vector<2x8x8xf32>
    %22 = arith.subf %20, %21 : vector<2x8x8xf32>
    %cst_16 = arith.constant 1.000000e+09 : f32
    %23 = vector.broadcast %cst_16 : f32 to vector<2x8x8xf32>
    %24 = arith.mulf %22, %23 : vector<2x8x8xf32>
    %c0_17 = arith.constant 0 : index
    %c0_18 = arith.constant 0 : index
    %25 = vector.load %arg4[%c0_17, %c0_18] : memref<4x32xbf16, #tpu.memory_space<vmem>>, vector<4x32xbf16>
    %26 = vector.extract_strided_slice %3 {offsets = [0, 0], sizes = [1, 32], strides = [1, 1]} : vector<2x32xf32> to vector<1x32xf32>
    %27 = vector.shape_cast %0 : vector<2x8x4xf32> to vector<16x4xf32>
    %28 = arith.truncf %27 : vector<16x4xf32> to vector<16x4xbf16>
    %cst_19 = arith.constant dense<0.000000e+00> : vector<16x32xf32>
    %29 = tpu.matmul %28, %25, %cst_19 {dimension_numbers = #tpu.dot_dimension_numbers<[1], [0], [0], [1], [0, 0, 1, 1], [], []>} : vector<16x4xbf16>, vector<4x32xbf16>, vector<16x32xf32> -> vector<16x32xf32>
    %30 = vector.broadcast %26 : vector<1x32xf32> to vector<16x32xf32>
    %31 = arith.addf %29, %30 : vector<16x32xf32>
    %32 = vector.shape_cast %31 : vector<16x32xf32> to vector<2x8x32xf32>
    %33 = vector.extract_strided_slice %2 {offsets = [0, 0], sizes = [8, 32], strides = [1, 1]} : vector<16x32xf32> to vector<8x32xf32>
    %34 = vector.shape_cast %33 : vector<8x32xf32> to vector<1x8x32xf32>
    %35 = vector.broadcast %34 : vector<1x8x32xf32> to vector<2x8x32xf32>
    %36 = arith.addf %32, %35 : vector<2x8x32xf32>
    %37 = vector.shape_cast %36 : vector<2x8x32xf32> to vector<16x32xf32>
    %c0_20 = arith.constant 0 : index
    %c0_21 = arith.constant 0 : index
    %c0_22 = arith.constant 0 : index
    %38 = vector.load %arg13[%c0_20, %c0_21, %c0_22] : memref<2x6x32xf32, #tpu.memory_space<vmem>>, vector<1x6x32xf32>
    %39 = vector.shape_cast %38 : vector<1x6x32xf32> to vector<6x32xf32>
    %40 = vector.shape_cast %37 : vector<16x32xf32> to vector<2x8x32xf32>
    %c0_23 = arith.constant 0 : index
    %c0_24 = arith.constant 0 : index
    %c0_25 = arith.constant 0 : index
    %c0_26 = arith.constant 0 : index
    %41 = vector.load %arg7[%c0_23, %c0_24, %c0_25, %c0_26] : memref<2x12x32x8xbf16, #tpu.memory_space<vmem>>, vector<1x12x32x8xbf16>
    %42 = vector.shape_cast %41 : vector<1x12x32x8xbf16> to vector<12x32x8xbf16>
    %c0_27 = arith.constant 0 : index
    %c0_28 = arith.constant 0 : index
    %c0_29 = arith.constant 0 : index
    %c0_30 = arith.constant 0 : index
    %43 = vector.load %arg8[%c0_27, %c0_28, %c0_29, %c0_30] : memref<2x12x1x8xf32, #tpu.memory_space<vmem>>, vector<1x12x1x8xf32>
    %44 = vector.shape_cast %43 : vector<1x12x1x8xf32> to vector<12x1x8xf32>
    %c0_31 = arith.constant 0 : index
    %c0_32 = arith.constant 0 : index
    %c0_33 = arith.constant 0 : index
    %c0_34 = arith.constant 0 : index
    %45 = vector.load %arg9[%c0_31, %c0_32, %c0_33, %c0_34] : memref<2x4x8x32xbf16, #tpu.memory_space<vmem>>, vector<1x4x8x32xbf16>
    %46 = vector.shape_cast %45 : vector<1x4x8x32xbf16> to vector<4x8x32xbf16>
    %47 = vector.extract_strided_slice %39 {offsets = [0, 0], sizes = [1, 32], strides = [1, 1]} : vector<6x32xf32> to vector<1x32xf32>
    %48 = arith.truncf %40 : vector<2x8x32xf32> to vector<2x8x32xbf16>
    %49 = vector.shape_cast %48 : vector<2x8x32xbf16> to vector<1x2x8x32xbf16>
    %50 = vector.shape_cast %49 : vector<1x2x8x32xbf16> to vector<1x2x8x32xbf16>
    %51 = vector.broadcast %50 : vector<1x2x8x32xbf16> to vector<12x2x8x32xbf16>
    %52 = vector.shape_cast %51 : vector<12x2x8x32xbf16> to vector<24x8x32xbf16>
    %53 = vector.shape_cast %42 : vector<12x32x8xbf16> to vector<12x1x32x8xbf16>
    %54 = vector.shape_cast %53 : vector<12x1x32x8xbf16> to vector<12x1x32x8xbf16>
    %55 = vector.broadcast %54 : vector<12x1x32x8xbf16> to vector<12x2x32x8xbf16>
    %56 = vector.shape_cast %55 : vector<12x2x32x8xbf16> to vector<24x32x8xbf16>
    %57 = vector.shape_cast %44 : vector<12x1x8xf32> to vector<12x1x1x8xf32>
    %58 = vector.shape_cast %57 : vector<12x1x1x8xf32> to vector<12x1x1x8xf32>
    %59 = vector.broadcast %58 : vector<12x1x1x8xf32> to vector<12x2x1x8xf32>
    %60 = vector.shape_cast %59 : vector<12x2x1x8xf32> to vector<24x1x8xf32>
    "tpu.trace_start"() <{level = 10 : i32, message = "gsd,gdf->gsf"}> : () -> ()
    %cst_35 = arith.constant dense<0.000000e+00> : vector<24x8x8xf32>
    %61 = tpu.matmul %52, %56, %cst_35 {dimension_numbers = #tpu.dot_dimension_numbers<[2], [1], [1], [2], [0, 0, 0, 1, 1, 2], [0], [0]>} : vector<24x8x32xbf16>, vector<24x32x8xbf16>, vector<24x8x8xf32> -> vector<24x8x8xf32>
    "tpu.trace_stop"() : () -> ()
    %62 = vector.broadcast %60 : vector<24x1x8xf32> to vector<24x8x8xf32>
    %63 = arith.addf %61, %62 : vector<24x8x8xf32>
    %64 = vector.extract_strided_slice %63 {offsets = [0, 0, 0], sizes = [8, 8, 8], strides = [1, 1, 1]} : vector<24x8x8xf32> to vector<8x8x8xf32>
    %65 = vector.extract_strided_slice %63 {offsets = [8, 0, 0], sizes = [8, 8, 8], strides = [1, 1, 1]} : vector<24x8x8xf32> to vector<8x8x8xf32>
    %66 = vector.extract_strided_slice %63 {offsets = [16, 0, 0], sizes = [8, 8, 8], strides = [1, 1, 1]} : vector<24x8x8xf32> to vector<8x8x8xf32>
    %67 = arith.truncf %64 : vector<8x8x8xf32> to vector<8x8x8xbf16>
    %68 = arith.truncf %65 : vector<8x8x8xf32> to vector<8x8x8xbf16>
    "tpu.trace_start"() <{level = 10 : i32, message = "gqd,gkd->gqk"}> : () -> ()
    %cst_36 = arith.constant dense<0.000000e+00> : vector<8x8x8xf32>
    %69 = tpu.matmul %67, %68, %cst_36 {dimension_numbers = #tpu.dot_dimension_numbers<[2], [2], [1], [1], [0, 0, 0, 1, 1, 1], [0], [0]>} : vector<8x8x8xbf16>, vector<8x8x8xbf16>, vector<8x8x8xf32> -> vector<8x8x8xf32>
    "tpu.trace_stop"() : () -> ()
    %cst_37 = arith.constant 0.353553385 : f32
    %70 = vector.broadcast %cst_37 : f32 to vector<8x8x8xf32>
    %71 = arith.mulf %69, %70 : vector<8x8x8xf32>
    %72 = vector.shape_cast %71 : vector<8x8x8xf32> to vector<4x2x8x8xf32>
    %73 = vector.shape_cast %4 : vector<2x1x8xf32> to vector<1x2x1x8xf32>
    %74 = vector.broadcast %73 : vector<1x2x1x8xf32> to vector<4x2x8x8xf32>
    %75 = arith.addf %72, %74 : vector<4x2x8x8xf32>
    %76 = vector.shape_cast %75 : vector<4x2x8x8xf32> to vector<8x8x8xf32>
    %cst_38 = arith.constant dense<0xFF800000> : vector<8x8xf32>
    %77 = vector.multi_reduction <maximumf>, %76, %cst_38 [2] : vector<8x8x8xf32> to vector<8x8xf32>
    %78 = vector.shape_cast %77 : vector<8x8xf32> to vector<8x8x1xf32>
    %79 = vector.broadcast %78 : vector<8x8x1xf32> to vector<8x8x8xf32>
    %80 = arith.subf %76, %79 : vector<8x8x8xf32>
    %81 = math.exp %80 : vector<8x8x8xf32>
    %cst_39 = arith.constant dense<0.000000e+00> : vector<8x8xf32>
    %82 = vector.multi_reduction <add>, %81, %cst_39 [2] : vector<8x8x8xf32> to vector<8x8xf32>
    %83 = vector.shape_cast %82 : vector<8x8xf32> to vector<8x8x1xf32>
    %84 = vector.broadcast %83 : vector<8x8x1xf32> to vector<8x8x8xf32>
    %85 = arith.divf %81, %84 : vector<8x8x8xf32>
    %86 = arith.truncf %85 : vector<8x8x8xf32> to vector<8x8x8xbf16>
    %87 = arith.truncf %66 : vector<8x8x8xf32> to vector<8x8x8xbf16>
    "tpu.trace_start"() <{level = 10 : i32, message = "gqk,gkd->gqd"}> : () -> ()
    %cst_40 = arith.constant dense<0.000000e+00> : vector<8x8x8xf32>
    %88 = tpu.matmul %86, %87, %cst_40 {dimension_numbers = #tpu.dot_dimension_numbers<[2], [1], [1], [2], [0, 0, 0, 1, 1, 2], [0], [0]>} : vector<8x8x8xbf16>, vector<8x8x8xbf16>, vector<8x8x8xf32> -> vector<8x8x8xf32>
    "tpu.trace_stop"() : () -> ()
    %89 = vector.shape_cast %46 : vector<4x8x32xbf16> to vector<4x1x8x32xbf16>
    %90 = vector.shape_cast %89 : vector<4x1x8x32xbf16> to vector<4x1x8x32xbf16>
    %91 = vector.broadcast %90 : vector<4x1x8x32xbf16> to vector<4x2x8x32xbf16>
    %92 = vector.shape_cast %91 : vector<4x2x8x32xbf16> to vector<8x8x32xbf16>
    %93 = arith.truncf %88 : vector<8x8x8xf32> to vector<8x8x8xbf16>
    "tpu.trace_start"() <{level = 10 : i32, message = "gqd,gdf->gqf"}> : () -> ()
    %cst_41 = arith.constant dense<0.000000e+00> : vector<8x8x32xf32>
    %94 = tpu.matmul %93, %92, %cst_41 {dimension_numbers = #tpu.dot_dimension_numbers<[2], [1], [1], [2], [0, 0, 0, 1, 1, 2], [0], [0]>} : vector<8x8x8xbf16>, vector<8x8x32xbf16>, vector<8x8x32xf32> -> vector<8x8x32xf32>
    "tpu.trace_stop"() : () -> ()
    %95 = vector.shape_cast %94 : vector<8x8x32xf32> to vector<4x2x8x32xf32>
    %cst_42 = arith.constant dense<0.000000e+00> : vector<2x8x32xf32>
    %96 = vector.multi_reduction <add>, %95, %cst_42 [0] : vector<4x2x8x32xf32> to vector<2x8x32xf32>
    %97 = vector.shape_cast %47 : vector<1x32xf32> to vector<1x1x32xf32>
    %98 = vector.broadcast %97 : vector<1x1x32xf32> to vector<2x8x32xf32>
    %99 = arith.addf %96, %98 : vector<2x8x32xf32>
    %100 = vector.shape_cast %99 : vector<2x8x32xf32> to vector<16x32xf32>
    %101 = vector.extract_strided_slice %39 {offsets = [1, 0], sizes = [1, 32], strides = [1, 1]} : vector<6x32xf32> to vector<1x32xf32>
    %102 = vector.extract_strided_slice %39 {offsets = [2, 0], sizes = [1, 32], strides = [1, 1]} : vector<6x32xf32> to vector<1x32xf32>
    %103 = arith.addf %37, %100 : vector<16x32xf32>
    %cst_43 = arith.constant dense<0.000000e+00> : vector<16xf32>
    %104 = vector.multi_reduction <add>, %103, %cst_43 [1] : vector<16x32xf32> to vector<16xf32>
    %105 = vector.shape_cast %104 : vector<16xf32> to vector<16x1xf32>
    %cst_44 = arith.constant 3.200000e+01 : f32
    %106 = vector.broadcast %cst_44 : f32 to vector<16x1xf32>
    %107 = arith.divf %105, %106 : vector<16x1xf32>
    %108 = vector.broadcast %107 : vector<16x1xf32> to vector<16x32xf32>
    %109 = arith.subf %103, %108 : vector<16x32xf32>
    %110 = arith.mulf %109, %109 : vector<16x32xf32>
    %cst_45 = arith.constant dense<0.000000e+00> : vector<16xf32>
    %111 = vector.multi_reduction <add>, %110, %cst_45 [1] : vector<16x32xf32> to vector<16xf32>
    %112 = vector.shape_cast %111 : vector<16xf32> to vector<16x1xf32>
    %cst_46 = arith.constant 3.200000e+01 : f32
    %113 = vector.broadcast %cst_46 : f32 to vector<16x1xf32>
    %114 = arith.divf %112, %113 : vector<16x1xf32>
    %115 = vector.broadcast %107 : vector<16x1xf32> to vector<16x32xf32>
    %116 = arith.subf %103, %115 : vector<16x32xf32>
    %cst_47 = arith.constant 9.99999974E-6 : f32
    %117 = vector.broadcast %cst_47 : f32 to vector<16x1xf32>
    %118 = arith.addf %114, %117 : vector<16x1xf32>
    %119 = math.rsqrt %118 : vector<16x1xf32>
    %120 = vector.broadcast %119 : vector<16x1xf32> to vector<16x32xf32>
    %121 = arith.mulf %116, %120 : vector<16x32xf32>
    %122 = vector.broadcast %101 : vector<1x32xf32> to vector<16x32xf32>
    %123 = arith.mulf %121, %122 : vector<16x32xf32>
    %124 = vector.broadcast %102 : vector<1x32xf32> to vector<16x32xf32>
    %125 = arith.addf %123, %124 : vector<16x32xf32>
    %c0_48 = arith.constant 0 : index
    %c0_49 = arith.constant 0 : index
    %c0_50 = arith.constant 0 : index
    %126 = vector.load %arg10[%c0_48, %c0_49, %c0_50] : memref<2x32x64xbf16, #tpu.memory_space<vmem>>, vector<1x32x64xbf16>
    %127 = vector.shape_cast %126 : vector<1x32x64xbf16> to vector<32x64xbf16>
    %c0_51 = arith.constant 0 : index
    %c0_52 = arith.constant 0 : index
    %c0_53 = arith.constant 0 : index
    %128 = vector.load %arg11[%c0_51, %c0_52, %c0_53] : memref<2x1x64xf32, #tpu.memory_space<vmem>>, vector<1x1x64xf32>
    %129 = vector.shape_cast %128 : vector<1x1x64xf32> to vector<1x64xf32>
    %c0_54 = arith.constant 0 : index
    %c0_55 = arith.constant 0 : index
    %c0_56 = arith.constant 0 : index
    %130 = vector.load %arg12[%c0_54, %c0_55, %c0_56] : memref<2x64x32xbf16, #tpu.memory_space<vmem>>, vector<1x64x32xbf16>
    %131 = vector.shape_cast %130 : vector<1x64x32xbf16> to vector<64x32xbf16>
    %132 = vector.extract_strided_slice %39 {offsets = [3, 0], sizes = [1, 32], strides = [1, 1]} : vector<6x32xf32> to vector<1x32xf32>
    %133 = arith.truncf %125 : vector<16x32xf32> to vector<16x32xbf16>
    %cst_57 = arith.constant dense<0.000000e+00> : vector<16x64xf32>
    %134 = tpu.matmul %133, %127, %cst_57 {dimension_numbers = #tpu.dot_dimension_numbers<[1], [0], [0], [1], [0, 0, 1, 1], [], []>} : vector<16x32xbf16>, vector<32x64xbf16>, vector<16x64xf32> -> vector<16x64xf32>
    %135 = vector.broadcast %129 : vector<1x64xf32> to vector<16x64xf32>
    %136 = arith.addf %134, %135 : vector<16x64xf32>
    %cst_58 = arith.constant 0.000000e+00 : f32
    %137 = vector.broadcast %cst_58 : f32 to vector<16x64xf32>
    %138 = arith.maximumf %136, %137 : vector<16x64xf32>
    %139 = arith.truncf %138 : vector<16x64xf32> to vector<16x64xbf16>
    %cst_59 = arith.constant dense<0.000000e+00> : vector<16x32xf32>
    %140 = tpu.matmul %139, %131, %cst_59 {dimension_numbers = #tpu.dot_dimension_numbers<[1], [0], [0], [1], [0, 0, 1, 1], [], []>} : vector<16x64xbf16>, vector<64x32xbf16>, vector<16x32xf32> -> vector<16x32xf32>
    %141 = vector.broadcast %132 : vector<1x32xf32> to vector<16x32xf32>
    %142 = arith.addf %140, %141 : vector<16x32xf32>
    %143 = vector.extract_strided_slice %39 {offsets = [4, 0], sizes = [1, 32], strides = [1, 1]} : vector<6x32xf32> to vector<1x32xf32>
    %144 = vector.extract_strided_slice %39 {offsets = [5, 0], sizes = [1, 32], strides = [1, 1]} : vector<6x32xf32> to vector<1x32xf32>
    %145 = arith.addf %125, %142 : vector<16x32xf32>
    %cst_60 = arith.constant dense<0.000000e+00> : vector<16xf32>
    %146 = vector.multi_reduction <add>, %145, %cst_60 [1] : vector<16x32xf32> to vector<16xf32>
    %147 = vector.shape_cast %146 : vector<16xf32> to vector<16x1xf32>
    %cst_61 = arith.constant 3.200000e+01 : f32
    %148 = vector.broadcast %cst_61 : f32 to vector<16x1xf32>
    %149 = arith.divf %147, %148 : vector<16x1xf32>
    %150 = vector.broadcast %149 : vector<16x1xf32> to vector<16x32xf32>
    %151 = arith.subf %145, %150 : vector<16x32xf32>
    %152 = arith.mulf %151, %151 : vector<16x32xf32>
    %cst_62 = arith.constant dense<0.000000e+00> : vector<16xf32>
    %153 = vector.multi_reduction <add>, %152, %cst_62 [1] : vector<16x32xf32> to vector<16xf32>
    %154 = vector.shape_cast %153 : vector<16xf32> to vector<16x1xf32>
    %cst_63 = arith.constant 3.200000e+01 : f32
    %155 = vector.broadcast %cst_63 : f32 to vector<16x1xf32>
    %156 = arith.divf %154, %155 : vector<16x1xf32>
    %157 = vector.broadcast %149 : vector<16x1xf32> to vector<16x32xf32>
    %158 = arith.subf %145, %157 : vector<16x32xf32>
    %cst_64 = arith.constant 9.99999974E-6 : f32
    %159 = vector.broadcast %cst_64 : f32 to vector<16x1xf32>
    %160 = arith.addf %156, %159 : vector<16x1xf32>
    %161 = math.rsqrt %160 : vector<16x1xf32>
    %162 = vector.broadcast %161 : vector<16x1xf32> to vector<16x32xf32>
    %163 = arith.mulf %158, %162 : vector<16x32xf32>
    %164 = vector.broadcast %143 : vector<1x32xf32> to vector<16x32xf32>
    %165 = arith.mulf %163, %164 : vector<16x32xf32>
    %166 = vector.broadcast %144 : vector<1x32xf32> to vector<16x32xf32>
    %167 = arith.addf %165, %166 : vector<16x32xf32>
    %c1 = arith.constant 1 : index
    %c0_65 = arith.constant 0 : index
    %c0_66 = arith.constant 0 : index
    %168 = vector.load %arg13[%c1, %c0_65, %c0_66] : memref<2x6x32xf32, #tpu.memory_space<vmem>>, vector<1x6x32xf32>
    %169 = vector.shape_cast %168 : vector<1x6x32xf32> to vector<6x32xf32>
    %170 = vector.shape_cast %167 : vector<16x32xf32> to vector<2x8x32xf32>
    %c1_67 = arith.constant 1 : index
    %c0_68 = arith.constant 0 : index
    %c0_69 = arith.constant 0 : index
    %c0_70 = arith.constant 0 : index
    %171 = vector.load %arg7[%c1_67, %c0_68, %c0_69, %c0_70] : memref<2x12x32x8xbf16, #tpu.memory_space<vmem>>, vector<1x12x32x8xbf16>
    %172 = vector.shape_cast %171 : vector<1x12x32x8xbf16> to vector<12x32x8xbf16>
    %c1_71 = arith.constant 1 : index
    %c0_72 = arith.constant 0 : index
    %c0_73 = arith.constant 0 : index
    %c0_74 = arith.constant 0 : index
    %173 = vector.load %arg8[%c1_71, %c0_72, %c0_73, %c0_74] : memref<2x12x1x8xf32, #tpu.memory_space<vmem>>, vector<1x12x1x8xf32>
    %174 = vector.shape_cast %173 : vector<1x12x1x8xf32> to vector<12x1x8xf32>
    %c1_75 = arith.constant 1 : index
    %c0_76 = arith.constant 0 : index
    %c0_77 = arith.constant 0 : index
    %c0_78 = arith.constant 0 : index
    %175 = vector.load %arg9[%c1_75, %c0_76, %c0_77, %c0_78] : memref<2x4x8x32xbf16, #tpu.memory_space<vmem>>, vector<1x4x8x32xbf16>
    %176 = vector.shape_cast %175 : vector<1x4x8x32xbf16> to vector<4x8x32xbf16>
    %177 = vector.extract_strided_slice %169 {offsets = [0, 0], sizes = [1, 32], strides = [1, 1]} : vector<6x32xf32> to vector<1x32xf32>
    %178 = arith.truncf %170 : vector<2x8x32xf32> to vector<2x8x32xbf16>
    %179 = vector.shape_cast %178 : vector<2x8x32xbf16> to vector<1x2x8x32xbf16>
    %180 = vector.shape_cast %179 : vector<1x2x8x32xbf16> to vector<1x2x8x32xbf16>
    %181 = vector.broadcast %180 : vector<1x2x8x32xbf16> to vector<12x2x8x32xbf16>
    %182 = vector.shape_cast %181 : vector<12x2x8x32xbf16> to vector<24x8x32xbf16>
    %183 = vector.shape_cast %172 : vector<12x32x8xbf16> to vector<12x1x32x8xbf16>
    %184 = vector.shape_cast %183 : vector<12x1x32x8xbf16> to vector<12x1x32x8xbf16>
    %185 = vector.broadcast %184 : vector<12x1x32x8xbf16> to vector<12x2x32x8xbf16>
    %186 = vector.shape_cast %185 : vector<12x2x32x8xbf16> to vector<24x32x8xbf16>
    %187 = vector.shape_cast %174 : vector<12x1x8xf32> to vector<12x1x1x8xf32>
    %188 = vector.shape_cast %187 : vector<12x1x1x8xf32> to vector<12x1x1x8xf32>
    %189 = vector.broadcast %188 : vector<12x1x1x8xf32> to vector<12x2x1x8xf32>
    %190 = vector.shape_cast %189 : vector<12x2x1x8xf32> to vector<24x1x8xf32>
    "tpu.trace_start"() <{level = 10 : i32, message = "gsd,gdf->gsf"}> : () -> ()
    %cst_79 = arith.constant dense<0.000000e+00> : vector<24x8x8xf32>
    %191 = tpu.matmul %182, %186, %cst_79 {dimension_numbers = #tpu.dot_dimension_numbers<[2], [1], [1], [2], [0, 0, 0, 1, 1, 2], [0], [0]>} : vector<24x8x32xbf16>, vector<24x32x8xbf16>, vector<24x8x8xf32> -> vector<24x8x8xf32>
    "tpu.trace_stop"() : () -> ()
    %192 = vector.broadcast %190 : vector<24x1x8xf32> to vector<24x8x8xf32>
    %193 = arith.addf %191, %192 : vector<24x8x8xf32>
    %194 = vector.extract_strided_slice %193 {offsets = [0, 0, 0], sizes = [8, 8, 8], strides = [1, 1, 1]} : vector<24x8x8xf32> to vector<8x8x8xf32>
    %195 = vector.extract_strided_slice %193 {offsets = [8, 0, 0], sizes = [8, 8, 8], strides = [1, 1, 1]} : vector<24x8x8xf32> to vector<8x8x8xf32>
    %196 = vector.extract_strided_slice %193 {offsets = [16, 0, 0], sizes = [8, 8, 8], strides = [1, 1, 1]} : vector<24x8x8xf32> to vector<8x8x8xf32>
    %197 = arith.truncf %194 : vector<8x8x8xf32> to vector<8x8x8xbf16>
    %198 = arith.truncf %195 : vector<8x8x8xf32> to vector<8x8x8xbf16>
    "tpu.trace_start"() <{level = 10 : i32, message = "gqd,gkd->gqk"}> : () -> ()
    %cst_80 = arith.constant dense<0.000000e+00> : vector<8x8x8xf32>
    %199 = tpu.matmul %197, %198, %cst_80 {dimension_numbers = #tpu.dot_dimension_numbers<[2], [2], [1], [1], [0, 0, 0, 1, 1, 1], [0], [0]>} : vector<8x8x8xbf16>, vector<8x8x8xbf16>, vector<8x8x8xf32> -> vector<8x8x8xf32>
    "tpu.trace_stop"() : () -> ()
    %cst_81 = arith.constant 0.353553385 : f32
    %200 = vector.broadcast %cst_81 : f32 to vector<8x8x8xf32>
    %201 = arith.mulf %199, %200 : vector<8x8x8xf32>
    %202 = vector.shape_cast %201 : vector<8x8x8xf32> to vector<4x2x8x8xf32>
    %203 = vector.shape_cast %4 : vector<2x1x8xf32> to vector<1x2x1x8xf32>
    %204 = vector.broadcast %203 : vector<1x2x1x8xf32> to vector<4x2x8x8xf32>
    %205 = arith.addf %202, %204 : vector<4x2x8x8xf32>
    %206 = vector.shape_cast %205 : vector<4x2x8x8xf32> to vector<8x8x8xf32>
    %cst_82 = arith.constant dense<0xFF800000> : vector<8x8xf32>
    %207 = vector.multi_reduction <maximumf>, %206, %cst_82 [2] : vector<8x8x8xf32> to vector<8x8xf32>
    %208 = vector.shape_cast %207 : vector<8x8xf32> to vector<8x8x1xf32>
    %209 = vector.broadcast %208 : vector<8x8x1xf32> to vector<8x8x8xf32>
    %210 = arith.subf %206, %209 : vector<8x8x8xf32>
    %211 = math.exp %210 : vector<8x8x8xf32>
    %cst_83 = arith.constant dense<0.000000e+00> : vector<8x8xf32>
    %212 = vector.multi_reduction <add>, %211, %cst_83 [2] : vector<8x8x8xf32> to vector<8x8xf32>
    %213 = vector.shape_cast %212 : vector<8x8xf32> to vector<8x8x1xf32>
    %214 = vector.broadcast %213 : vector<8x8x1xf32> to vector<8x8x8xf32>
    %215 = arith.divf %211, %214 : vector<8x8x8xf32>
    %216 = arith.truncf %215 : vector<8x8x8xf32> to vector<8x8x8xbf16>
    %217 = arith.truncf %196 : vector<8x8x8xf32> to vector<8x8x8xbf16>
    "tpu.trace_start"() <{level = 10 : i32, message = "gqk,gkd->gqd"}> : () -> ()
    %cst_84 = arith.constant dense<0.000000e+00> : vector<8x8x8xf32>
    %218 = tpu.matmul %216, %217, %cst_84 {dimension_numbers = #tpu.dot_dimension_numbers<[2], [1], [1], [2], [0, 0, 0, 1, 1, 2], [0], [0]>} : vector<8x8x8xbf16>, vector<8x8x8xbf16>, vector<8x8x8xf32> -> vector<8x8x8xf32>
    "tpu.trace_stop"() : () -> ()
    %219 = vector.shape_cast %176 : vector<4x8x32xbf16> to vector<4x1x8x32xbf16>
    %220 = vector.shape_cast %219 : vector<4x1x8x32xbf16> to vector<4x1x8x32xbf16>
    %221 = vector.broadcast %220 : vector<4x1x8x32xbf16> to vector<4x2x8x32xbf16>
    %222 = vector.shape_cast %221 : vector<4x2x8x32xbf16> to vector<8x8x32xbf16>
    %223 = arith.truncf %218 : vector<8x8x8xf32> to vector<8x8x8xbf16>
    "tpu.trace_start"() <{level = 10 : i32, message = "gqd,gdf->gqf"}> : () -> ()
    %cst_85 = arith.constant dense<0.000000e+00> : vector<8x8x32xf32>
    %224 = tpu.matmul %223, %222, %cst_85 {dimension_numbers = #tpu.dot_dimension_numbers<[2], [1], [1], [2], [0, 0, 0, 1, 1, 2], [0], [0]>} : vector<8x8x8xbf16>, vector<8x8x32xbf16>, vector<8x8x32xf32> -> vector<8x8x32xf32>
    "tpu.trace_stop"() : () -> ()
    %225 = vector.shape_cast %224 : vector<8x8x32xf32> to vector<4x2x8x32xf32>
    %cst_86 = arith.constant dense<0.000000e+00> : vector<2x8x32xf32>
    %226 = vector.multi_reduction <add>, %225, %cst_86 [0] : vector<4x2x8x32xf32> to vector<2x8x32xf32>
    %227 = vector.shape_cast %177 : vector<1x32xf32> to vector<1x1x32xf32>
    %228 = vector.broadcast %227 : vector<1x1x32xf32> to vector<2x8x32xf32>
    %229 = arith.addf %226, %228 : vector<2x8x32xf32>
    %230 = vector.shape_cast %229 : vector<2x8x32xf32> to vector<16x32xf32>
    %231 = vector.extract_strided_slice %169 {offsets = [1, 0], sizes = [1, 32], strides = [1, 1]} : vector<6x32xf32> to vector<1x32xf32>
    %232 = vector.extract_strided_slice %169 {offsets = [2, 0], sizes = [1, 32], strides = [1, 1]} : vector<6x32xf32> to vector<1x32xf32>
    %233 = arith.addf %167, %230 : vector<16x32xf32>
    %cst_87 = arith.constant dense<0.000000e+00> : vector<16xf32>
    %234 = vector.multi_reduction <add>, %233, %cst_87 [1] : vector<16x32xf32> to vector<16xf32>
    %235 = vector.shape_cast %234 : vector<16xf32> to vector<16x1xf32>
    %cst_88 = arith.constant 3.200000e+01 : f32
    %236 = vector.broadcast %cst_88 : f32 to vector<16x1xf32>
    %237 = arith.divf %235, %236 : vector<16x1xf32>
    %238 = vector.broadcast %237 : vector<16x1xf32> to vector<16x32xf32>
    %239 = arith.subf %233, %238 : vector<16x32xf32>
    %240 = arith.mulf %239, %239 : vector<16x32xf32>
    %cst_89 = arith.constant dense<0.000000e+00> : vector<16xf32>
    %241 = vector.multi_reduction <add>, %240, %cst_89 [1] : vector<16x32xf32> to vector<16xf32>
    %242 = vector.shape_cast %241 : vector<16xf32> to vector<16x1xf32>
    %cst_90 = arith.constant 3.200000e+01 : f32
    %243 = vector.broadcast %cst_90 : f32 to vector<16x1xf32>
    %244 = arith.divf %242, %243 : vector<16x1xf32>
    %245 = vector.broadcast %237 : vector<16x1xf32> to vector<16x32xf32>
    %246 = arith.subf %233, %245 : vector<16x32xf32>
    %cst_91 = arith.constant 9.99999974E-6 : f32
    %247 = vector.broadcast %cst_91 : f32 to vector<16x1xf32>
    %248 = arith.addf %244, %247 : vector<16x1xf32>
    %249 = math.rsqrt %248 : vector<16x1xf32>
    %250 = vector.broadcast %249 : vector<16x1xf32> to vector<16x32xf32>
    %251 = arith.mulf %246, %250 : vector<16x32xf32>
    %252 = vector.broadcast %231 : vector<1x32xf32> to vector<16x32xf32>
    %253 = arith.mulf %251, %252 : vector<16x32xf32>
    %254 = vector.broadcast %232 : vector<1x32xf32> to vector<16x32xf32>
    %255 = arith.addf %253, %254 : vector<16x32xf32>
    %c1_92 = arith.constant 1 : index
    %c0_93 = arith.constant 0 : index
    %c0_94 = arith.constant 0 : index
    %256 = vector.load %arg10[%c1_92, %c0_93, %c0_94] : memref<2x32x64xbf16, #tpu.memory_space<vmem>>, vector<1x32x64xbf16>
    %257 = vector.shape_cast %256 : vector<1x32x64xbf16> to vector<32x64xbf16>
    %c1_95 = arith.constant 1 : index
    %c0_96 = arith.constant 0 : index
    %c0_97 = arith.constant 0 : index
    %258 = vector.load %arg11[%c1_95, %c0_96, %c0_97] : memref<2x1x64xf32, #tpu.memory_space<vmem>>, vector<1x1x64xf32>
    %259 = vector.shape_cast %258 : vector<1x1x64xf32> to vector<1x64xf32>
    %c1_98 = arith.constant 1 : index
    %c0_99 = arith.constant 0 : index
    %c0_100 = arith.constant 0 : index
    %260 = vector.load %arg12[%c1_98, %c0_99, %c0_100] : memref<2x64x32xbf16, #tpu.memory_space<vmem>>, vector<1x64x32xbf16>
    %261 = vector.shape_cast %260 : vector<1x64x32xbf16> to vector<64x32xbf16>
    %262 = vector.extract_strided_slice %169 {offsets = [3, 0], sizes = [1, 32], strides = [1, 1]} : vector<6x32xf32> to vector<1x32xf32>
    %263 = arith.truncf %255 : vector<16x32xf32> to vector<16x32xbf16>
    %cst_101 = arith.constant dense<0.000000e+00> : vector<16x64xf32>
    %264 = tpu.matmul %263, %257, %cst_101 {dimension_numbers = #tpu.dot_dimension_numbers<[1], [0], [0], [1], [0, 0, 1, 1], [], []>} : vector<16x32xbf16>, vector<32x64xbf16>, vector<16x64xf32> -> vector<16x64xf32>
    %265 = vector.broadcast %259 : vector<1x64xf32> to vector<16x64xf32>
    %266 = arith.addf %264, %265 : vector<16x64xf32>
    %cst_102 = arith.constant 0.000000e+00 : f32
    %267 = vector.broadcast %cst_102 : f32 to vector<16x64xf32>
    %268 = arith.maximumf %266, %267 : vector<16x64xf32>
    %269 = arith.truncf %268 : vector<16x64xf32> to vector<16x64xbf16>
    %cst_103 = arith.constant dense<0.000000e+00> : vector<16x32xf32>
    %270 = tpu.matmul %269, %261, %cst_103 {dimension_numbers = #tpu.dot_dimension_numbers<[1], [0], [0], [1], [0, 0, 1, 1], [], []>} : vector<16x64xbf16>, vector<64x32xbf16>, vector<16x32xf32> -> vector<16x32xf32>
    %271 = vector.broadcast %262 : vector<1x32xf32> to vector<16x32xf32>
    %272 = arith.addf %270, %271 : vector<16x32xf32>
    %273 = vector.extract_strided_slice %169 {offsets = [4, 0], sizes = [1, 32], strides = [1, 1]} : vector<6x32xf32> to vector<1x32xf32>
    %274 = vector.extract_strided_slice %169 {offsets = [5, 0], sizes = [1, 32], strides = [1, 1]} : vector<6x32xf32> to vector<1x32xf32>
    %275 = arith.addf %255, %272 : vector<16x32xf32>
    %cst_104 = arith.constant dense<0.000000e+00> : vector<16xf32>
    %276 = vector.multi_reduction <add>, %275, %cst_104 [1] : vector<16x32xf32> to vector<16xf32>
    %277 = vector.shape_cast %276 : vector<16xf32> to vector<16x1xf32>
    %cst_105 = arith.constant 3.200000e+01 : f32
    %278 = vector.broadcast %cst_105 : f32 to vector<16x1xf32>
    %279 = arith.divf %277, %278 : vector<16x1xf32>
    %280 = vector.broadcast %279 : vector<16x1xf32> to vector<16x32xf32>
    %281 = arith.subf %275, %280 : vector<16x32xf32>
    %282 = arith.mulf %281, %281 : vector<16x32xf32>
    %cst_106 = arith.constant dense<0.000000e+00> : vector<16xf32>
    %283 = vector.multi_reduction <add>, %282, %cst_106 [1] : vector<16x32xf32> to vector<16xf32>
    %284 = vector.shape_cast %283 : vector<16xf32> to vector<16x1xf32>
    %cst_107 = arith.constant 3.200000e+01 : f32
    %285 = vector.broadcast %cst_107 : f32 to vector<16x1xf32>
    %286 = arith.divf %284, %285 : vector<16x1xf32>
    %287 = vector.broadcast %279 : vector<16x1xf32> to vector<16x32xf32>
    %288 = arith.subf %275, %287 : vector<16x32xf32>
    %cst_108 = arith.constant 9.99999974E-6 : f32
    %289 = vector.broadcast %cst_108 : f32 to vector<16x1xf32>
    %290 = arith.addf %286, %289 : vector<16x1xf32>
    %291 = math.rsqrt %290 : vector<16x1xf32>
    %292 = vector.broadcast %291 : vector<16x1xf32> to vector<16x32xf32>
    %293 = arith.mulf %288, %292 : vector<16x32xf32>
    %294 = vector.broadcast %273 : vector<1x32xf32> to vector<16x32xf32>
    %295 = arith.mulf %293, %294 : vector<16x32xf32>
    %296 = vector.broadcast %274 : vector<1x32xf32> to vector<16x32xf32>
    %297 = arith.addf %295, %296 : vector<16x32xf32>
    %298 = vector.shape_cast %297 : vector<16x32xf32> to vector<2x8x32xf32>
    %c0_109 = arith.constant 0 : index
    %c0_110 = arith.constant 0 : index
    %299 = vector.load %arg5[%c0_109, %c0_110] : memref<4x32xbf16, #tpu.memory_space<vmem>>, vector<4x32xbf16>
    %300 = vector.extract_strided_slice %3 {offsets = [1, 0], sizes = [1, 32], strides = [1, 1]} : vector<2x32xf32> to vector<1x32xf32>
    %301 = vector.shape_cast %1 : vector<2x8x4xf32> to vector<16x4xf32>
    %302 = arith.truncf %301 : vector<16x4xf32> to vector<16x4xbf16>
    %cst_111 = arith.constant dense<0.000000e+00> : vector<16x32xf32>
    %303 = tpu.matmul %302, %299, %cst_111 {dimension_numbers = #tpu.dot_dimension_numbers<[1], [0], [0], [1], [0, 0, 1, 1], [], []>} : vector<16x4xbf16>, vector<4x32xbf16>, vector<16x32xf32> -> vector<16x32xf32>
    %304 = vector.broadcast %300 : vector<1x32xf32> to vector<16x32xf32>
    %305 = arith.addf %303, %304 : vector<16x32xf32>
    %306 = vector.shape_cast %305 : vector<16x32xf32> to vector<2x8x32xf32>
    %307 = vector.extract_strided_slice %2 {offsets = [0, 0], sizes = [8, 32], strides = [1, 1]} : vector<16x32xf32> to vector<8x32xf32>
    %308 = vector.shape_cast %307 : vector<8x32xf32> to vector<1x8x32xf32>
    %309 = vector.broadcast %308 : vector<1x8x32xf32> to vector<2x8x32xf32>
    %310 = arith.addf %306, %309 : vector<2x8x32xf32>
    %311 = vector.shape_cast %310 : vector<2x8x32xf32> to vector<16x32xf32>
    %c0_112 = arith.constant 0 : index
    %c0_113 = arith.constant 0 : index
    %c0_114 = arith.constant 0 : index
    %312 = vector.load %arg23[%c0_112, %c0_113, %c0_114] : memref<2x9x32xf32, #tpu.memory_space<vmem>>, vector<1x9x32xf32>
    %313 = vector.shape_cast %312 : vector<1x9x32xf32> to vector<9x32xf32>
    %314 = vector.shape_cast %311 : vector<16x32xf32> to vector<2x8x32xf32>
    %c0_115 = arith.constant 0 : index
    %c0_116 = arith.constant 0 : index
    %c0_117 = arith.constant 0 : index
    %c0_118 = arith.constant 0 : index
    %315 = vector.load %arg14[%c0_115, %c0_116, %c0_117, %c0_118] : memref<2x12x32x8xbf16, #tpu.memory_space<vmem>>, vector<1x12x32x8xbf16>
    %316 = vector.shape_cast %315 : vector<1x12x32x8xbf16> to vector<12x32x8xbf16>
    %c0_119 = arith.constant 0 : index
    %c0_120 = arith.constant 0 : index
    %c0_121 = arith.constant 0 : index
    %c0_122 = arith.constant 0 : index
    %317 = vector.load %arg15[%c0_119, %c0_120, %c0_121, %c0_122] : memref<2x12x1x8xf32, #tpu.memory_space<vmem>>, vector<1x12x1x8xf32>
    %318 = vector.shape_cast %317 : vector<1x12x1x8xf32> to vector<12x1x8xf32>
    %c0_123 = arith.constant 0 : index
    %c0_124 = arith.constant 0 : index
    %c0_125 = arith.constant 0 : index
    %c0_126 = arith.constant 0 : index
    %319 = vector.load %arg16[%c0_123, %c0_124, %c0_125, %c0_126] : memref<2x4x8x32xbf16, #tpu.memory_space<vmem>>, vector<1x4x8x32xbf16>
    %320 = vector.shape_cast %319 : vector<1x4x8x32xbf16> to vector<4x8x32xbf16>
    %321 = vector.extract_strided_slice %313 {offsets = [0, 0], sizes = [1, 32], strides = [1, 1]} : vector<9x32xf32> to vector<1x32xf32>
    %322 = arith.truncf %314 : vector<2x8x32xf32> to vector<2x8x32xbf16>
    %323 = vector.shape_cast %322 : vector<2x8x32xbf16> to vector<1x2x8x32xbf16>
    %324 = vector.shape_cast %323 : vector<1x2x8x32xbf16> to vector<1x2x8x32xbf16>
    %325 = vector.broadcast %324 : vector<1x2x8x32xbf16> to vector<12x2x8x32xbf16>
    %326 = vector.shape_cast %325 : vector<12x2x8x32xbf16> to vector<24x8x32xbf16>
    %327 = vector.shape_cast %316 : vector<12x32x8xbf16> to vector<12x1x32x8xbf16>
    %328 = vector.shape_cast %327 : vector<12x1x32x8xbf16> to vector<12x1x32x8xbf16>
    %329 = vector.broadcast %328 : vector<12x1x32x8xbf16> to vector<12x2x32x8xbf16>
    %330 = vector.shape_cast %329 : vector<12x2x32x8xbf16> to vector<24x32x8xbf16>
    %331 = vector.shape_cast %318 : vector<12x1x8xf32> to vector<12x1x1x8xf32>
    %332 = vector.shape_cast %331 : vector<12x1x1x8xf32> to vector<12x1x1x8xf32>
    %333 = vector.broadcast %332 : vector<12x1x1x8xf32> to vector<12x2x1x8xf32>
    %334 = vector.shape_cast %333 : vector<12x2x1x8xf32> to vector<24x1x8xf32>
    "tpu.trace_start"() <{level = 10 : i32, message = "gsd,gdf->gsf"}> : () -> ()
    %cst_127 = arith.constant dense<0.000000e+00> : vector<24x8x8xf32>
    %335 = tpu.matmul %326, %330, %cst_127 {dimension_numbers = #tpu.dot_dimension_numbers<[2], [1], [1], [2], [0, 0, 0, 1, 1, 2], [0], [0]>} : vector<24x8x32xbf16>, vector<24x32x8xbf16>, vector<24x8x8xf32> -> vector<24x8x8xf32>
    "tpu.trace_stop"() : () -> ()
    %336 = vector.broadcast %334 : vector<24x1x8xf32> to vector<24x8x8xf32>
    %337 = arith.addf %335, %336 : vector<24x8x8xf32>
    %338 = vector.extract_strided_slice %337 {offsets = [0, 0, 0], sizes = [8, 8, 8], strides = [1, 1, 1]} : vector<24x8x8xf32> to vector<8x8x8xf32>
    %339 = vector.extract_strided_slice %337 {offsets = [8, 0, 0], sizes = [8, 8, 8], strides = [1, 1, 1]} : vector<24x8x8xf32> to vector<8x8x8xf32>
    %340 = vector.extract_strided_slice %337 {offsets = [16, 0, 0], sizes = [8, 8, 8], strides = [1, 1, 1]} : vector<24x8x8xf32> to vector<8x8x8xf32>
    %341 = arith.truncf %338 : vector<8x8x8xf32> to vector<8x8x8xbf16>
    %342 = arith.truncf %339 : vector<8x8x8xf32> to vector<8x8x8xbf16>
    "tpu.trace_start"() <{level = 10 : i32, message = "gqd,gkd->gqk"}> : () -> ()
    %cst_128 = arith.constant dense<0.000000e+00> : vector<8x8x8xf32>
    %343 = tpu.matmul %341, %342, %cst_128 {dimension_numbers = #tpu.dot_dimension_numbers<[2], [2], [1], [1], [0, 0, 0, 1, 1, 1], [0], [0]>} : vector<8x8x8xbf16>, vector<8x8x8xbf16>, vector<8x8x8xf32> -> vector<8x8x8xf32>
    "tpu.trace_stop"() : () -> ()
    %cst_129 = arith.constant 0.353553385 : f32
    %344 = vector.broadcast %cst_129 : f32 to vector<8x8x8xf32>
    %345 = arith.mulf %343, %344 : vector<8x8x8xf32>
    %346 = vector.shape_cast %345 : vector<8x8x8xf32> to vector<4x2x8x8xf32>
    %347 = vector.shape_cast %24 : vector<2x8x8xf32> to vector<1x2x8x8xf32>
    %348 = vector.broadcast %347 : vector<1x2x8x8xf32> to vector<4x2x8x8xf32>
    %349 = arith.addf %346, %348 : vector<4x2x8x8xf32>
    %350 = vector.shape_cast %349 : vector<4x2x8x8xf32> to vector<8x8x8xf32>
    %cst_130 = arith.constant dense<0xFF800000> : vector<8x8xf32>
    %351 = vector.multi_reduction <maximumf>, %350, %cst_130 [2] : vector<8x8x8xf32> to vector<8x8xf32>
    %352 = vector.shape_cast %351 : vector<8x8xf32> to vector<8x8x1xf32>
    %353 = vector.broadcast %352 : vector<8x8x1xf32> to vector<8x8x8xf32>
    %354 = arith.subf %350, %353 : vector<8x8x8xf32>
    %355 = math.exp %354 : vector<8x8x8xf32>
    %cst_131 = arith.constant dense<0.000000e+00> : vector<8x8xf32>
    %356 = vector.multi_reduction <add>, %355, %cst_131 [2] : vector<8x8x8xf32> to vector<8x8xf32>
    %357 = vector.shape_cast %356 : vector<8x8xf32> to vector<8x8x1xf32>
    %358 = vector.broadcast %357 : vector<8x8x1xf32> to vector<8x8x8xf32>
    %359 = arith.divf %355, %358 : vector<8x8x8xf32>
    %360 = arith.truncf %359 : vector<8x8x8xf32> to vector<8x8x8xbf16>
    %361 = arith.truncf %340 : vector<8x8x8xf32> to vector<8x8x8xbf16>
    "tpu.trace_start"() <{level = 10 : i32, message = "gqk,gkd->gqd"}> : () -> ()
    %cst_132 = arith.constant dense<0.000000e+00> : vector<8x8x8xf32>
    %362 = tpu.matmul %360, %361, %cst_132 {dimension_numbers = #tpu.dot_dimension_numbers<[2], [1], [1], [2], [0, 0, 0, 1, 1, 2], [0], [0]>} : vector<8x8x8xbf16>, vector<8x8x8xbf16>, vector<8x8x8xf32> -> vector<8x8x8xf32>
    "tpu.trace_stop"() : () -> ()
    %363 = vector.shape_cast %320 : vector<4x8x32xbf16> to vector<4x1x8x32xbf16>
    %364 = vector.shape_cast %363 : vector<4x1x8x32xbf16> to vector<4x1x8x32xbf16>
    %365 = vector.broadcast %364 : vector<4x1x8x32xbf16> to vector<4x2x8x32xbf16>
    %366 = vector.shape_cast %365 : vector<4x2x8x32xbf16> to vector<8x8x32xbf16>
    %367 = arith.truncf %362 : vector<8x8x8xf32> to vector<8x8x8xbf16>
    "tpu.trace_start"() <{level = 10 : i32, message = "gqd,gdf->gqf"}> : () -> ()
    %cst_133 = arith.constant dense<0.000000e+00> : vector<8x8x32xf32>
    %368 = tpu.matmul %367, %366, %cst_133 {dimension_numbers = #tpu.dot_dimension_numbers<[2], [1], [1], [2], [0, 0, 0, 1, 1, 2], [0], [0]>} : vector<8x8x8xbf16>, vector<8x8x32xbf16>, vector<8x8x32xf32> -> vector<8x8x32xf32>
    "tpu.trace_stop"() : () -> ()
    %369 = vector.shape_cast %368 : vector<8x8x32xf32> to vector<4x2x8x32xf32>
    %cst_134 = arith.constant dense<0.000000e+00> : vector<2x8x32xf32>
    %370 = vector.multi_reduction <add>, %369, %cst_134 [0] : vector<4x2x8x32xf32> to vector<2x8x32xf32>
    %371 = vector.shape_cast %321 : vector<1x32xf32> to vector<1x1x32xf32>
    %372 = vector.broadcast %371 : vector<1x1x32xf32> to vector<2x8x32xf32>
    %373 = arith.addf %370, %372 : vector<2x8x32xf32>
    %374 = vector.shape_cast %373 : vector<2x8x32xf32> to vector<16x32xf32>
    %375 = vector.extract_strided_slice %313 {offsets = [1, 0], sizes = [1, 32], strides = [1, 1]} : vector<9x32xf32> to vector<1x32xf32>
    %376 = vector.extract_strided_slice %313 {offsets = [2, 0], sizes = [1, 32], strides = [1, 1]} : vector<9x32xf32> to vector<1x32xf32>
    %377 = arith.addf %311, %374 : vector<16x32xf32>
    %cst_135 = arith.constant dense<0.000000e+00> : vector<16xf32>
    %378 = vector.multi_reduction <add>, %377, %cst_135 [1] : vector<16x32xf32> to vector<16xf32>
    %379 = vector.shape_cast %378 : vector<16xf32> to vector<16x1xf32>
    %cst_136 = arith.constant 3.200000e+01 : f32
    %380 = vector.broadcast %cst_136 : f32 to vector<16x1xf32>
    %381 = arith.divf %379, %380 : vector<16x1xf32>
    %382 = vector.broadcast %381 : vector<16x1xf32> to vector<16x32xf32>
    %383 = arith.subf %377, %382 : vector<16x32xf32>
    %384 = arith.mulf %383, %383 : vector<16x32xf32>
    %cst_137 = arith.constant dense<0.000000e+00> : vector<16xf32>
    %385 = vector.multi_reduction <add>, %384, %cst_137 [1] : vector<16x32xf32> to vector<16xf32>
    %386 = vector.shape_cast %385 : vector<16xf32> to vector<16x1xf32>
    %cst_138 = arith.constant 3.200000e+01 : f32
    %387 = vector.broadcast %cst_138 : f32 to vector<16x1xf32>
    %388 = arith.divf %386, %387 : vector<16x1xf32>
    %389 = vector.broadcast %381 : vector<16x1xf32> to vector<16x32xf32>
    %390 = arith.subf %377, %389 : vector<16x32xf32>
    %cst_139 = arith.constant 9.99999974E-6 : f32
    %391 = vector.broadcast %cst_139 : f32 to vector<16x1xf32>
    %392 = arith.addf %388, %391 : vector<16x1xf32>
    %393 = math.rsqrt %392 : vector<16x1xf32>
    %394 = vector.broadcast %393 : vector<16x1xf32> to vector<16x32xf32>
    %395 = arith.mulf %390, %394 : vector<16x32xf32>
    %396 = vector.broadcast %375 : vector<1x32xf32> to vector<16x32xf32>
    %397 = arith.mulf %395, %396 : vector<16x32xf32>
    %398 = vector.broadcast %376 : vector<1x32xf32> to vector<16x32xf32>
    %399 = arith.addf %397, %398 : vector<16x32xf32>
    %400 = vector.shape_cast %399 : vector<16x32xf32> to vector<2x8x32xf32>
    %c0_140 = arith.constant 0 : index
    %c0_141 = arith.constant 0 : index
    %c0_142 = arith.constant 0 : index
    %c0_143 = arith.constant 0 : index
    %401 = vector.load %arg17[%c0_140, %c0_141, %c0_142, %c0_143] : memref<2x12x32x8xbf16, #tpu.memory_space<vmem>>, vector<1x12x32x8xbf16>
    %402 = vector.shape_cast %401 : vector<1x12x32x8xbf16> to vector<12x32x8xbf16>
    %c0_144 = arith.constant 0 : index
    %c0_145 = arith.constant 0 : index
    %c0_146 = arith.constant 0 : index
    %c0_147 = arith.constant 0 : index
    %403 = vector.load %arg18[%c0_144, %c0_145, %c0_146, %c0_147] : memref<2x12x1x8xf32, #tpu.memory_space<vmem>>, vector<1x12x1x8xf32>
    %404 = vector.shape_cast %403 : vector<1x12x1x8xf32> to vector<12x1x8xf32>
    %c0_148 = arith.constant 0 : index
    %c0_149 = arith.constant 0 : index
    %c0_150 = arith.constant 0 : index
    %c0_151 = arith.constant 0 : index
    %405 = vector.load %arg19[%c0_148, %c0_149, %c0_150, %c0_151] : memref<2x4x8x32xbf16, #tpu.memory_space<vmem>>, vector<1x4x8x32xbf16>
    %406 = vector.shape_cast %405 : vector<1x4x8x32xbf16> to vector<4x8x32xbf16>
    %407 = vector.extract_strided_slice %313 {offsets = [3, 0], sizes = [1, 32], strides = [1, 1]} : vector<9x32xf32> to vector<1x32xf32>
    %408 = vector.extract_strided_slice %402 {offsets = [0, 0, 0], sizes = [4, 32, 8], strides = [1, 1, 1]} : vector<12x32x8xbf16> to vector<4x32x8xbf16>
    %409 = vector.extract_strided_slice %404 {offsets = [0, 0, 0], sizes = [4, 1, 8], strides = [1, 1, 1]} : vector<12x1x8xf32> to vector<4x1x8xf32>
    %410 = arith.truncf %400 : vector<2x8x32xf32> to vector<2x8x32xbf16>
    %411 = vector.shape_cast %410 : vector<2x8x32xbf16> to vector<1x2x8x32xbf16>
    %412 = vector.shape_cast %411 : vector<1x2x8x32xbf16> to vector<1x2x8x32xbf16>
    %413 = vector.broadcast %412 : vector<1x2x8x32xbf16> to vector<4x2x8x32xbf16>
    %414 = vector.shape_cast %413 : vector<4x2x8x32xbf16> to vector<8x8x32xbf16>
    %415 = vector.shape_cast %408 : vector<4x32x8xbf16> to vector<4x1x32x8xbf16>
    %416 = vector.shape_cast %415 : vector<4x1x32x8xbf16> to vector<4x1x32x8xbf16>
    %417 = vector.broadcast %416 : vector<4x1x32x8xbf16> to vector<4x2x32x8xbf16>
    %418 = vector.shape_cast %417 : vector<4x2x32x8xbf16> to vector<8x32x8xbf16>
    %419 = vector.shape_cast %409 : vector<4x1x8xf32> to vector<4x1x1x8xf32>
    %420 = vector.shape_cast %419 : vector<4x1x1x8xf32> to vector<4x1x1x8xf32>
    %421 = vector.broadcast %420 : vector<4x1x1x8xf32> to vector<4x2x1x8xf32>
    %422 = vector.shape_cast %421 : vector<4x2x1x8xf32> to vector<8x1x8xf32>
    "tpu.trace_start"() <{level = 10 : i32, message = "gsd,gdf->gsf"}> : () -> ()
    %cst_152 = arith.constant dense<0.000000e+00> : vector<8x8x8xf32>
    %423 = tpu.matmul %414, %418, %cst_152 {dimension_numbers = #tpu.dot_dimension_numbers<[2], [1], [1], [2], [0, 0, 0, 1, 1, 2], [0], [0]>} : vector<8x8x32xbf16>, vector<8x32x8xbf16>, vector<8x8x8xf32> -> vector<8x8x8xf32>
    "tpu.trace_stop"() : () -> ()
    %424 = vector.broadcast %422 : vector<8x1x8xf32> to vector<8x8x8xf32>
    %425 = arith.addf %423, %424 : vector<8x8x8xf32>
    %426 = vector.extract_strided_slice %402 {offsets = [4, 0, 0], sizes = [8, 32, 8], strides = [1, 1, 1]} : vector<12x32x8xbf16> to vector<8x32x8xbf16>
    %427 = vector.extract_strided_slice %404 {offsets = [4, 0, 0], sizes = [8, 1, 8], strides = [1, 1, 1]} : vector<12x1x8xf32> to vector<8x1x8xf32>
    %428 = arith.truncf %298 : vector<2x8x32xf32> to vector<2x8x32xbf16>
    %429 = vector.shape_cast %428 : vector<2x8x32xbf16> to vector<1x2x8x32xbf16>
    %430 = vector.shape_cast %429 : vector<1x2x8x32xbf16> to vector<1x2x8x32xbf16>
    %431 = vector.broadcast %430 : vector<1x2x8x32xbf16> to vector<8x2x8x32xbf16>
    %432 = vector.shape_cast %431 : vector<8x2x8x32xbf16> to vector<16x8x32xbf16>
    %433 = vector.shape_cast %426 : vector<8x32x8xbf16> to vector<8x1x32x8xbf16>
    %434 = vector.shape_cast %433 : vector<8x1x32x8xbf16> to vector<8x1x32x8xbf16>
    %435 = vector.broadcast %434 : vector<8x1x32x8xbf16> to vector<8x2x32x8xbf16>
    %436 = vector.shape_cast %435 : vector<8x2x32x8xbf16> to vector<16x32x8xbf16>
    %437 = vector.shape_cast %427 : vector<8x1x8xf32> to vector<8x1x1x8xf32>
    %438 = vector.shape_cast %437 : vector<8x1x1x8xf32> to vector<8x1x1x8xf32>
    %439 = vector.broadcast %438 : vector<8x1x1x8xf32> to vector<8x2x1x8xf32>
    %440 = vector.shape_cast %439 : vector<8x2x1x8xf32> to vector<16x1x8xf32>
    "tpu.trace_start"() <{level = 10 : i32, message = "gsd,gdf->gsf"}> : () -> ()
    %cst_153 = arith.constant dense<0.000000e+00> : vector<16x8x8xf32>
    %441 = tpu.matmul %432, %436, %cst_153 {dimension_numbers = #tpu.dot_dimension_numbers<[2], [1], [1], [2], [0, 0, 0, 1, 1, 2], [0], [0]>} : vector<16x8x32xbf16>, vector<16x32x8xbf16>, vector<16x8x8xf32> -> vector<16x8x8xf32>
    "tpu.trace_stop"() : () -> ()
    %442 = vector.broadcast %440 : vector<16x1x8xf32> to vector<16x8x8xf32>
    %443 = arith.addf %441, %442 : vector<16x8x8xf32>
    %444 = vector.extract_strided_slice %443 {offsets = [0, 0, 0], sizes = [8, 8, 8], strides = [1, 1, 1]} : vector<16x8x8xf32> to vector<8x8x8xf32>
    %445 = vector.extract_strided_slice %443 {offsets = [8, 0, 0], sizes = [8, 8, 8], strides = [1, 1, 1]} : vector<16x8x8xf32> to vector<8x8x8xf32>
    %446 = arith.truncf %425 : vector<8x8x8xf32> to vector<8x8x8xbf16>
    %447 = arith.truncf %444 : vector<8x8x8xf32> to vector<8x8x8xbf16>
    "tpu.trace_start"() <{level = 10 : i32, message = "gqd,gkd->gqk"}> : () -> ()
    %cst_154 = arith.constant dense<0.000000e+00> : vector<8x8x8xf32>
    %448 = tpu.matmul %446, %447, %cst_154 {dimension_numbers = #tpu.dot_dimension_numbers<[2], [2], [1], [1], [0, 0, 0, 1, 1, 1], [0], [0]>} : vector<8x8x8xbf16>, vector<8x8x8xbf16>, vector<8x8x8xf32> -> vector<8x8x8xf32>
    "tpu.trace_stop"() : () -> ()
    %cst_155 = arith.constant 0.353553385 : f32
    %449 = vector.broadcast %cst_155 : f32 to vector<8x8x8xf32>
    %450 = arith.mulf %448, %449 : vector<8x8x8xf32>
    %451 = vector.shape_cast %450 : vector<8x8x8xf32> to vector<4x2x8x8xf32>
    %452 = vector.shape_cast %4 : vector<2x1x8xf32> to vector<1x2x1x8xf32>
    %453 = vector.broadcast %452 : vector<1x2x1x8xf32> to vector<4x2x8x8xf32>
    %454 = arith.addf %451, %453 : vector<4x2x8x8xf32>
    %455 = vector.shape_cast %454 : vector<4x2x8x8xf32> to vector<8x8x8xf32>
    %cst_156 = arith.constant dense<0xFF800000> : vector<8x8xf32>
    %456 = vector.multi_reduction <maximumf>, %455, %cst_156 [2] : vector<8x8x8xf32> to vector<8x8xf32>
    %457 = vector.shape_cast %456 : vector<8x8xf32> to vector<8x8x1xf32>
    %458 = vector.broadcast %457 : vector<8x8x1xf32> to vector<8x8x8xf32>
    %459 = arith.subf %455, %458 : vector<8x8x8xf32>
    %460 = math.exp %459 : vector<8x8x8xf32>
    %cst_157 = arith.constant dense<0.000000e+00> : vector<8x8xf32>
    %461 = vector.multi_reduction <add>, %460, %cst_157 [2] : vector<8x8x8xf32> to vector<8x8xf32>
    %462 = vector.shape_cast %461 : vector<8x8xf32> to vector<8x8x1xf32>
    %463 = vector.broadcast %462 : vector<8x8x1xf32> to vector<8x8x8xf32>
    %464 = arith.divf %460, %463 : vector<8x8x8xf32>
    %465 = arith.truncf %464 : vector<8x8x8xf32> to vector<8x8x8xbf16>
    %466 = arith.truncf %445 : vector<8x8x8xf32> to vector<8x8x8xbf16>
    "tpu.trace_start"() <{level = 10 : i32, message = "gqk,gkd->gqd"}> : () -> ()
    %cst_158 = arith.constant dense<0.000000e+00> : vector<8x8x8xf32>
    %467 = tpu.matmul %465, %466, %cst_158 {dimension_numbers = #tpu.dot_dimension_numbers<[2], [1], [1], [2], [0, 0, 0, 1, 1, 2], [0], [0]>} : vector<8x8x8xbf16>, vector<8x8x8xbf16>, vector<8x8x8xf32> -> vector<8x8x8xf32>
    "tpu.trace_stop"() : () -> ()
    %468 = vector.shape_cast %406 : vector<4x8x32xbf16> to vector<4x1x8x32xbf16>
    %469 = vector.shape_cast %468 : vector<4x1x8x32xbf16> to vector<4x1x8x32xbf16>
    %470 = vector.broadcast %469 : vector<4x1x8x32xbf16> to vector<4x2x8x32xbf16>
    %471 = vector.shape_cast %470 : vector<4x2x8x32xbf16> to vector<8x8x32xbf16>
    %472 = arith.truncf %467 : vector<8x8x8xf32> to vector<8x8x8xbf16>
    "tpu.trace_start"() <{level = 10 : i32, message = "gqd,gdf->gqf"}> : () -> ()
    %cst_159 = arith.constant dense<0.000000e+00> : vector<8x8x32xf32>
    %473 = tpu.matmul %472, %471, %cst_159 {dimension_numbers = #tpu.dot_dimension_numbers<[2], [1], [1], [2], [0, 0, 0, 1, 1, 2], [0], [0]>} : vector<8x8x8xbf16>, vector<8x8x32xbf16>, vector<8x8x32xf32> -> vector<8x8x32xf32>
    "tpu.trace_stop"() : () -> ()
    %474 = vector.shape_cast %473 : vector<8x8x32xf32> to vector<4x2x8x32xf32>
    %cst_160 = arith.constant dense<0.000000e+00> : vector<2x8x32xf32>
    %475 = vector.multi_reduction <add>, %474, %cst_160 [0] : vector<4x2x8x32xf32> to vector<2x8x32xf32>
    %476 = vector.shape_cast %407 : vector<1x32xf32> to vector<1x1x32xf32>
    %477 = vector.broadcast %476 : vector<1x1x32xf32> to vector<2x8x32xf32>
    %478 = arith.addf %475, %477 : vector<2x8x32xf32>
    %479 = vector.shape_cast %478 : vector<2x8x32xf32> to vector<16x32xf32>
    %480 = vector.extract_strided_slice %313 {offsets = [4, 0], sizes = [1, 32], strides = [1, 1]} : vector<9x32xf32> to vector<1x32xf32>
    %481 = vector.extract_strided_slice %313 {offsets = [5, 0], sizes = [1, 32], strides = [1, 1]} : vector<9x32xf32> to vector<1x32xf32>
    %482 = arith.addf %399, %479 : vector<16x32xf32>
    %cst_161 = arith.constant dense<0.000000e+00> : vector<16xf32>
    %483 = vector.multi_reduction <add>, %482, %cst_161 [1] : vector<16x32xf32> to vector<16xf32>
    %484 = vector.shape_cast %483 : vector<16xf32> to vector<16x1xf32>
    %cst_162 = arith.constant 3.200000e+01 : f32
    %485 = vector.broadcast %cst_162 : f32 to vector<16x1xf32>
    %486 = arith.divf %484, %485 : vector<16x1xf32>
    %487 = vector.broadcast %486 : vector<16x1xf32> to vector<16x32xf32>
    %488 = arith.subf %482, %487 : vector<16x32xf32>
    %489 = arith.mulf %488, %488 : vector<16x32xf32>
    %cst_163 = arith.constant dense<0.000000e+00> : vector<16xf32>
    %490 = vector.multi_reduction <add>, %489, %cst_163 [1] : vector<16x32xf32> to vector<16xf32>
    %491 = vector.shape_cast %490 : vector<16xf32> to vector<16x1xf32>
    %cst_164 = arith.constant 3.200000e+01 : f32
    %492 = vector.broadcast %cst_164 : f32 to vector<16x1xf32>
    %493 = arith.divf %491, %492 : vector<16x1xf32>
    %494 = vector.broadcast %486 : vector<16x1xf32> to vector<16x32xf32>
    %495 = arith.subf %482, %494 : vector<16x32xf32>
    %cst_165 = arith.constant 9.99999974E-6 : f32
    %496 = vector.broadcast %cst_165 : f32 to vector<16x1xf32>
    %497 = arith.addf %493, %496 : vector<16x1xf32>
    %498 = math.rsqrt %497 : vector<16x1xf32>
    %499 = vector.broadcast %498 : vector<16x1xf32> to vector<16x32xf32>
    %500 = arith.mulf %495, %499 : vector<16x32xf32>
    %501 = vector.broadcast %480 : vector<1x32xf32> to vector<16x32xf32>
    %502 = arith.mulf %500, %501 : vector<16x32xf32>
    %503 = vector.broadcast %481 : vector<1x32xf32> to vector<16x32xf32>
    %504 = arith.addf %502, %503 : vector<16x32xf32>
    %c0_166 = arith.constant 0 : index
    %c0_167 = arith.constant 0 : index
    %c0_168 = arith.constant 0 : index
    %505 = vector.load %arg20[%c0_166, %c0_167, %c0_168] : memref<2x32x64xbf16, #tpu.memory_space<vmem>>, vector<1x32x64xbf16>
    %506 = vector.shape_cast %505 : vector<1x32x64xbf16> to vector<32x64xbf16>
    %c0_169 = arith.constant 0 : index
    %c0_170 = arith.constant 0 : index
    %c0_171 = arith.constant 0 : index
    %507 = vector.load %arg21[%c0_169, %c0_170, %c0_171] : memref<2x1x64xf32, #tpu.memory_space<vmem>>, vector<1x1x64xf32>
    %508 = vector.shape_cast %507 : vector<1x1x64xf32> to vector<1x64xf32>
    %c0_172 = arith.constant 0 : index
    %c0_173 = arith.constant 0 : index
    %c0_174 = arith.constant 0 : index
    %509 = vector.load %arg22[%c0_172, %c0_173, %c0_174] : memref<2x64x32xbf16, #tpu.memory_space<vmem>>, vector<1x64x32xbf16>
    %510 = vector.shape_cast %509 : vector<1x64x32xbf16> to vector<64x32xbf16>
    %511 = vector.extract_strided_slice %313 {offsets = [6, 0], sizes = [1, 32], strides = [1, 1]} : vector<9x32xf32> to vector<1x32xf32>
    %512 = arith.truncf %504 : vector<16x32xf32> to vector<16x32xbf16>
    %cst_175 = arith.constant dense<0.000000e+00> : vector<16x64xf32>
    %513 = tpu.matmul %512, %506, %cst_175 {dimension_numbers = #tpu.dot_dimension_numbers<[1], [0], [0], [1], [0, 0, 1, 1], [], []>} : vector<16x32xbf16>, vector<32x64xbf16>, vector<16x64xf32> -> vector<16x64xf32>
    %514 = vector.broadcast %508 : vector<1x64xf32> to vector<16x64xf32>
    %515 = arith.addf %513, %514 : vector<16x64xf32>
    %cst_176 = arith.constant 0.000000e+00 : f32
    %516 = vector.broadcast %cst_176 : f32 to vector<16x64xf32>
    %517 = arith.maximumf %515, %516 : vector<16x64xf32>
    %518 = arith.truncf %517 : vector<16x64xf32> to vector<16x64xbf16>
    %cst_177 = arith.constant dense<0.000000e+00> : vector<16x32xf32>
    %519 = tpu.matmul %518, %510, %cst_177 {dimension_numbers = #tpu.dot_dimension_numbers<[1], [0], [0], [1], [0, 0, 1, 1], [], []>} : vector<16x64xbf16>, vector<64x32xbf16>, vector<16x32xf32> -> vector<16x32xf32>
    %520 = vector.broadcast %511 : vector<1x32xf32> to vector<16x32xf32>
    %521 = arith.addf %519, %520 : vector<16x32xf32>
    %522 = vector.extract_strided_slice %313 {offsets = [7, 0], sizes = [1, 32], strides = [1, 1]} : vector<9x32xf32> to vector<1x32xf32>
    %523 = vector.extract_strided_slice %313 {offsets = [8, 0], sizes = [1, 32], strides = [1, 1]} : vector<9x32xf32> to vector<1x32xf32>
    %524 = arith.addf %504, %521 : vector<16x32xf32>
    %cst_178 = arith.constant dense<0.000000e+00> : vector<16xf32>
    %525 = vector.multi_reduction <add>, %524, %cst_178 [1] : vector<16x32xf32> to vector<16xf32>
    %526 = vector.shape_cast %525 : vector<16xf32> to vector<16x1xf32>
    %cst_179 = arith.constant 3.200000e+01 : f32
    %527 = vector.broadcast %cst_179 : f32 to vector<16x1xf32>
    %528 = arith.divf %526, %527 : vector<16x1xf32>
    %529 = vector.broadcast %528 : vector<16x1xf32> to vector<16x32xf32>
    %530 = arith.subf %524, %529 : vector<16x32xf32>
    %531 = arith.mulf %530, %530 : vector<16x32xf32>
    %cst_180 = arith.constant dense<0.000000e+00> : vector<16xf32>
    %532 = vector.multi_reduction <add>, %531, %cst_180 [1] : vector<16x32xf32> to vector<16xf32>
    %533 = vector.shape_cast %532 : vector<16xf32> to vector<16x1xf32>
    %cst_181 = arith.constant 3.200000e+01 : f32
    %534 = vector.broadcast %cst_181 : f32 to vector<16x1xf32>
    %535 = arith.divf %533, %534 : vector<16x1xf32>
    %536 = vector.broadcast %528 : vector<16x1xf32> to vector<16x32xf32>
    %537 = arith.subf %524, %536 : vector<16x32xf32>
    %cst_182 = arith.constant 9.99999974E-6 : f32
    %538 = vector.broadcast %cst_182 : f32 to vector<16x1xf32>
    %539 = arith.addf %535, %538 : vector<16x1xf32>
    %540 = math.rsqrt %539 : vector<16x1xf32>
    %541 = vector.broadcast %540 : vector<16x1xf32> to vector<16x32xf32>
    %542 = arith.mulf %537, %541 : vector<16x32xf32>
    %543 = vector.broadcast %522 : vector<1x32xf32> to vector<16x32xf32>
    %544 = arith.mulf %542, %543 : vector<16x32xf32>
    %545 = vector.broadcast %523 : vector<1x32xf32> to vector<16x32xf32>
    %546 = arith.addf %544, %545 : vector<16x32xf32>
    %c1_183 = arith.constant 1 : index
    %c0_184 = arith.constant 0 : index
    %c0_185 = arith.constant 0 : index
    %547 = vector.load %arg23[%c1_183, %c0_184, %c0_185] : memref<2x9x32xf32, #tpu.memory_space<vmem>>, vector<1x9x32xf32>
    %548 = vector.shape_cast %547 : vector<1x9x32xf32> to vector<9x32xf32>
    %549 = vector.shape_cast %546 : vector<16x32xf32> to vector<2x8x32xf32>
    %c1_186 = arith.constant 1 : index
    %c0_187 = arith.constant 0 : index
    %c0_188 = arith.constant 0 : index
    %c0_189 = arith.constant 0 : index
    %550 = vector.load %arg14[%c1_186, %c0_187, %c0_188, %c0_189] : memref<2x12x32x8xbf16, #tpu.memory_space<vmem>>, vector<1x12x32x8xbf16>
    %551 = vector.shape_cast %550 : vector<1x12x32x8xbf16> to vector<12x32x8xbf16>
    %c1_190 = arith.constant 1 : index
    %c0_191 = arith.constant 0 : index
    %c0_192 = arith.constant 0 : index
    %c0_193 = arith.constant 0 : index
    %552 = vector.load %arg15[%c1_190, %c0_191, %c0_192, %c0_193] : memref<2x12x1x8xf32, #tpu.memory_space<vmem>>, vector<1x12x1x8xf32>
    %553 = vector.shape_cast %552 : vector<1x12x1x8xf32> to vector<12x1x8xf32>
    %c1_194 = arith.constant 1 : index
    %c0_195 = arith.constant 0 : index
    %c0_196 = arith.constant 0 : index
    %c0_197 = arith.constant 0 : index
    %554 = vector.load %arg16[%c1_194, %c0_195, %c0_196, %c0_197] : memref<2x4x8x32xbf16, #tpu.memory_space<vmem>>, vector<1x4x8x32xbf16>
    %555 = vector.shape_cast %554 : vector<1x4x8x32xbf16> to vector<4x8x32xbf16>
    %556 = vector.extract_strided_slice %548 {offsets = [0, 0], sizes = [1, 32], strides = [1, 1]} : vector<9x32xf32> to vector<1x32xf32>
    %557 = arith.truncf %549 : vector<2x8x32xf32> to vector<2x8x32xbf16>
    %558 = vector.shape_cast %557 : vector<2x8x32xbf16> to vector<1x2x8x32xbf16>
    %559 = vector.shape_cast %558 : vector<1x2x8x32xbf16> to vector<1x2x8x32xbf16>
    %560 = vector.broadcast %559 : vector<1x2x8x32xbf16> to vector<12x2x8x32xbf16>
    %561 = vector.shape_cast %560 : vector<12x2x8x32xbf16> to vector<24x8x32xbf16>
    %562 = vector.shape_cast %551 : vector<12x32x8xbf16> to vector<12x1x32x8xbf16>
    %563 = vector.shape_cast %562 : vector<12x1x32x8xbf16> to vector<12x1x32x8xbf16>
    %564 = vector.broadcast %563 : vector<12x1x32x8xbf16> to vector<12x2x32x8xbf16>
    %565 = vector.shape_cast %564 : vector<12x2x32x8xbf16> to vector<24x32x8xbf16>
    %566 = vector.shape_cast %553 : vector<12x1x8xf32> to vector<12x1x1x8xf32>
    %567 = vector.shape_cast %566 : vector<12x1x1x8xf32> to vector<12x1x1x8xf32>
    %568 = vector.broadcast %567 : vector<12x1x1x8xf32> to vector<12x2x1x8xf32>
    %569 = vector.shape_cast %568 : vector<12x2x1x8xf32> to vector<24x1x8xf32>
    "tpu.trace_start"() <{level = 10 : i32, message = "gsd,gdf->gsf"}> : () -> ()
    %cst_198 = arith.constant dense<0.000000e+00> : vector<24x8x8xf32>
    %570 = tpu.matmul %561, %565, %cst_198 {dimension_numbers = #tpu.dot_dimension_numbers<[2], [1], [1], [2], [0, 0, 0, 1, 1, 2], [0], [0]>} : vector<24x8x32xbf16>, vector<24x32x8xbf16>, vector<24x8x8xf32> -> vector<24x8x8xf32>
    "tpu.trace_stop"() : () -> ()
    %571 = vector.broadcast %569 : vector<24x1x8xf32> to vector<24x8x8xf32>
    %572 = arith.addf %570, %571 : vector<24x8x8xf32>
    %573 = vector.extract_strided_slice %572 {offsets = [0, 0, 0], sizes = [8, 8, 8], strides = [1, 1, 1]} : vector<24x8x8xf32> to vector<8x8x8xf32>
    %574 = vector.extract_strided_slice %572 {offsets = [8, 0, 0], sizes = [8, 8, 8], strides = [1, 1, 1]} : vector<24x8x8xf32> to vector<8x8x8xf32>
    %575 = vector.extract_strided_slice %572 {offsets = [16, 0, 0], sizes = [8, 8, 8], strides = [1, 1, 1]} : vector<24x8x8xf32> to vector<8x8x8xf32>
    %576 = arith.truncf %573 : vector<8x8x8xf32> to vector<8x8x8xbf16>
    %577 = arith.truncf %574 : vector<8x8x8xf32> to vector<8x8x8xbf16>
    "tpu.trace_start"() <{level = 10 : i32, message = "gqd,gkd->gqk"}> : () -> ()
    %cst_199 = arith.constant dense<0.000000e+00> : vector<8x8x8xf32>
    %578 = tpu.matmul %576, %577, %cst_199 {dimension_numbers = #tpu.dot_dimension_numbers<[2], [2], [1], [1], [0, 0, 0, 1, 1, 1], [0], [0]>} : vector<8x8x8xbf16>, vector<8x8x8xbf16>, vector<8x8x8xf32> -> vector<8x8x8xf32>
    "tpu.trace_stop"() : () -> ()
    %cst_200 = arith.constant 0.353553385 : f32
    %579 = vector.broadcast %cst_200 : f32 to vector<8x8x8xf32>
    %580 = arith.mulf %578, %579 : vector<8x8x8xf32>
    %581 = vector.shape_cast %580 : vector<8x8x8xf32> to vector<4x2x8x8xf32>
    %582 = vector.shape_cast %24 : vector<2x8x8xf32> to vector<1x2x8x8xf32>
    %583 = vector.broadcast %582 : vector<1x2x8x8xf32> to vector<4x2x8x8xf32>
    %584 = arith.addf %581, %583 : vector<4x2x8x8xf32>
    %585 = vector.shape_cast %584 : vector<4x2x8x8xf32> to vector<8x8x8xf32>
    %cst_201 = arith.constant dense<0xFF800000> : vector<8x8xf32>
    %586 = vector.multi_reduction <maximumf>, %585, %cst_201 [2] : vector<8x8x8xf32> to vector<8x8xf32>
    %587 = vector.shape_cast %586 : vector<8x8xf32> to vector<8x8x1xf32>
    %588 = vector.broadcast %587 : vector<8x8x1xf32> to vector<8x8x8xf32>
    %589 = arith.subf %585, %588 : vector<8x8x8xf32>
    %590 = math.exp %589 : vector<8x8x8xf32>
    %cst_202 = arith.constant dense<0.000000e+00> : vector<8x8xf32>
    %591 = vector.multi_reduction <add>, %590, %cst_202 [2] : vector<8x8x8xf32> to vector<8x8xf32>
    %592 = vector.shape_cast %591 : vector<8x8xf32> to vector<8x8x1xf32>
    %593 = vector.broadcast %592 : vector<8x8x1xf32> to vector<8x8x8xf32>
    %594 = arith.divf %590, %593 : vector<8x8x8xf32>
    %595 = arith.truncf %594 : vector<8x8x8xf32> to vector<8x8x8xbf16>
    %596 = arith.truncf %575 : vector<8x8x8xf32> to vector<8x8x8xbf16>
    "tpu.trace_start"() <{level = 10 : i32, message = "gqk,gkd->gqd"}> : () -> ()
    %cst_203 = arith.constant dense<0.000000e+00> : vector<8x8x8xf32>
    %597 = tpu.matmul %595, %596, %cst_203 {dimension_numbers = #tpu.dot_dimension_numbers<[2], [1], [1], [2], [0, 0, 0, 1, 1, 2], [0], [0]>} : vector<8x8x8xbf16>, vector<8x8x8xbf16>, vector<8x8x8xf32> -> vector<8x8x8xf32>
    "tpu.trace_stop"() : () -> ()
    %598 = vector.shape_cast %555 : vector<4x8x32xbf16> to vector<4x1x8x32xbf16>
    %599 = vector.shape_cast %598 : vector<4x1x8x32xbf16> to vector<4x1x8x32xbf16>
    %600 = vector.broadcast %599 : vector<4x1x8x32xbf16> to vector<4x2x8x32xbf16>
    %601 = vector.shape_cast %600 : vector<4x2x8x32xbf16> to vector<8x8x32xbf16>
    %602 = arith.truncf %597 : vector<8x8x8xf32> to vector<8x8x8xbf16>
    "tpu.trace_start"() <{level = 10 : i32, message = "gqd,gdf->gqf"}> : () -> ()
    %cst_204 = arith.constant dense<0.000000e+00> : vector<8x8x32xf32>
    %603 = tpu.matmul %602, %601, %cst_204 {dimension_numbers = #tpu.dot_dimension_numbers<[2], [1], [1], [2], [0, 0, 0, 1, 1, 2], [0], [0]>} : vector<8x8x8xbf16>, vector<8x8x32xbf16>, vector<8x8x32xf32> -> vector<8x8x32xf32>
    "tpu.trace_stop"() : () -> ()
    %604 = vector.shape_cast %603 : vector<8x8x32xf32> to vector<4x2x8x32xf32>
    %cst_205 = arith.constant dense<0.000000e+00> : vector<2x8x32xf32>
    %605 = vector.multi_reduction <add>, %604, %cst_205 [0] : vector<4x2x8x32xf32> to vector<2x8x32xf32>
    %606 = vector.shape_cast %556 : vector<1x32xf32> to vector<1x1x32xf32>
    %607 = vector.broadcast %606 : vector<1x1x32xf32> to vector<2x8x32xf32>
    %608 = arith.addf %605, %607 : vector<2x8x32xf32>
    %609 = vector.shape_cast %608 : vector<2x8x32xf32> to vector<16x32xf32>
    %610 = vector.extract_strided_slice %548 {offsets = [1, 0], sizes = [1, 32], strides = [1, 1]} : vector<9x32xf32> to vector<1x32xf32>
    %611 = vector.extract_strided_slice %548 {offsets = [2, 0], sizes = [1, 32], strides = [1, 1]} : vector<9x32xf32> to vector<1x32xf32>
    %612 = arith.addf %546, %609 : vector<16x32xf32>
    %cst_206 = arith.constant dense<0.000000e+00> : vector<16xf32>
    %613 = vector.multi_reduction <add>, %612, %cst_206 [1] : vector<16x32xf32> to vector<16xf32>
    %614 = vector.shape_cast %613 : vector<16xf32> to vector<16x1xf32>
    %cst_207 = arith.constant 3.200000e+01 : f32
    %615 = vector.broadcast %cst_207 : f32 to vector<16x1xf32>
    %616 = arith.divf %614, %615 : vector<16x1xf32>
    %617 = vector.broadcast %616 : vector<16x1xf32> to vector<16x32xf32>
    %618 = arith.subf %612, %617 : vector<16x32xf32>
    %619 = arith.mulf %618, %618 : vector<16x32xf32>
    %cst_208 = arith.constant dense<0.000000e+00> : vector<16xf32>
    %620 = vector.multi_reduction <add>, %619, %cst_208 [1] : vector<16x32xf32> to vector<16xf32>
    %621 = vector.shape_cast %620 : vector<16xf32> to vector<16x1xf32>
    %cst_209 = arith.constant 3.200000e+01 : f32
    %622 = vector.broadcast %cst_209 : f32 to vector<16x1xf32>
    %623 = arith.divf %621, %622 : vector<16x1xf32>
    %624 = vector.broadcast %616 : vector<16x1xf32> to vector<16x32xf32>
    %625 = arith.subf %612, %624 : vector<16x32xf32>
    %cst_210 = arith.constant 9.99999974E-6 : f32
    %626 = vector.broadcast %cst_210 : f32 to vector<16x1xf32>
    %627 = arith.addf %623, %626 : vector<16x1xf32>
    %628 = math.rsqrt %627 : vector<16x1xf32>
    %629 = vector.broadcast %628 : vector<16x1xf32> to vector<16x32xf32>
    %630 = arith.mulf %625, %629 : vector<16x32xf32>
    %631 = vector.broadcast %610 : vector<1x32xf32> to vector<16x32xf32>
    %632 = arith.mulf %630, %631 : vector<16x32xf32>
    %633 = vector.broadcast %611 : vector<1x32xf32> to vector<16x32xf32>
    %634 = arith.addf %632, %633 : vector<16x32xf32>
    %635 = vector.shape_cast %634 : vector<16x32xf32> to vector<2x8x32xf32>
    %c1_211 = arith.constant 1 : index
    %c0_212 = arith.constant 0 : index
    %c0_213 = arith.constant 0 : index
    %c0_214 = arith.constant 0 : index
    %636 = vector.load %arg17[%c1_211, %c0_212, %c0_213, %c0_214] : memref<2x12x32x8xbf16, #tpu.memory_space<vmem>>, vector<1x12x32x8xbf16>
    %637 = vector.shape_cast %636 : vector<1x12x32x8xbf16> to vector<12x32x8xbf16>
    %c1_215 = arith.constant 1 : index
    %c0_216 = arith.constant 0 : index
    %c0_217 = arith.constant 0 : index
    %c0_218 = arith.constant 0 : index
    %638 = vector.load %arg18[%c1_215, %c0_216, %c0_217, %c0_218] : memref<2x12x1x8xf32, #tpu.memory_space<vmem>>, vector<1x12x1x8xf32>
    %639 = vector.shape_cast %638 : vector<1x12x1x8xf32> to vector<12x1x8xf32>
    %c1_219 = arith.constant 1 : index
    %c0_220 = arith.constant 0 : index
    %c0_221 = arith.constant 0 : index
    %c0_222 = arith.constant 0 : index
    %640 = vector.load %arg19[%c1_219, %c0_220, %c0_221, %c0_222] : memref<2x4x8x32xbf16, #tpu.memory_space<vmem>>, vector<1x4x8x32xbf16>
    %641 = vector.shape_cast %640 : vector<1x4x8x32xbf16> to vector<4x8x32xbf16>
    %642 = vector.extract_strided_slice %548 {offsets = [3, 0], sizes = [1, 32], strides = [1, 1]} : vector<9x32xf32> to vector<1x32xf32>
    %643 = vector.extract_strided_slice %637 {offsets = [0, 0, 0], sizes = [4, 32, 8], strides = [1, 1, 1]} : vector<12x32x8xbf16> to vector<4x32x8xbf16>
    %644 = vector.extract_strided_slice %639 {offsets = [0, 0, 0], sizes = [4, 1, 8], strides = [1, 1, 1]} : vector<12x1x8xf32> to vector<4x1x8xf32>
    %645 = arith.truncf %635 : vector<2x8x32xf32> to vector<2x8x32xbf16>
    %646 = vector.shape_cast %645 : vector<2x8x32xbf16> to vector<1x2x8x32xbf16>
    %647 = vector.shape_cast %646 : vector<1x2x8x32xbf16> to vector<1x2x8x32xbf16>
    %648 = vector.broadcast %647 : vector<1x2x8x32xbf16> to vector<4x2x8x32xbf16>
    %649 = vector.shape_cast %648 : vector<4x2x8x32xbf16> to vector<8x8x32xbf16>
    %650 = vector.shape_cast %643 : vector<4x32x8xbf16> to vector<4x1x32x8xbf16>
    %651 = vector.shape_cast %650 : vector<4x1x32x8xbf16> to vector<4x1x32x8xbf16>
    %652 = vector.broadcast %651 : vector<4x1x32x8xbf16> to vector<4x2x32x8xbf16>
    %653 = vector.shape_cast %652 : vector<4x2x32x8xbf16> to vector<8x32x8xbf16>
    %654 = vector.shape_cast %644 : vector<4x1x8xf32> to vector<4x1x1x8xf32>
    %655 = vector.shape_cast %654 : vector<4x1x1x8xf32> to vector<4x1x1x8xf32>
    %656 = vector.broadcast %655 : vector<4x1x1x8xf32> to vector<4x2x1x8xf32>
    %657 = vector.shape_cast %656 : vector<4x2x1x8xf32> to vector<8x1x8xf32>
    "tpu.trace_start"() <{level = 10 : i32, message = "gsd,gdf->gsf"}> : () -> ()
    %cst_223 = arith.constant dense<0.000000e+00> : vector<8x8x8xf32>
    %658 = tpu.matmul %649, %653, %cst_223 {dimension_numbers = #tpu.dot_dimension_numbers<[2], [1], [1], [2], [0, 0, 0, 1, 1, 2], [0], [0]>} : vector<8x8x32xbf16>, vector<8x32x8xbf16>, vector<8x8x8xf32> -> vector<8x8x8xf32>
    "tpu.trace_stop"() : () -> ()
    %659 = vector.broadcast %657 : vector<8x1x8xf32> to vector<8x8x8xf32>
    %660 = arith.addf %658, %659 : vector<8x8x8xf32>
    %661 = vector.extract_strided_slice %637 {offsets = [4, 0, 0], sizes = [8, 32, 8], strides = [1, 1, 1]} : vector<12x32x8xbf16> to vector<8x32x8xbf16>
    %662 = vector.extract_strided_slice %639 {offsets = [4, 0, 0], sizes = [8, 1, 8], strides = [1, 1, 1]} : vector<12x1x8xf32> to vector<8x1x8xf32>
    %663 = arith.truncf %298 : vector<2x8x32xf32> to vector<2x8x32xbf16>
    %664 = vector.shape_cast %663 : vector<2x8x32xbf16> to vector<1x2x8x32xbf16>
    %665 = vector.shape_cast %664 : vector<1x2x8x32xbf16> to vector<1x2x8x32xbf16>
    %666 = vector.broadcast %665 : vector<1x2x8x32xbf16> to vector<8x2x8x32xbf16>
    %667 = vector.shape_cast %666 : vector<8x2x8x32xbf16> to vector<16x8x32xbf16>
    %668 = vector.shape_cast %661 : vector<8x32x8xbf16> to vector<8x1x32x8xbf16>
    %669 = vector.shape_cast %668 : vector<8x1x32x8xbf16> to vector<8x1x32x8xbf16>
    %670 = vector.broadcast %669 : vector<8x1x32x8xbf16> to vector<8x2x32x8xbf16>
    %671 = vector.shape_cast %670 : vector<8x2x32x8xbf16> to vector<16x32x8xbf16>
    %672 = vector.shape_cast %662 : vector<8x1x8xf32> to vector<8x1x1x8xf32>
    %673 = vector.shape_cast %672 : vector<8x1x1x8xf32> to vector<8x1x1x8xf32>
    %674 = vector.broadcast %673 : vector<8x1x1x8xf32> to vector<8x2x1x8xf32>
    %675 = vector.shape_cast %674 : vector<8x2x1x8xf32> to vector<16x1x8xf32>
    "tpu.trace_start"() <{level = 10 : i32, message = "gsd,gdf->gsf"}> : () -> ()
    %cst_224 = arith.constant dense<0.000000e+00> : vector<16x8x8xf32>
    %676 = tpu.matmul %667, %671, %cst_224 {dimension_numbers = #tpu.dot_dimension_numbers<[2], [1], [1], [2], [0, 0, 0, 1, 1, 2], [0], [0]>} : vector<16x8x32xbf16>, vector<16x32x8xbf16>, vector<16x8x8xf32> -> vector<16x8x8xf32>
    "tpu.trace_stop"() : () -> ()
    %677 = vector.broadcast %675 : vector<16x1x8xf32> to vector<16x8x8xf32>
    %678 = arith.addf %676, %677 : vector<16x8x8xf32>
    %679 = vector.extract_strided_slice %678 {offsets = [0, 0, 0], sizes = [8, 8, 8], strides = [1, 1, 1]} : vector<16x8x8xf32> to vector<8x8x8xf32>
    %680 = vector.extract_strided_slice %678 {offsets = [8, 0, 0], sizes = [8, 8, 8], strides = [1, 1, 1]} : vector<16x8x8xf32> to vector<8x8x8xf32>
    %681 = arith.truncf %660 : vector<8x8x8xf32> to vector<8x8x8xbf16>
    %682 = arith.truncf %679 : vector<8x8x8xf32> to vector<8x8x8xbf16>
    "tpu.trace_start"() <{level = 10 : i32, message = "gqd,gkd->gqk"}> : () -> ()
    %cst_225 = arith.constant dense<0.000000e+00> : vector<8x8x8xf32>
    %683 = tpu.matmul %681, %682, %cst_225 {dimension_numbers = #tpu.dot_dimension_numbers<[2], [2], [1], [1], [0, 0, 0, 1, 1, 1], [0], [0]>} : vector<8x8x8xbf16>, vector<8x8x8xbf16>, vector<8x8x8xf32> -> vector<8x8x8xf32>
    "tpu.trace_stop"() : () -> ()
    %cst_226 = arith.constant 0.353553385 : f32
    %684 = vector.broadcast %cst_226 : f32 to vector<8x8x8xf32>
    %685 = arith.mulf %683, %684 : vector<8x8x8xf32>
    %686 = vector.shape_cast %685 : vector<8x8x8xf32> to vector<4x2x8x8xf32>
    %687 = vector.shape_cast %4 : vector<2x1x8xf32> to vector<1x2x1x8xf32>
    %688 = vector.broadcast %687 : vector<1x2x1x8xf32> to vector<4x2x8x8xf32>
    %689 = arith.addf %686, %688 : vector<4x2x8x8xf32>
    %690 = vector.shape_cast %689 : vector<4x2x8x8xf32> to vector<8x8x8xf32>
    %cst_227 = arith.constant dense<0xFF800000> : vector<8x8xf32>
    %691 = vector.multi_reduction <maximumf>, %690, %cst_227 [2] : vector<8x8x8xf32> to vector<8x8xf32>
    %692 = vector.shape_cast %691 : vector<8x8xf32> to vector<8x8x1xf32>
    %693 = vector.broadcast %692 : vector<8x8x1xf32> to vector<8x8x8xf32>
    %694 = arith.subf %690, %693 : vector<8x8x8xf32>
    %695 = math.exp %694 : vector<8x8x8xf32>
    %cst_228 = arith.constant dense<0.000000e+00> : vector<8x8xf32>
    %696 = vector.multi_reduction <add>, %695, %cst_228 [2] : vector<8x8x8xf32> to vector<8x8xf32>
    %697 = vector.shape_cast %696 : vector<8x8xf32> to vector<8x8x1xf32>
    %698 = vector.broadcast %697 : vector<8x8x1xf32> to vector<8x8x8xf32>
    %699 = arith.divf %695, %698 : vector<8x8x8xf32>
    %700 = arith.truncf %699 : vector<8x8x8xf32> to vector<8x8x8xbf16>
    %701 = arith.truncf %680 : vector<8x8x8xf32> to vector<8x8x8xbf16>
    "tpu.trace_start"() <{level = 10 : i32, message = "gqk,gkd->gqd"}> : () -> ()
    %cst_229 = arith.constant dense<0.000000e+00> : vector<8x8x8xf32>
    %702 = tpu.matmul %700, %701, %cst_229 {dimension_numbers = #tpu.dot_dimension_numbers<[2], [1], [1], [2], [0, 0, 0, 1, 1, 2], [0], [0]>} : vector<8x8x8xbf16>, vector<8x8x8xbf16>, vector<8x8x8xf32> -> vector<8x8x8xf32>
    "tpu.trace_stop"() : () -> ()
    %703 = vector.shape_cast %641 : vector<4x8x32xbf16> to vector<4x1x8x32xbf16>
    %704 = vector.shape_cast %703 : vector<4x1x8x32xbf16> to vector<4x1x8x32xbf16>
    %705 = vector.broadcast %704 : vector<4x1x8x32xbf16> to vector<4x2x8x32xbf16>
    %706 = vector.shape_cast %705 : vector<4x2x8x32xbf16> to vector<8x8x32xbf16>
    %707 = arith.truncf %702 : vector<8x8x8xf32> to vector<8x8x8xbf16>
    "tpu.trace_start"() <{level = 10 : i32, message = "gqd,gdf->gqf"}> : () -> ()
    %cst_230 = arith.constant dense<0.000000e+00> : vector<8x8x32xf32>
    %708 = tpu.matmul %707, %706, %cst_230 {dimension_numbers = #tpu.dot_dimension_numbers<[2], [1], [1], [2], [0, 0, 0, 1, 1, 2], [0], [0]>} : vector<8x8x8xbf16>, vector<8x8x32xbf16>, vector<8x8x32xf32> -> vector<8x8x32xf32>
    "tpu.trace_stop"() : () -> ()
    %709 = vector.shape_cast %708 : vector<8x8x32xf32> to vector<4x2x8x32xf32>
    %cst_231 = arith.constant dense<0.000000e+00> : vector<2x8x32xf32>
    %710 = vector.multi_reduction <add>, %709, %cst_231 [0] : vector<4x2x8x32xf32> to vector<2x8x32xf32>
    %711 = vector.shape_cast %642 : vector<1x32xf32> to vector<1x1x32xf32>
    %712 = vector.broadcast %711 : vector<1x1x32xf32> to vector<2x8x32xf32>
    %713 = arith.addf %710, %712 : vector<2x8x32xf32>
    %714 = vector.shape_cast %713 : vector<2x8x32xf32> to vector<16x32xf32>
    %715 = vector.extract_strided_slice %548 {offsets = [4, 0], sizes = [1, 32], strides = [1, 1]} : vector<9x32xf32> to vector<1x32xf32>
    %716 = vector.extract_strided_slice %548 {offsets = [5, 0], sizes = [1, 32], strides = [1, 1]} : vector<9x32xf32> to vector<1x32xf32>
    %717 = arith.addf %634, %714 : vector<16x32xf32>
    %cst_232 = arith.constant dense<0.000000e+00> : vector<16xf32>
    %718 = vector.multi_reduction <add>, %717, %cst_232 [1] : vector<16x32xf32> to vector<16xf32>
    %719 = vector.shape_cast %718 : vector<16xf32> to vector<16x1xf32>
    %cst_233 = arith.constant 3.200000e+01 : f32
    %720 = vector.broadcast %cst_233 : f32 to vector<16x1xf32>
    %721 = arith.divf %719, %720 : vector<16x1xf32>
    %722 = vector.broadcast %721 : vector<16x1xf32> to vector<16x32xf32>
    %723 = arith.subf %717, %722 : vector<16x32xf32>
    %724 = arith.mulf %723, %723 : vector<16x32xf32>
    %cst_234 = arith.constant dense<0.000000e+00> : vector<16xf32>
    %725 = vector.multi_reduction <add>, %724, %cst_234 [1] : vector<16x32xf32> to vector<16xf32>
    %726 = vector.shape_cast %725 : vector<16xf32> to vector<16x1xf32>
    %cst_235 = arith.constant 3.200000e+01 : f32
    %727 = vector.broadcast %cst_235 : f32 to vector<16x1xf32>
    %728 = arith.divf %726, %727 : vector<16x1xf32>
    %729 = vector.broadcast %721 : vector<16x1xf32> to vector<16x32xf32>
    %730 = arith.subf %717, %729 : vector<16x32xf32>
    %cst_236 = arith.constant 9.99999974E-6 : f32
    %731 = vector.broadcast %cst_236 : f32 to vector<16x1xf32>
    %732 = arith.addf %728, %731 : vector<16x1xf32>
    %733 = math.rsqrt %732 : vector<16x1xf32>
    %734 = vector.broadcast %733 : vector<16x1xf32> to vector<16x32xf32>
    %735 = arith.mulf %730, %734 : vector<16x32xf32>
    %736 = vector.broadcast %715 : vector<1x32xf32> to vector<16x32xf32>
    %737 = arith.mulf %735, %736 : vector<16x32xf32>
    %738 = vector.broadcast %716 : vector<1x32xf32> to vector<16x32xf32>
    %739 = arith.addf %737, %738 : vector<16x32xf32>
    %c1_237 = arith.constant 1 : index
    %c0_238 = arith.constant 0 : index
    %c0_239 = arith.constant 0 : index
    %740 = vector.load %arg20[%c1_237, %c0_238, %c0_239] : memref<2x32x64xbf16, #tpu.memory_space<vmem>>, vector<1x32x64xbf16>
    %741 = vector.shape_cast %740 : vector<1x32x64xbf16> to vector<32x64xbf16>
    %c1_240 = arith.constant 1 : index
    %c0_241 = arith.constant 0 : index
    %c0_242 = arith.constant 0 : index
    %742 = vector.load %arg21[%c1_240, %c0_241, %c0_242] : memref<2x1x64xf32, #tpu.memory_space<vmem>>, vector<1x1x64xf32>
    %743 = vector.shape_cast %742 : vector<1x1x64xf32> to vector<1x64xf32>
    %c1_243 = arith.constant 1 : index
    %c0_244 = arith.constant 0 : index
    %c0_245 = arith.constant 0 : index
    %744 = vector.load %arg22[%c1_243, %c0_244, %c0_245] : memref<2x64x32xbf16, #tpu.memory_space<vmem>>, vector<1x64x32xbf16>
    %745 = vector.shape_cast %744 : vector<1x64x32xbf16> to vector<64x32xbf16>
    %746 = vector.extract_strided_slice %548 {offsets = [6, 0], sizes = [1, 32], strides = [1, 1]} : vector<9x32xf32> to vector<1x32xf32>
    %747 = arith.truncf %739 : vector<16x32xf32> to vector<16x32xbf16>
    %cst_246 = arith.constant dense<0.000000e+00> : vector<16x64xf32>
    %748 = tpu.matmul %747, %741, %cst_246 {dimension_numbers = #tpu.dot_dimension_numbers<[1], [0], [0], [1], [0, 0, 1, 1], [], []>} : vector<16x32xbf16>, vector<32x64xbf16>, vector<16x64xf32> -> vector<16x64xf32>
    %749 = vector.broadcast %743 : vector<1x64xf32> to vector<16x64xf32>
    %750 = arith.addf %748, %749 : vector<16x64xf32>
    %cst_247 = arith.constant 0.000000e+00 : f32
    %751 = vector.broadcast %cst_247 : f32 to vector<16x64xf32>
    %752 = arith.maximumf %750, %751 : vector<16x64xf32>
    %753 = arith.truncf %752 : vector<16x64xf32> to vector<16x64xbf16>
    %cst_248 = arith.constant dense<0.000000e+00> : vector<16x32xf32>
    %754 = tpu.matmul %753, %745, %cst_248 {dimension_numbers = #tpu.dot_dimension_numbers<[1], [0], [0], [1], [0, 0, 1, 1], [], []>} : vector<16x64xbf16>, vector<64x32xbf16>, vector<16x32xf32> -> vector<16x32xf32>
    %755 = vector.broadcast %746 : vector<1x32xf32> to vector<16x32xf32>
    %756 = arith.addf %754, %755 : vector<16x32xf32>
    %757 = vector.extract_strided_slice %548 {offsets = [7, 0], sizes = [1, 32], strides = [1, 1]} : vector<9x32xf32> to vector<1x32xf32>
    %758 = vector.extract_strided_slice %548 {offsets = [8, 0], sizes = [1, 32], strides = [1, 1]} : vector<9x32xf32> to vector<1x32xf32>
    %759 = arith.addf %739, %756 : vector<16x32xf32>
    %cst_249 = arith.constant dense<0.000000e+00> : vector<16xf32>
    %760 = vector.multi_reduction <add>, %759, %cst_249 [1] : vector<16x32xf32> to vector<16xf32>
    %761 = vector.shape_cast %760 : vector<16xf32> to vector<16x1xf32>
    %cst_250 = arith.constant 3.200000e+01 : f32
    %762 = vector.broadcast %cst_250 : f32 to vector<16x1xf32>
    %763 = arith.divf %761, %762 : vector<16x1xf32>
    %764 = vector.broadcast %763 : vector<16x1xf32> to vector<16x32xf32>
    %765 = arith.subf %759, %764 : vector<16x32xf32>
    %766 = arith.mulf %765, %765 : vector<16x32xf32>
    %cst_251 = arith.constant dense<0.000000e+00> : vector<16xf32>
    %767 = vector.multi_reduction <add>, %766, %cst_251 [1] : vector<16x32xf32> to vector<16xf32>
    %768 = vector.shape_cast %767 : vector<16xf32> to vector<16x1xf32>
    %cst_252 = arith.constant 3.200000e+01 : f32
    %769 = vector.broadcast %cst_252 : f32 to vector<16x1xf32>
    %770 = arith.divf %768, %769 : vector<16x1xf32>
    %771 = vector.broadcast %763 : vector<16x1xf32> to vector<16x32xf32>
    %772 = arith.subf %759, %771 : vector<16x32xf32>
    %cst_253 = arith.constant 9.99999974E-6 : f32
    %773 = vector.broadcast %cst_253 : f32 to vector<16x1xf32>
    %774 = arith.addf %770, %773 : vector<16x1xf32>
    %775 = math.rsqrt %774 : vector<16x1xf32>
    %776 = vector.broadcast %775 : vector<16x1xf32> to vector<16x32xf32>
    %777 = arith.mulf %772, %776 : vector<16x32xf32>
    %778 = vector.broadcast %757 : vector<1x32xf32> to vector<16x32xf32>
    %779 = arith.mulf %777, %778 : vector<16x32xf32>
    %780 = vector.broadcast %758 : vector<1x32xf32> to vector<16x32xf32>
    %781 = arith.addf %779, %780 : vector<16x32xf32>
    %782 = arith.truncf %781 : vector<16x32xf32> to vector<16x32xbf16>
    %c0_254 = arith.constant 0 : index
    %c0_255 = arith.constant 0 : index
    %783 = vector.load %arg24[%c0_254, %c0_255] : memref<32x128xbf16, #tpu.memory_space<vmem>>, vector<32x128xbf16>
    %cst_256 = arith.constant dense<0.000000e+00> : vector<16x128xf32>
    %784 = tpu.matmul %782, %783, %cst_256 {dimension_numbers = #tpu.dot_dimension_numbers<[1], [0], [0], [1], [0, 0, 1, 1], [], []>} : vector<16x32xbf16>, vector<32x128xbf16>, vector<16x128xf32> -> vector<16x128xf32>
    %c0_257 = arith.constant 0 : index
    %c0_258 = arith.constant 0 : index
    %785 = vector.load %arg25[%c0_257, %c0_258] : memref<1x128xf32, #tpu.memory_space<vmem>>, vector<1x128xf32>
    %786 = vector.broadcast %785 : vector<1x128xf32> to vector<16x128xf32>
    %787 = arith.addf %784, %786 : vector<16x128xf32>
    %788 = vector.shape_cast %787 : vector<16x128xf32> to vector<2x8x128xf32>
    %c0_259 = arith.constant 0 : index
    %c0_260 = arith.constant 0 : index
    %c0_261 = arith.constant 0 : index
    %789 = vector.load %arg26[%c0_259, %c0_260, %c0_261] : memref<2x8x128xf32, #tpu.memory_space<vmem>>, vector<2x8x128xf32>
    tpu.vector_store %arg26[%c0_259, %c0_260, %c0_261], %788 {strides = array<i32>} : memref<2x8x128xf32, #tpu.memory_space<vmem>>, vector<2x8x128xf32>,
    return
  }
}

</mosaic_0001>

<bundles_post_ra>
// kernel: ribonanza_forward.1
= control target key start
LH: loop header
LB: loop body
LE: loop exit
PB: predicated region body
PF: predicated region fallthrough
CT: control target
= control target key end

     0   :  { %vm125_vm0 = vcmask 1041408   ;;  %v20441_v0 = vmov 0.0   ;;  %vm20442_vm1 = vmmov 0   ;;  %vm96_vm2 = vcmask 31744   ;;  %s23895_s4 = inlined_call_operand.vmem [shape: bf16[4,32], index: 4, kind: input, shape index: {}]   ;;  %s23896_s0 = inlined_call_operand.vmem [shape: f32[2,8,4], index: 0, kind: input, shape index: {}]   ;;  %s23897_s7 = inlined_call_operand.vmem [shape: bf16[2,12,32,8], index: 7, kind: input, shape index: {}]   ;;  %s23898_s6 = inlined_call_operand.vmem [shape: f32[2,32], index: 6, kind: input, shape index: {}]   ;;  %s23899_s3 = inlined_call_operand.vmem [shape: f32[16,32], index: 3, kind: input, shape index: {}]   ;;  %s23900_s8 = inlined_call_operand.vmem [shape: f32[2,12,1,8], index: 8, kind: input, shape index: {}]   ;;  %s23901_s2 = inlined_call_operand.vmem [shape: f32[2,1,8], index: 2, kind: input, shape index: {}]   ;;  %s23902_s9 = inlined_call_operand.vmem [shape: bf16[2,4,8,32], index: 9, kind: input, shape index: {}]   ;;  %s23903_s13 = inlined_call_operand.vmem [shape: f32[2,6,32], index: 13, kind: input, shape index: {}]   ;;  %s23904_s10 = inlined_call_operand.vmem [shape: bf16[2,32,64], index: 10, kind: input, shape index: {}]   ;;  %s23905_s12 = inlined_call_operand.vmem [shape: bf16[2,64,32], index: 12, kind: input, shape index: {}]   ;;  %s23906_s11 = inlined_call_operand.vmem [shape: f32[2,1,64], index: 11, kind: input, shape index: {}]   ;;  %s23907_s5 = inlined_call_operand.vmem [shape: bf16[4,32], index: 5, kind: input, shape index: {}]   ;;  %s23908_s1 = inlined_call_operand.vmem [shape: f32[2,8,4], index: 1, kind: input, shape index: {}]   ;;  %s23909_s14 = inlined_call_operand.vmem [shape: bf16[2,12,32,8], index: 14, kind: input, shape index: {}]   ;;  %s23910_s15 = inlined_call_operand.vmem [shape: f32[2,12,1,8], index: 15, kind: input, shape index: {}]   ;;  %s23911_s16 = inlined_call_operand.vmem [shape: bf16[2,4,8,32], index: 16, kind: input, shape index: {}]   ;;  %s23912_s23 = inlined_call_operand.vmem [shape: f32[2,9,32], index: 23, kind: input, shape index: {}]   ;;  %s23913_s17 = inlined_call_operand.vmem [shape: bf16[2,12,32,8], index: 17, kind: input, shape index: {}]   ;;  %s23914_s18 = inlined_call_operand.vmem [shape: f32[2,12,1,8], index: 18, kind: input, shape index: {}]   ;;  %s23915_s19 = inlined_call_operand.vmem [shape: bf16[2,4,8,32], index: 19, kind: input, shape index: {}]   ;;  %s23916_s20 = inlined_call_operand.vmem [shape: bf16[2,32,64], index: 20, kind: input, shape index: {}]   ;;  %s23917_s22 = inlined_call_operand.vmem [shape: bf16[2,64,32], index: 22, kind: input, shape index: {}]   ;;  %s23918_s21 = inlined_call_operand.vmem [shape: f32[2,1,64], index: 21, kind: input, shape index: {}]   ;;  %s23919_s24 = inlined_call_operand.vmem [shape: bf16[32,128], index: 24, kind: input, shape index: {}]   ;;  %s23920_s25 = inlined_call_operand.vmem [shape: f32[1,128], index: 25, kind: input, shape index: {}]   ;;  %s23921_s26 = inlined_call_operand.vmem [shape: f32[2,8,128], index: 26, kind: output, shape index: {}]  }
   0x1   :  { %23933 = sst [smem:[#allocation2_spill]] %s23895_s4  ;;  %17910 = vmatprep.subr.bf16.mxu0 %v20441_v0  ;;  %17912 = vmatprep.mubr.msk.bf16.mxu0 %vm20442_vm1, %v20441_v0  ;;  %v103_v8 = vlaneseq  ;;  %vm323_vm3 = vcmask 261120   ;;  %vm1438_vm4 = vcmask 64512   ;;  %vm1942_vm5 = vcmask 1043456  }
   0x2   :  { %23934 = sst [smem:[#allocation3_spill]] %s23896_s0  ;;  %17916 = vmatprep.subr.bf16.mxu1 %v20441_v0  ;;  %17920 = vmatprep.mubr.msk.bf16.mxu1 %vm20442_vm1, %v20441_v0  ;;  %vm2840_vm6 = vcmask 523264  }
   0x3   :  { %23935 = sst [smem:[#allocation4_spill]] %s23897_s7  ;;  %v20609_v9 = vshrl.u32 %v103_v8, 7 }
   0x4   :  { %23936 = sst [smem:[#allocation5_spill]] %s23898_s6 }
   0x5   :  { %23937 = sst [smem:[#allocation6_spill]] %s23899_s3  ;;  %v20612_v10 = vsub.s32 0, %v20609_v9 }
   0x6   :  { %23938 = sst [smem:[#allocation7_spill]] %s23900_s8 }
   0x7   :  { %23939 = sst [smem:[#allocation8_spill]] %s23901_s2 }
   0x8   :  { %23940 = sst [smem:[#allocation9_spill]] %s23902_s9 }
   0x9   :  { %23941 = sst [smem:[#allocation10_spill]] %s23903_s13 }
   0xa   :  { %23942 = sst [smem:[#allocation11_spill]] %s23904_s10 }
   0xb   :  { %23943 = sst [smem:[#allocation12_spill]] %s23905_s12 }
   0xc   :  { %23944 = sst [smem:[#allocation13_spill]] %s23920_s25 }
   0xd   :  { %23945 = sst [smem:[#allocation14_spill]] %s23921_s26 }
   0xe   :  { %s23946_s9 = sld [smem:[#allocation2_spill]] }
   0xf   :  { %s23947_s3 = sld [smem:[#allocation3_spill]] }
  0x10   :  { %s23948_s7 = sld [smem:[#allocation4_spill]] }
  0x11   :  { %s23949_s27 = sld [smem:[#allocation5_spill]] }
  0x12   :  { %s23950_s28 = sld [smem:[#allocation6_spill]] }
  0x13   :  { %s23951_s6 = sld [smem:[#allocation7_spill]] }
  0x14   :  { %v116_v1 = vld [vmem:[%s23946_s9] sm:$0x3]  ;;  %s23952_s8 = sld [smem:[#allocation8_spill]] }
  0x15   :  { %v84_v2 = vld [vmem:[%s23947_s3] sm:$0xff]  ;;  %v127_v3 = vsel %vm125_vm0, %v116_v1, 0  ;;  %v85_v4 = vld [vmem:[%s23947_s3 + $0x8] sm:$0xff]  ;;  %s23953_s12 = sld [smem:[#allocation9_spill]] }
  0x16   :  { %17911 = vmatpush3.bf16.msra.mxu0 %v127_v3  ;;  %v117_v5 = vpack.c.bf16 %v85_v4, %v84_v2  ;;  %v20028_v6 = vld [vmem:[%s23948_s7 + $0x8] sm:$0xff]   ;;  %v20029_v7 = vld [vmem:[%s23948_s7] sm:$0xff]   ;;  %v20030_v19 = vld [vmem:[%s23948_s7 + $0x18] sm:$0xff]   ;;  %s23954_s30 = sld [smem:[#allocation10_spill]] }
  0x17   :  { %17924 = vmatprep.subr.bf16.mxu0 %v20441_v0  ;;  %17917 = vmatpush3.bf16.msra.mxu1 %v20028_v6  ;;  %v89_v11 = vld [vmem:[%s23949_s27] sm:$0x3]  ;;  %v20031_v24 = vld [vmem:[%s23948_s7 + $0x10] sm:$0xff]   ;;  %v20032_v26 = vld [vmem:[%s23948_s7 + $0x28] sm:$0xff]   ;;  %s23955_s9 = sld [smem:[#allocation11_spill]] }
  0x18   :  { %17918 = vmatprep.subr.bf16.mxu1 %v20441_v0  ;;  %v121_v12 = vrot.slane %v89_v11, %v20612_v10  ;;  %v88_v13 = vld [vmem:[%s23950_s28] sm:$0xff]  ;;  %v20034_v28 = vld [vmem:[%s23948_s7 + $0x38] sm:$0xff]   ;;  %v20035_v29 = vld [vmem:[%s23948_s7 + $0x30] sm:$0xff]   ;;  %s23956_s10 = sld [smem:[#allocation12_spill]] }
  0x19   :  { %17913 = vmatmul.mubr.msk.bf16.vlgmr.msra.gmra.mxu0 %vm96_vm2, %v117_v5  ;;  %v20033_v27 = vld [vmem:[%s23948_s7 + $0x20] sm:$0xff]   ;;  %v20036_v30 = vld [vmem:[%s23948_s7 + $0x48] sm:$0xff]   ;;  %v20038_v32 = vld [vmem:[%s23948_s7 + $0x58] sm:$0xff]  }
  0x1a   :  { %17928 = vmatprep.mubr.msk.bf16.mxu0 %vm20442_vm1, %v20441_v0  ;;  %17925 = vmatpush3.bf16.msra.mxu0 %v20028_v6  ;;  %v20037_v31 = vld [vmem:[%s23948_s7 + $0x40] sm:$0xff]   ;;  %v20039_v33 = vld [vmem:[%s23948_s7 + $0x50] sm:$0xff]   ;;  %v20040_v34 = vld [vmem:[%s23948_s7 + $0x68] sm:$0xff]  }
  0x1b   :  { %17926 = vmatprep.subr.bf16.mxu0 %v20441_v0  ;;  %17919 = vmatpush3.bf16.msra.mxu1 %v20029_v7  ;;  %v20041_v35 = vld [vmem:[%s23948_s7 + $0x60] sm:$0xff]   ;;  %v20042_v36 = vld [vmem:[%s23948_s7 + $0x78] sm:$0xff]   ;;  %v20043_v37 = vld [vmem:[%s23948_s7 + $0x70] sm:$0xff]  }
  0x1c   :  { %17932 = vmatprep.subr.bf16.mxu1 %v20441_v0  ;;  %v20044_v38 = vld [vmem:[%s23948_s7 + $0x88] sm:$0xff]   ;;  %v20045_v39 = vld [vmem:[%s23948_s7 + $0x80] sm:$0xff]   ;;  %v20046_v40 = vld [vmem:[%s23948_s7 + $0x98] sm:$0xff]  }
  0x1d   :  { %v20047_v41 = vld [vmem:[%s23948_s7 + $0x90] sm:$0xff]   ;;  %v20048_v42 = vld [vmem:[%s23948_s7 + $0xa8] sm:$0xff]   ;;  %v20049_v43 = vld [vmem:[%s23948_s7 + $0xa0] sm:$0xff]  }
  0x1e   :  { %17927 = vmatpush3.bf16.msra.mxu0 %v20029_v7  ;;  %v20050_v44 = vld [vmem:[%s23948_s7 + $0xb8] sm:$0xff]   ;;  %v20051_v45 = vld [vmem:[%s23948_s7 + $0xb0] sm:$0xff]  }
  0x1f   :  { %17940 = vmatprep.subr.bf16.mxu0 %v20441_v0 }
  0xd9   :  { %v163_v14 = vpop.f32.mrf.mxu0 }
  0xda   :  { %v164_v15 = vadd.f32 %v163_v14, %v121_v12 }
  0xdb   :  { %v17914_v16 = vpop.f32.mrf.mxu0 }
  0xdc   :  { %v20621_v17 = vadd.f32 %v164_v15, %v88_v13  ;;  %v16385_v16 = vld [vmem:[%s23951_s6 + $0x4] ss:$0 sm:$0xff] }
  0xdd   :  { %v166_v18 = vpop.f32.mrf.mxu0 }
  0xde   :  { %v20628_v20 = vpack.c.bf16 %v20621_v17, %v20621_v17  ;;  %v167_v21 = vadd.f32 %v166_v18, %v121_v12 }
  0xdf   :  { %v17915_v22 = vpop.f32.mrf.mxu0 }
  0xe0   :  { %v20630_v23 = vadd.f32 %v167_v21, %v88_v13  ;;  %17921 = vmatmul.mubr.msk.bf16.vlgmr.msra.gmra.mxu1 %vm323_vm3, %v20628_v20 }
  0xe1   :  { %17933 = vmatpush3.bf16.msra.mxu1 %v20030_v19  ;;  %17936 = vmatprep.mubr.msk.bf16.mxu1 %vm20442_vm1, %v20441_v0 }
  0xe2   :  { %v20641_v25 = vpack.c.bf16 %v20630_v23, %v20630_v23  ;;  %17934 = vmatprep.subr.bf16.mxu1 %v20441_v0 }
  0xe4   :  { %17929 = vmatmul.mubr.msk.bf16.vlgmr.msra.gmra.mxu0 %vm323_vm3, %v20641_v25 }
  0xe5   :  { %17935 = vmatpush3.bf16.msra.mxu1 %v20031_v24  ;;  %17941 = vmatpush3.bf16.msra.mxu0 %v20030_v19 }
  0xe6   :  { %17942 = vmatprep.subr.bf16.mxu0 %v20441_v0  ;;  %17948 = vmatprep.subr.bf16.mxu1 %v20441_v0 }
  0xe7   :  { %17944 = vmatprep.mubr.msk.bf16.mxu0 %vm20442_vm1, %v20441_v0 }
  0xe8   :  { %17937 = vmatmul.mubr.msk.bf16.vlgmr.msra.gmra.mxu1 %vm323_vm3, %v20628_v20 }
  0xe9   :  { %17943 = vmatpush3.bf16.msra.mxu0 %v20031_v24  ;;  %17949 = vmatpush3.bf16.msra.mxu1 %v20032_v26 }
  0xea   :  { %17950 = vmatprep.subr.bf16.mxu1 %v20441_v0  ;;  %17956 = vmatprep.subr.bf16.mxu0 %v20441_v0 }
  0xeb   :  { %17952 = vmatprep.mubr.msk.bf16.mxu1 %vm20442_vm1, %v20441_v0 }
  0xec   :  { %17945 = vmatmul.mubr.msk.bf16.vlgmr.msra.gmra.mxu0 %vm323_vm3, %v20641_v25 }
  0xed   :  { %17951 = vmatpush3.bf16.msra.mxu1 %v20033_v27  ;;  %17957 = vmatpush3.bf16.msra.mxu0 %v20032_v26 }
  0xee   :  { %17958 = vmatprep.subr.bf16.mxu0 %v20441_v0  ;;  %17964 = vmatprep.subr.bf16.mxu1 %v20441_v0 }
  0xef   :  { %17960 = vmatprep.mubr.msk.bf16.mxu0 %vm20442_vm1, %v20441_v0 }
  0xf0   :  { %17953 = vmatmul.mubr.msk.bf16.vlgmr.msra.gmra.mxu1 %vm323_vm3, %v20628_v20 }
  0xf1   :  { %17959 = vmatpush3.bf16.msra.mxu0 %v20033_v27  ;;  %17965 = vmatpush3.bf16.msra.mxu1 %v20034_v28 }
  0xf2   :  { %17966 = vmatprep.subr.bf16.mxu1 %v20441_v0  ;;  %17972 = vmatprep.subr.bf16.mxu0 %v20441_v0 }
  0xf3   :  { %17968 = vmatprep.mubr.msk.bf16.mxu1 %vm20442_vm1, %v20441_v0 }
  0xf4   :  { %17961 = vmatmul.mubr.msk.bf16.vlgmr.msra.gmra.mxu0 %vm323_vm3, %v20641_v25 }
  0xf5   :  { %17967 = vmatpush3.bf16.msra.mxu1 %v20035_v29  ;;  %17973 = vmatpush3.bf16.msra.mxu0 %v20034_v28 }
  0xf6   :  { %17974 = vmatprep.subr.bf16.mxu0 %v20441_v0  ;;  %17980 = vmatprep.subr.bf16.mxu1 %v20441_v0 }
  0xf7   :  { %17976 = vmatprep.mubr.msk.bf16.mxu0 %vm20442_vm1, %v20441_v0 }
  0xf8   :  { %17969 = vmatmul.mubr.msk.bf16.vlgmr.msra.gmra.mxu1 %vm323_vm3, %v20628_v20 }
  0xf9   :  { %17975 = vmatpush3.bf16.msra.mxu0 %v20035_v29  ;;  %17981 = vmatpush3.bf16.msra.mxu1 %v20036_v30 }
  0xfa   :  { %17982 = vmatprep.subr.bf16.mxu1 %v20441_v0  ;;  %17988 = vmatprep.subr.bf16.mxu0 %v20441_v0 }
  0xfb   :  { %17984 = vmatprep.mubr.msk.bf16.mxu1 %vm20442_vm1, %v20441_v0 }
  0xfc   :  { %17977 = vmatmul.mubr.msk.bf16.vlgmr.msra.gmra.mxu0 %vm323_vm3, %v20641_v25 }
  0xfd   :  { %17983 = vmatpush3.bf16.msra.mxu1 %v20037_v31  ;;  %17989 = vmatpush3.bf16.msra.mxu0 %v20036_v30 }
  0xfe   :  { %17990 = vmatprep.subr.bf16.mxu0 %v20441_v0  ;;  %17996 = vmatprep.subr.bf16.mxu1 %v20441_v0 }
  0xff   :  { %17992 = vmatprep.mubr.msk.bf16.mxu0 %vm20442_vm1, %v20441_v0 }
 0x100   :  { %17985 = vmatmul.mubr.msk.bf16.vlgmr.msra.gmra.mxu1 %vm323_vm3, %v20628_v20 }
 0x101   :  { %17991 = vmatpush3.bf16.msra.mxu0 %v20037_v31  ;;  %17997 = vmatpush3.bf16.msra.mxu1 %v20038_v32 }
 0x102   :  { %17998 = vmatprep.subr.bf16.mxu1 %v20441_v0  ;;  %18004 = vmatprep.subr.bf16.mxu0 %v20441_v0 }
 0x103   :  { %18000 = vmatprep.mubr.msk.bf16.mxu1 %vm20442_vm1, %v20441_v0 }
 0x104   :  { %17993 = vmatmul.mubr.msk.bf16.vlgmr.msra.gmra.mxu0 %vm323_vm3, %v20641_v25 }
 0x105   :  { %17999 = vmatpush3.bf16.msra.mxu1 %v20039_v33  ;;  %18005 = vmatpush3.bf16.msra.mxu0 %v20038_v32  ;;  %v16386_v32 = vld [vmem:[%s23951_s6 + $0x5] ss:$0 sm:$0xff] }
 0x106   :  { %18006 = vmatprep.subr.bf16.mxu0 %v20441_v0  ;;  %18012 = vmatprep.subr.bf16.mxu1 %v20441_v0 }
 0x107   :  { %18008 = vmatprep.mubr.msk.bf16.mxu0 %vm20442_vm1, %v20441_v0 }
 0x108   :  { %18001 = vmatmul.mubr.msk.bf16.vlgmr.msra.gmra.mxu1 %vm323_vm3, %v20628_v20 }
 0x109   :  { %18007 = vmatpush3.bf16.msra.mxu0 %v20039_v33  ;;  %18013 = vmatpush3.bf16.msra.mxu1 %v20040_v34 }
 0x10a   :  { %18014 = vmatprep.subr.bf16.mxu1 %v20441_v0  ;;  %18020 = vmatprep.subr.bf16.mxu0 %v20441_v0 }
 0x10b   :  { %18016 = vmatprep.mubr.msk.bf16.mxu1 %vm20442_vm1, %v20441_v0 }
 0x10c   :  { %18009 = vmatmul.mubr.msk.bf16.vlgmr.msra.gmra.mxu0 %vm323_vm3, %v20641_v25 }
 0x10d   :  { %18015 = vmatpush3.bf16.msra.mxu1 %v20041_v35  ;;  %18021 = vmatpush3.bf16.msra.mxu0 %v20040_v34 }
 0x10e   :  { %18022 = vmatprep.subr.bf16.mxu0 %v20441_v0  ;;  %18028 = vmatprep.subr.bf16.mxu1 %v20441_v0 }
 0x10f   :  { %18024 = vmatprep.mubr.msk.bf16.mxu0 %vm20442_vm1, %v20441_v0 }
 0x110   :  { %18017 = vmatmul.mubr.msk.bf16.vlgmr.msra.gmra.mxu1 %vm323_vm3, %v20628_v20 }
 0x111   :  { %18023 = vmatpush3.bf16.msra.mxu0 %v20041_v35  ;;  %18029 = vmatpush3.bf16.msra.mxu1 %v20042_v36 }
 0x112   :  { %18030 = vmatprep.subr.bf16.mxu1 %v20441_v0  ;;  %18036 = vmatprep.subr.bf16.mxu0 %v20441_v0 }
 0x113   :  { %18032 = vmatprep.mubr.msk.bf16.mxu1 %vm20442_vm1, %v20441_v0 }
 0x114   :  { %18025 = vmatmul.mubr.msk.bf16.vlgmr.msra.gmra.mxu0 %vm323_vm3, %v20641_v25 }
 0x115   :  { %18031 = vmatpush3.bf16.msra.mxu1 %v20043_v37  ;;  %18037 = vmatpush3.bf16.msra.mxu0 %v20042_v36 }
 0x116   :  { %18038 = vmatprep.subr.bf16.mxu0 %v20441_v0  ;;  %18044 = vmatprep.subr.bf16.mxu1 %v20441_v0 }
 0x117   :  { %18040 = vmatprep.mubr.msk.bf16.mxu0 %vm20442_vm1, %v20441_v0 }
 0x118   :  { %18033 = vmatmul.mubr.msk.bf16.vlgmr.msra.gmra.mxu1 %vm323_vm3, %v20628_v20 }
 0x119   :  { %18039 = vmatpush3.bf16.msra.mxu0 %v20043_v37  ;;  %18045 = vmatpush3.bf16.msra.mxu1 %v20044_v38 }
 0x11a   :  { %18046 = vmatprep.subr.bf16.mxu1 %v20441_v0  ;;  %18052 = vmatprep.subr.bf16.mxu0 %v20441_v0 }
 0x11b   :  { %18048 = vmatprep.mubr.msk.bf16.mxu1 %vm20442_vm1, %v20441_v0 }
 0x11c   :  { %18041 = vmatmul.mubr.msk.bf16.vlgmr.msra.gmra.mxu0 %vm323_vm3, %v20641_v25 }
 0x11d   :  { %18047 = vmatpush3.bf16.msra.mxu1 %v20045_v39  ;;  %18053 = vmatpush3.bf16.msra.mxu0 %v20044_v38 }
 0x11e   :  { %18054 = vmatprep.subr.bf16.mxu0 %v20441_v0  ;;  %18060 = vmatprep.subr.bf16.mxu1 %v20441_v0 }
 0x11f   :  { %18056 = vmatprep.mubr.msk.bf16.mxu0 %vm20442_vm1, %v20441_v0 }
 0x120   :  { %18049 = vmatmul.mubr.msk.bf16.vlgmr.msra.gmra.mxu1 %vm323_vm3, %v20628_v20 }
 0x121   :  { %18055 = vmatpush3.bf16.msra.mxu0 %v20045_v39  ;;  %18061 = vmatpush3.bf16.msra.mxu1 %v20046_v40 }
 0x122   :  { %18062 = vmatprep.subr.bf16.mxu1 %v20441_v0  ;;  %18068 = vmatprep.subr.bf16.mxu0 %v20441_v0 }
 0x123   :  { %18064 = vmatprep.mubr.msk.bf16.mxu1 %vm20442_vm1, %v20441_v0 }
 0x124   :  { %18057 = vmatmul.mubr.msk.bf16.vlgmr.msra.gmra.mxu0 %vm323_vm3, %v20641_v25 }
 0x125   :  { %18063 = vmatpush3.bf16.msra.mxu1 %v20047_v41  ;;  %18069 = vmatpush3.bf16.msra.mxu0 %v20046_v40 }
 0x126   :  { %18070 = vmatprep.subr.bf16.mxu0 %v20441_v0  ;;  %18076 = vmatprep.subr.bf16.mxu1 %v20441_v0 }
 0x127   :  { %18072 = vmatprep.mubr.msk.bf16.mxu0 %vm20442_vm1, %v20441_v0 }
 0x128   :  { %18065 = vmatmul.mubr.msk.bf16.vlgmr.msra.gmra.mxu1 %vm323_vm3, %v20628_v20 }
 0x129   :  { %18071 = vmatpush3.bf16.msra.mxu0 %v20047_v41  ;;  %18077 = vmatpush3.bf16.msra.mxu1 %v20048_v42 }
 0x12a   :  { %18078 = vmatprep.subr.bf16.mxu1 %v20441_v0  ;;  %18084 = vmatprep.subr.bf16.mxu0 %v20441_v0 }
 0x12b   :  { %18080 = vmatprep.mubr.msk.bf16.mxu1 %vm20442_vm1, %v20441_v0 }
 0x12c   :  { %18073 = vmatmul.mubr.msk.bf16.vlgmr.msra.gmra.mxu0 %vm323_vm3, %v20641_v25 }
 0x12d   :  { %18079 = vmatpush3.bf16.msra.mxu1 %v20049_v43  ;;  %18085 = vmatpush3.bf16.msra.mxu0 %v20048_v42 }
 0x12e   :  { %18086 = vmatprep.subr.bf16.mxu0 %v20441_v0  ;;  %18092 = vmatprep.subr.bf16.mxu1 %v20441_v0 }
 0x12f   :  { %18088 = vmatprep.mubr.msk.bf16.mxu0 %vm20442_vm1, %v20441_v0 }
 0x130   :  { %18081 = vmatmul.mubr.msk.bf16.vlgmr.msra.gmra.mxu1 %vm323_vm3, %v20628_v20 }
 0x131   :  { %18087 = vmatpush3.bf16.msra.mxu0 %v20049_v43  ;;  %18093 = vmatpush3.bf16.msra.mxu1 %v20050_v44 }
 0x132   :  { %18094 = vmatprep.subr.bf16.mxu1 %v20441_v0  ;;  %18100 = vmatprep.subr.bf16.mxu0 %v20441_v0 }
 0x133   :  { %18096 = vmatprep.mubr.msk.bf16.mxu1 %vm20442_vm1, %v20441_v0 }
 0x134   :  { %18089 = vmatmul.mubr.msk.bf16.vlgmr.msra.gmra.mxu0 %vm323_vm3, %v20641_v25 }
 0x135   :  { %18095 = vmatpush3.bf16.msra.mxu1 %v20051_v45  ;;  %18101 = vmatpush3.bf16.msra.mxu0 %v20050_v44  ;;  %v16382_v44 = vld [vmem:[%s23951_s6 + $0x1] ss:$0 sm:$0xff] }
 0x136   :  { %18102 = vmatprep.subr.bf16.mxu0 %v20441_v0  ;;  %18104 = vmatprep.mubr.msk.bf16.mxu0 %vm20442_vm1, %v20441_v0 }
 0x137   :  { %18108 = vmatprep.subr.bf16.mxu1 %v20441_v0 }
 0x138   :  { %18097 = vmatmul.mubr.msk.bf16.vlgmr.msra.gmra.mxu1 %vm323_vm3, %v20628_v20 }
 0x139   :  { %18103 = vmatpush3.bf16.msra.mxu0 %v20051_v45  ;;  %18110 = vmatprep.mubr.msk.bf16.mxu1 %vm20442_vm1, %v20441_v0 }
 0x13a   :  { %18114 = vmatprep.subr.bf16.mxu0 %v20441_v0 }
 0x13c   :  { %18105 = vmatmul.mubr.msk.bf16.vlgmr.msra.gmra.mxu0 %vm323_vm3, %v20641_v25  ;;  %v16381_v25 = vld [vmem:[%s23951_s6] ss:$0 sm:$0xff] }
 0x13d   :  { %18116 = vmatprep.mubr.msk.bf16.mxu0 %vm20442_vm1, %v20441_v0 }
 0x1a0   :  { %v361_v46 = vpop.f32.mrf.mxu1 }
 0x1a1   :  { %v362_v33 = vadd.f32 %v16381_v25, %v361_v46 }
 0x1a2   :  { %v17922_v47 = vpop.f32.mrf.mxu1 }
 0x1a3   :  { %v1422_v41 = vpack.c.bf16 %v362_v33, %v362_v33 }
 0x1a4   :  { %v364_v48 = vpop.f32.mrf.mxu1  ;;  %v404_v49 = vpop.f32.mrf.mxu0 }
 0x1a5   :  { %v405_v42 = vadd.f32 %v16381_v25, %v404_v49  ;;  %v16387_v49 = vld [vmem:[%s23951_s6 + $0x6] ss:$0 sm:$0xff] }
 0x1a6   :  { %v17923_v50 = vpop.f32.mrf.mxu1  ;;  %v17930_v51 = vpop.f32.mrf.mxu0 }
 0x1a8   :  { %v407_v52 = vpop.f32.mrf.mxu0  ;;  %v20839_v53 = vpop.f32.mrf.mxu1 }
 0x1a9   :  { %v1423_v52 = vpack.c.bf16 %v405_v42, %v405_v42 }
 0x1aa   :  { %v17931_v54 = vpop.f32.mrf.mxu0  ;;  %v17938_v55 = vpop.f32.mrf.mxu1 }
 0x1ab   :  { %v457_v54 = vadd.f32 %v16382_v44, %v20839_v53 }
 0x1ac   :  { %v459_v56 = vpop.f32.mrf.mxu1  ;;  %v20841_v57 = vpop.f32.mrf.mxu0 }
 0x1ae   :  { %v17939_v58 = vpop.f32.mrf.mxu1  ;;  %v17946_v59 = vpop.f32.mrf.mxu0 }
 0x1b0   :  { %v499_v60 = vpop.f32.mrf.mxu0  ;;  %v20843_v61 = vpop.f32.mrf.mxu1 }
 0x1b2   :  { %v17947_v62 = vpop.f32.mrf.mxu0  ;;  %v17954_v63 = vpop.f32.mrf.mxu1 }
 0x1b4   :  { %v551_v1 = vpop.f32.mrf.mxu1  ;;  %v20845_v2 = vpop.f32.mrf.mxu0 }
 0x1b5   :  { %v1424_v1 = vpack.c.bf16 %v457_v54, %v457_v54 }
 0x1b6   :  { %v17955_v3 = vpop.f32.mrf.mxu1  ;;  %v17962_v4 = vpop.f32.mrf.mxu0 }
 0x1b7   :  { %v497_v3 = vadd.f32 %v16382_v44, %v20841_v57  ;;  %v16383_v4 = vld [vmem:[%s23951_s6 + $0x2] ss:$0 sm:$0xff]  ;;  %v16388_v57 = vld [vmem:[%s23951_s6 + $0x7] ss:$0 sm:$0xff] }
 0x1b8   :  { %v591_v5 = vpop.f32.mrf.mxu0  ;;  %v20847_v6 = vpop.f32.mrf.mxu1 }
 0x1ba   :  { %v17963_v7 = vpop.f32.mrf.mxu0  ;;  %v17970_v11 = vpop.f32.mrf.mxu1 }
 0x1bc   :  { %v643_v12 = vpop.f32.mrf.mxu1  ;;  %v20849_v13 = vpop.f32.mrf.mxu0 }
 0x1be   :  { %v17971_v14 = vpop.f32.mrf.mxu1  ;;  %v17978_v15 = vpop.f32.mrf.mxu0 }
 0x1c0   :  { %v683_v18 = vpop.f32.mrf.mxu0  ;;  %v732_v19 = vpop.f32.mrf.mxu1 }
 0x1c1   :  { %v733_v20 = vadd.f32 %v16385_v16, %v732_v19  ;;  %v549_v18 = vadd.f32 %v16383_v4, %v20843_v61 }
 0x1c2   :  { %v17979_v21 = vpop.f32.mrf.mxu0  ;;  %v17986_v22 = vpop.f32.mrf.mxu1 }
 0x1c3   :  { %v1430_v24 = vpack.c.bf16 %v733_v20, %v733_v20 }
 0x1c4   :  { %v735_v26 = vpop.f32.mrf.mxu1  ;;  %v772_v27 = vpop.f32.mrf.mxu0 }
 0x1c5   :  { %v1443_v28 = vsel %vm1438_vm4, %v1430_v24, 0  ;;  %v773_v29 = vadd.f32 %v16385_v16, %v772_v27  ;;  %v1425_v16 = vpack.c.bf16 %v497_v3, %v497_v3  ;;  %v1426_v27 = vpack.c.bf16 %v549_v18, %v549_v18 }
 0x1c6   :  { %v17987_v30 = vpop.f32.mrf.mxu1  ;;  %v17994_v31 = vpop.f32.mrf.mxu0  ;;  %18109 = vmatpush3.bf16.xpose.msra.mxu1 %v1443_v28  ;;  %v589_v28 = vadd.f32 %v16383_v4, %v20845_v2  ;;  %v16389_v2 = vld [vmem:[%s23951_s6 + $0x8] ss:$0 sm:$0xff] }
 0x1c7   :  { %v1431_v34 = vpack.c.bf16 %v773_v29, %v773_v29  ;;  %18120 = vmatprep.subr.bf16.mxu1 %v20441_v0  ;;  %v16384_v29 = vld [vmem:[%s23951_s6 + $0x3] ss:$0 sm:$0xff] }
 0x1c8   :  { %v775_v35 = vpop.f32.mrf.mxu0  ;;  %v824_v36 = vpop.f32.mrf.mxu1 }
 0x1c9   :  { %v1489_v37 = vsel %vm1438_vm4, %v1431_v34, 0  ;;  %v825_v38 = vadd.f32 %v16386_v32, %v824_v36  ;;  %v1427_v36 = vpack.c.bf16 %v589_v28, %v589_v28  ;;  %v16449_v28 = vld [vmem:[%s23952_s8] ss:$0 sm:$0xff] }
 0x1ca   :  { %v17995_v39 = vpop.f32.mrf.mxu0  ;;  %v18002_v40 = vpop.f32.mrf.mxu1  ;;  %18115 = vmatpush3.bf16.xpose.msra.mxu0 %v1489_v37  ;;  %v641_v37 = vadd.f32 %v16384_v29, %v20847_v6  ;;  %v681_v6 = vadd.f32 %v16384_v29, %v20849_v13 }
 0x1cb   :  { %v1432_v43 = vpack.c.bf16 %v825_v38, %v825_v38  ;;  %18126 = vmatprep.subr.bf16.mxu0 %v20441_v0 }
 0x1cc   :  { %v827_v45 = vpop.f32.mrf.mxu1  ;;  %v864_v46 = vpop.f32.mrf.mxu0  ;;  %v1429_v54 = vpack.c.bf16 %v681_v6, %v681_v6 }
 0x1cd   :  { %v1535_v47 = vsel %vm1438_vm4, %v1432_v43, 0  ;;  %v865_v48 = vadd.f32 %v16386_v32, %v864_v46  ;;  %18111 = vmatmul.mubr.msk.bf16.vlgmr.msra.gmra.mxu1 %vm1438_vm4, %v1422_v41  ;;  %v1428_v45 = vpack.c.bf16 %v641_v37, %v641_v37 }
 0x1ce   :  { %v18003_v50 = vpop.f32.mrf.mxu1  ;;  %v18010_v51 = vpop.f32.mrf.mxu0  ;;  %18121 = vmatpush3.bf16.xpose.msra.mxu1 %v1535_v47  ;;  %18122 = vmatprep.mubr.msk.bf16.mxu1 %vm20442_vm1, %v20441_v0 }
 0x1cf   :  { %v1433_v55 = vpack.c.bf16 %v865_v48, %v865_v48  ;;  %18132 = vmatprep.subr.bf16.mxu1 %v20441_v0 }
 0x1d0   :  { %v867_v56 = vpop.f32.mrf.mxu0  ;;  %v916_v58 = vpop.f32.mrf.mxu1 }
 0x1d1   :  { %v1581_v59 = vsel %vm1438_vm4, %v1433_v55, 0  ;;  %v917_v60 = vadd.f32 %v16387_v49, %v916_v58  ;;  %18117 = vmatmul.mubr.msk.bf16.vlgmr.msra.gmra.mxu0 %vm1438_vm4, %v1423_v52 }
 0x1d2   :  { %v18011_v62 = vpop.f32.mrf.mxu0  ;;  %v18018_v63 = vpop.f32.mrf.mxu1  ;;  %18127 = vmatpush3.bf16.xpose.msra.mxu0 %v1581_v59  ;;  %18128 = vmatprep.mubr.msk.bf16.mxu0 %vm20442_vm1, %v20441_v0 }
 0x1d3   :  { %v1434_v53 = vpack.c.bf16 %v917_v60, %v917_v60  ;;  %18138 = vmatprep.subr.bf16.mxu0 %v20441_v0 }
 0x1d4   :  { %v919_v5 = vpop.f32.mrf.mxu1  ;;  %v956_v7 = vpop.f32.mrf.mxu0 }
 0x1d5   :  { %v1627_v11 = vsel %vm1438_vm4, %v1434_v53, 0  ;;  %v957_v12 = vadd.f32 %v16387_v49, %v956_v7  ;;  %18123 = vmatmul.mubr.msk.bf16.vlgmr.msra.gmra.mxu1 %vm1438_vm4, %v1424_v1 }
 0x1d6   :  { %v18019_v14 = vpop.f32.mrf.mxu1  ;;  %v18026_v15 = vpop.f32.mrf.mxu0  ;;  %18133 = vmatpush3.bf16.xpose.msra.mxu1 %v1627_v11  ;;  %18134 = vmatprep.mubr.msk.bf16.mxu1 %vm20442_vm1, %v20441_v0 }
 0x1d7   :  { %v1435_v19 = vpack.c.bf16 %v957_v12, %v957_v12  ;;  %18144 = vmatprep.subr.bf16.mxu1 %v20441_v0 }
 0x1d8   :  { %v959_v20 = vpop.f32.mrf.mxu0  ;;  %v1008_v21 = vpop.f32.mrf.mxu1 }
 0x1d9   :  { %v1673_v22 = vsel %vm1438_vm4, %v1435_v19, 0  ;;  %v1009_v24 = vadd.f32 %v16388_v57, %v1008_v21  ;;  %18129 = vmatmul.mubr.msk.bf16.vlgmr.msra.gmra.mxu0 %vm1438_vm4, %v1425_v16 }
 0x1da   :  { %v18027_v25 = vpop.f32.mrf.mxu0  ;;  %v18034_v26 = vpop.f32.mrf.mxu1  ;;  %18139 = vmatpush3.bf16.xpose.msra.mxu0 %v1673_v22  ;;  %18140 = vmatprep.mubr.msk.bf16.mxu0 %vm20442_vm1, %v20441_v0 }
 0x1db   :  { %v1436_v61 = vpack.c.bf16 %v1009_v24, %v1009_v24  ;;  %18150 = vmatprep.subr.bf16.mxu0 %v20441_v0 }
 0x1dc   :  { %v1011_v30 = vpop.f32.mrf.mxu1  ;;  %v1048_v31 = vpop.f32.mrf.mxu0 }
 0x1dd   :  { %v1719_v32 = vsel %vm1438_vm4, %v1436_v61, 0  ;;  %v1049_v33 = vadd.f32 %v16388_v57, %v1048_v31  ;;  %18135 = vmatmul.mubr.msk.bf16.vlgmr.msra.gmra.mxu1 %vm1438_vm4, %v1426_v27 }
 0x1de   :  { %v18035_v34 = vpop.f32.mrf.mxu1  ;;  %v18042_v35 = vpop.f32.mrf.mxu0  ;;  %18145 = vmatpush3.bf16.xpose.msra.mxu1 %v1719_v32  ;;  %18146 = vmatprep.mubr.msk.bf16.mxu1 %vm20442_vm1, %v20441_v0 }
 0x1df   :  { %v1437_v38 = vpack.c.bf16 %v1049_v33, %v1049_v33  ;;  %18156 = vmatprep.subr.bf16.mxu1 %v20441_v0  ;;  %v16450_v33 = vld [vmem:[%s23952_s8 + $0x1] ss:$0 sm:$0xff] }
 0x1e0   :  { %v1051_v39 = vpop.f32.mrf.mxu0  ;;  %v1100_v40 = vpop.f32.mrf.mxu1 }
 0x1e1   :  { %v1765_v41 = vsel %vm1438_vm4, %v1437_v38, 0  ;;  %v1101_v42 = vadd.f32 %v16389_v2, %v1100_v40  ;;  %18141 = vmatmul.mubr.msk.bf16.vlgmr.msra.gmra.mxu0 %vm1438_vm4, %v1427_v36 }
 0x1e2   :  { %v18043_v43 = vpop.f32.mrf.mxu0  ;;  %v18050_v44 = vpop.f32.mrf.mxu1  ;;  %18151 = vmatpush3.bf16.xpose.msra.mxu0 %v1765_v41  ;;  %18152 = vmatprep.mubr.msk.bf16.mxu0 %vm20442_vm1, %v20441_v0 }
 0x1e3   :  { %v1931_v46 = vpack.c.bf16 %v1101_v42, %v1101_v42  ;;  %18162 = vmatprep.subr.bf16.mxu0 %v20441_v0 }
 0x1e4   :  { %v1103_v47 = vpop.f32.mrf.mxu1  ;;  %v1140_v48 = vpop.f32.mrf.mxu0 }
 0x1e5   :  { %v1944_v50 = vsel %vm1942_vm5, %v1931_v46, 0  ;;  %v1141_v51 = vadd.f32 %v16389_v2, %v1140_v48  ;;  %18147 = vmatmul.mubr.msk.bf16.vlgmr.msra.gmra.mxu1 %vm1438_vm4, %v1428_v45 }
 0x1e6   :  { %v18051_v49 = vpop.f32.mrf.mxu1  ;;  %v18058_v52 = vpop.f32.mrf.mxu0  ;;  %18157 = vmatpush3.bf16.msra.mxu1 %v1944_v50  ;;  %18158 = vmatprep.mubr.msk.bf16.mxu1 %vm20442_vm1, %v20441_v0 }
 0x1e7   :  { %v1932_v55 = vpack.c.bf16 %v1141_v51, %v1141_v51  ;;  %18168 = vmatprep.subr.bf16.mxu1 %v20441_v0 }
 0x1e8   :  { %v1143_v13 = vpop.f32.mrf.mxu0  ;;  %v20923_v56 = vpop.f32.mrf.mxu1 }
 0x1e9   :  { %v1990_v58 = vsel %vm1942_vm5, %v1932_v55, 0  ;;  %18153 = vmatmul.mubr.msk.bf16.vlgmr.msra.gmra.mxu0 %vm1438_vm4, %v1429_v54 }
 0x1ea   :  { %v18059_v59 = vpop.f32.mrf.mxu0  ;;  %v18066_v60 = vpop.f32.mrf.mxu1  ;;  %18163 = vmatpush3.bf16.msra.mxu0 %v1990_v58  ;;  %18164 = vmatprep.mubr.msk.bf16.mxu0 %vm20442_vm1, %v20441_v0 }
 0x1eb   :  { %18174 = vmatprep.subr.bf16.mxu0 %v20441_v0 }
 0x1ec   :  { %v1195_v62 = vpop.f32.mrf.mxu1  ;;  %v20930_v63 = vpop.f32.mrf.mxu0 }
 0x1ee   :  { %v18067_v1 = vpop.f32.mrf.mxu1  ;;  %v18074_v3 = vpop.f32.mrf.mxu0 }
 0x1f0   :  { %v1235_v53 = vpop.f32.mrf.mxu0  ;;  %v20932_v4 = vpop.f32.mrf.mxu1 }
 0x1f2   :  { %v18075_v5 = vpop.f32.mrf.mxu0  ;;  %v18082_v7 = vpop.f32.mrf.mxu1 }
 0x1f4   :  { %v1287_v11 = vpop.f32.mrf.mxu1  ;;  %v20934_v12 = vpop.f32.mrf.mxu0 }
 0x1f6   :  { %v18083_v14 = vpop.f32.mrf.mxu1  ;;  %v18090_v15 = vpop.f32.mrf.mxu0 }
 0x1f8   :  { %v1327_v57 = vpop.f32.mrf.mxu0  ;;  %v20936_v16 = vpop.f32.mrf.mxu1 }
 0x1fa   :  { %v18091_v18 = vpop.f32.mrf.mxu0  ;;  %v18098_v19 = vpop.f32.mrf.mxu1 }
 0x1fc   :  { %v1379_v20 = vpop.f32.mrf.mxu1  ;;  %v20938_v21 = vpop.f32.mrf.mxu0 }
 0x1fe   :  { %v18099_v22 = vpop.f32.mrf.mxu1  ;;  %v18106_v24 = vpop.f32.mrf.mxu0 }
 0x200   :  { %v1419_v25 = vpop.f32.mrf.mxu0 }
 0x202   :  { %v18107_v26 = vpop.f32.mrf.mxu0 }
 0x28d   :  { %v1479_v27 = vpop.f32.mrf.mxu1 }
 0x28e   :  { %v1807_v61 = vmul.f32 0.35355338, %v1479_v27 }
 0x28f   :  { %v18112_v29 = vpop.f32.mrf.mxu1 }
 0x290   :  { %v20943_v30 = vadd.f32 %v16449_v28, %v1807_v61 }
 0x291   :  { %v1482_v31 = vpop.f32.mrf.mxu1  ;;  %v1525_v32 = vpop.f32.mrf.mxu0 }
 0x292   :  { %v1808_v34 = vmul.f32 0.35355338, %v1525_v32  ;;  %v1835_v35 = vsel %vm1438_vm4, %v20943_v30, -inf }
 0x293   :  { %1836 = vmax.xlane.f32.xlu0 %v1835_v35  ;;  %v18113_v2 = vpop.f32.mrf.mxu1  ;;  %v18118_v36 = vpop.f32.mrf.mxu0 }
 0x294   :  { %v1828_v37 = vadd.f32 %v16450_v33, %v1808_v34 }
 0x295   :  { %v1528_v38 = vpop.f32.mrf.mxu0  ;;  %v1571_v39 = vpop.f32.mrf.mxu1 }
 0x296   :  { %v1809_v40 = vmul.f32 0.35355338, %v1571_v39  ;;  %v1838_v41 = vsel %vm1438_vm4, %v1828_v37, -inf }
 0x297   :  { %v18124_v42 = vpop.f32.mrf.mxu1  ;;  %1839 = vmax.xlane.f32.xlu0 %v1838_v41  ;;  %v18119_v43 = vpop.f32.mrf.mxu0 }
 0x298   :  { %v1829_v44 = vadd.f32 %v16449_v28, %v1809_v40 }
 0x299   :  { %v1574_v45 = vpop.f32.mrf.mxu1  ;;  %v1617_v6 = vpop.f32.mrf.mxu0 }
 0x29a   :  { %v1810_v46 = vmul.f32 0.35355338, %v1617_v6  ;;  %v1841_v47 = vsel %vm1438_vm4, %v1829_v44, -inf }
 0x29b   :  { %1842 = vmax.xlane.f32.xlu1 %v1841_v47  ;;  %v18125_v48 = vpop.f32.mrf.mxu1  ;;  %v18130_v50 = vpop.f32.mrf.mxu0 }
 0x29c   :  { %v1830_v51 = vadd.f32 %v16450_v33, %v1810_v46 }
 0x29d   :  { %v1620_v49 = vpop.f32.mrf.mxu0  ;;  %v1663_v52 = vpop.f32.mrf.mxu1 }
 0x29e   :  { %v1811_v54 = vmul.f32 0.35355338, %v1663_v52  ;;  %v1844_v55 = vsel %vm1438_vm4, %v1830_v51, -inf }
 0x29f   :  { %v18136_v13 = vpop.f32.mrf.mxu1  ;;  %1845 = vmax.xlane.f32.xlu1 %v1844_v55  ;;  %v18131_v58 = vpop.f32.mrf.mxu0 }
 0x2a0   :  { %v1831_v59 = vadd.f32 %v16449_v28, %v1811_v54 }
 0x2a1   :  { %v1666_v60 = vpop.f32.mrf.mxu1  ;;  %v1709_v62 = vpop.f32.mrf.mxu0 }
 0x2a2   :  { %v1812_v1 = vmul.f32 0.35355338, %v1709_v62  ;;  %v1847_v3 = vsel %vm1438_vm4, %v1831_v59, -inf }
 0x2a3   :  { %v18137_v53 = vpop.f32.mrf.mxu1  ;;  %1848 = vmax.xlane.f32.xlu0 %v1847_v3  ;;  %v18142_v5 = vpop.f32.mrf.mxu0 }
 0x2a4   :  { %v1832_v7 = vadd.f32 %v16450_v33, %v1812_v1 }
 0x2a5   :  { %v1712_v11 = vpop.f32.mrf.mxu0  ;;  %v1755_v14 = vpop.f32.mrf.mxu1 }
 0x2a6   :  { %v1813_v15 = vmul.f32 0.35355338, %v1755_v14  ;;  %v1850_v57 = vsel %vm1438_vm4, %v1832_v7, -inf }
 0x2a7   :  { %v18148_v18 = vpop.f32.mrf.mxu1  ;;  %1851 = vmax.xlane.f32.xlu1 %v1850_v57  ;;  %v18143_v19 = vpop.f32.mrf.mxu0 }
 0x2a8   :  { %v1833_v20 = vadd.f32 %v16449_v28, %v1813_v15 }
 0x2a9   :  { %v1758_v22 = vpop.f32.mrf.mxu1  ;;  %v1801_v24 = vpop.f32.mrf.mxu0 }
 0x2aa   :  { %v1814_v25 = vmul.f32 0.35355338, %v1801_v24  ;;  %v1853_v26 = vsel %vm1438_vm4, %v1833_v20, -inf  ;;  %v16390_v22 = vld [vmem:[%s23951_s6 + $0x9] ss:$0 sm:$0xff] }
 0x2ab   :  { %v18149_v27 = vpop.f32.mrf.mxu1  ;;  %1854 = vmax.xlane.f32.xlu0 %v1853_v26  ;;  %v18154_v61 = vpop.f32.mrf.mxu0 }
 0x2ac   :  { %v1834_v29 = vadd.f32 %v16450_v33, %v1814_v25  ;;  %v1193_v25 = vadd.f32 %v16390_v22, %v20923_v56 }
 0x2ad   :  { %v1804_v31 = vpop.f32.mrf.mxu0 }
 0x2ae   :  { %v1856_v32 = vsel %vm1438_vm4, %v1834_v29, -inf  ;;  %v1933_v61 = vpack.c.bf16 %v1193_v25, %v1193_v25 }
 0x2af   :  { %1857 = vmax.xlane.f32.xlu1 %v1856_v32  ;;  %v18155_v34 = vpop.f32.mrf.mxu0  ;;  %v16391_v32 = vld [vmem:[%s23951_s6 + $0xa] ss:$0 sm:$0xff] }
 0x2b0   :  { %v1285_v56 = vadd.f32 %v16391_v32, %v20932_v4 }
 0x31c   :  { %v1837_v35 = vpop.xlane.xlu0 %1836 }
 0x31d   :  { %v1859_v2 = vsub.f32 %v20943_v30, %v1837_v35 }
 0x31f   :  { %v1867_v36 = vmul.f32 1.442695, %v1859_v2 }
 0x320   :  { %v1840_v38 = vpop.xlane.xlu0 %1839 }
 0x321   :  { %20198 = vpow2.f32 %v1867_v36  ;;  %v1860_v28 = vsub.f32 %v1828_v37, %v1840_v38  ;;  %v2036_v36 = vsel %vm1942_vm5, %v1933_v61, 0  ;;  %v235_v61 = vld [vmem:[%s23953_s12 + $0x8] sm:$0xf] }
 0x323   :  { %v1869_v39 = vmul.f32 1.442695, %v1860_v28 }
 0x324   :  { %v1843_v40 = vpop.xlane.xlu1 %1842 }
 0x325   :  { %20200 = vpow2.f32 %v1869_v39  ;;  %v1861_v41 = vsub.f32 %v1829_v44, %v1843_v40 }
 0x327   :  { %v1871_v42 = vmul.f32 1.442695, %v1861_v41 }
 0x328   :  { %v1846_v43 = vpop.xlane.xlu1 %1845 }
 0x329   :  { %20202 = vpow2.f32 %v1871_v42  ;;  %v1862_v33 = vsub.f32 %v1830_v51, %v1846_v43  ;;  %v1935_v42 = vpack.c.bf16 %v1285_v56, %v1285_v56  ;;  %v1325_v43 = vadd.f32 %v16391_v32, %v20934_v12 }
 0x32b   :  { %v1873_v45 = vmul.f32 1.442695, %v1862_v33  ;;  %v16392_v33 = vld [vmem:[%s23951_s6 + $0xb] ss:$0 sm:$0xff]  ;;  %v1936_v12 = vpack.c.bf16 %v1325_v43, %v1325_v43 }
 0x32c   :  { %v1849_v6 = vpop.xlane.xlu0 %1848 }
 0x32d   :  { %20204 = vpow2.f32 %v1873_v45  ;;  %v1863_v46 = vsub.f32 %v1831_v59, %v1849_v6 }
 0x32e   :  { %v20199_v47 = vpop.eup %20198 }
 0x32f   :  { %v1875_v48 = vmul.f32 1.442695, %v1863_v46  ;;  %v1883_v30 = vsel %vm1438_vm4, %v20199_v47, 0.0 }
 0x330   :  { %1884 = vadd.xlane.f32.xlu0 %v1883_v30  ;;  %v1852_v50 = vpop.xlane.xlu1 %1851 }
 0x331   :  { %20206 = vpow2.f32 %v1875_v48  ;;  %v1864_v37 = vsub.f32 %v1832_v7, %v1852_v50  ;;  %v1377_v48 = vadd.f32 %v16392_v33, %v20936_v16 }
 0x332   :  { %v20201_v49 = vpop.eup %20200 }
 0x333   :  { %v1877_v52 = vmul.f32 1.442695, %v1864_v37  ;;  %v1886_v44 = vsel %vm1438_vm4, %v20201_v49, 0.0 }
 0x334   :  { %v1855_v54 = vpop.xlane.xlu0 %1854  ;;  %1887 = vadd.xlane.f32.xlu1 %v1886_v44  ;;  %v1937_v44 = vpack.c.bf16 %v1377_v48, %v1377_v48 }
 0x335   :  { %20208 = vpow2.f32 %v1877_v52  ;;  %v1865_v51 = vsub.f32 %v1833_v20, %v1855_v54  ;;  %v2174_v52 = vsel %vm1942_vm5, %v1936_v12, 0  ;;  %v1417_v54 = vadd.f32 %v16392_v33, %v20938_v21 }
 0x336   :  { %v20203_v55 = vpop.eup %20202 }
 0x337   :  { %v1879_v13 = vmul.f32 1.442695, %v1865_v51  ;;  %v1889_v58 = vsel %vm1438_vm4, %v20203_v55, 0.0 }
 0x338   :  { %1890 = vadd.xlane.f32.xlu0 %v1889_v58  ;;  %v1858_v59 = vpop.xlane.xlu1 %1857  ;;  %v1938_v58 = vpack.c.bf16 %v1417_v54, %v1417_v54 }
 0x339   :  { %20210 = vpow2.f32 %v1879_v13  ;;  %v1866_v60 = vsub.f32 %v1834_v29, %v1858_v59  ;;  %v1233_v29 = vadd.f32 %v16390_v22, %v20930_v63  ;;  %v2220_v13 = vsel %vm1942_vm5, %v1937_v44, 0 }
 0x33a   :  { %v20961_v62 = vpop.eup %20204 }
 0x33b   :  { %v1881_v1 = vmul.f32 1.442695, %v1866_v60  ;;  %v1892_v3 = vsel %vm1438_vm4, %v20961_v62, 0.0  ;;  %v1934_v38 = vpack.c.bf16 %v1233_v29, %v1233_v29 }
 0x33c   :  { %1893 = vadd.xlane.f32.xlu1 %v1892_v3 }
 0x33d   :  { %20212 = vpow2.f32 %v1881_v1  ;;  %v2082_v41 = vsel %vm1942_vm5, %v1934_v38, 0 }
 0x33e   :  { %v20965_v53 = vpop.eup %20206 }
 0x33f   :  { %v1895_v5 = vsel %vm1438_vm4, %v20965_v53, 0.0 }
 0x340   :  { %1896 = vadd.xlane.f32.xlu0 %v1895_v5 }
 0x342   :  { %v20969_v7 = vpop.eup %20208 }
 0x343   :  { %v1898_v11 = vsel %vm1438_vm4, %v20969_v7, 0.0 }
 0x344   :  { %1899 = vadd.xlane.f32.xlu1 %v1898_v11  ;;  %v233_v11 = vld [vmem:[%s23953_s12] sm:$0xf] }
 0x346   :  { %v20973_v14 = vpop.eup %20210 }
 0x347   :  { %v1901_v15 = vsel %vm1438_vm4, %v20973_v14, 0.0 }
 0x348   :  { %1902 = vadd.xlane.f32.xlu0 %v1901_v15  ;;  %v234_v15 = vld [vmem:[%s23953_s12 + $0x4] sm:$0xf] }
 0x34a   :  { %v20977_v57 = vpop.eup %20212 }
 0x34b   :  { %v1904_v18 = vsel %vm1438_vm4, %v20977_v57, 0.0 }
 0x34c   :  { %1905 = vadd.xlane.f32.xlu1 %v1904_v18 }
 0x3b9   :  { %v1885_v19 = vpop.xlane.xlu0 %1884 }
 0x3ba   :  { %20214 = vrcp.f32 %v1885_v19  ;;  %v2409_v19 = vsel %vm1942_vm5, %v234_v15, 0 }
 0x3bd   :  { %v1888_v20 = vpop.xlane.xlu1 %1887 }
 0x3be   :  { %20216 = vrcp.f32 %v1888_v20 }
 0x3c1   :  { %v1891_v24 = vpop.xlane.xlu0 %1890 }
 0x3c2   :  { %20218 = vrcp.f32 %v1891_v24 }
 0x3c5   :  { %v1894_v26 = vpop.xlane.xlu1 %1893 }
 0x3c6   :  { %20220 = vrcp.f32 %v1894_v26 }
 0x3c7   :  { %v20215_v27 = vpop.eup %20214 }
 0x3c8   :  { %v1908_v31 = vmul.f32 %v20215_v27, %v20199_v47  ;;  %v2128_v47 = vsel %vm1942_vm5, %v1935_v42, 0 }
 0x3c9   :  { %v1897_v34 = vpop.xlane.xlu0 %1896 }
 0x3ca   :  { %20222 = vrcp.f32 %v1897_v34  ;;  %v1923_v35 = vpack.c.bf16 %v1908_v31, %v1908_v31  ;;  %v2498_v34 = vsel %vm1942_vm5, %v235_v61, 0 }
 0x3cb   :  { %v20217_v2 = vpop.eup %20216 }
 0x3cc   :  { %18159 = vmatmul.mubr.msk.bf16.vlgmr.msra.gmra.mxu1 %vm1438_vm4, %v1923_v35  ;;  %v1910_v28 = vmul.f32 %v20217_v2, %v20201_v49 }
 0x3cd   :  { %18169 = vmatpush3.bf16.msra.mxu1 %v2036_v36  ;;  %v1900_v39 = vpop.xlane.xlu1 %1899  ;;  %18170 = vmatprep.mubr.msk.bf16.mxu1 %vm20442_vm1, %v20441_v0 }
 0x3ce   :  { %20224 = vrcp.f32 %v1900_v39  ;;  %v1924_v63 = vpack.c.bf16 %v1910_v28, %v1910_v28  ;;  %18180 = vmatprep.subr.bf16.mxu1 %v20441_v0 }
 0x3cf   :  { %v20219_v40 = vpop.eup %20218 }
 0x3d0   :  { %18165 = vmatmul.mubr.msk.bf16.vlgmr.msra.gmra.mxu0 %vm1438_vm4, %v1924_v63  ;;  %v1912_v4 = vmul.f32 %v20219_v40, %v20203_v55  ;;  %v236_v63 = vld [vmem:[%s23953_s12 + $0xc] sm:$0xf] }
 0x3d1   :  { %18175 = vmatpush3.bf16.msra.mxu0 %v2082_v41  ;;  %v1903_v45 = vpop.xlane.xlu0 %1902  ;;  %18176 = vmatprep.mubr.msk.bf16.mxu0 %vm20442_vm1, %v20441_v0  ;;  %v2587_v43 = vsel %vm1942_vm5, %v236_v63, 0 }
 0x3d2   :  { %20226 = vrcp.f32 %v1903_v45  ;;  %v1925_v6 = vpack.c.bf16 %v1912_v4, %v1912_v4  ;;  %18186 = vmatprep.subr.bf16.mxu0 %v20441_v0 }
 0x3d3   :  { %v20221_v46 = vpop.eup %20220 }
 0x3d4   :  { %18171 = vmatmul.mubr.msk.bf16.vlgmr.msra.gmra.mxu1 %vm1438_vm4, %v1925_v6  ;;  %v1914_v30 = vmul.f32 %v20221_v46, %v20961_v62  ;;  %v2266_v62 = vsel %vm1942_vm5, %v1938_v58, 0 }
 0x3d5   :  { %18181 = vmatpush3.bf16.msra.mxu1 %v2128_v47  ;;  %v1906_v50 = vpop.xlane.xlu1 %1905  ;;  %18182 = vmatprep.mubr.msk.bf16.mxu1 %vm20442_vm1, %v20441_v0 }
 0x3d6   :  { %20228 = vrcp.f32 %v1906_v50  ;;  %v1926_v37 = vpack.c.bf16 %v1914_v30, %v1914_v30  ;;  %18192 = vmatprep.subr.bf16.mxu1 %v20441_v0 }
 0x3d7   :  { %v20223_v49 = vpop.eup %20222 }
 0x3d8   :  { %18177 = vmatmul.mubr.msk.bf16.vlgmr.msra.gmra.mxu0 %vm1438_vm4, %v1926_v37  ;;  %v1916_v16 = vmul.f32 %v20223_v49, %v20965_v53 }
 0x3d9   :  { %18187 = vmatpush3.bf16.msra.mxu0 %v2174_v52  ;;  %18188 = vmatprep.mubr.msk.bf16.mxu0 %vm20442_vm1, %v20441_v0 }
 0x3da   :  { %v1927_v51 = vpack.c.bf16 %v1916_v16, %v1916_v16  ;;  %18198 = vmatprep.subr.bf16.mxu0 %v20441_v0 }
 0x3db   :  { %v20225_v55 = vpop.eup %20224 }
 0x3dc   :  { %18183 = vmatmul.mubr.msk.bf16.vlgmr.msra.gmra.mxu1 %vm1438_vm4, %v1927_v51  ;;  %v1918_v59 = vmul.f32 %v20225_v55, %v20969_v7 }
 0x3dd   :  { %18193 = vmatpush3.bf16.msra.mxu1 %v2220_v13  ;;  %18194 = vmatprep.mubr.msk.bf16.mxu1 %vm20442_vm1, %v20441_v0 }
 0x3de   :  { %v1928_v21 = vpack.c.bf16 %v1918_v59, %v1918_v59  ;;  %18204 = vmatprep.subr.bf16.mxu1 %v20441_v0 }
 0x3df   :  { %v20227_v60 = vpop.eup %20226 }
 0x3e0   :  { %18189 = vmatmul.mubr.msk.bf16.vlgmr.msra.gmra.mxu0 %vm1438_vm4, %v1928_v21  ;;  %v1920_v1 = vmul.f32 %v20227_v60, %v20973_v14  ;;  %v2320_v14 = vsel %vm1942_vm5, %v233_v11, 0 }
 0x3e1   :  { %18199 = vmatpush3.bf16.msra.mxu0 %v2266_v62  ;;  %18200 = vmatprep.mubr.msk.bf16.mxu0 %vm20442_vm1, %v20441_v0 }
 0x3e2   :  { %v1929_v3 = vpack.c.bf16 %v1920_v1, %v1920_v1  ;;  %18210 = vmatprep.subr.bf16.mxu0 %v20441_v0 }
 0x3e3   :  { %v20229_v53 = vpop.eup %20228 }
 0x3e4   :  { %18195 = vmatmul.mubr.msk.bf16.vlgmr.msra.gmra.mxu1 %vm1438_vm4, %v1929_v3  ;;  %v1922_v5 = vmul.f32 %v20229_v53, %v20977_v57 }
 0x3e5   :  { %18206 = vmatprep.mubr.msk.bf16.mxu1 %vm20442_vm1, %v20441_v0  ;;  %18205 = vmatpush3.bf16.msra.mxu1 %v2320_v14 }
 0x3e6   :  { %v1930_v7 = vpack.c.bf16 %v1922_v5, %v1922_v5  ;;  %18216 = vmatprep.subr.bf16.mxu1 %v20441_v0 }
 0x3e8   :  { %18201 = vmatmul.mubr.msk.bf16.vlgmr.msra.gmra.mxu0 %vm1438_vm4, %v1930_v7 }
 0x3e9   :  { %18212 = vmatprep.mubr.msk.bf16.mxu0 %vm20442_vm1, %v20441_v0  ;;  %18211 = vmatpush3.bf16.msra.mxu0 %v2320_v14 }
 0x3ea   :  { %18222 = vmatprep.subr.bf16.mxu0 %v20441_v0 }
 0x48c   :  { %v1980_v57 = vpop.f32.mrf.mxu1 }
 0x48d   :  { %v2308_v18 = vpack.c.bf16 %v1980_v57, %v1980_v57 }
 0x48e   :  { %v18160_v20 = vpop.f32.mrf.mxu1 }
 0x48f   :  { %18207 = vmatmul.mubr.msk.bf16.vlgmr.msra.gmra.mxu1 %vm1438_vm4, %v2308_v18 }
 0x490   :  { %v1983_v22 = vpop.f32.mrf.mxu1  ;;  %v2026_v24 = vpop.f32.mrf.mxu0  ;;  %18217 = vmatpush3.bf16.msra.mxu1 %v2409_v19  ;;  %18218 = vmatprep.mubr.msk.bf16.mxu1 %vm20442_vm1, %v20441_v0 }
 0x491   :  { %v2309_v25 = vpack.c.bf16 %v2026_v24, %v2026_v24  ;;  %18228 = vmatprep.subr.bf16.mxu1 %v20441_v0 }
 0x492   :  { %v18161_v26 = vpop.f32.mrf.mxu1  ;;  %v18166_v27 = vpop.f32.mrf.mxu0 }
 0x493   :  { %18213 = vmatmul.mubr.msk.bf16.vlgmr.msra.gmra.mxu0 %vm1438_vm4, %v2309_v25 }
 0x494   :  { %v2029_v29 = vpop.f32.mrf.mxu0  ;;  %v2072_v31 = vpop.f32.mrf.mxu1  ;;  %18223 = vmatpush3.bf16.msra.mxu0 %v2409_v19  ;;  %18224 = vmatprep.mubr.msk.bf16.mxu0 %vm20442_vm1, %v20441_v0 }
 0x495   :  { %v2310_v32 = vpack.c.bf16 %v2072_v31, %v2072_v31  ;;  %18234 = vmatprep.subr.bf16.mxu0 %v20441_v0  ;;  %v21091_v29 = vld [vmem:[%s23954_s30] sm:$0x3f] }
 0x496   :  { %v18167_v35 = vpop.f32.mrf.mxu0  ;;  %v18172_v2 = vpop.f32.mrf.mxu1 }
 0x497   :  { %18219 = vmatmul.mubr.msk.bf16.vlgmr.msra.gmra.mxu1 %vm1438_vm4, %v2310_v32 }
 0x498   :  { %v2075_v36 = vpop.f32.mrf.mxu1  ;;  %v2118_v38 = vpop.f32.mrf.mxu0  ;;  %18229 = vmatpush3.bf16.msra.mxu1 %v2498_v34  ;;  %18230 = vmatprep.mubr.msk.bf16.mxu1 %vm20442_vm1, %v20441_v0 }
 0x499   :  { %v2311_v56 = vpack.c.bf16 %v2118_v38, %v2118_v38  ;;  %18240 = vmatprep.subr.bf16.mxu1 %v20441_v0 }
 0x49a   :  { %v18173_v28 = vpop.f32.mrf.mxu1  ;;  %v18178_v39 = vpop.f32.mrf.mxu0 }
 0x49b   :  { %18225 = vmatmul.mubr.msk.bf16.vlgmr.msra.gmra.mxu0 %vm1438_vm4, %v2311_v56  ;;  %v2689_v56 = vrot.slane %v21091_v29, %v20612_v10 }
 0x49c   :  { %v2121_v40 = vpop.f32.mrf.mxu0  ;;  %v2164_v41 = vpop.f32.mrf.mxu1  ;;  %18235 = vmatpush3.bf16.msra.mxu0 %v2498_v34  ;;  %18236 = vmatprep.mubr.msk.bf16.mxu0 %vm20442_vm1, %v20441_v0 }
 0x49d   :  { %v2312_v42 = vpack.c.bf16 %v2164_v41, %v2164_v41  ;;  %18246 = vmatprep.subr.bf16.mxu0 %v20441_v0 }
 0x49e   :  { %v18179_v4 = vpop.f32.mrf.mxu0  ;;  %v18184_v33 = vpop.f32.mrf.mxu1 }
 0x49f   :  { %18231 = vmatmul.mubr.msk.bf16.vlgmr.msra.gmra.mxu1 %vm1438_vm4, %v2312_v42 }
 0x4a0   :  { %v2167_v45 = vpop.f32.mrf.mxu1  ;;  %v2210_v6 = vpop.f32.mrf.mxu0  ;;  %18241 = vmatpush3.bf16.msra.mxu1 %v2587_v43  ;;  %18242 = vmatprep.mubr.msk.bf16.mxu1 %vm20442_vm1, %v20441_v0 }
 0x4a1   :  { %v2313_v46 = vpack.c.bf16 %v2210_v6, %v2210_v6  ;;  %18252 = vmatprep.subr.bf16.mxu1 %v20441_v0 }
 0x4a2   :  { %v18185_v47 = vpop.f32.mrf.mxu1  ;;  %v18190_v12 = vpop.f32.mrf.mxu0 }
 0x4a3   :  { %18237 = vmatmul.mubr.msk.bf16.vlgmr.msra.gmra.mxu0 %vm1438_vm4, %v2313_v46 }
 0x4a4   :  { %v2213_v48 = vpop.f32.mrf.mxu0  ;;  %v2256_v30 = vpop.f32.mrf.mxu1  ;;  %18247 = vmatpush3.bf16.msra.mxu0 %v2587_v43  ;;  %18248 = vmatprep.mubr.msk.bf16.mxu0 %vm20442_vm1, %v20441_v0 }
 0x4a5   :  { %v2314_v50 = vpack.c.bf16 %v2256_v30, %v2256_v30  ;;  %18260 = vmatprep.subr.bf16.mxu0 %v20441_v0 }
 0x4a6   :  { %v18191_v37 = vpop.f32.mrf.mxu0  ;;  %v18196_v49 = vpop.f32.mrf.mxu1 }
 0x4a7   :  { %18243 = vmatmul.mubr.msk.bf16.vlgmr.msra.gmra.mxu1 %vm1438_vm4, %v2314_v50 }
 0x4a8   :  { %v2259_v52 = vpop.f32.mrf.mxu1  ;;  %v2302_v44 = vpop.f32.mrf.mxu0  ;;  %18256 = vmatprep.mubr.msk.bf16.mxu1 %vm20442_vm1, %v20441_v0 }
 0x4a9   :  { %v2315_v54 = vpack.c.bf16 %v2302_v44, %v2302_v44 }
 0x4aa   :  { %v18197_v16 = vpop.f32.mrf.mxu1  ;;  %v18202_v51 = vpop.f32.mrf.mxu0 }
 0x4ab   :  { %18249 = vmatmul.mubr.msk.bf16.vlgmr.msra.gmra.mxu0 %vm1438_vm4, %v2315_v54 }
 0x4ac   :  { %v2305_v55 = vpop.f32.mrf.mxu0  ;;  %18268 = vmatprep.mubr.msk.bf16.mxu0 %vm20442_vm1, %v20441_v0 }
 0x4ae   :  { %v18203_v13 = vpop.f32.mrf.mxu0 }
 0x54f   :  { %v2356_v58 = vpop.f32.mrf.mxu1 }
 0x550   :  { %v2672_v27 = vsel %vm323_vm3, %v2356_v58, 0.0 }
 0x551   :  { %v18208_v59 = vpop.f32.mrf.mxu1 }
 0x553   :  { %v2359_v21 = vpop.f32.mrf.mxu1  ;;  %v2399_v60 = vpop.f32.mrf.mxu0 }
 0x554   :  { %v2679_v28 = vsel %vm323_vm3, %v2399_v60, 0.0 }
 0x555   :  { %v18209_v62 = vpop.f32.mrf.mxu1  ;;  %v18214_v1 = vpop.f32.mrf.mxu0 }
 0x556   :  { %v20053_v1 = vld [vmem:[%s23955_s9] sm:$0xff]  }
 0x557   :  { %v2402_v3 = vpop.f32.mrf.mxu0  ;;  %v2445_v53 = vpop.f32.mrf.mxu1 }
 0x558   :  { %v2673_v24 = vsel %vm323_vm3, %v2445_v53, 0.0  ;;  %v20054_v3 = vld [vmem:[%s23956_s10 + $0x18] sm:$0xff]  }
 0x559   :  { %v18215_v5 = vpop.f32.mrf.mxu0  ;;  %v18220_v7 = vpop.f32.mrf.mxu1  ;;  %v2674_v31 = vadd.f32 %v2673_v24, %v2672_v27  ;;  %18261 = vmatpush3.bf16.msra.mxu0 %v20054_v3 }
 0x55a   :  { %18262 = vmatprep.subr.bf16.mxu0 %v20441_v0 }
 0x55b   :  { %v2448_v11 = vpop.f32.mrf.mxu1  ;;  %v2488_v14 = vpop.f32.mrf.mxu0 }
 0x55c   :  { %v2680_v35 = vsel %vm323_vm3, %v2488_v14, 0.0 }
 0x55d   :  { %v18221_v15 = vpop.f32.mrf.mxu1  ;;  %v18226_v57 = vpop.f32.mrf.mxu0  ;;  %v2681_v40 = vadd.f32 %v2680_v35, %v2679_v28  ;;  %v20055_v35 = vld [vmem:[%s23956_s10 + $0x10] sm:$0xff]  }
 0x55e   :  { %v21119_v57 = vsub.s32 1, %v20609_v9  ;;  %18263 = vmatpush3.bf16.msra.mxu0 %v20055_v35 }
 0x55f   :  { %v2491_v18 = vpop.f32.mrf.mxu0  ;;  %v2534_v19 = vpop.f32.mrf.mxu1  ;;  %18264 = vmatprep.subr.bf16.mxu0 %v20441_v0 }
 0x560   :  { %v2675_v61 = vsel %vm323_vm3, %v2534_v19, 0.0 }
 0x561   :  { %v18227_v20 = vpop.f32.mrf.mxu0  ;;  %v18232_v22 = vpop.f32.mrf.mxu1  ;;  %v2676_v2 = vadd.f32 %v2675_v61, %v2674_v31 }
 0x562   :  { %v2724_v20 = vrot.slane %v21091_v29, %v21119_v57  ;;  %v21124_v22 = vsub.s32 2, %v20609_v9 }
 0x563   :  { %v2537_v25 = vpop.f32.mrf.mxu1  ;;  %v2577_v26 = vpop.f32.mrf.mxu0 }
 0x564   :  { %v2682_v39 = vsel %vm323_vm3, %v2577_v26, 0.0  ;;  %v2730_v27 = vrot.slane %v21091_v29, %v21124_v22 }
 0x565   :  { %v18233_v32 = vpop.f32.mrf.mxu1  ;;  %v18238_v34 = vpop.f32.mrf.mxu0  ;;  %v2683_v4 = vadd.f32 %v2682_v39, %v2681_v40 }
 0x567   :  { %v2580_v36 = vpop.f32.mrf.mxu0  ;;  %v2623_v38 = vpop.f32.mrf.mxu1 }
 0x568   :  { %v2677_v63 = vsel %vm323_vm3, %v2623_v38, 0.0  ;;  %v20057_v36 = vld [vmem:[%s23956_s10] sm:$0xff]  }
 0x569   :  { %v2678_v41 = vadd.f32 %v2677_v63, %v2676_v2  ;;  %v18239_v42 = vpop.f32.mrf.mxu0  ;;  %v18244_v43 = vpop.f32.mrf.mxu1  ;;  %v20056_v2 = vld [vmem:[%s23956_s10 + $0x8] sm:$0xff]   ;;  %v16467_v38 = vld [vmem:[%s23906_s11] ss:$0 sm:$0xff] }
 0x56a   :  { %18265 = vmatpush3.bf16.msra.mxu0 %v20056_v2 }
 0x56b   :  { %v2690_v33 = vadd.f32 %v2689_v56, %v2678_v41  ;;  %v2626_v45 = vpop.f32.mrf.mxu1  ;;  %v2666_v6 = vpop.f32.mrf.mxu0  ;;  %18266 = vmatprep.subr.bf16.mxu0 %v20441_v0 }
 0x56c   :  { %v2684_v46 = vsel %vm323_vm3, %v2666_v6, 0.0 }
 0x56d   :  { %v2685_v47 = vadd.f32 %v2684_v46, %v2683_v4  ;;  %v18245_v12 = vpop.f32.mrf.mxu1  ;;  %v18250_v48 = vpop.f32.mrf.mxu0  ;;  %v2692_v30 = vadd.f32 %v2690_v33, %v20621_v17  ;;  %v21150_v33 = vsub.s32 3, %v20609_v9 }
 0x56e   :  { %18267 = vmatpush3.bf16.msra.mxu0 %v20057_v36  ;;  %v20064_v36 = vld [vmem:[%s23948_s7 + $0xf8] sm:$0xff]  }
 0x56f   :  { %v2691_v50 = vadd.f32 %v2689_v56, %v2685_v47  ;;  %v2669_v37 = vpop.f32.mrf.mxu0  ;;  %v2694_v49 = vsel %vm323_vm3, %v2692_v30, 0.0  ;;  %18288 = vmatprep.subr.bf16.mxu0 %v20441_v0  ;;  %v2815_v45 = vrot.slane %v21091_v29, %v21150_v33 }
 0x570   :  { %2695 = vadd.xlane.f32.xlu0 %v2694_v49 }
 0x571   :  { %v18251_v52 = vpop.f32.mrf.mxu0  ;;  %v2693_v44 = vadd.f32 %v2691_v50, %v20630_v23  ;;  %v20052_v23 = vld [vmem:[%s23955_s9 + $0x8] sm:$0xff]  }
 0x572   :  { %18253 = vmatpush3.bf16.msra.mxu1 %v20052_v23  ;;  %v20060_v23 = vld [vmem:[%s23948_s7 + $0xc0] sm:$0xff]  }
 0x573   :  { %v2697_v54 = vsel %vm323_vm3, %v2693_v44, 0.0  ;;  %18254 = vmatprep.subr.bf16.mxu1 %v20441_v0 }
 0x574   :  { %2698 = vadd.xlane.f32.xlu1 %v2697_v54 }
 0x576   :  { %18255 = vmatpush3.bf16.msra.mxu1 %v20053_v1  ;;  %v20061_v1 = vld [vmem:[%s23948_s7 + $0xd0] sm:$0xff]  }
 0x577   :  { %18272 = vmatprep.subr.bf16.mxu1 %v20441_v0 }
 0x5f9   :  { %v2696_v16 = vpop.xlane.xlu0 %2695 }
 0x5fa   :  { %v2701_v51 = vmul.f32 0.03125, %v2696_v16 }
 0x5fc   :  { %v2703_v55 = vsub.f32 %v2692_v30, %v2701_v51 }
 0x5fd   :  { %v2699_v13 = vpop.xlane.xlu1 %2698 }
 0x5fe   :  { %v2702_v58 = vmul.f32 0.03125, %v2699_v13  ;;  %v2705_v59 = vmul.f32 %v2703_v55, %v2703_v55 }
 0x600   :  { %v2704_v21 = vsub.f32 %v2693_v44, %v2702_v58  ;;  %v2707_v17 = vsel %vm323_vm3, %v2705_v59, 0.0 }
 0x601   :  { %2708 = vadd.xlane.f32.xlu0 %v2707_v17 }
 0x602   :  { %v2706_v60 = vmul.f32 %v2704_v21, %v2704_v21 }
 0x604   :  { %v2710_v62 = vsel %vm323_vm3, %v2706_v60, 0.0  ;;  %v20058_v60 = vld [vmem:[%s23948_s7 + $0xc8] sm:$0xff]  }
 0x605   :  { %2711 = vadd.xlane.f32.xlu1 %v2710_v62  ;;  %v20059_v62 = vld [vmem:[%s23948_s7 + $0xd8] sm:$0xff]  }
 0x68a   :  { %v2709_v53 = vpop.xlane.xlu0 %2708 }
 0x68b   :  { %v2713_v5 = vmul.f32 0.03125, %v2709_v53 }
 0x68d   :  { %v2715_v7 = vadd.f32 1e-05, %v2713_v5 }
 0x68e   :  { %v2712_v11 = vpop.xlane.xlu1 %2711 }
 0x68f   :  { %20230 = vrsqrt.f32 %v2715_v7  ;;  %v2714_v14 = vmul.f32 0.03125, %v2712_v11 }
 0x691   :  { %v2716_v15 = vadd.f32 1e-05, %v2714_v14 }
 0x693   :  { %20232 = vrsqrt.f32 %v2716_v15  ;;  %v21175_v15 = vsub.s32 4, %v20609_v9 }
 0x69c   :  { %v20231_v18 = vpop.eup %20230 }
 0x69d   :  { %v2719_v19 = vmul.f32 %v20231_v18, %v2703_v55  ;;  %v21178_v18 = vsub.s32 5, %v20609_v9 }
 0x69f   :  { %v2725_v26 = vmul.f32 %v2724_v20, %v2719_v19  ;;  %v2916_v19 = vrot.slane %v21091_v29, %v21175_v15 }
 0x6a0   :  { %v20233_v24 = vpop.eup %20232 }
 0x6a1   :  { %v2720_v25 = vmul.f32 %v20233_v24, %v2704_v21  ;;  %v2731_v31 = vadd.f32 %v2730_v27, %v2725_v26  ;;  %v2922_v24 = vrot.slane %v21091_v29, %v21178_v18  ;;  %v20063_v29 = vld [vmem:[%s23948_s7 + $0xe0] sm:$0xff]  }
 0x6a3   :  { %v2726_v61 = vmul.f32 %v2724_v20, %v2720_v25 }
 0x6a5   :  { %v2732_v32 = vadd.f32 %v2730_v27, %v2726_v61 }
 0x6a7   :  { %v2746_v34 = vpack.c.bf16 %v2732_v32, %v2731_v31 }
 0x6a9   :  { %18257 = vmatmul.mubr.msk.bf16.vlgmr.msra.gmra.mxu1 %vm323_vm3, %v2746_v34 }
 0x6aa   :  { %18276 = vmatprep.mubr.msk.bf16.mxu1 %vm20442_vm1, %v20441_v0  ;;  %18273 = vmatpush3.bf16.msra.mxu1 %v20058_v60 }
 0x6ab   :  { %18274 = vmatprep.subr.bf16.mxu1 %v20441_v0 }
 0x6ae   :  { %18275 = vmatpush3.bf16.msra.mxu1 %v20060_v23 }
 0x6af   :  { %18280 = vmatprep.subr.bf16.mxu1 %v20441_v0 }
 0x769   :  { %v2802_v56 = vpop.f32.mrf.mxu1 }
 0x76a   :  { %v2803_v39 = vadd.f32 %v16467_v38, %v2802_v56  ;;  %v20065_v56 = vld [vmem:[%s23948_s7 + $0xf0] sm:$0xff]  }
 0x76b   :  { %v18258_v28 = vpop.f32.mrf.mxu1 }
 0x76c   :  { %v2809_v42 = vmax.f32 %v2803_v39, 0.0  ;;  %v20066_v28 = vld [vmem:[%s23948_s7 + $0x108] sm:$0xff]   ;;  %v20067_v39 = vld [vmem:[%s23948_s7 + $0x100] sm:$0xff]  }
 0x76d   :  { %v2805_v63 = vpop.f32.mrf.mxu1 }
 0x76e   :  { %v2806_v40 = vadd.f32 %v16467_v38, %v2805_v63  ;;  %v20068_v63 = vld [vmem:[%s23948_s7 + $0x118] sm:$0xff]  }
 0x76f   :  { %v18259_v41 = vpop.f32.mrf.mxu1 }
 0x770   :  { %v2810_v43 = vmax.f32 %v2806_v40, 0.0  ;;  %v20069_v40 = vld [vmem:[%s23948_s7 + $0x110] sm:$0xff]   ;;  %v20070_v41 = vld [vmem:[%s23948_s7 + $0x128] sm:$0xff]  }
 0x772   :  { %v2811_v4 = vpack.c.bf16 %v2810_v43, %v2809_v42  ;;  %v20071_v42 = vld [vmem:[%s23948_s7 + $0x120] sm:$0xff]   ;;  %v20072_v43 = vld [vmem:[%s23948_s7 + $0x138] sm:$0xff]  }
 0x774   :  { %18269 = vmatmul.mubr.msk.bf16.vlgmr.msra.gmra.mxu0 %vm2840_vm6, %v2811_v4  ;;  %v20073_v4 = vld [vmem:[%s23948_s7 + $0x130] sm:$0xff]  }
 0x775   :  { %18292 = vmatprep.mubr.msk.bf16.mxu0 %vm20442_vm1, %v20441_v0  ;;  %18289 = vmatpush3.bf16.msra.mxu0 %v20059_v62 }
 0x776   :  { %18290 = vmatprep.subr.bf16.mxu0 %v20441_v0 }
 0x779   :  { %18291 = vmatpush3.bf16.msra.mxu0 %v20061_v1 }
 0x77a   :  { %18304 = vmatprep.subr.bf16.mxu0 %v20441_v0 }
 0x834   :  { %v2878_v6 = vpop.f32.mrf.mxu0 }
 0x835   :  { %v2879_v46 = vadd.f32 %v2878_v6, %v2815_v45  ;;  %v20075_v6 = vld [vmem:[%s23948_s7 + $0x140] sm:$0xff]  }
 0x836   :  { %v18270_v47 = vpop.f32.mrf.mxu0 }
 0x837   :  { %v2885_v12 = vadd.f32 %v2879_v46, %v2731_v31  ;;  %v20076_v46 = vld [vmem:[%s23948_s7 + $0x158] sm:$0xff]   ;;  %v20077_v47 = vld [vmem:[%s23948_s7 + $0x150] sm:$0xff]  }
 0x838   :  { %v2881_v48 = vpop.f32.mrf.mxu0 }
 0x839   :  { %v2882_v30 = vadd.f32 %v2881_v48, %v2815_v45  ;;  %v2887_v50 = vsel %vm323_vm3, %v2885_v12, 0.0  ;;  %v20074_v45 = vld [vmem:[%s23948_s7 + $0x148] sm:$0xff]   ;;  %v20079_v48 = vld [vmem:[%s23948_s7 + $0x160] sm:$0xff]  }
 0x83a   :  { %2888 = vadd.xlane.f32.xlu0 %v2887_v50  ;;  %v18271_v37 = vpop.f32.mrf.mxu0  ;;  %v20081_v50 = vld [vmem:[%s23948_s7 + $0x170] sm:$0xff]  }
 0x83b   :  { %v2886_v49 = vadd.f32 %v2882_v30, %v2732_v32  ;;  %v20062_v32 = vld [vmem:[%s23948_s7 + $0xe8] sm:$0xff]   ;;  %v20080_v30 = vld [vmem:[%s23948_s7 + $0x178] sm:$0xff]  }
 0x83d   :  { %v2890_v52 = vsel %vm323_vm3, %v2886_v49, 0.0 }
 0x83e   :  { %2891 = vadd.xlane.f32.xlu1 %v2890_v52 }
 0x8c3   :  { %v2889_v44 = vpop.xlane.xlu0 %2888 }
 0x8c4   :  { %v2893_v54 = vmul.f32 0.03125, %v2889_v44 }
 0x8c6   :  { %v2895_v16 = vsub.f32 %v2885_v12, %v2893_v54  ;;  %v20078_v12 = vld [vmem:[%s23948_s7 + $0x168] sm:$0xff]  }
 0x8c7   :  { %v2892_v51 = vpop.xlane.xlu1 %2891 }
 0x8c8   :  { %v2894_v55 = vmul.f32 0.03125, %v2892_v51  ;;  %v2897_v13 = vmul.f32 %v2895_v16, %v2895_v16 }
 0x8ca   :  { %v2896_v58 = vsub.f32 %v2886_v49, %v2894_v55  ;;  %v2899_v59 = vsel %vm323_vm3, %v2897_v13, 0.0 }
 0x8cb   :  { %2900 = vadd.xlane.f32.xlu0 %v2899_v59 }
 0x8cc   :  { %v2898_v21 = vmul.f32 %v2896_v58, %v2896_v58 }
 0x8ce   :  { %v2902_v17 = vsel %vm323_vm3, %v2898_v21, 0.0 }
 0x8cf   :  { %2903 = vadd.xlane.f32.xlu1 %v2902_v17 }
 0x954   :  { %v2901_v3 = vpop.xlane.xlu0 %2900 }
 0x955   :  { %v2905_v53 = vmul.f32 0.03125, %v2901_v3 }
 0x957   :  { %v2907_v5 = vadd.f32 1e-05, %v2905_v53 }
 0x958   :  { %v2904_v7 = vpop.xlane.xlu1 %2903 }
 0x959   :  { %20234 = vrsqrt.f32 %v2907_v5  ;;  %v2906_v11 = vmul.f32 0.03125, %v2904_v7 }
 0x95b   :  { %v2908_v14 = vadd.f32 1e-05, %v2906_v11 }
 0x95d   :  { %20236 = vrsqrt.f32 %v2908_v14 }
 0x966   :  { %v20235_v20 = vpop.eup %20234 }
 0x967   :  { %v2911_v25 = vmul.f32 %v20235_v20, %v2895_v16  ;;  %v16545_v20 = vld [vmem:[%s23951_s6 + $0x10] ss:$0 sm:$0xff] }
 0x969   :  { %v2917_v26 = vmul.f32 %v2916_v19, %v2911_v25 }
 0x96a   :  { %v20237_v27 = vpop.eup %20236 }
 0x96b   :  { %v21184_v61 = vadd.f32 %v2922_v24, %v2917_v26  ;;  %v2912_v31 = vmul.f32 %v20237_v27, %v2896_v58 }
 0x96d   :  { %v21191_v34 = vpack.c.bf16 %v21184_v61, %v21184_v61  ;;  %v2918_v35 = vmul.f32 %v2916_v19, %v2912_v31 }
 0x96f   :  { %18277 = vmatmul.mubr.msk.bf16.vlgmr.msra.gmra.mxu1 %vm323_vm3, %v21191_v34  ;;  %18293 = vmatmul.mubr.msk.bf16.vlgmr.msra.gmra.mxu0 %vm323_vm3, %v21191_v34  ;;  %v21200_v2 = vadd.f32 %v2922_v24, %v2918_v35 }
 0x970   :  { %18281 = vmatpush3.bf16.msra.mxu1 %v20058_v60  ;;  %18305 = vmatpush3.bf16.msra.mxu0 %v20062_v32 }
 0x971   :  { %18282 = vmatprep.subr.bf16.mxu1 %v20441_v0  ;;  %18306 = vmatprep.subr.bf16.mxu0 %v20441_v0  ;;  %v21213_v38 = vpack.c.bf16 %v21200_v2, %v21200_v2 }
 0x972   :  { %18284 = vmatprep.mubr.msk.bf16.mxu1 %vm20442_vm1, %v20441_v0  ;;  %18308 = vmatprep.mubr.msk.bf16.mxu0 %vm20442_vm1, %v20441_v0 }
 0x974   :  { %18283 = vmatpush3.bf16.msra.mxu1 %v20060_v23  ;;  %18307 = vmatpush3.bf16.msra.mxu0 %v20063_v29 }
 0x975   :  { %18296 = vmatprep.subr.bf16.mxu1 %v20441_v0  ;;  %18320 = vmatprep.subr.bf16.mxu0 %v20441_v0 }
 0x977   :  { %18285 = vmatmul.mubr.msk.bf16.vlgmr.msra.gmra.mxu1 %vm323_vm3, %v21213_v38  ;;  %18309 = vmatmul.mubr.msk.bf16.vlgmr.msra.gmra.mxu0 %vm323_vm3, %v21191_v34 }
 0x978   :  { %18297 = vmatpush3.bf16.msra.mxu1 %v20059_v62  ;;  %18321 = vmatpush3.bf16.msra.mxu0 %v20064_v36 }
 0x979   :  { %18298 = vmatprep.subr.bf16.mxu1 %v20441_v0  ;;  %18322 = vmatprep.subr.bf16.mxu0 %v20441_v0 }
 0x97a   :  { %18300 = vmatprep.mubr.msk.bf16.mxu1 %vm20442_vm1, %v20441_v0  ;;  %18324 = vmatprep.mubr.msk.bf16.mxu0 %vm20442_vm1, %v20441_v0 }
 0x97c   :  { %18299 = vmatpush3.bf16.msra.mxu1 %v20061_v1  ;;  %18323 = vmatpush3.bf16.msra.mxu0 %v20065_v56 }
 0x97d   :  { %18312 = vmatprep.subr.bf16.mxu1 %v20441_v0  ;;  %18336 = vmatprep.subr.bf16.mxu0 %v20441_v0 }
 0x97f   :  { %18301 = vmatmul.mubr.msk.bf16.vlgmr.msra.gmra.mxu1 %vm323_vm3, %v21213_v38  ;;  %18325 = vmatmul.mubr.msk.bf16.vlgmr.msra.gmra.mxu0 %vm323_vm3, %v21191_v34 }
 0x980   :  { %18313 = vmatpush3.bf16.msra.mxu1 %v20062_v32  ;;  %18337 = vmatpush3.bf16.msra.mxu0 %v20066_v28 }
 0x981   :  { %18314 = vmatprep.subr.bf16.mxu1 %v20441_v0  ;;  %18338 = vmatprep.subr.bf16.mxu0 %v20441_v0 }
 0x982   :  { %18316 = vmatprep.mubr.msk.bf16.mxu1 %vm20442_vm1, %v20441_v0  ;;  %18340 = vmatprep.mubr.msk.bf16.mxu0 %vm20442_vm1, %v20441_v0 }
 0x984   :  { %18315 = vmatpush3.bf16.msra.mxu1 %v20063_v29  ;;  %18339 = vmatpush3.bf16.msra.mxu0 %v20067_v39 }
 0x985   :  { %18328 = vmatprep.subr.bf16.mxu1 %v20441_v0  ;;  %18352 = vmatprep.subr.bf16.mxu0 %v20441_v0 }
 0x987   :  { %18317 = vmatmul.mubr.msk.bf16.vlgmr.msra.gmra.mxu1 %vm323_vm3, %v21213_v38  ;;  %18341 = vmatmul.mubr.msk.bf16.vlgmr.msra.gmra.mxu0 %vm323_vm3, %v21191_v34 }
 0x988   :  { %18329 = vmatpush3.bf16.msra.mxu1 %v20064_v36  ;;  %18353 = vmatpush3.bf16.msra.mxu0 %v20068_v63 }
 0x989   :  { %18330 = vmatprep.subr.bf16.mxu1 %v20441_v0  ;;  %18354 = vmatprep.subr.bf16.mxu0 %v20441_v0 }
 0x98a   :  { %18332 = vmatprep.mubr.msk.bf16.mxu1 %vm20442_vm1, %v20441_v0  ;;  %18356 = vmatprep.mubr.msk.bf16.mxu0 %vm20442_vm1, %v20441_v0 }
 0x98c   :  { %18331 = vmatpush3.bf16.msra.mxu1 %v20065_v56  ;;  %18355 = vmatpush3.bf16.msra.mxu0 %v20069_v40 }
 0x98d   :  { %18344 = vmatprep.subr.bf16.mxu1 %v20441_v0  ;;  %18368 = vmatprep.subr.bf16.mxu0 %v20441_v0 }
 0x98f   :  { %18333 = vmatmul.mubr.msk.bf16.vlgmr.msra.gmra.mxu1 %vm323_vm3, %v21213_v38  ;;  %18357 = vmatmul.mubr.msk.bf16.vlgmr.msra.gmra.mxu0 %vm323_vm3, %v21191_v34 }
 0x990   :  { %18345 = vmatpush3.bf16.msra.mxu1 %v20066_v28  ;;  %18369 = vmatpush3.bf16.msra.mxu0 %v20070_v41  ;;  %v16546_v28 = vld [vmem:[%s23951_s6 + $0x11] ss:$0 sm:$0xff] }
 0x991   :  { %18346 = vmatprep.subr.bf16.mxu1 %v20441_v0  ;;  %18370 = vmatprep.subr.bf16.mxu0 %v20441_v0 }
 0x992   :  { %18348 = vmatprep.mubr.msk.bf16.mxu1 %vm20442_vm1, %v20441_v0  ;;  %18372 = vmatprep.mubr.msk.bf16.mxu0 %vm20442_vm1, %v20441_v0 }
 0x994   :  { %18347 = vmatpush3.bf16.msra.mxu1 %v20067_v39  ;;  %18371 = vmatpush3.bf16.msra.mxu0 %v20071_v42 }
 0x995   :  { %18360 = vmatprep.subr.bf16.mxu1 %v20441_v0  ;;  %18384 = vmatprep.subr.bf16.mxu0 %v20441_v0 }
 0x997   :  { %18349 = vmatmul.mubr.msk.bf16.vlgmr.msra.gmra.mxu1 %vm323_vm3, %v21213_v38  ;;  %18373 = vmatmul.mubr.msk.bf16.vlgmr.msra.gmra.mxu0 %vm323_vm3, %v21191_v34 }
 0x998   :  { %18361 = vmatpush3.bf16.msra.mxu1 %v20068_v63  ;;  %18385 = vmatpush3.bf16.msra.mxu0 %v20072_v43 }
 0x999   :  { %18362 = vmatprep.subr.bf16.mxu1 %v20441_v0  ;;  %18386 = vmatprep.subr.bf16.mxu0 %v20441_v0 }
 0x99a   :  { %18364 = vmatprep.mubr.msk.bf16.mxu1 %vm20442_vm1, %v20441_v0  ;;  %18388 = vmatprep.mubr.msk.bf16.mxu0 %vm20442_vm1, %v20441_v0 }
 0x99c   :  { %18363 = vmatpush3.bf16.msra.mxu1 %v20069_v40  ;;  %18387 = vmatpush3.bf16.msra.mxu0 %v20073_v4 }
 0x99d   :  { %18376 = vmatprep.subr.bf16.mxu1 %v20441_v0  ;;  %18400 = vmatprep.subr.bf16.mxu0 %v20441_v0 }
 0x99f   :  { %18365 = vmatmul.mubr.msk.bf16.vlgmr.msra.gmra.mxu1 %vm323_vm3, %v21213_v38  ;;  %18389 = vmatmul.mubr.msk.bf16.vlgmr.msra.gmra.mxu0 %vm323_vm3, %v21191_v34 }
 0x9a0   :  { %18377 = vmatpush3.bf16.msra.mxu1 %v20070_v41  ;;  %18401 = vmatpush3.bf16.msra.mxu0 %v20074_v45 }
 0x9a1   :  { %18378 = vmatprep.subr.bf16.mxu1 %v20441_v0  ;;  %18402 = vmatprep.subr.bf16.mxu0 %v20441_v0 }
 0x9a2   :  { %18380 = vmatprep.mubr.msk.bf16.mxu1 %vm20442_vm1, %v20441_v0  ;;  %18404 = vmatprep.mubr.msk.bf16.mxu0 %vm20442_vm1, %v20441_v0 }
 0x9a4   :  { %18379 = vmatpush3.bf16.msra.mxu1 %v20071_v42  ;;  %18403 = vmatpush3.bf16.msra.mxu0 %v20075_v6 }
 0x9a5   :  { %18392 = vmatprep.subr.bf16.mxu1 %v20441_v0  ;;  %18416 = vmatprep.subr.bf16.mxu0 %v20441_v0 }
 0x9a7   :  { %18381 = vmatmul.mubr.msk.bf16.vlgmr.msra.gmra.mxu1 %vm323_vm3, %v21213_v38  ;;  %18405 = vmatmul.mubr.msk.bf16.vlgmr.msra.gmra.mxu0 %vm323_vm3, %v21191_v34 }
 0x9a8   :  { %18393 = vmatpush3.bf16.msra.mxu1 %v20072_v43  ;;  %18417 = vmatpush3.bf16.msra.mxu0 %v20076_v46 }
 0x9a9   :  { %18394 = vmatprep.subr.bf16.mxu1 %v20441_v0  ;;  %18418 = vmatprep.subr.bf16.mxu0 %v20441_v0 }
 0x9aa   :  { %18396 = vmatprep.mubr.msk.bf16.mxu1 %vm20442_vm1, %v20441_v0  ;;  %18420 = vmatprep.mubr.msk.bf16.mxu0 %vm20442_vm1, %v20441_v0 }
 0x9ac   :  { %18395 = vmatpush3.bf16.msra.mxu1 %v20073_v4  ;;  %18419 = vmatpush3.bf16.msra.mxu0 %v20077_v47 }
 0x9ad   :  { %18408 = vmatprep.subr.bf16.mxu1 %v20441_v0  ;;  %18432 = vmatprep.subr.bf16.mxu0 %v20441_v0 }
 0x9af   :  { %18397 = vmatmul.mubr.msk.bf16.vlgmr.msra.gmra.mxu1 %vm323_vm3, %v21213_v38  ;;  %18421 = vmatmul.mubr.msk.bf16.vlgmr.msra.gmra.mxu0 %vm323_vm3, %v21191_v34 }
 0x9b0   :  { %18409 = vmatpush3.bf16.msra.mxu1 %v20074_v45  ;;  %18433 = vmatpush3.bf16.msra.mxu0 %v20078_v12 }
 0x9b1   :  { %18410 = vmatprep.subr.bf16.mxu1 %v20441_v0  ;;  %18434 = vmatprep.subr.bf16.mxu0 %v20441_v0 }
 0x9b2   :  { %18412 = vmatprep.mubr.msk.bf16.mxu1 %vm20442_vm1, %v20441_v0  ;;  %18436 = vmatprep.mubr.msk.bf16.mxu0 %vm20442_vm1, %v20441_v0 }
 0x9b4   :  { %18411 = vmatpush3.bf16.msra.mxu1 %v20075_v6  ;;  %18435 = vmatpush3.bf16.msra.mxu0 %v20079_v48  ;;  %v16542_v6 = vld [vmem:[%s23951_s6 + $0xd] ss:$0 sm:$0xff] }
 0x9b5   :  { %18424 = vmatprep.subr.bf16.mxu1 %v20441_v0  ;;  %18448 = vmatprep.subr.bf16.mxu0 %v20441_v0 }
 0x9b7   :  { %18413 = vmatmul.mubr.msk.bf16.vlgmr.msra.gmra.mxu1 %vm323_vm3, %v21213_v38  ;;  %18437 = vmatmul.mubr.msk.bf16.vlgmr.msra.gmra.mxu0 %vm323_vm3, %v21191_v34 }
 0x9b8   :  { %18425 = vmatpush3.bf16.msra.mxu1 %v20076_v46  ;;  %18449 = vmatpush3.bf16.msra.mxu0 %v20080_v30 }
 0x9b9   :  { %18426 = vmatprep.subr.bf16.mxu1 %v20441_v0  ;;  %18450 = vmatprep.subr.bf16.mxu0 %v20441_v0 }
 0x9ba   :  { %18428 = vmatprep.mubr.msk.bf16.mxu1 %vm20442_vm1, %v20441_v0  ;;  %18452 = vmatprep.mubr.msk.bf16.mxu0 %vm20442_vm1, %v20441_v0 }
 0x9bc   :  { %18427 = vmatpush3.bf16.msra.mxu1 %v20077_v47  ;;  %18451 = vmatpush3.bf16.msra.mxu0 %v20081_v50 }
 0x9bd   :  { %18440 = vmatprep.subr.bf16.mxu1 %v20441_v0  ;;  %18464 = vmatprep.subr.bf16.mxu0 %v20441_v0 }
 0x9bf   :  { %18429 = vmatmul.mubr.msk.bf16.vlgmr.msra.gmra.mxu1 %vm323_vm3, %v21213_v38  ;;  %18453 = vmatmul.mubr.msk.bf16.vlgmr.msra.gmra.mxu0 %vm323_vm3, %v21191_v34  ;;  %v16541_v34 = vld [vmem:[%s23951_s6 + $0xc] ss:$0 sm:$0xff] }
 0x9c0   :  { %18441 = vmatpush3.bf16.msra.mxu1 %v20078_v12  ;;  %18444 = vmatprep.mubr.msk.bf16.mxu1 %vm20442_vm1, %v20441_v0 }
 0x9c1   :  { %18442 = vmatprep.subr.bf16.mxu1 %v20441_v0  ;;  %18466 = vmatprep.mubr.msk.bf16.mxu0 %vm20442_vm1, %v20441_v0 }
 0x9c4   :  { %18443 = vmatpush3.bf16.msra.mxu1 %v20079_v48 }
 0x9c5   :  { %18456 = vmatprep.subr.bf16.mxu1 %v20441_v0 }
 0x9c7   :  { %18445 = vmatmul.mubr.msk.bf16.vlgmr.msra.gmra.mxu1 %vm323_vm3, %v21213_v38 }
 0x9c8   :  { %18457 = vmatpush3.bf16.msra.mxu1 %v20080_v30  ;;  %18460 = vmatprep.mubr.msk.bf16.mxu1 %vm20442_vm1, %v20441_v0 }
 0x9c9   :  { %18458 = vmatprep.subr.bf16.mxu1 %v20441_v0 }
 0x9cc   :  { %18459 = vmatpush3.bf16.msra.mxu1 %v20081_v50  ;;  %v16547_v50 = vld [vmem:[%s23951_s6 + $0x12] ss:$0 sm:$0xff] }
 0x9cd   :  { %18470 = vmatprep.subr.bf16.mxu1 %v20441_v0 }
 0x9cf   :  { %18461 = vmatmul.mubr.msk.bf16.vlgmr.msra.gmra.mxu1 %vm323_vm3, %v21213_v38 }
 0x9d0   :  { %18472 = vmatprep.mubr.msk.bf16.mxu1 %vm20442_vm1, %v20441_v0 }
 0xa2f   :  { %v3117_v37 = vpop.f32.mrf.mxu1  ;;  %v3212_v49 = vpop.f32.mrf.mxu0 }
 0xa30   :  { %v3118_v39 = vadd.f32 %v16541_v34, %v3117_v37  ;;  %v3213_v37 = vadd.f32 %v16542_v6, %v3212_v49 }
 0xa31   :  { %v18278_v52 = vpop.f32.mrf.mxu1  ;;  %v18294_v44 = vpop.f32.mrf.mxu0 }
 0xa32   :  { %v4178_v4 = vpack.c.bf16 %v3118_v39, %v3118_v39 }
 0xa33   :  { %v3120_v54 = vpop.f32.mrf.mxu1  ;;  %v3215_v16 = vpop.f32.mrf.mxu0 }
 0xa35   :  { %v18279_v51 = vpop.f32.mrf.mxu1  ;;  %v18295_v55 = vpop.f32.mrf.mxu0 }
 0xa37   :  { %v21396_v13 = vpop.f32.mrf.mxu1  ;;  %v21398_v58 = vpop.f32.mrf.mxu0 }
 0xa39   :  { %v18286_v59 = vpop.f32.mrf.mxu1  ;;  %v18310_v21 = vpop.f32.mrf.mxu0 }
 0xa3a   :  { %v4180_v59 = vpack.c.bf16 %v3213_v37, %v3213_v37 }
 0xa3b   :  { %v3163_v17 = vpop.f32.mrf.mxu1  ;;  %v3307_v60 = vpop.f32.mrf.mxu0 }
 0xa3c   :  { %v21433_v60 = vld [vmem:[%s23951_s6 + $0xe] ss:$0 sm:$0xff] }
 0xa3d   :  { %v18287_v62 = vpop.f32.mrf.mxu1  ;;  %v18311_v23 = vpop.f32.mrf.mxu0 }
 0xa3f   :  { %v21400_v1 = vpop.f32.mrf.mxu1  ;;  %v21402_v3 = vpop.f32.mrf.mxu0 }
 0xa41   :  { %v18302_v53 = vpop.f32.mrf.mxu1  ;;  %v18326_v5 = vpop.f32.mrf.mxu0 }
 0xa43   :  { %v3255_v7 = vpop.f32.mrf.mxu1  ;;  %v3399_v11 = vpop.f32.mrf.mxu0 }
 0xa44   :  { %v16548_v11 = vld [vmem:[%s23951_s6 + $0x13] ss:$0 sm:$0xff] }
 0xa45   :  { %v18303_v14 = vpop.f32.mrf.mxu1  ;;  %v18327_v19 = vpop.f32.mrf.mxu0 }
 0xa46   :  { %v3161_v14 = vadd.f32 %v16541_v34, %v21396_v13  ;;  %v3305_v19 = vadd.f32 %v21433_v60, %v21398_v58  ;;  %v16544_v58 = vld [vmem:[%s23951_s6 + $0xf] ss:$0 sm:$0xff] }
 0xa47   :  { %v21407_v24 = vpop.f32.mrf.mxu1  ;;  %v3488_v25 = vpop.f32.mrf.mxu0 }
 0xa48   :  { %v3489_v26 = vadd.f32 %v16545_v20, %v3488_v25 }
 0xa49   :  { %v18318_v27 = vpop.f32.mrf.mxu1  ;;  %v18342_v31 = vpop.f32.mrf.mxu0 }
 0xa4a   :  { %v4186_v32 = vpack.c.bf16 %v3489_v26, %v3489_v26 }
 0xa4b   :  { %v3347_v35 = vpop.f32.mrf.mxu1  ;;  %v3491_v29 = vpop.f32.mrf.mxu0 }
 0xa4c   :  { %v4198_v36 = vsel %vm1438_vm4, %v4186_v32, 0  ;;  %v4179_v35 = vpack.c.bf16 %v3161_v14, %v3161_v14  ;;  %v4182_v29 = vpack.c.bf16 %v3305_v19, %v3305_v19 }
 0xa4d   :  { %v18319_v38 = vpop.f32.mrf.mxu1  ;;  %v18343_v56 = vpop.f32.mrf.mxu0  ;;  %18465 = vmatpush3.bf16.xpose.msra.mxu0 %v4198_v36 }
 0xa4e   :  { %18476 = vmatprep.subr.bf16.mxu0 %v20441_v0 }
 0xa4f   :  { %v21417_v63 = vpop.f32.mrf.mxu1  ;;  %v3580_v40 = vpop.f32.mrf.mxu0 }
 0xa50   :  { %v3581_v41 = vadd.f32 %v16546_v28, %v3580_v40  ;;  %v3437_v14 = vadd.f32 %v16544_v58, %v21417_v63 }
 0xa51   :  { %v18334_v42 = vpop.f32.mrf.mxu1  ;;  %v18358_v43 = vpop.f32.mrf.mxu0 }
 0xa52   :  { %v4188_v45 = vpack.c.bf16 %v3581_v41, %v3581_v41  ;;  %v16549_v41 = vld [vmem:[%s23951_s6 + $0x14] ss:$0 sm:$0xff]  ;;  %v3253_v42 = vadd.f32 %v16542_v6, %v21400_v1  ;;  %v3397_v43 = vadd.f32 %v16544_v58, %v21402_v3 }
 0xa53   :  { %v3439_v46 = vpop.f32.mrf.mxu1  ;;  %v3583_v47 = vpop.f32.mrf.mxu0 }
 0xa54   :  { %v4290_v12 = vsel %vm1438_vm4, %v4188_v45, 0  ;;  %18467 = vmatmul.mubr.msk.bf16.vlgmr.msra.gmra.mxu0 %vm1438_vm4, %v4178_v4  ;;  %v4184_v1 = vpack.c.bf16 %v3397_v43, %v3397_v43 }
 0xa55   :  { %v18335_v48 = vpop.f32.mrf.mxu1  ;;  %v18359_v30 = vpop.f32.mrf.mxu0  ;;  %18477 = vmatpush3.bf16.xpose.msra.mxu0 %v4290_v12  ;;  %18478 = vmatprep.mubr.msk.bf16.mxu0 %vm20442_vm1, %v20441_v0 }
 0xa56   :  { %18488 = vmatprep.subr.bf16.mxu0 %v20441_v0  ;;  %v4181_v30 = vpack.c.bf16 %v3253_v42, %v3253_v42 }
 0xa57   :  { %v3528_v52 = vpop.f32.mrf.mxu1  ;;  %v3672_v44 = vpop.f32.mrf.mxu0 }
 0xa58   :  { %v3529_v54 = vadd.f32 %v16545_v20, %v3528_v52  ;;  %v3673_v16 = vadd.f32 %v16547_v50, %v3672_v44 }
 0xa59   :  { %v18350_v51 = vpop.f32.mrf.mxu1  ;;  %v18374_v55 = vpop.f32.mrf.mxu0 }
 0xa5a   :  { %v4187_v21 = vpack.c.bf16 %v3529_v54, %v3529_v54  ;;  %v4190_v17 = vpack.c.bf16 %v3673_v16, %v3673_v16 }
 0xa5b   :  { %v3531_v62 = vpop.f32.mrf.mxu1  ;;  %v3675_v23 = vpop.f32.mrf.mxu0 }
 0xa5c   :  { %v4244_v49 = vsel %vm1438_vm4, %v4187_v21, 0  ;;  %v4382_v53 = vsel %vm1438_vm4, %v4190_v17, 0  ;;  %18479 = vmatmul.mubr.msk.bf16.vlgmr.msra.gmra.mxu0 %vm1438_vm4, %v4180_v59 }
 0xa5d   :  { %v18351_v5 = vpop.f32.mrf.mxu1  ;;  %v18375_v7 = vpop.f32.mrf.mxu0  ;;  %18471 = vmatpush3.bf16.xpose.msra.mxu1 %v4244_v49  ;;  %18489 = vmatpush3.bf16.xpose.msra.mxu0 %v4382_v53 }
 0xa5e   :  { %18490 = vmatprep.mubr.msk.bf16.mxu0 %vm20442_vm1, %v20441_v0  ;;  %18482 = vmatprep.subr.bf16.mxu1 %v20441_v0 }
 0xa5f   :  { %v3620_v20 = vpop.f32.mrf.mxu1  ;;  %v3764_v25 = vpop.f32.mrf.mxu0  ;;  %18500 = vmatprep.subr.bf16.mxu0 %v20441_v0 }
 0xa60   :  { %v3621_v26 = vadd.f32 %v16546_v28, %v3620_v20  ;;  %v3765_v27 = vadd.f32 %v16548_v11, %v3764_v25 }
 0xa61   :  { %v18366_v31 = vpop.f32.mrf.mxu1  ;;  %v18390_v32 = vpop.f32.mrf.mxu0 }
 0xa62   :  { %v4189_v36 = vpack.c.bf16 %v3621_v26, %v3621_v26  ;;  %v4192_v13 = vpack.c.bf16 %v3765_v27, %v3765_v27  ;;  %v4185_v27 = vpack.c.bf16 %v3437_v14, %v3437_v14 }
 0xa63   :  { %v3623_v34 = vpop.f32.mrf.mxu1  ;;  %v3767_v38 = vpop.f32.mrf.mxu0 }
 0xa64   :  { %v4336_v56 = vsel %vm1438_vm4, %v4189_v36, 0  ;;  %v4474_v39 = vsel %vm1438_vm4, %v4192_v13, 0  ;;  %18473 = vmatmul.mubr.msk.bf16.vlgmr.msra.gmra.mxu1 %vm1438_vm4, %v4179_v35  ;;  %18491 = vmatmul.mubr.msk.bf16.vlgmr.msra.gmra.mxu0 %vm1438_vm4, %v4182_v29 }
 0xa65   :  { %v18367_v28 = vpop.f32.mrf.mxu1  ;;  %v18391_v40 = vpop.f32.mrf.mxu0  ;;  %18483 = vmatpush3.bf16.xpose.msra.mxu1 %v4336_v56  ;;  %18501 = vmatpush3.bf16.xpose.msra.mxu0 %v4474_v39 }
 0xa66   :  { %18484 = vmatprep.mubr.msk.bf16.mxu1 %vm20442_vm1, %v20441_v0  ;;  %18502 = vmatprep.mubr.msk.bf16.mxu0 %vm20442_vm1, %v20441_v0 }
 0xa67   :  { %v3712_v4 = vpop.f32.mrf.mxu1  ;;  %v3856_v45 = vpop.f32.mrf.mxu0  ;;  %18494 = vmatprep.subr.bf16.mxu1 %v20441_v0  ;;  %18512 = vmatprep.subr.bf16.mxu0 %v20441_v0 }
 0xa68   :  { %v3713_v46 = vadd.f32 %v16547_v50, %v3712_v4  ;;  %v3857_v47 = vadd.f32 %v16549_v41, %v3856_v45  ;;  %v3345_v50 = vadd.f32 %v21433_v60, %v21407_v24 }
 0xa69   :  { %v18382_v12 = vpop.f32.mrf.mxu1  ;;  %v18406_v48 = vpop.f32.mrf.mxu0 }
 0xa6a   :  { %v4191_v6 = vpack.c.bf16 %v3713_v46, %v3713_v46  ;;  %v4674_v3 = vpack.c.bf16 %v3857_v47, %v3857_v47  ;;  %v4183_v23 = vpack.c.bf16 %v3345_v50, %v3345_v50 }
 0xa6b   :  { %v3715_v37 = vpop.f32.mrf.mxu1  ;;  %v3859_v52 = vpop.f32.mrf.mxu0 }
 0xa6c   :  { %v4428_v44 = vsel %vm1438_vm4, %v4191_v6, 0  ;;  %v4686_v54 = vsel %vm1942_vm5, %v4674_v3, 0  ;;  %18485 = vmatmul.mubr.msk.bf16.vlgmr.msra.gmra.mxu1 %vm1438_vm4, %v4181_v30  ;;  %18503 = vmatmul.mubr.msk.bf16.vlgmr.msra.gmra.mxu0 %vm1438_vm4, %v4184_v1  ;;  %v20430_v6 = vld [vmem:[%s23952_s8] ss:$0 sm:$0xff] }
 0xa6d   :  { %v18383_v16 = vpop.f32.mrf.mxu1  ;;  %v18407_v51 = vpop.f32.mrf.mxu0  ;;  %18495 = vmatpush3.bf16.xpose.msra.mxu1 %v4428_v44  ;;  %18513 = vmatpush3.bf16.msra.mxu0 %v4686_v54 }
 0xa6e   :  { %18496 = vmatprep.mubr.msk.bf16.mxu1 %vm20442_vm1, %v20441_v0  ;;  %18506 = vmatprep.subr.bf16.mxu1 %v20441_v0 }
 0xa6f   :  { %v3804_v55 = vpop.f32.mrf.mxu1  ;;  %v21475_v59 = vpop.f32.mrf.mxu0  ;;  %18514 = vmatprep.mubr.msk.bf16.mxu0 %vm20442_vm1, %v20441_v0  ;;  %18524 = vmatprep.subr.bf16.mxu0 %v20441_v0 }
 0xa70   :  { %v3805_v21 = vadd.f32 %v16548_v11, %v3804_v55 }
 0xa71   :  { %v18398_v17 = vpop.f32.mrf.mxu1  ;;  %v18422_v62 = vpop.f32.mrf.mxu0 }
 0xa72   :  { %v4193_v49 = vpack.c.bf16 %v3805_v21, %v3805_v21 }
 0xa73   :  { %v3807_v53 = vpop.f32.mrf.mxu1  ;;  %v3951_v24 = vpop.f32.mrf.mxu0 }
 0xa74   :  { %v4520_v60 = vsel %vm1438_vm4, %v4193_v49, 0  ;;  %18497 = vmatmul.mubr.msk.bf16.vlgmr.msra.gmra.mxu1 %vm1438_vm4, %v4183_v23 }
 0xa75   :  { %v18399_v5 = vpop.f32.mrf.mxu1  ;;  %v18423_v7 = vpop.f32.mrf.mxu0  ;;  %18507 = vmatpush3.bf16.xpose.msra.mxu1 %v4520_v60  ;;  %18508 = vmatprep.mubr.msk.bf16.mxu1 %vm20442_vm1, %v20441_v0 }
 0xa76   :  { %18518 = vmatprep.subr.bf16.mxu1 %v20441_v0  ;;  %v20431_v5 = vld [vmem:[%s23952_s8 + $0x1] ss:$0 sm:$0xff] }
 0xa77   :  { %v3896_v11 = vpop.f32.mrf.mxu1  ;;  %v21486_v19 = vpop.f32.mrf.mxu0 }
 0xa78   :  { %v3897_v20 = vadd.f32 %v16549_v41, %v3896_v11 }
 0xa79   :  { %v18414_v25 = vpop.f32.mrf.mxu1  ;;  %v18438_v26 = vpop.f32.mrf.mxu0 }
 0xa7a   :  { %v4675_v31 = vpack.c.bf16 %v3897_v20, %v3897_v20 }
 0xa7b   :  { %v3899_v32 = vpop.f32.mrf.mxu1  ;;  %v4043_v35 = vpop.f32.mrf.mxu0 }
 0xa7c   :  { %v4732_v29 = vsel %vm1942_vm5, %v4675_v31, 0  ;;  %18509 = vmatmul.mubr.msk.bf16.vlgmr.msra.gmra.mxu1 %vm1438_vm4, %v4185_v27 }
 0xa7d   :  { %v18415_v36 = vpop.f32.mrf.mxu1  ;;  %v18439_v13 = vpop.f32.mrf.mxu0  ;;  %18519 = vmatpush3.bf16.msra.mxu1 %v4732_v29  ;;  %18520 = vmatprep.mubr.msk.bf16.mxu1 %vm20442_vm1, %v20441_v0 }
 0xa7e   :  { %18530 = vmatprep.subr.bf16.mxu1 %v20441_v0 }
 0xa7f   :  { %v21493_v63 = vpop.f32.mrf.mxu1  ;;  %v21495_v58 = vpop.f32.mrf.mxu0 }
 0xa81   :  { %v18430_v34 = vpop.f32.mrf.mxu1  ;;  %v18454_v38 = vpop.f32.mrf.mxu0 }
 0xa83   :  { %v3991_v56 = vpop.f32.mrf.mxu1  ;;  %v4135_v39 = vpop.f32.mrf.mxu0 }
 0xa85   :  { %v18431_v28 = vpop.f32.mrf.mxu1  ;;  %v18455_v40 = vpop.f32.mrf.mxu0 }
 0xa87   :  { %v21497_v41 = vpop.f32.mrf.mxu1 }
 0xa89   :  { %v18446_v42 = vpop.f32.mrf.mxu1 }
 0xa8b   :  { %v4083_v43 = vpop.f32.mrf.mxu1 }
 0xa8d   :  { %v18447_v4 = vpop.f32.mrf.mxu1 }
 0xa8f   :  { %v21499_v45 = vpop.f32.mrf.mxu1 }
 0xa91   :  { %v18462_v46 = vpop.f32.mrf.mxu1 }
 0xa93   :  { %v4175_v47 = vpop.f32.mrf.mxu1 }
 0xa95   :  { %v18463_v12 = vpop.f32.mrf.mxu1 }
 0xb14   :  { %v4234_v48 = vpop.f32.mrf.mxu0 }
 0xb15   :  { %v4562_v30 = vmul.f32 0.35355338, %v4234_v48 }
 0xb16   :  { %v18468_v1 = vpop.f32.mrf.mxu0 }
 0xb17   :  { %v21504_v3 = vadd.f32 %v20430_v6, %v4562_v30 }
 0xb18   :  { %v4237_v37 = vpop.f32.mrf.mxu0 }
 0xb19   :  { %v4578_v52 = vsel %vm1438_vm4, %v21504_v3, -inf }
 0xb1a   :  { %4579 = vmax.xlane.f32.xlu0 %v4578_v52  ;;  %v18469_v44 = vpop.f32.mrf.mxu0 }
 0xb1c   :  { %v4326_v54 = vpop.f32.mrf.mxu0 }
 0xb1d   :  { %v4564_v16 = vmul.f32 0.35355338, %v4326_v54 }
 0xb1e   :  { %v18480_v51 = vpop.f32.mrf.mxu0 }
 0xb1f   :  { %v4572_v50 = vadd.f32 %v20430_v6, %v4564_v16 }
 0xb20   :  { %v4329_v55 = vpop.f32.mrf.mxu0 }
 0xb21   :  { %v4584_v21 = vsel %vm1438_vm4, %v4572_v50, -inf }
 0xb22   :  { %4585 = vmax.xlane.f32.xlu0 %v4584_v21  ;;  %v18481_v17 = vpop.f32.mrf.mxu0 }
 0xb24   :  { %v4280_v62 = vpop.f32.mrf.mxu1  ;;  %v4418_v23 = vpop.f32.mrf.mxu0 }
 0xb25   :  { %v4563_v49 = vmul.f32 0.35355338, %v4280_v62  ;;  %v4566_v53 = vmul.f32 0.35355338, %v4418_v23 }
 0xb26   :  { %v18474_v24 = vpop.f32.mrf.mxu1  ;;  %v18492_v60 = vpop.f32.mrf.mxu0 }
 0xb27   :  { %v4571_v7 = vadd.f32 %v20431_v5, %v4563_v49  ;;  %v4574_v14 = vadd.f32 %v20430_v6, %v4566_v53 }
 0xb28   :  { %v4283_v11 = vpop.f32.mrf.mxu1  ;;  %v4421_v20 = vpop.f32.mrf.mxu0 }
 0xb29   :  { %v4581_v25 = vsel %vm1438_vm4, %v4571_v7, -inf  ;;  %v4590_v26 = vsel %vm1438_vm4, %v4574_v14, -inf }
 0xb2a   :  { %4582 = vmax.xlane.f32.xlu1 %v4581_v25  ;;  %v18475_v27 = vpop.f32.mrf.mxu1  ;;  %4591 = vmax.xlane.f32.xlu0 %v4590_v26  ;;  %v18493_v31 = vpop.f32.mrf.mxu0 }
 0xb2c   :  { %v4372_v32 = vpop.f32.mrf.mxu1  ;;  %v4510_v35 = vpop.f32.mrf.mxu0 }
 0xb2d   :  { %v4565_v29 = vmul.f32 0.35355338, %v4372_v32  ;;  %v4568_v36 = vmul.f32 0.35355338, %v4510_v35 }
 0xb2e   :  { %v18486_v13 = vpop.f32.mrf.mxu1  ;;  %v18504_v34 = vpop.f32.mrf.mxu0 }
 0xb2f   :  { %v4573_v38 = vadd.f32 %v20431_v5, %v4565_v29  ;;  %v4576_v56 = vadd.f32 %v20430_v6, %v4568_v36 }
 0xb30   :  { %v4375_v39 = vpop.f32.mrf.mxu1  ;;  %v4513_v28 = vpop.f32.mrf.mxu0 }
 0xb31   :  { %v4587_v40 = vsel %vm1438_vm4, %v4573_v38, -inf  ;;  %v4596_v42 = vsel %vm1438_vm4, %v4576_v56, -inf }
 0xb32   :  { %4588 = vmax.xlane.f32.xlu1 %v4587_v40  ;;  %v18487_v43 = vpop.f32.mrf.mxu1  ;;  %4597 = vmax.xlane.f32.xlu0 %v4596_v42  ;;  %v18505_v4 = vpop.f32.mrf.mxu0 }
 0xb34   :  { %v4464_v46 = vpop.f32.mrf.mxu1 }
 0xb35   :  { %v4567_v47 = vmul.f32 0.35355338, %v4464_v46 }
 0xb36   :  { %v18498_v12 = vpop.f32.mrf.mxu1 }
 0xb37   :  { %v4575_v48 = vadd.f32 %v20431_v5, %v4567_v47 }
 0xb38   :  { %v4467_v30 = vpop.f32.mrf.mxu1 }
 0xb39   :  { %v4593_v1 = vsel %vm1438_vm4, %v4575_v48, -inf }
 0xb3a   :  { %4594 = vmax.xlane.f32.xlu1 %v4593_v1  ;;  %v18499_v37 = vpop.f32.mrf.mxu1 }
 0xb3c   :  { %v4556_v6 = vpop.f32.mrf.mxu1 }
 0xb3d   :  { %v4569_v52 = vmul.f32 0.35355338, %v4556_v6 }
 0xb3e   :  { %v18510_v44 = vpop.f32.mrf.mxu1 }
 0xb3f   :  { %v4577_v54 = vadd.f32 %v20431_v5, %v4569_v52  ;;  %v16550_v52 = vld [vmem:[%s23951_s6 + $0x15] ss:$0 sm:$0xff] }
 0xb40   :  { %v4559_v16 = vpop.f32.mrf.mxu1 }
 0xb41   :  { %v4599_v51 = vsel %vm1438_vm4, %v4577_v54, -inf }
 0xb42   :  { %4600 = vmax.xlane.f32.xlu1 %v4599_v51  ;;  %v18511_v55 = vpop.f32.mrf.mxu1 }
 0xba3   :  { %v4580_v21 = vpop.xlane.xlu0 %4579 }
 0xba4   :  { %v4602_v17 = vsub.f32 %v21504_v3, %v4580_v21  ;;  %v16551_v21 = vld [vmem:[%s23951_s6 + $0x16] ss:$0 sm:$0xff] }
 0xba6   :  { %v4610_v62 = vmul.f32 1.442695, %v4602_v17 }
 0xba8   :  { %20238 = vpow2.f32 %v4610_v62 }
 0xbab   :  { %v4586_v23 = vpop.xlane.xlu0 %4585 }
 0xbac   :  { %v4604_v49 = vsub.f32 %v4572_v50, %v4586_v23 }
 0xbae   :  { %v4614_v53 = vmul.f32 1.442695, %v4604_v49 }
 0xbb0   :  { %20240 = vpow2.f32 %v4614_v53  ;;  %v4041_v53 = vadd.f32 %v16551_v21, %v21486_v19 }
 0xbb3   :  { %v4583_v24 = vpop.xlane.xlu1 %4582  ;;  %v4592_v60 = vpop.xlane.xlu0 %4591 }
 0xbb4   :  { %v4603_v11 = vsub.f32 %v4571_v7, %v4583_v24  ;;  %v4606_v20 = vsub.f32 %v4574_v14, %v4592_v60  ;;  %v4678_v24 = vpack.c.bf16 %v4041_v53, %v4041_v53 }
 0xbb5   :  { %v20239_v25 = vpop.eup %20238 }
 0xbb6   :  { %v4612_v5 = vmul.f32 1.442695, %v4603_v11  ;;  %v4618_v26 = vmul.f32 1.442695, %v4606_v20  ;;  %v4626_v27 = vsel %vm1438_vm4, %v20239_v25, 0.0  ;;  %v4870_v19 = vsel %vm1942_vm5, %v4678_v24, 0 }
 0xbb7   :  { %4627 = vadd.xlane.f32.xlu0 %v4626_v27  ;;  %v16552_v20 = vld [vmem:[%s23951_s6 + $0x17] ss:$0 sm:$0xff] }
 0xbb8   :  { %20242 = vpow2.f32 %v4612_v5  ;;  %v4133_v27 = vadd.f32 %v16552_v20, %v21495_v58 }
 0xbb9   :  { %20244 = vpow2.f32 %v4618_v26  ;;  %v3989_v26 = vadd.f32 %v16550_v52, %v21493_v63 }
 0xbbb   :  { %v4589_v31 = vpop.xlane.xlu1 %4588  ;;  %v4598_v3 = vpop.xlane.xlu0 %4597 }
 0xbbc   :  { %v4605_v32 = vsub.f32 %v4573_v38, %v4589_v31  ;;  %v4608_v35 = vsub.f32 %v4576_v56, %v4598_v3 }
 0xbbd   :  { %v20241_v29 = vpop.eup %20240 }
 0xbbe   :  { %v4616_v50 = vmul.f32 1.442695, %v4605_v32  ;;  %v4622_v36 = vmul.f32 1.442695, %v4608_v35  ;;  %v4632_v13 = vsel %vm1438_vm4, %v20241_v29, 0.0  ;;  %v4677_v32 = vpack.c.bf16 %v3989_v26, %v3989_v26 }
 0xbbf   :  { %4633 = vadd.xlane.f32.xlu0 %v4632_v13 }
 0xbc0   :  { %20246 = vpow2.f32 %v4616_v50  ;;  %v4824_v58 = vsel %vm1942_vm5, %v4677_v32, 0 }
 0xbc1   :  { %20248 = vpow2.f32 %v4622_v36 }
 0xbc3   :  { %v4595_v7 = vpop.xlane.xlu1 %4594 }
 0xbc4   :  { %v4607_v14 = vsub.f32 %v4575_v48, %v4595_v7  ;;  %v4081_v7 = vadd.f32 %v16551_v21, %v21497_v41 }
 0xbc5   :  { %v21521_v34 = vpop.eup %20242 }
 0xbc6   :  { %v21523_v39 = vpop.eup %20244  ;;  %v4620_v28 = vmul.f32 1.442695, %v4607_v14  ;;  %v4629_v40 = vsel %vm1438_vm4, %v21521_v34, 0.0 }
 0xbc7   :  { %4630 = vadd.xlane.f32.xlu1 %v4629_v40  ;;  %v4638_v38 = vsel %vm1438_vm4, %v21523_v39, 0.0 }
 0xbc8   :  { %20250 = vpow2.f32 %v4620_v28  ;;  %4639 = vadd.xlane.f32.xlu0 %v4638_v38  ;;  %v4679_v28 = vpack.c.bf16 %v4081_v7, %v4081_v7 }
 0xbcb   :  { %v4601_v56 = vpop.xlane.xlu1 %4600 }
 0xbcc   :  { %v4609_v42 = vsub.f32 %v4577_v54, %v4601_v56  ;;  %v3949_v54 = vadd.f32 %v16550_v52, %v21475_v59 }
 0xbcd   :  { %v21529_v43 = vpop.eup %20246 }
 0xbce   :  { %v21531_v4 = vpop.eup %20248  ;;  %v4624_v46 = vmul.f32 1.442695, %v4609_v42  ;;  %v4635_v47 = vsel %vm1438_vm4, %v21529_v43, 0.0  ;;  %v4676_v51 = vpack.c.bf16 %v3949_v54, %v3949_v54 }
 0xbcf   :  { %4636 = vadd.xlane.f32.xlu1 %v4635_v47  ;;  %v4644_v12 = vsel %vm1438_vm4, %v21531_v4, 0.0  ;;  %v4173_v47 = vadd.f32 %v16552_v20, %v21499_v45 }
 0xbd0   :  { %20252 = vpow2.f32 %v4624_v46  ;;  %4645 = vadd.xlane.f32.xlu0 %v4644_v12  ;;  %v4778_v49 = vsel %vm1942_vm5, %v4676_v51, 0  ;;  %v4916_v46 = vsel %vm1942_vm5, %v4679_v28, 0 }
 0xbd5   :  { %v21537_v48 = vpop.eup %20250 }
 0xbd6   :  { %v4641_v30 = vsel %vm1438_vm4, %v21537_v48, 0.0 }
 0xbd7   :  { %4642 = vadd.xlane.f32.xlu1 %v4641_v30 }
 0xbdd   :  { %v21541_v1 = vpop.eup %20252 }
 0xbde   :  { %v4647_v37 = vsel %vm1438_vm4, %v21541_v1, 0.0 }
 0xbdf   :  { %4648 = vadd.xlane.f32.xlu1 %v4647_v37 }
 0xc40   :  { %v4628_v6 = vpop.xlane.xlu0 %4627 }
 0xc41   :  { %20254 = vrcp.f32 %v4628_v6 }
 0xc48   :  { %v4634_v44 = vpop.xlane.xlu0 %4633 }
 0xc49   :  { %20256 = vrcp.f32 %v4634_v44 }
 0xc4e   :  { %v20255_v16 = vpop.eup %20254 }
 0xc4f   :  { %v4651_v55 = vmul.f32 %v20255_v16, %v20239_v25 }
 0xc50   :  { %v4631_v17 = vpop.xlane.xlu1 %4630 }
 0xc51   :  { %v4666_v62 = vpack.c.bf16 %v4651_v55, %v4651_v55  ;;  %20258 = vrcp.f32 %v4631_v17  ;;  %v4640_v23 = vpop.xlane.xlu0 %4639 }
 0xc52   :  { %20260 = vrcp.f32 %v4640_v23 }
 0xc53   :  { %18515 = vmatmul.mubr.msk.bf16.vlgmr.msra.gmra.mxu0 %vm1438_vm4, %v4666_v62  ;;  %v16539_v62 = vld [vmem:[%s23953_s12 + $0x18] sm:$0xf] }
 0xc54   :  { %18525 = vmatpush3.bf16.msra.mxu0 %v4778_v49  ;;  %18526 = vmatprep.mubr.msk.bf16.mxu0 %vm20442_vm1, %v20441_v0  ;;  %v5240_v53 = vsel %vm1942_vm5, %v16539_v62, 0 }
 0xc55   :  { %18536 = vmatprep.subr.bf16.mxu0 %v20441_v0 }
 0xc56   :  { %v20257_v59 = vpop.eup %20256 }
 0xc57   :  { %v4655_v60 = vmul.f32 %v20257_v59, %v20241_v29  ;;  %v4680_v29 = vpack.c.bf16 %v4133_v27, %v4133_v27 }
 0xc58   :  { %v4637_v11 = vpop.xlane.xlu1 %4636 }
 0xc59   :  { %v4668_v25 = vpack.c.bf16 %v4655_v60, %v4655_v60  ;;  %20262 = vrcp.f32 %v4637_v11  ;;  %v4646_v5 = vpop.xlane.xlu0 %4645  ;;  %v4962_v14 = vsel %vm1942_vm5, %v4680_v29, 0  ;;  %v16540_v11 = vld [vmem:[%s23953_s12 + $0x1c] sm:$0xf] }
 0xc5a   :  { %20264 = vrcp.f32 %v4646_v5  ;;  %v5329_v27 = vsel %vm1942_vm5, %v16540_v11, 0 }
 0xc5b   :  { %18527 = vmatmul.mubr.msk.bf16.vlgmr.msra.gmra.mxu0 %vm1438_vm4, %v4668_v25 }
 0xc5c   :  { %18537 = vmatpush3.bf16.msra.mxu0 %v4870_v19  ;;  %18538 = vmatprep.mubr.msk.bf16.mxu0 %vm20442_vm1, %v20441_v0 }
 0xc5d   :  { %18548 = vmatprep.subr.bf16.mxu0 %v20441_v0 }
 0xc5e   :  { %v20259_v31 = vpop.eup %20258 }
 0xc5f   :  { %v20261_v3 = vpop.eup %20260  ;;  %v4653_v35 = vmul.f32 %v20259_v31, %v21521_v34 }
 0xc60   :  { %v4659_v50 = vmul.f32 %v20261_v3, %v21523_v39  ;;  %v4643_v36 = vpop.xlane.xlu1 %4642 }
 0xc61   :  { %v4667_v63 = vpack.c.bf16 %v4653_v35, %v4653_v35  ;;  %20266 = vrcp.f32 %v4643_v36 }
 0xc62   :  { %v4670_v13 = vpack.c.bf16 %v4659_v50, %v4659_v50 }
 0xc63   :  { %18521 = vmatmul.mubr.msk.bf16.vlgmr.msra.gmra.mxu1 %vm1438_vm4, %v4667_v63 }
 0xc64   :  { %18531 = vmatpush3.bf16.msra.mxu1 %v4824_v58  ;;  %18539 = vmatmul.mubr.msk.bf16.vlgmr.msra.gmra.mxu0 %vm1438_vm4, %v4670_v13 }
 0xc65   :  { %18549 = vmatpush3.bf16.msra.mxu0 %v4962_v14  ;;  %18532 = vmatprep.mubr.msk.bf16.mxu1 %vm20442_vm1, %v20441_v0 }
 0xc66   :  { %v20263_v34 = vpop.eup %20262  ;;  %18542 = vmatprep.subr.bf16.mxu1 %v20441_v0  ;;  %18550 = vmatprep.mubr.msk.bf16.mxu0 %vm20442_vm1, %v20441_v0 }
 0xc67   :  { %v20265_v39 = vpop.eup %20264  ;;  %v4657_v41 = vmul.f32 %v20263_v34, %v21529_v43  ;;  %18560 = vmatprep.subr.bf16.mxu0 %v20441_v0 }
 0xc68   :  { %v4663_v40 = vmul.f32 %v20265_v39, %v21531_v4  ;;  %v4649_v38 = vpop.xlane.xlu1 %4648  ;;  %v4681_v4 = vpack.c.bf16 %v4173_v47, %v4173_v47 }
 0xc69   :  { %v4669_v56 = vpack.c.bf16 %v4657_v41, %v4657_v41  ;;  %20268 = vrcp.f32 %v4649_v38 }
 0xc6a   :  { %v4672_v42 = vpack.c.bf16 %v4663_v40, %v4663_v40  ;;  %v5008_v45 = vsel %vm1942_vm5, %v4681_v4, 0 }
 0xc6b   :  { %18533 = vmatmul.mubr.msk.bf16.vlgmr.msra.gmra.mxu1 %vm1438_vm4, %v4669_v56 }
 0xc6c   :  { %18543 = vmatpush3.bf16.msra.mxu1 %v4916_v46  ;;  %18551 = vmatmul.mubr.msk.bf16.vlgmr.msra.gmra.mxu0 %vm1438_vm4, %v4672_v42 }
 0xc6d   :  { %18544 = vmatprep.mubr.msk.bf16.mxu1 %vm20442_vm1, %v20441_v0  ;;  %18554 = vmatprep.subr.bf16.mxu1 %v20441_v0 }
 0xc6e   :  { %v20267_v43 = vpop.eup %20266  ;;  %18562 = vmatprep.mubr.msk.bf16.mxu0 %vm20442_vm1, %v20441_v0 }
 0xc6f   :  { %v4661_v12 = vmul.f32 %v20267_v43, %v21537_v48  ;;  %v16537_v48 = vld [vmem:[%s23953_s12 + $0x10] sm:$0xf] }
 0xc70   :  { %v5062_v44 = vsel %vm1942_vm5, %v16537_v48, 0 }
 0xc71   :  { %v4671_v30 = vpack.c.bf16 %v4661_v12, %v4661_v12  ;;  %18561 = vmatpush3.bf16.msra.mxu0 %v5062_v44 }
 0xc72   :  { %18572 = vmatprep.subr.bf16.mxu0 %v20441_v0 }
 0xc73   :  { %18545 = vmatmul.mubr.msk.bf16.vlgmr.msra.gmra.mxu1 %vm1438_vm4, %v4671_v30 }
 0xc74   :  { %18555 = vmatpush3.bf16.msra.mxu1 %v5008_v45  ;;  %18556 = vmatprep.mubr.msk.bf16.mxu1 %vm20442_vm1, %v20441_v0 }
 0xc75   :  { %18566 = vmatprep.subr.bf16.mxu1 %v20441_v0 }
 0xc76   :  { %v20269_v37 = vpop.eup %20268 }
 0xc77   :  { %v4665_v6 = vmul.f32 %v20269_v37, %v21541_v1  ;;  %v16538_v1 = vld [vmem:[%s23953_s12 + $0x14] sm:$0xf] }
 0xc78   :  { %v5151_v51 = vsel %vm1942_vm5, %v16538_v1, 0 }
 0xc79   :  { %v4673_v52 = vpack.c.bf16 %v4665_v6, %v4665_v6 }
 0xc7b   :  { %18557 = vmatmul.mubr.msk.bf16.vlgmr.msra.gmra.mxu1 %vm1438_vm4, %v4673_v52 }
 0xc7c   :  { %18568 = vmatprep.mubr.msk.bf16.mxu1 %vm20442_vm1, %v20441_v0  ;;  %18567 = vmatpush3.bf16.msra.mxu1 %v5062_v44 }
 0xc7d   :  { %18578 = vmatprep.subr.bf16.mxu1 %v20441_v0 }
 0xd13   :  { %v4722_v54 = vpop.f32.mrf.mxu0 }
 0xd14   :  { %v5050_v16 = vpack.c.bf16 %v4722_v54, %v4722_v54 }
 0xd15   :  { %v18516_v55 = vpop.f32.mrf.mxu0 }
 0xd16   :  { %18563 = vmatmul.mubr.msk.bf16.vlgmr.msra.gmra.mxu0 %vm1438_vm4, %v5050_v16 }
 0xd17   :  { %v4725_v21 = vpop.f32.mrf.mxu0  ;;  %18573 = vmatpush3.bf16.msra.mxu0 %v5151_v51  ;;  %18574 = vmatprep.mubr.msk.bf16.mxu0 %vm20442_vm1, %v20441_v0 }
 0xd18   :  { %18584 = vmatprep.subr.bf16.mxu0 %v20441_v0 }
 0xd19   :  { %v18517_v17 = vpop.f32.mrf.mxu0 }
 0xd1b   :  { %v4814_v23 = vpop.f32.mrf.mxu0 }
 0xd1c   :  { %v5052_v49 = vpack.c.bf16 %v4814_v23, %v4814_v23 }
 0xd1d   :  { %v18528_v59 = vpop.f32.mrf.mxu0 }
 0xd1e   :  { %18575 = vmatmul.mubr.msk.bf16.vlgmr.msra.gmra.mxu0 %vm1438_vm4, %v5052_v49  ;;  %v21656_v59 = vld [vmem:[%s23954_s30 + $0x8] sm:$0x3f] }
 0xd1f   :  { %v4817_v24 = vpop.f32.mrf.mxu0  ;;  %18585 = vmatpush3.bf16.msra.mxu0 %v5240_v53  ;;  %18586 = vmatprep.mubr.msk.bf16.mxu0 %vm20442_vm1, %v20441_v0 }
 0xd20   :  { %18596 = vmatprep.subr.bf16.mxu0 %v20441_v0 }
 0xd21   :  { %v18529_v60 = vpop.f32.mrf.mxu0 }
 0xd23   :  { %v4768_v20 = vpop.f32.mrf.mxu1 }
 0xd24   :  { %v5051_v25 = vpack.c.bf16 %v4768_v20, %v4768_v20  ;;  %v4906_v5 = vpop.f32.mrf.mxu0 }
 0xd25   :  { %v5054_v19 = vpack.c.bf16 %v4906_v5, %v4906_v5  ;;  %v18522_v26 = vpop.f32.mrf.mxu1  ;;  %v5431_v5 = vrot.slane %v21656_v59, %v20612_v10 }
 0xd26   :  { %v18540_v31 = vpop.f32.mrf.mxu0  ;;  %18569 = vmatmul.mubr.msk.bf16.vlgmr.msra.gmra.mxu1 %vm1438_vm4, %v5051_v25 }
 0xd27   :  { %18587 = vmatmul.mubr.msk.bf16.vlgmr.msra.gmra.mxu0 %vm1438_vm4, %v5054_v19  ;;  %v4771_v3 = vpop.f32.mrf.mxu1  ;;  %18579 = vmatpush3.bf16.msra.mxu1 %v5151_v51 }
 0xd28   :  { %v4909_v32 = vpop.f32.mrf.mxu0  ;;  %18597 = vmatpush3.bf16.msra.mxu0 %v5329_v27  ;;  %18580 = vmatprep.mubr.msk.bf16.mxu1 %vm20442_vm1, %v20441_v0 }
 0xd29   :  { %v18523_v35 = vpop.f32.mrf.mxu1  ;;  %18598 = vmatprep.mubr.msk.bf16.mxu0 %vm20442_vm1, %v20441_v0  ;;  %18590 = vmatprep.subr.bf16.mxu1 %v20441_v0 }
 0xd2a   :  { %v18541_v29 = vpop.f32.mrf.mxu0  ;;  %18608 = vmatprep.subr.bf16.mxu0 %v20441_v0 }
 0xd2b   :  { %v4860_v50 = vpop.f32.mrf.mxu1 }
 0xd2c   :  { %v5053_v36 = vpack.c.bf16 %v4860_v50, %v4860_v50  ;;  %v4998_v63 = vpop.f32.mrf.mxu0 }
 0xd2d   :  { %v5056_v13 = vpack.c.bf16 %v4998_v63, %v4998_v63  ;;  %v18534_v58 = vpop.f32.mrf.mxu1 }
 0xd2e   :  { %v18552_v7 = vpop.f32.mrf.mxu0  ;;  %18581 = vmatmul.mubr.msk.bf16.vlgmr.msra.gmra.mxu1 %vm1438_vm4, %v5053_v36 }
 0xd2f   :  { %18599 = vmatmul.mubr.msk.bf16.vlgmr.msra.gmra.mxu0 %vm1438_vm4, %v5056_v13  ;;  %v4863_v14 = vpop.f32.mrf.mxu1  ;;  %18591 = vmatpush3.bf16.msra.mxu1 %v5240_v53 }
 0xd30   :  { %v5001_v34 = vpop.f32.mrf.mxu0  ;;  %18592 = vmatprep.mubr.msk.bf16.mxu1 %vm20442_vm1, %v20441_v0  ;;  %18602 = vmatprep.subr.bf16.mxu1 %v20441_v0 }
 0xd31   :  { %v18535_v39 = vpop.f32.mrf.mxu1  ;;  %18612 = vmatprep.mubr.msk.bf16.mxu0 %vm20442_vm1, %v20441_v0 }
 0xd32   :  { %v18553_v28 = vpop.f32.mrf.mxu0 }
 0xd33   :  { %v4952_v41 = vpop.f32.mrf.mxu1 }
 0xd34   :  { %v5055_v40 = vpack.c.bf16 %v4952_v41, %v4952_v41 }
 0xd35   :  { %v18546_v38 = vpop.f32.mrf.mxu1 }
 0xd36   :  { %18593 = vmatmul.mubr.msk.bf16.vlgmr.msra.gmra.mxu1 %vm1438_vm4, %v5055_v40 }
 0xd37   :  { %v4955_v56 = vpop.f32.mrf.mxu1  ;;  %18603 = vmatpush3.bf16.msra.mxu1 %v5329_v27  ;;  %18604 = vmatprep.mubr.msk.bf16.mxu1 %vm20442_vm1, %v20441_v0 }
 0xd38   :  { %18616 = vmatprep.subr.bf16.mxu1 %v20441_v0 }
 0xd39   :  { %v18547_v42 = vpop.f32.mrf.mxu1 }
 0xd3b   :  { %v5044_v46 = vpop.f32.mrf.mxu1 }
 0xd3c   :  { %v5057_v47 = vpack.c.bf16 %v5044_v46, %v5044_v46 }
 0xd3d   :  { %v18558_v43 = vpop.f32.mrf.mxu1 }
 0xd3e   :  { %18605 = vmatmul.mubr.msk.bf16.vlgmr.msra.gmra.mxu1 %vm1438_vm4, %v5057_v47 }
 0xd3f   :  { %v5047_v4 = vpop.f32.mrf.mxu1  ;;  %18624 = vmatprep.mubr.msk.bf16.mxu1 %vm20442_vm1, %v20441_v0 }
 0xd41   :  { %v18559_v12 = vpop.f32.mrf.mxu1 }
 0xdd6   :  { %v5098_v30 = vpop.f32.mrf.mxu0 }
 0xdd7   :  { %v5414_v23 = vsel %vm323_vm3, %v5098_v30, 0.0 }
 0xdd8   :  { %v18564_v45 = vpop.f32.mrf.mxu0 }
 0xdda   :  { %v5101_v37 = vpop.f32.mrf.mxu0 }
 0xddc   :  { %v18565_v6 = vpop.f32.mrf.mxu0 }
 0xdde   :  { %v5187_v52 = vpop.f32.mrf.mxu0 }
 0xddf   :  { %v5415_v21 = vsel %vm323_vm3, %v5187_v52, 0.0 }
 0xde0   :  { %v18576_v48 = vpop.f32.mrf.mxu0  ;;  %v5416_v24 = vadd.f32 %v5415_v21, %v5414_v23 }
 0xde2   :  { %v5190_v44 = vpop.f32.mrf.mxu0 }
 0xde4   :  { %v18577_v1 = vpop.f32.mrf.mxu0 }
 0xde6   :  { %v5141_v54 = vpop.f32.mrf.mxu1 }
 0xde7   :  { %v5276_v16 = vpop.f32.mrf.mxu0  ;;  %v5421_v34 = vsel %vm323_vm3, %v5141_v54, 0.0 }
 0xde8   :  { %v18570_v51 = vpop.f32.mrf.mxu1  ;;  %v5417_v49 = vsel %vm323_vm3, %v5276_v16, 0.0 }
 0xde9   :  { %v18588_v55 = vpop.f32.mrf.mxu0  ;;  %v5418_v20 = vadd.f32 %v5417_v49, %v5416_v24  ;;  %v20083_v51 = vld [vmem:[%s23955_s9 + $0x10] sm:$0xff]  }
 0xdea   :  { %v5144_v17 = vpop.f32.mrf.mxu1  ;;  %v20084_v55 = vld [vmem:[%s23956_s10 + $0x38] sm:$0xff]  }
 0xdeb   :  { %v5279_v62 = vpop.f32.mrf.mxu0  ;;  %18617 = vmatpush3.bf16.msra.mxu1 %v20084_v55  ;;  %v20094_v55 = vld [vmem:[%s23909_s14 + $0x38] sm:$0xff]  }
 0xdec   :  { %v18571_v53 = vpop.f32.mrf.mxu1  ;;  %18618 = vmatprep.subr.bf16.mxu1 %v20441_v0 }
 0xded   :  { %v18589_v60 = vpop.f32.mrf.mxu0 }
 0xdee   :  { %v5230_v11 = vpop.f32.mrf.mxu1  ;;  %v5465_v60 = vrot.slane %v21656_v59, %v21119_v57 }
 0xdef   :  { %v5365_v25 = vpop.f32.mrf.mxu0  ;;  %v5422_v7 = vsel %vm323_vm3, %v5230_v11, 0.0 }
 0xdf0   :  { %v5419_v19 = vsel %vm323_vm3, %v5365_v25, 0.0  ;;  %v18582_v26 = vpop.f32.mrf.mxu1  ;;  %v5423_v28 = vadd.f32 %v5422_v7, %v5421_v34  ;;  %v20089_v7 = vld [vmem:[%s23909_s14] sm:$0xff]  }
 0xdf1   :  { %v5420_v27 = vadd.f32 %v5419_v19, %v5418_v20  ;;  %v18600_v31 = vpop.f32.mrf.mxu0  ;;  %v5471_v19 = vrot.slane %v21656_v59, %v21124_v22  ;;  %v21703_v59 = vld [vmem:[%s23908_s1] sm:$0xff] }
 0xdf2   :  { %v5233_v3 = vpop.f32.mrf.mxu1  ;;  %vm92_vm7 = vcmp.ge.f32.partialorder %v21703_v59, -1.0 }
 0xdf3   :  { %v5432_v32 = vadd.f32 %v5431_v5, %v5420_v27  ;;  %v5368_v35 = vpop.f32.mrf.mxu0  ;;  %v5668_v27 = vld [vmem:[%s23907_s5] sm:$0x3] }
 0xdf4   :  { %v18583_v29 = vpop.f32.mrf.mxu1 }
 0xdf5   :  { %v18601_v50 = vpop.f32.mrf.mxu0  ;;  %v5434_v36 = vadd.f32 %v5432_v32, %v21184_v61  ;;  %v5678_v32 = vsel %vm125_vm0, %v5668_v27, 0  ;;  %v21708_v29 = vld [vmem:[%s23908_s1 + $0x8] sm:$0xff]  ;;  %v20109_v27 = vld [vmem:[%s23909_s14 + $0xa0] sm:$0xff]  }
 0xdf6   :  { %v5319_v63 = vpop.f32.mrf.mxu1  ;;  %v5669_v50 = vpack.c.bf16 %v21708_v29, %v21703_v59  ;;  %vm93_vm8 = vcmp.ge.f32.partialorder %v21708_v29, -1.0 }
 0xdf7   :  { %v5436_v13 = vsel %vm323_vm3, %v5434_v36, 0.0  ;;  %v5424_v39 = vsel %vm323_vm3, %v5319_v63, 0.0  ;;  %v20086_v63 = vld [vmem:[%s23956_s10 + $0x28] sm:$0xff]  }
 0xdf8   :  { %5437 = vadd.xlane.f32.xlu0 %v5436_v13  ;;  %v18594_v58 = vpop.f32.mrf.mxu1  ;;  %v5425_v40 = vadd.f32 %v5424_v39, %v5423_v28  ;;  %v20087_v13 = vld [vmem:[%s23956_s10 + $0x20] sm:$0xff]  }
 0xdf9   :  { %v20088_v58 = vld [vmem:[%s23909_s14 + $0x8] sm:$0xff]  }
 0xdfa   :  { %v5322_v14 = vpop.f32.mrf.mxu1 }
 0xdfb   :  { %v16638_v14 = vld [vmem:[%s23906_s11 + $0x1] ss:$0 sm:$0xff] }
 0xdfc   :  { %v18595_v41 = vpop.f32.mrf.mxu1 }
 0xdfe   :  { %v5408_v38 = vpop.f32.mrf.mxu1 }
 0xdff   :  { %v5426_v56 = vsel %vm323_vm3, %v5408_v38, 0.0  ;;  %v20432_v38 = vld [vmem:[%s23949_s27] sm:$0x3] }
 0xe00   :  { %v5427_v42 = vadd.f32 %v5426_v56, %v5425_v40  ;;  %v18606_v61 = vpop.f32.mrf.mxu1  ;;  %v5673_v56 = vrot.slane %v20432_v38, %v21119_v57 }
 0xe02   :  { %v5433_v46 = vadd.f32 %v5431_v5, %v5427_v42  ;;  %v5411_v47 = vpop.f32.mrf.mxu1 }
 0xe04   :  { %v18607_v43 = vpop.f32.mrf.mxu1  ;;  %v5435_v4 = vadd.f32 %v5433_v46, %v21200_v2  ;;  %v20082_v2 = vld [vmem:[%s23955_s9 + $0x18] sm:$0xff]  }
 0xe05   :  { %18609 = vmatpush3.bf16.msra.mxu0 %v20082_v2  ;;  %v20092_v2 = vld [vmem:[%s23909_s14 + $0x28] sm:$0xff]  }
 0xe06   :  { %v5439_v12 = vsel %vm323_vm3, %v5435_v4, 0.0  ;;  %18610 = vmatprep.subr.bf16.mxu0 %v20441_v0 }
 0xe07   :  { %5440 = vadd.xlane.f32.xlu1 %v5439_v12 }
 0xe09   :  { %18611 = vmatpush3.bf16.msra.mxu0 %v20083_v51  ;;  %v20093_v51 = vld [vmem:[%s23909_s14 + $0x20] sm:$0xff]  }
 0xe0a   :  { %18628 = vmatprep.subr.bf16.mxu0 %v20441_v0 }
 0xe81   :  { %v5438_v30 = vpop.xlane.xlu0 %5437 }
 0xe82   :  { %v5442_v45 = vmul.f32 0.03125, %v5438_v30  ;;  %v20433_v30 = vld [vmem:[%s23950_s28] sm:$0xff] }
 0xe84   :  { %v5444_v37 = vsub.f32 %v5434_v36, %v5442_v45  ;;  %v20085_v36 = vld [vmem:[%s23956_s10 + $0x30] sm:$0xff]  }
 0xe85   :  { %18619 = vmatpush3.bf16.msra.mxu1 %v20085_v36 }
 0xe86   :  { %v5446_v6 = vmul.f32 %v5444_v37, %v5444_v37  ;;  %18620 = vmatprep.subr.bf16.mxu1 %v20441_v0 }
 0xe88   :  { %v5448_v52 = vsel %vm323_vm3, %v5446_v6, 0.0  ;;  %v20090_v6 = vld [vmem:[%s23909_s14 + $0x18] sm:$0xff]  }
 0xe89   :  { %5449 = vadd.xlane.f32.xlu0 %v5448_v52  ;;  %18621 = vmatpush3.bf16.msra.mxu1 %v20086_v63  ;;  %v95_v63 = vsel %vm93_vm8, 1.0, %v20441_v0 }
 0xe8a   :  { %18622 = vmatprep.subr.bf16.mxu1 %v20441_v0 }
 0xe8d   :  { %18623 = vmatpush3.bf16.msra.mxu1 %v20087_v13  ;;  %v100_v13 = vsel %vm96_vm2, %v95_v63, inf }
 0xe8e   :  { %18642 = vmatprep.subr.bf16.mxu1 %v20441_v0 }
 0xe90   :  { %v5441_v48 = vpop.xlane.xlu1 %5440 }
 0xe91   :  { %v5443_v44 = vmul.f32 0.03125, %v5441_v48 }
 0xe93   :  { %v5445_v1 = vsub.f32 %v5435_v4, %v5443_v44 }
 0xe95   :  { %v5447_v54 = vmul.f32 %v5445_v1, %v5445_v1 }
 0xe97   :  { %v5451_v16 = vsel %vm323_vm3, %v5447_v54, 0.0  ;;  %v20091_v54 = vld [vmem:[%s23909_s14 + $0x10] sm:$0xff]  }
 0xe98   :  { %5452 = vadd.xlane.f32.xlu1 %v5451_v16 }
 0xe9c   :  { %101 = vmin.xlane.f32.xlu1 %v100_v13 }
 0xf12   :  { %v5450_v21 = vpop.xlane.xlu0 %5449 }
 0xf13   :  { %v5454_v17 = vmul.f32 0.03125, %v5450_v21  ;;  %v20095_v21 = vld [vmem:[%s23909_s14 + $0x30] sm:$0xff]  }
 0xf15   :  { %v5456_v62 = vadd.f32 1e-05, %v5454_v17  ;;  %v20096_v17 = vld [vmem:[%s23909_s14 + $0x48] sm:$0xff]  }
 0xf17   :  { %20270 = vrsqrt.f32 %v5456_v62  ;;  %v20097_v62 = vld [vmem:[%s23909_s14 + $0x40] sm:$0xff]  }
 0xf21   :  { %v5453_v23 = vpop.xlane.xlu1 %5452 }
 0xf22   :  { %v5455_v49 = vmul.f32 0.03125, %v5453_v23  ;;  %v20098_v23 = vld [vmem:[%s23909_s14 + $0x58] sm:$0xff]  }
 0xf24   :  { %v5457_v53 = vadd.f32 1e-05, %v5455_v49  ;;  %v20271_v24 = vpop.eup %20270  ;;  %v20099_v49 = vld [vmem:[%s23909_s14 + $0x50] sm:$0xff]  }
 0xf25   :  { %v5460_v11 = vmul.f32 %v20271_v24, %v5444_v37  ;;  %v20101_v24 = vld [vmem:[%s23909_s14 + $0x60] sm:$0xff]  }
 0xf26   :  { %20272 = vrsqrt.f32 %v5457_v53  ;;  %v20100_v53 = vld [vmem:[%s23909_s14 + $0x68] sm:$0xff]  }
 0xf27   :  { %v5466_v25 = vmul.f32 %v5465_v60, %v5460_v11  ;;  %v20103_v11 = vld [vmem:[%s23909_s14 + $0x70] sm:$0xff]  }
 0xf29   :  { %v21690_v31 = vadd.f32 %v5471_v19, %v5466_v25  ;;  %v20105_v25 = vld [vmem:[%s23909_s14 + $0x80] sm:$0xff]  }
 0xf33   :  { %v20273_v20 = vpop.eup %20272 }
 0xf34   :  { %v5461_v5 = vmul.f32 %v20273_v20, %v5445_v1  ;;  %v20104_v20 = vld [vmem:[%s23909_s14 + $0x88] sm:$0xff]  }
 0xf36   :  { %v5467_v26 = vmul.f32 %v5465_v60, %v5461_v5  ;;  %v20102_v60 = vld [vmem:[%s23909_s14 + $0x78] sm:$0xff]  }
 0xf37   :  { %v20106_v5 = vld [vmem:[%s23909_s14 + $0x98] sm:$0xff]  }
 0xf38   :  { %v21692_v3 = vadd.f32 %v5471_v19, %v5467_v26  ;;  %v20107_v19 = vld [vmem:[%s23909_s14 + $0x90] sm:$0xff]   ;;  %v20108_v26 = vld [vmem:[%s23909_s14 + $0xa8] sm:$0xff]  }
 0xf3a   :  { %v5490_v35 = vpack.c.bf16 %v21692_v3, %v21690_v31 }
 0xf3c   :  { %18613 = vmatmul.mubr.msk.bf16.vlgmr.msra.gmra.mxu0 %vm323_vm3, %v5490_v35  ;;  %v20111_v35 = vld [vmem:[%s23909_s14 + $0xb0] sm:$0xff]  }
 0xf3d   :  { %18629 = vmatpush3.bf16.msra.mxu0 %v5678_v32  ;;  %18630 = vmatprep.mubr.msk.bf16.mxu0 %vm20442_vm1, %v20441_v0  ;;  %v20110_v32 = vld [vmem:[%s23909_s14 + $0xb8] sm:$0xff]  }
 0xf3e   :  { %18634 = vmatprep.subr.bf16.mxu0 %v20441_v0 }
 0xf44   :  { %18631 = vmatmul.mubr.msk.bf16.vlgmr.msra.gmra.mxu0 %vm96_vm2, %v5669_v50  ;;  %v94_v50 = vsel %vm92_vm7, 1.0, %v20441_v0 }
 0xf45   :  { %18638 = vmatprep.mubr.msk.bf16.mxu0 %vm20442_vm1, %v20441_v0  ;;  %18635 = vmatpush3.bf16.msra.mxu0 %v20088_v58  ;;  %v97_v36 = vsel %vm96_vm2, %v94_v50, inf }
 0xf46   :  { %18636 = vmatprep.subr.bf16.mxu0 %v20441_v0  ;;  %98 = vmin.xlane.f32.xlu0 %v97_v36  ;;  %v16653_v36 = vld [vmem:[%s23910_s15 + $0x5] ss:$0 sm:$0xff] }
 0xf49   :  { %18637 = vmatpush3.bf16.msra.mxu0 %v20089_v7 }
 0xf4a   :  { %18650 = vmatprep.subr.bf16.mxu0 %v20441_v0 }
 0xffc   :  { %v5546_v34 = vpop.f32.mrf.mxu0 }
 0xffd   :  { %v5547_v28 = vadd.f32 %v16638_v14, %v5546_v34 }
 0xffe   :  { %v18614_v39 = vpop.f32.mrf.mxu0 }
 0xfff   :  { %v5553_v61 = vmax.f32 %v5547_v28, 0.0 }
0x1000   :  { %v5549_v41 = vpop.f32.mrf.mxu0 }
0x1001   :  { %v5550_v40 = vadd.f32 %v16638_v14, %v5549_v41 }
0x1002   :  { %v18615_v42 = vpop.f32.mrf.mxu0 }
0x1003   :  { %v5554_v46 = vmax.f32 %v5550_v40, 0.0 }
0x1004   :  { %v5714_v47 = vpop.f32.mrf.mxu0 }
0x1005   :  { %v5555_v43 = vpack.c.bf16 %v5554_v46, %v5553_v61  ;;  %v5715_v4 = vadd.f32 %v5714_v47, %v5673_v56 }
0x1006   :  { %v18632_v12 = vpop.f32.mrf.mxu0 }
0x1007   :  { %v21746_v45 = vadd.f32 %v20433_v30, %v5715_v4  ;;  %18625 = vmatmul.mubr.msk.bf16.vlgmr.msra.gmra.mxu1 %vm2840_vm6, %v5555_v43 }
0x1008   :  { %v5717_v37 = vpop.f32.mrf.mxu0  ;;  %18643 = vmatpush3.bf16.msra.mxu1 %v20088_v58  ;;  %18646 = vmatprep.mubr.msk.bf16.mxu1 %vm20442_vm1, %v20441_v0 }
0x1009   :  { %v21756_v52 = vpack.c.bf16 %v21746_v45, %v21746_v45  ;;  %v5718_v48 = vadd.f32 %v5717_v37, %v5673_v56  ;;  %18644 = vmatprep.subr.bf16.mxu1 %v20441_v0 }
0x100a   :  { %v18633_v44 = vpop.f32.mrf.mxu0 }
0x100b   :  { %v21759_v1 = vadd.f32 %v20433_v30, %v5718_v48  ;;  %18639 = vmatmul.mubr.msk.bf16.vlgmr.msra.gmra.mxu0 %vm323_vm3, %v21756_v52 }
0x100c   :  { %18645 = vmatpush3.bf16.msra.mxu1 %v20089_v7  ;;  %18651 = vmatpush3.bf16.msra.mxu0 %v20090_v6 }
0x100d   :  { %v21768_v16 = vpack.c.bf16 %v21759_v1, %v21759_v1  ;;  %18652 = vmatprep.subr.bf16.mxu0 %v20441_v0  ;;  %18658 = vmatprep.subr.bf16.mxu1 %v20441_v0 }
0x100e   :  { %18654 = vmatprep.mubr.msk.bf16.mxu0 %vm20442_vm1, %v20441_v0 }
0x100f   :  { %18647 = vmatmul.mubr.msk.bf16.vlgmr.msra.gmra.mxu1 %vm323_vm3, %v21768_v16 }
0x1010   :  { %18653 = vmatpush3.bf16.msra.mxu0 %v20091_v54  ;;  %18659 = vmatpush3.bf16.msra.mxu1 %v20090_v6 }
0x1011   :  { %18660 = vmatprep.subr.bf16.mxu1 %v20441_v0  ;;  %18666 = vmatprep.subr.bf16.mxu0 %v20441_v0 }
0x1012   :  { %18662 = vmatprep.mubr.msk.bf16.mxu1 %vm20442_vm1, %v20441_v0 }
0x1013   :  { %18655 = vmatmul.mubr.msk.bf16.vlgmr.msra.gmra.mxu0 %vm323_vm3, %v21756_v52 }
0x1014   :  { %18661 = vmatpush3.bf16.msra.mxu1 %v20091_v54  ;;  %18667 = vmatpush3.bf16.msra.mxu0 %v20092_v2 }
0x1015   :  { %18668 = vmatprep.subr.bf16.mxu0 %v20441_v0  ;;  %18674 = vmatprep.subr.bf16.mxu1 %v20441_v0 }
0x1016   :  { %18670 = vmatprep.mubr.msk.bf16.mxu0 %vm20442_vm1, %v20441_v0 }
0x1017   :  { %18663 = vmatmul.mubr.msk.bf16.vlgmr.msra.gmra.mxu1 %vm323_vm3, %v21768_v16 }
0x1018   :  { %18669 = vmatpush3.bf16.msra.mxu0 %v20093_v51  ;;  %18675 = vmatpush3.bf16.msra.mxu1 %v20092_v2 }
0x1019   :  { %18676 = vmatprep.subr.bf16.mxu1 %v20441_v0  ;;  %18682 = vmatprep.subr.bf16.mxu0 %v20441_v0 }
0x101a   :  { %18678 = vmatprep.mubr.msk.bf16.mxu1 %vm20442_vm1, %v20441_v0 }
0x101b   :  { %18671 = vmatmul.mubr.msk.bf16.vlgmr.msra.gmra.mxu0 %vm323_vm3, %v21756_v52 }
0x101c   :  { %18677 = vmatpush3.bf16.msra.mxu1 %v20093_v51  ;;  %18683 = vmatpush3.bf16.msra.mxu0 %v20094_v55 }
0x101d   :  { %18684 = vmatprep.subr.bf16.mxu0 %v20441_v0  ;;  %18690 = vmatprep.subr.bf16.mxu1 %v20441_v0 }
0x101e   :  { %18686 = vmatprep.mubr.msk.bf16.mxu0 %vm20442_vm1, %v20441_v0 }
0x101f   :  { %18679 = vmatmul.mubr.msk.bf16.vlgmr.msra.gmra.mxu1 %vm323_vm3, %v21768_v16 }
0x1020   :  { %18685 = vmatpush3.bf16.msra.mxu0 %v20095_v21  ;;  %18691 = vmatpush3.bf16.msra.mxu1 %v20094_v55 }
0x1021   :  { %18692 = vmatprep.subr.bf16.mxu1 %v20441_v0  ;;  %18698 = vmatprep.subr.bf16.mxu0 %v20441_v0 }
0x1022   :  { %18694 = vmatprep.mubr.msk.bf16.mxu1 %vm20442_vm1, %v20441_v0 }
0x1023   :  { %18687 = vmatmul.mubr.msk.bf16.vlgmr.msra.gmra.mxu0 %vm323_vm3, %v21756_v52 }
0x1024   :  { %18693 = vmatpush3.bf16.msra.mxu1 %v20095_v21  ;;  %18699 = vmatpush3.bf16.msra.mxu0 %v20096_v17 }
0x1025   :  { %18700 = vmatprep.subr.bf16.mxu0 %v20441_v0  ;;  %18706 = vmatprep.subr.bf16.mxu1 %v20441_v0 }
0x1026   :  { %18702 = vmatprep.mubr.msk.bf16.mxu0 %vm20442_vm1, %v20441_v0 }
0x1027   :  { %18695 = vmatmul.mubr.msk.bf16.vlgmr.msra.gmra.mxu1 %vm323_vm3, %v21768_v16 }
0x1028   :  { %18701 = vmatpush3.bf16.msra.mxu0 %v20097_v62  ;;  %18707 = vmatpush3.bf16.msra.mxu1 %v20096_v17 }
0x1029   :  { %18708 = vmatprep.subr.bf16.mxu1 %v20441_v0  ;;  %18714 = vmatprep.subr.bf16.mxu0 %v20441_v0 }
0x102a   :  { %18710 = vmatprep.mubr.msk.bf16.mxu1 %vm20442_vm1, %v20441_v0 }
0x102b   :  { %18703 = vmatmul.mubr.msk.bf16.vlgmr.msra.gmra.mxu0 %vm323_vm3, %v21756_v52 }
0x102c   :  { %18709 = vmatpush3.bf16.msra.mxu1 %v20097_v62  ;;  %18715 = vmatpush3.bf16.msra.mxu0 %v20098_v23 }
0x102d   :  { %18716 = vmatprep.subr.bf16.mxu0 %v20441_v0  ;;  %18722 = vmatprep.subr.bf16.mxu1 %v20441_v0 }
0x102e   :  { %18718 = vmatprep.mubr.msk.bf16.mxu0 %vm20442_vm1, %v20441_v0 }
0x102f   :  { %18711 = vmatmul.mubr.msk.bf16.vlgmr.msra.gmra.mxu1 %vm323_vm3, %v21768_v16 }
0x1030   :  { %18717 = vmatpush3.bf16.msra.mxu0 %v20099_v49  ;;  %18723 = vmatpush3.bf16.msra.mxu1 %v20098_v23 }
0x1031   :  { %18724 = vmatprep.subr.bf16.mxu1 %v20441_v0  ;;  %18730 = vmatprep.subr.bf16.mxu0 %v20441_v0 }
0x1032   :  { %18726 = vmatprep.mubr.msk.bf16.mxu1 %vm20442_vm1, %v20441_v0 }
0x1033   :  { %18719 = vmatmul.mubr.msk.bf16.vlgmr.msra.gmra.mxu0 %vm323_vm3, %v21756_v52 }
0x1034   :  { %18725 = vmatpush3.bf16.msra.mxu1 %v20099_v49  ;;  %18731 = vmatpush3.bf16.msra.mxu0 %v20100_v53  ;;  %v16652_v49 = vld [vmem:[%s23910_s15 + $0x4] ss:$0 sm:$0xff] }
0x1035   :  { %18732 = vmatprep.subr.bf16.mxu0 %v20441_v0  ;;  %18738 = vmatprep.subr.bf16.mxu1 %v20441_v0 }
0x1036   :  { %18734 = vmatprep.mubr.msk.bf16.mxu0 %vm20442_vm1, %v20441_v0 }
0x1037   :  { %18727 = vmatmul.mubr.msk.bf16.vlgmr.msra.gmra.mxu1 %vm323_vm3, %v21768_v16 }
0x1038   :  { %18733 = vmatpush3.bf16.msra.mxu0 %v20101_v24  ;;  %18739 = vmatpush3.bf16.msra.mxu1 %v20100_v53 }
0x1039   :  { %18740 = vmatprep.subr.bf16.mxu1 %v20441_v0  ;;  %18746 = vmatprep.subr.bf16.mxu0 %v20441_v0 }
0x103a   :  { %18742 = vmatprep.mubr.msk.bf16.mxu1 %vm20442_vm1, %v20441_v0 }
0x103b   :  { %18735 = vmatmul.mubr.msk.bf16.vlgmr.msra.gmra.mxu0 %vm323_vm3, %v21756_v52 }
0x103c   :  { %18741 = vmatpush3.bf16.msra.mxu1 %v20101_v24  ;;  %18747 = vmatpush3.bf16.msra.mxu0 %v20102_v60 }
0x103d   :  { %18748 = vmatprep.subr.bf16.mxu0 %v20441_v0  ;;  %18754 = vmatprep.subr.bf16.mxu1 %v20441_v0 }
0x103e   :  { %18750 = vmatprep.mubr.msk.bf16.mxu0 %vm20442_vm1, %v20441_v0 }
0x103f   :  { %18743 = vmatmul.mubr.msk.bf16.vlgmr.msra.gmra.mxu1 %vm323_vm3, %v21768_v16 }
0x1040   :  { %18749 = vmatpush3.bf16.msra.mxu0 %v20103_v11  ;;  %18755 = vmatpush3.bf16.msra.mxu1 %v20102_v60 }
0x1041   :  { %18756 = vmatprep.subr.bf16.mxu1 %v20441_v0  ;;  %18762 = vmatprep.subr.bf16.mxu0 %v20441_v0 }
0x1042   :  { %18758 = vmatprep.mubr.msk.bf16.mxu1 %vm20442_vm1, %v20441_v0 }
0x1043   :  { %18751 = vmatmul.mubr.msk.bf16.vlgmr.msra.gmra.mxu0 %vm323_vm3, %v21756_v52 }
0x1044   :  { %18757 = vmatpush3.bf16.msra.mxu1 %v20103_v11  ;;  %18763 = vmatpush3.bf16.msra.mxu0 %v20104_v20 }
0x1045   :  { %18764 = vmatprep.subr.bf16.mxu0 %v20441_v0  ;;  %18770 = vmatprep.subr.bf16.mxu1 %v20441_v0 }
0x1046   :  { %18766 = vmatprep.mubr.msk.bf16.mxu0 %vm20442_vm1, %v20441_v0 }
0x1047   :  { %18759 = vmatmul.mubr.msk.bf16.vlgmr.msra.gmra.mxu1 %vm323_vm3, %v21768_v16 }
0x1048   :  { %18765 = vmatpush3.bf16.msra.mxu0 %v20105_v25  ;;  %18771 = vmatpush3.bf16.msra.mxu1 %v20104_v20 }
0x1049   :  { %18772 = vmatprep.subr.bf16.mxu1 %v20441_v0  ;;  %18778 = vmatprep.subr.bf16.mxu0 %v20441_v0 }
0x104a   :  { %18774 = vmatprep.mubr.msk.bf16.mxu1 %vm20442_vm1, %v20441_v0 }
0x104b   :  { %18767 = vmatmul.mubr.msk.bf16.vlgmr.msra.gmra.mxu0 %vm323_vm3, %v21756_v52 }
0x104c   :  { %18773 = vmatpush3.bf16.msra.mxu1 %v20105_v25  ;;  %18779 = vmatpush3.bf16.msra.mxu0 %v20106_v5 }
0x104d   :  { %18780 = vmatprep.subr.bf16.mxu0 %v20441_v0  ;;  %18786 = vmatprep.subr.bf16.mxu1 %v20441_v0 }
0x104e   :  { %18782 = vmatprep.mubr.msk.bf16.mxu0 %vm20442_vm1, %v20441_v0 }
0x104f   :  { %18775 = vmatmul.mubr.msk.bf16.vlgmr.msra.gmra.mxu1 %vm323_vm3, %v21768_v16 }
0x1050   :  { %18781 = vmatpush3.bf16.msra.mxu0 %v20107_v19  ;;  %18787 = vmatpush3.bf16.msra.mxu1 %v20106_v5  ;;  %v16648_v5 = vld [vmem:[%s23910_s15] ss:$0 sm:$0xff] }
0x1051   :  { %18788 = vmatprep.subr.bf16.mxu1 %v20441_v0  ;;  %18794 = vmatprep.subr.bf16.mxu0 %v20441_v0 }
0x1052   :  { %18790 = vmatprep.mubr.msk.bf16.mxu1 %vm20442_vm1, %v20441_v0 }
0x1053   :  { %18783 = vmatmul.mubr.msk.bf16.vlgmr.msra.gmra.mxu0 %vm323_vm3, %v21756_v52 }
0x1054   :  { %18789 = vmatpush3.bf16.msra.mxu1 %v20107_v19  ;;  %18795 = vmatpush3.bf16.msra.mxu0 %v20108_v26 }
0x1055   :  { %18796 = vmatprep.subr.bf16.mxu0 %v20441_v0  ;;  %18802 = vmatprep.subr.bf16.mxu1 %v20441_v0 }
0x1056   :  { %18798 = vmatprep.mubr.msk.bf16.mxu0 %vm20442_vm1, %v20441_v0 }
0x1057   :  { %18791 = vmatmul.mubr.msk.bf16.vlgmr.msra.gmra.mxu1 %vm323_vm3, %v21768_v16 }
0x1058   :  { %18797 = vmatpush3.bf16.msra.mxu0 %v20109_v27  ;;  %18803 = vmatpush3.bf16.msra.mxu1 %v20108_v26 }
0x1059   :  { %18804 = vmatprep.subr.bf16.mxu1 %v20441_v0  ;;  %18810 = vmatprep.subr.bf16.mxu0 %v20441_v0 }
0x105a   :  { %18806 = vmatprep.mubr.msk.bf16.mxu1 %vm20442_vm1, %v20441_v0 }
0x105b   :  { %18799 = vmatmul.mubr.msk.bf16.vlgmr.msra.gmra.mxu0 %vm323_vm3, %v21756_v52 }
0x105c   :  { %18805 = vmatpush3.bf16.msra.mxu1 %v20109_v27  ;;  %18811 = vmatpush3.bf16.msra.mxu0 %v20110_v32 }
0x105d   :  { %18812 = vmatprep.subr.bf16.mxu0 %v20441_v0  ;;  %18818 = vmatprep.subr.bf16.mxu1 %v20441_v0 }
0x105e   :  { %18814 = vmatprep.mubr.msk.bf16.mxu0 %vm20442_vm1, %v20441_v0 }
0x105f   :  { %18807 = vmatmul.mubr.msk.bf16.vlgmr.msra.gmra.mxu1 %vm323_vm3, %v21768_v16 }
0x1060   :  { %18813 = vmatpush3.bf16.msra.mxu0 %v20111_v35  ;;  %18819 = vmatpush3.bf16.msra.mxu1 %v20110_v32 }
0x1061   :  { %18820 = vmatprep.subr.bf16.mxu1 %v20441_v0  ;;  %18822 = vmatprep.mubr.msk.bf16.mxu1 %vm20442_vm1, %v20441_v0 }
0x1062   :  { %18826 = vmatprep.subr.bf16.mxu0 %v20441_v0 }
0x1063   :  { %18815 = vmatmul.mubr.msk.bf16.vlgmr.msra.gmra.mxu0 %vm323_vm3, %v21756_v52 }
0x1064   :  { %18821 = vmatpush3.bf16.msra.mxu1 %v20111_v35  ;;  %18828 = vmatprep.mubr.msk.bf16.mxu0 %vm20442_vm1, %v20441_v0 }
0x1065   :  { %18832 = vmatprep.subr.bf16.mxu1 %v20441_v0 }
0x1067   :  { %18823 = vmatmul.mubr.msk.bf16.vlgmr.msra.gmra.mxu1 %vm323_vm3, %v21768_v16 }
0x1068   :  { %18834 = vmatprep.mubr.msk.bf16.mxu1 %vm20442_vm1, %v20441_v0 }
0x10c7   :  { %v21975_v58 = vpop.f32.mrf.mxu1 }
0x10c9   :  { %v18626_v7 = vpop.f32.mrf.mxu1 }
0x10cb   :  { %v21977_v14 = vpop.f32.mrf.mxu1  ;;  %v5912_v34 = vpop.f32.mrf.mxu0 }
0x10cc   :  { %v5913_v63 = vadd.f32 %v16648_v5, %v5912_v34  ;;  %v16649_v34 = vld [vmem:[%s23910_s15 + $0x1] ss:$0 sm:$0xff] }
0x10cd   :  { %v18627_v39 = vpop.f32.mrf.mxu1  ;;  %v18640_v59 = vpop.f32.mrf.mxu0 }
0x10cf   :  { %v5915_v28 = vpop.f32.mrf.mxu0  ;;  %v5955_v41 = vpop.f32.mrf.mxu1 }
0x10d1   :  { %v18641_v40 = vpop.f32.mrf.mxu0  ;;  %v18648_v38 = vpop.f32.mrf.mxu1 }
0x10d3   :  { %v5958_v56 = vpop.f32.mrf.mxu1  ;;  %v21979_v42 = vpop.f32.mrf.mxu0 }
0x10d4   :  { %v6973_v56 = vpack.c.bf16 %v5913_v63, %v5913_v63 }
0x10d5   :  { %v18649_v29 = vpop.f32.mrf.mxu1  ;;  %v18656_v61 = vpop.f32.mrf.mxu0 }
0x10d6   :  { %v5956_v29 = vadd.f32 %v16648_v5, %v5955_v41  ;;  %v16654_v41 = vld [vmem:[%s23910_s15 + $0x6] ss:$0 sm:$0xff] }
0x10d7   :  { %v6010_v46 = vpop.f32.mrf.mxu0  ;;  %v21981_v47 = vpop.f32.mrf.mxu1 }
0x10d9   :  { %v18657_v43 = vpop.f32.mrf.mxu0  ;;  %v18664_v4 = vpop.f32.mrf.mxu1 }
0x10db   :  { %v6050_v12 = vpop.f32.mrf.mxu1  ;;  %v21983_v30 = vpop.f32.mrf.mxu0 }
0x10dd   :  { %v18665_v37 = vpop.f32.mrf.mxu1  ;;  %v18672_v6 = vpop.f32.mrf.mxu0 }
0x10df   :  { %v6102_v52 = vpop.f32.mrf.mxu0  ;;  %v21985_v48 = vpop.f32.mrf.mxu1 }
0x10e0   :  { %v6974_v52 = vpack.c.bf16 %v5956_v29, %v5956_v29 }
0x10e1   :  { %v18673_v44 = vpop.f32.mrf.mxu0  ;;  %v18680_v54 = vpop.f32.mrf.mxu1 }
0x10e2   :  { %v6008_v44 = vadd.f32 %v16649_v34, %v21979_v42 }
0x10e3   :  { %v6142_v16 = vpop.f32.mrf.mxu1  ;;  %v21987_v2 = vpop.f32.mrf.mxu0 }
0x10e5   :  { %v18681_v51 = vpop.f32.mrf.mxu1  ;;  %v18688_v55 = vpop.f32.mrf.mxu0 }
0x10e7   :  { %v6194_v21 = vpop.f32.mrf.mxu0  ;;  %v21989_v17 = vpop.f32.mrf.mxu1 }
0x10e9   :  { %v18689_v62 = vpop.f32.mrf.mxu0  ;;  %v18696_v23 = vpop.f32.mrf.mxu1 }
0x10eb   :  { %v6234_v53 = vpop.f32.mrf.mxu1  ;;  %v6283_v24 = vpop.f32.mrf.mxu0 }
0x10ec   :  { %v6284_v60 = vadd.f32 %v16652_v49, %v6283_v24  ;;  %v6048_v53 = vadd.f32 %v16649_v34, %v21981_v47  ;;  %v16650_v24 = vld [vmem:[%s23910_s15 + $0x2] ss:$0 sm:$0xff]  ;;  %v16655_v47 = vld [vmem:[%s23910_s15 + $0x7] ss:$0 sm:$0xff] }
0x10ed   :  { %v18697_v11 = vpop.f32.mrf.mxu1  ;;  %v18704_v20 = vpop.f32.mrf.mxu0 }
0x10ee   :  { %v6981_v25 = vpack.c.bf16 %v6284_v60, %v6284_v60 }
0x10ef   :  { %v6286_v19 = vpop.f32.mrf.mxu0  ;;  %v6323_v26 = vpop.f32.mrf.mxu1 }
0x10f0   :  { %v6993_v27 = vsel %vm1438_vm4, %v6981_v25, 0  ;;  %v6324_v32 = vadd.f32 %v16652_v49, %v6323_v26  ;;  %v6975_v49 = vpack.c.bf16 %v6008_v44, %v6008_v44  ;;  %v6976_v26 = vpack.c.bf16 %v6048_v53, %v6048_v53 }
0x10f1   :  { %v18705_v35 = vpop.f32.mrf.mxu0  ;;  %v18712_v50 = vpop.f32.mrf.mxu1  ;;  %18827 = vmatpush3.bf16.xpose.msra.mxu0 %v6993_v27  ;;  %v6100_v27 = vadd.f32 %v16650_v24, %v21983_v30 }
0x10f2   :  { %v6982_v13 = vpack.c.bf16 %v6324_v32, %v6324_v32  ;;  %18838 = vmatprep.subr.bf16.mxu0 %v20441_v0 }
0x10f3   :  { %v6326_v7 = vpop.f32.mrf.mxu1  ;;  %v6375_v39 = vpop.f32.mrf.mxu0 }
0x10f4   :  { %v7039_v59 = vsel %vm1438_vm4, %v6982_v13, 0  ;;  %v6376_v28 = vadd.f32 %v16653_v36, %v6375_v39  ;;  %v6977_v39 = vpack.c.bf16 %v6100_v27, %v6100_v27 }
0x10f5   :  { %v18713_v40 = vpop.f32.mrf.mxu1  ;;  %v18720_v38 = vpop.f32.mrf.mxu0  ;;  %18833 = vmatpush3.bf16.xpose.msra.mxu1 %v7039_v59  ;;  %v6140_v59 = vadd.f32 %v16650_v24, %v21985_v48  ;;  %v16656_v48 = vld [vmem:[%s23910_s15 + $0x8] ss:$0 sm:$0xff] }
0x10f6   :  { %v6983_v61 = vpack.c.bf16 %v6376_v28, %v6376_v28  ;;  %18844 = vmatprep.subr.bf16.mxu1 %v20441_v0  ;;  %v16651_v28 = vld [vmem:[%s23910_s15 + $0x3] ss:$0 sm:$0xff] }
0x10f7   :  { %v6378_v46 = vpop.f32.mrf.mxu0  ;;  %v6415_v43 = vpop.f32.mrf.mxu1 }
0x10f8   :  { %v7085_v4 = vsel %vm1438_vm4, %v6983_v61, 0  ;;  %v6416_v12 = vadd.f32 %v16653_v36, %v6415_v43  ;;  %18829 = vmatmul.mubr.msk.bf16.vlgmr.msra.gmra.mxu0 %vm1438_vm4, %v6973_v56  ;;  %v6978_v46 = vpack.c.bf16 %v6140_v59, %v6140_v59  ;;  %v6192_v43 = vadd.f32 %v16651_v28, %v21987_v2 }
0x10f9   :  { %v18721_v37 = vpop.f32.mrf.mxu0  ;;  %v18728_v6 = vpop.f32.mrf.mxu1  ;;  %18839 = vmatpush3.bf16.xpose.msra.mxu0 %v7085_v4  ;;  %18840 = vmatprep.mubr.msk.bf16.mxu0 %vm20442_vm1, %v20441_v0 }
0x10fa   :  { %v6984_v54 = vpack.c.bf16 %v6416_v12, %v6416_v12  ;;  %18850 = vmatprep.subr.bf16.mxu0 %v20441_v0 }
0x10fb   :  { %v6418_v16 = vpop.f32.mrf.mxu1  ;;  %v6467_v51 = vpop.f32.mrf.mxu0 }
0x10fc   :  { %v7131_v55 = vsel %vm1438_vm4, %v6984_v54, 0  ;;  %v6468_v21 = vadd.f32 %v16654_v41, %v6467_v51  ;;  %18835 = vmatmul.mubr.msk.bf16.vlgmr.msra.gmra.mxu1 %vm1438_vm4, %v6974_v52  ;;  %v6979_v54 = vpack.c.bf16 %v6192_v43, %v6192_v43  ;;  %v6232_v16 = vadd.f32 %v16651_v28, %v21989_v17 }
0x10fd   :  { %v18729_v62 = vpop.f32.mrf.mxu1  ;;  %v18736_v23 = vpop.f32.mrf.mxu0  ;;  %18845 = vmatpush3.bf16.xpose.msra.mxu1 %v7131_v55  ;;  %18846 = vmatprep.mubr.msk.bf16.mxu1 %vm20442_vm1, %v20441_v0 }
0x10fe   :  { %v6985_v42 = vpack.c.bf16 %v6468_v21, %v6468_v21  ;;  %18856 = vmatprep.subr.bf16.mxu1 %v20441_v0  ;;  %v6980_v53 = vpack.c.bf16 %v6232_v16, %v6232_v16 }
0x10ff   :  { %v6470_v60 = vpop.f32.mrf.mxu0  ;;  %v6507_v11 = vpop.f32.mrf.mxu1 }
0x1100   :  { %v7177_v20 = vsel %vm1438_vm4, %v6985_v42, 0  ;;  %v6508_v25 = vadd.f32 %v16654_v41, %v6507_v11  ;;  %18841 = vmatmul.mubr.msk.bf16.vlgmr.msra.gmra.mxu0 %vm1438_vm4, %v6975_v49 }
0x1101   :  { %v18737_v5 = vpop.f32.mrf.mxu0  ;;  %v18744_v19 = vpop.f32.mrf.mxu1  ;;  %18851 = vmatpush3.bf16.xpose.msra.mxu0 %v7177_v20  ;;  %18852 = vmatprep.mubr.msk.bf16.mxu0 %vm20442_vm1, %v20441_v0 }
0x1102   :  { %v6986_v32 = vpack.c.bf16 %v6508_v25, %v6508_v25  ;;  %18862 = vmatprep.subr.bf16.mxu0 %v20441_v0 }
0x1103   :  { %v6510_v35 = vpop.f32.mrf.mxu1  ;;  %v6559_v50 = vpop.f32.mrf.mxu0 }
0x1104   :  { %v7223_v36 = vsel %vm1438_vm4, %v6986_v32, 0  ;;  %v6560_v63 = vadd.f32 %v16655_v47, %v6559_v50  ;;  %18847 = vmatmul.mubr.msk.bf16.vlgmr.msra.gmra.mxu1 %vm1438_vm4, %v6976_v26 }
0x1105   :  { %v18745_v13 = vpop.f32.mrf.mxu1  ;;  %v18752_v7 = vpop.f32.mrf.mxu0  ;;  %18857 = vmatpush3.bf16.xpose.msra.mxu1 %v7223_v36  ;;  %18858 = vmatprep.mubr.msk.bf16.mxu1 %vm20442_vm1, %v20441_v0 }
0x1106   :  { %v6987_v30 = vpack.c.bf16 %v6560_v63, %v6560_v63  ;;  %18868 = vmatprep.subr.bf16.mxu1 %v20441_v0 }
0x1107   :  { %v6562_v40 = vpop.f32.mrf.mxu0  ;;  %v6599_v38 = vpop.f32.mrf.mxu1 }
0x1108   :  { %v7269_v56 = vsel %vm1438_vm4, %v6987_v30, 0  ;;  %v6600_v29 = vadd.f32 %v16655_v47, %v6599_v38  ;;  %18853 = vmatmul.mubr.msk.bf16.vlgmr.msra.gmra.mxu0 %vm1438_vm4, %v6977_v39 }
0x1109   :  { %v18753_v61 = vpop.f32.mrf.mxu0  ;;  %v18760_v34 = vpop.f32.mrf.mxu1  ;;  %18863 = vmatpush3.bf16.xpose.msra.mxu0 %v7269_v56  ;;  %18864 = vmatprep.mubr.msk.bf16.mxu0 %vm20442_vm1, %v20441_v0 }
0x110a   :  { %v6988_v4 = vpack.c.bf16 %v6600_v29, %v6600_v29  ;;  %18874 = vmatprep.subr.bf16.mxu0 %v20441_v0  ;;  %v106_v34 = vand.u32 127, %v103_v8 }
0x110b   :  { %v6602_v12 = vpop.f32.mrf.mxu1  ;;  %v6651_v37 = vpop.f32.mrf.mxu0 }
0x110c   :  { %v7315_v6 = vsel %vm1438_vm4, %v6988_v4, 0  ;;  %v6652_v41 = vadd.f32 %v16656_v48, %v6651_v37  ;;  %18859 = vmatmul.mubr.msk.bf16.vlgmr.msra.gmra.mxu1 %vm1438_vm4, %v6978_v46  ;;  %vm107_vm9 = vcmp.le.s32.totalorder %v106_v34, %v20609_v9  ;;  %v99_v46 = vpop.xlane.xlu0 %98  ;;  %v102_v4 = vpop.xlane.xlu1 %101 }
0x110d   :  { %v18761_v52 = vpop.f32.mrf.mxu1  ;;  %v18768_v44 = vpop.f32.mrf.mxu0  ;;  %18869 = vmatpush3.bf16.xpose.msra.mxu1 %v7315_v6  ;;  %18870 = vmatprep.mubr.msk.bf16.mxu1 %vm20442_vm1, %v20441_v0 }
0x110e   :  { %v7469_v2 = vpack.c.bf16 %v6652_v41, %v6652_v41  ;;  %18880 = vmatprep.subr.bf16.mxu1 %v20441_v0 }
0x110f   :  { %v6654_v51 = vpop.f32.mrf.mxu0  ;;  %v6691_v55 = vpop.f32.mrf.mxu1 }
0x1110   :  { %v7481_v21 = vsel %vm1942_vm5, %v7469_v2, 0  ;;  %v6692_v62 = vadd.f32 %v16656_v48, %v6691_v55  ;;  %18865 = vmatmul.mubr.msk.bf16.vlgmr.msra.gmra.mxu0 %vm1438_vm4, %v6979_v54  ;;  %v16377_v48 = vsel %vm107_vm9, 1.0, %v20441_v0 }
0x1111   :  { %v18769_v23 = vpop.f32.mrf.mxu0  ;;  %v18776_v49 = vpop.f32.mrf.mxu1  ;;  %18875 = vmatpush3.bf16.msra.mxu0 %v7481_v21  ;;  %18876 = vmatprep.mubr.msk.bf16.mxu0 %vm20442_vm1, %v20441_v0  ;;  %v110_v43 = vmul.f32 %v16377_v48, %v99_v46  ;;  %v111_v37 = vmul.f32 %v16377_v48, %v102_v4 }
0x1112   :  { %v7470_v42 = vpack.c.bf16 %v6692_v62, %v6692_v62  ;;  %18886 = vmatprep.subr.bf16.mxu0 %v20441_v0 }
0x1113   :  { %v6694_v17 = vpop.f32.mrf.mxu1  ;;  %v22063_v24 = vpop.f32.mrf.mxu0  ;;  %v16378_v12 = vadd.f32 -1.0, %v110_v43  ;;  %v16379_v41 = vadd.f32 -1.0, %v111_v37 }
0x1114   :  { %v7527_v60 = vsel %vm1942_vm5, %v7470_v42, 0  ;;  %18871 = vmatmul.mubr.msk.bf16.vlgmr.msra.gmra.mxu1 %vm1438_vm4, %v6980_v53 }
0x1115   :  { %v18777_v11 = vpop.f32.mrf.mxu1  ;;  %v18784_v20 = vpop.f32.mrf.mxu0  ;;  %18881 = vmatpush3.bf16.msra.mxu1 %v7527_v60  ;;  %18882 = vmatprep.mubr.msk.bf16.mxu1 %vm20442_vm1, %v20441_v0  ;;  %v22083_v6 = vmul.f32 1e+09, %v16378_v12  ;;  %v22085_v16 = vmul.f32 1e+09, %v16379_v41 }
0x1116   :  { %18892 = vmatprep.subr.bf16.mxu1 %v20441_v0 }
0x1117   :  { %v6746_v25 = vpop.f32.mrf.mxu0  ;;  %v22070_v5 = vpop.f32.mrf.mxu1 }
0x1119   :  { %v18785_v19 = vpop.f32.mrf.mxu0  ;;  %v18792_v47 = vpop.f32.mrf.mxu1 }
0x111b   :  { %v6786_v26 = vpop.f32.mrf.mxu1  ;;  %v22072_v27 = vpop.f32.mrf.mxu0 }
0x111d   :  { %v18793_v32 = vpop.f32.mrf.mxu1  ;;  %v18800_v35 = vpop.f32.mrf.mxu0 }
0x111f   :  { %v6838_v50 = vpop.f32.mrf.mxu0  ;;  %v22074_v36 = vpop.f32.mrf.mxu1 }
0x1121   :  { %v18801_v63 = vpop.f32.mrf.mxu0  ;;  %v18808_v13 = vpop.f32.mrf.mxu1 }
0x1123   :  { %v6878_v7 = vpop.f32.mrf.mxu1  ;;  %v22076_v39 = vpop.f32.mrf.mxu0 }
0x1125   :  { %v18809_v59 = vpop.f32.mrf.mxu1  ;;  %v18816_v30 = vpop.f32.mrf.mxu0 }
0x1127   :  { %v6930_v28 = vpop.f32.mrf.mxu0  ;;  %v22078_v40 = vpop.f32.mrf.mxu1 }
0x1129   :  { %v18817_v38 = vpop.f32.mrf.mxu0  ;;  %v18824_v56 = vpop.f32.mrf.mxu1 }
0x112b   :  { %v6970_v29 = vpop.f32.mrf.mxu1 }
0x112d   :  { %v18825_v61 = vpop.f32.mrf.mxu1 }
0x11b8   :  { %v7029_v52 = vpop.f32.mrf.mxu0 }
0x11b9   :  { %v7357_v44 = vmul.f32 0.35355338, %v7029_v52 }
0x11ba   :  { %v18830_v54 = vpop.f32.mrf.mxu0 }
0x11bb   :  { %v22088_v2 = vadd.f32 %v7357_v44, %v22083_v6 }
0x11bc   :  { %v7032_v8 = vpop.f32.mrf.mxu0  ;;  %v7075_v51 = vpop.f32.mrf.mxu1 }
0x11bd   :  { %v7358_v55 = vmul.f32 0.35355338, %v7075_v51  ;;  %v7373_v21 = vsel %vm1438_vm4, %v22088_v2, -inf }
0x11be   :  { %v18836_v62 = vpop.f32.mrf.mxu1  ;;  %7374 = vmax.xlane.f32.xlu0 %v7373_v21  ;;  %v18831_v23 = vpop.f32.mrf.mxu0 }
0x11bf   :  { %v7366_v49 = vadd.f32 %v7358_v55, %v22085_v16 }
0x11c0   :  { %v7078_v53 = vpop.f32.mrf.mxu1  ;;  %v7121_v42 = vpop.f32.mrf.mxu0 }
0x11c1   :  { %v7359_v17 = vmul.f32 0.35355338, %v7121_v42  ;;  %v7376_v60 = vsel %vm1438_vm4, %v7366_v49, -inf }
0x11c2   :  { %7377 = vmax.xlane.f32.xlu1 %v7376_v60  ;;  %v18837_v11 = vpop.f32.mrf.mxu1  ;;  %v18842_v20 = vpop.f32.mrf.mxu0 }
0x11c3   :  { %v7367_v25 = vadd.f32 %v7359_v17, %v22083_v6 }
0x11c4   :  { %v7124_v19 = vpop.f32.mrf.mxu0  ;;  %v7167_v47 = vpop.f32.mrf.mxu1 }
0x11c5   :  { %v7360_v26 = vmul.f32 0.35355338, %v7167_v47  ;;  %v7379_v32 = vsel %vm1438_vm4, %v7367_v25, -inf }
0x11c6   :  { %v18848_v35 = vpop.f32.mrf.mxu1  ;;  %7380 = vmax.xlane.f32.xlu0 %v7379_v32  ;;  %v18843_v50 = vpop.f32.mrf.mxu0 }
0x11c7   :  { %v7368_v63 = vadd.f32 %v7360_v26, %v22085_v16 }
0x11c8   :  { %v7170_v13 = vpop.f32.mrf.mxu1  ;;  %v7213_v7 = vpop.f32.mrf.mxu0 }
0x11c9   :  { %v7361_v59 = vmul.f32 0.35355338, %v7213_v7  ;;  %v7382_v30 = vsel %vm1438_vm4, %v7368_v63, -inf }
0x11ca   :  { %7383 = vmax.xlane.f32.xlu1 %v7382_v30  ;;  %v18849_v28 = vpop.f32.mrf.mxu1  ;;  %v18854_v38 = vpop.f32.mrf.mxu0 }
0x11cb   :  { %v7369_v56 = vadd.f32 %v7361_v59, %v22083_v6 }
0x11cc   :  { %v7216_v29 = vpop.f32.mrf.mxu0  ;;  %v7259_v61 = vpop.f32.mrf.mxu1 }
0x11cd   :  { %v7362_v34 = vmul.f32 0.35355338, %v7259_v61  ;;  %v7385_v48 = vsel %vm1438_vm4, %v7369_v56, -inf }
0x11ce   :  { %v18860_v46 = vpop.f32.mrf.mxu1  ;;  %7386 = vmax.xlane.f32.xlu0 %v7385_v48  ;;  %v18855_v43 = vpop.f32.mrf.mxu0 }
0x11cf   :  { %v7370_v4 = vadd.f32 %v7362_v34, %v22085_v16 }
0x11d0   :  { %v7262_v12 = vpop.f32.mrf.mxu1  ;;  %v7305_v37 = vpop.f32.mrf.mxu0 }
0x11d1   :  { %v7363_v41 = vmul.f32 0.35355338, %v7305_v37  ;;  %v7388_v52 = vsel %vm1438_vm4, %v7370_v4, -inf }
0x11d2   :  { %7389 = vmax.xlane.f32.xlu1 %v7388_v52  ;;  %v18861_v44 = vpop.f32.mrf.mxu1  ;;  %v18866_v54 = vpop.f32.mrf.mxu0 }
0x11d3   :  { %v7371_v8 = vadd.f32 %v7363_v41, %v22083_v6 }
0x11d4   :  { %v7308_v51 = vpop.f32.mrf.mxu0  ;;  %v7351_v55 = vpop.f32.mrf.mxu1 }
0x11d5   :  { %v7364_v21 = vmul.f32 0.35355338, %v7351_v55  ;;  %v7391_v62 = vsel %vm1438_vm4, %v7371_v8, -inf }
0x11d6   :  { %v18872_v23 = vpop.f32.mrf.mxu1  ;;  %7392 = vmax.xlane.f32.xlu0 %v7391_v62  ;;  %v18867_v53 = vpop.f32.mrf.mxu0 }
0x11d7   :  { %v7372_v42 = vadd.f32 %v7364_v21, %v22085_v16 }
0x11d8   :  { %v7354_v17 = vpop.f32.mrf.mxu1 }
0x11d9   :  { %v7394_v60 = vsel %vm1438_vm4, %v7372_v42, -inf }
0x11da   :  { %7395 = vmax.xlane.f32.xlu1 %v7394_v60  ;;  %v18873_v11 = vpop.f32.mrf.mxu1 }
0x1247   :  { %v7375_v20 = vpop.xlane.xlu0 %7374 }
0x1248   :  { %v7397_v19 = vsub.f32 %v22088_v2, %v7375_v20  ;;  %v16657_v20 = vld [vmem:[%s23910_s15 + $0x9] ss:$0 sm:$0xff] }
0x124a   :  { %v7405_v47 = vmul.f32 1.442695, %v7397_v19 }
0x124b   :  { %v7378_v26 = vpop.xlane.xlu1 %7377 }
0x124c   :  { %20274 = vpow2.f32 %v7405_v47  ;;  %v7398_v32 = vsub.f32 %v7366_v49, %v7378_v26  ;;  %v6744_v47 = vadd.f32 %v16657_v20, %v22063_v24 }
0x124e   :  { %v7407_v35 = vmul.f32 1.442695, %v7398_v32 }
0x124f   :  { %v7381_v50 = vpop.xlane.xlu0 %7380 }
0x1250   :  { %20276 = vpow2.f32 %v7407_v35  ;;  %v7399_v13 = vsub.f32 %v7367_v25, %v7381_v50  ;;  %v7471_v35 = vpack.c.bf16 %v6744_v47, %v6744_v47  ;;  %v6784_v50 = vadd.f32 %v16657_v20, %v22070_v5 }
0x1252   :  { %v7409_v7 = vmul.f32 1.442695, %v7399_v13 }
0x1253   :  { %v7384_v59 = vpop.xlane.xlu1 %7383 }
0x1254   :  { %20278 = vpow2.f32 %v7409_v7  ;;  %v7400_v30 = vsub.f32 %v7368_v63, %v7384_v59  ;;  %v16658_v7 = vld [vmem:[%s23910_s15 + $0xa] ss:$0 sm:$0xff] }
0x1255   :  { %v6836_v24 = vadd.f32 %v16658_v7, %v22072_v27  ;;  %v16659_v27 = vld [vmem:[%s23910_s15 + $0xb] ss:$0 sm:$0xff] }
0x1256   :  { %v7411_v28 = vmul.f32 1.442695, %v7400_v30 }
0x1257   :  { %v7387_v38 = vpop.xlane.xlu0 %7386 }
0x1258   :  { %20280 = vpow2.f32 %v7411_v28  ;;  %v7401_v29 = vsub.f32 %v7369_v56, %v7387_v38  ;;  %v7573_v38 = vsel %vm1942_vm5, %v7471_v35, 0 }
0x1259   :  { %v20275_v61 = vpop.eup %20274 }
0x125a   :  { %v7413_v34 = vmul.f32 1.442695, %v7401_v29  ;;  %v7421_v2 = vsel %vm1438_vm4, %v20275_v61, 0.0  ;;  %v7472_v29 = vpack.c.bf16 %v6784_v50, %v6784_v50 }
0x125b   :  { %v7390_v48 = vpop.xlane.xlu1 %7389  ;;  %7422 = vadd.xlane.f32.xlu0 %v7421_v2 }
0x125c   :  { %20282 = vpow2.f32 %v7413_v34  ;;  %v7402_v49 = vsub.f32 %v7370_v4, %v7390_v48  ;;  %v7619_v48 = vsel %vm1942_vm5, %v7472_v29, 0 }
0x125d   :  { %v20277_v46 = vpop.eup %20276 }
0x125e   :  { %v7415_v43 = vmul.f32 1.442695, %v7402_v49  ;;  %v7424_v25 = vsel %vm1438_vm4, %v20277_v46, 0.0  ;;  %v7473_v49 = vpack.c.bf16 %v6836_v24, %v6836_v24 }
0x125f   :  { %7425 = vadd.xlane.f32.xlu1 %v7424_v25  ;;  %v7393_v12 = vpop.xlane.xlu0 %7392 }
0x1260   :  { %20284 = vpow2.f32 %v7415_v43  ;;  %v7403_v63 = vsub.f32 %v7371_v8, %v7393_v12  ;;  %v6876_v43 = vadd.f32 %v16658_v7, %v22074_v36 }
0x1261   :  { %v20279_v37 = vpop.eup %20278 }
0x1262   :  { %v7417_v41 = vmul.f32 1.442695, %v7403_v63  ;;  %v7427_v56 = vsel %vm1438_vm4, %v20279_v37, 0.0  ;;  %v7474_v36 = vpack.c.bf16 %v6876_v43, %v6876_v43 }
0x1263   :  { %v7396_v52 = vpop.xlane.xlu1 %7395  ;;  %7428 = vadd.xlane.f32.xlu0 %v7427_v56 }
0x1264   :  { %20286 = vpow2.f32 %v7417_v41  ;;  %v7404_v44 = vsub.f32 %v7372_v42, %v7396_v52  ;;  %v7665_v41 = vsel %vm1942_vm5, %v7473_v49, 0 }
0x1265   :  { %v22110_v54 = vpop.eup %20280 }
0x1266   :  { %v7419_v51 = vmul.f32 1.442695, %v7404_v44  ;;  %v7430_v4 = vsel %vm1438_vm4, %v22110_v54, 0.0 }
0x1267   :  { %7431 = vadd.xlane.f32.xlu1 %v7430_v4  ;;  %v7711_v4 = vsel %vm1942_vm5, %v7474_v36, 0 }
0x1268   :  { %20288 = vpow2.f32 %v7419_v51 }
0x1269   :  { %v22114_v55 = vpop.eup %20282 }
0x126a   :  { %v7433_v8 = vsel %vm1438_vm4, %v22114_v55, 0.0 }
0x126b   :  { %7434 = vadd.xlane.f32.xlu0 %v7433_v8 }
0x126d   :  { %v22118_v21 = vpop.eup %20284 }
0x126e   :  { %v7436_v62 = vsel %vm1438_vm4, %v22118_v21, 0.0 }
0x126f   :  { %7437 = vadd.xlane.f32.xlu1 %v7436_v62  ;;  %v6968_v62 = vadd.f32 %v16659_v27, %v22078_v40 }
0x1271   :  { %v22122_v23 = vpop.eup %20286 }
0x1272   :  { %v7439_v53 = vsel %vm1438_vm4, %v22122_v23, 0.0 }
0x1273   :  { %7440 = vadd.xlane.f32.xlu0 %v7439_v53 }
0x1275   :  { %v22126_v42 = vpop.eup %20288 }
0x1276   :  { %v7442_v17 = vsel %vm1438_vm4, %v22126_v42, 0.0 }
0x1277   :  { %7443 = vadd.xlane.f32.xlu1 %v7442_v17 }
0x12e4   :  { %v7423_v60 = vpop.xlane.xlu0 %7422 }
0x12e5   :  { %20290 = vrcp.f32 %v7423_v60  ;;  %v7476_v60 = vpack.c.bf16 %v6968_v62, %v6968_v62 }
0x12e7   :  { %v7803_v20 = vsel %vm1942_vm5, %v7476_v60, 0 }
0x12e8   :  { %v7426_v11 = vpop.xlane.xlu1 %7425 }
0x12e9   :  { %20292 = vrcp.f32 %v7426_v11 }
0x12ec   :  { %v7429_v19 = vpop.xlane.xlu0 %7428 }
0x12ed   :  { %20294 = vrcp.f32 %v7429_v19 }
0x12f0   :  { %v7432_v26 = vpop.xlane.xlu1 %7431 }
0x12f1   :  { %20296 = vrcp.f32 %v7432_v26 }
0x12f2   :  { %v20291_v32 = vpop.eup %20290 }
0x12f3   :  { %v7446_v13 = vmul.f32 %v20291_v32, %v20275_v61 }
0x12f4   :  { %v7435_v59 = vpop.xlane.xlu0 %7434 }
0x12f5   :  { %v7461_v30 = vpack.c.bf16 %v7446_v13, %v7446_v13  ;;  %20298 = vrcp.f32 %v7435_v59 }
0x12f6   :  { %v20293_v28 = vpop.eup %20292 }
0x12f7   :  { %v7448_v34 = vmul.f32 %v20293_v28, %v20277_v46  ;;  %18877 = vmatmul.mubr.msk.bf16.vlgmr.msra.gmra.mxu0 %vm1438_vm4, %v7461_v30 }
0x12f8   :  { %18887 = vmatpush3.bf16.msra.mxu0 %v7573_v38  ;;  %v7438_v2 = vpop.xlane.xlu1 %7437  ;;  %18888 = vmatprep.mubr.msk.bf16.mxu0 %vm20442_vm1, %v20441_v0 }
0x12f9   :  { %v7462_v5 = vpack.c.bf16 %v7448_v34, %v7448_v34  ;;  %20300 = vrcp.f32 %v7438_v2  ;;  %18898 = vmatprep.subr.bf16.mxu0 %v20441_v0  ;;  %v5787_v34 = vld [vmem:[%s23911_s16 + $0x8] sm:$0xf] }
0x12fa   :  { %v20295_v61 = vpop.eup %20294 }
0x12fb   :  { %v7450_v25 = vmul.f32 %v20295_v61, %v20279_v37  ;;  %18883 = vmatmul.mubr.msk.bf16.vlgmr.msra.gmra.mxu1 %vm1438_vm4, %v7462_v5  ;;  %v6928_v37 = vadd.f32 %v16659_v27, %v22076_v39 }
0x12fc   :  { %18893 = vmatpush3.bf16.msra.mxu1 %v7619_v48  ;;  %v7441_v46 = vpop.xlane.xlu0 %7440  ;;  %18894 = vmatprep.mubr.msk.bf16.mxu1 %vm20442_vm1, %v20441_v0  ;;  %v8035_v48 = vsel %vm1942_vm5, %v5787_v34, 0 }
0x12fd   :  { %v7463_v12 = vpack.c.bf16 %v7450_v25, %v7450_v25  ;;  %20302 = vrcp.f32 %v7441_v46  ;;  %18904 = vmatprep.subr.bf16.mxu1 %v20441_v0  ;;  %v7475_v8 = vpack.c.bf16 %v6928_v37, %v6928_v37 }
0x12fe   :  { %v20297_v63 = vpop.eup %20296 }
0x12ff   :  { %v7452_v56 = vmul.f32 %v20297_v63, %v22110_v54  ;;  %18889 = vmatmul.mubr.msk.bf16.vlgmr.msra.gmra.mxu0 %vm1438_vm4, %v7463_v12  ;;  %v7757_v17 = vsel %vm1942_vm5, %v7475_v8, 0 }
0x1300   :  { %18899 = vmatpush3.bf16.msra.mxu0 %v7665_v41  ;;  %v7444_v52 = vpop.xlane.xlu1 %7443  ;;  %18900 = vmatprep.mubr.msk.bf16.mxu0 %vm20442_vm1, %v20441_v0  ;;  %v5788_v41 = vld [vmem:[%s23911_s16 + $0xc] sm:$0xf] }
0x1301   :  { %v7464_v44 = vpack.c.bf16 %v7452_v56, %v7452_v56  ;;  %20304 = vrcp.f32 %v7444_v52  ;;  %18910 = vmatprep.subr.bf16.mxu0 %v20441_v0  ;;  %v8124_v52 = vsel %vm1942_vm5, %v5788_v41, 0 }
0x1302   :  { %v20299_v51 = vpop.eup %20298 }
0x1303   :  { %v7454_v39 = vmul.f32 %v20299_v51, %v22114_v55  ;;  %18895 = vmatmul.mubr.msk.bf16.vlgmr.msra.gmra.mxu1 %vm1438_vm4, %v7464_v44 }
0x1304   :  { %18905 = vmatpush3.bf16.msra.mxu1 %v7711_v4  ;;  %18906 = vmatprep.mubr.msk.bf16.mxu1 %vm20442_vm1, %v20441_v0 }
0x1305   :  { %v7465_v54 = vpack.c.bf16 %v7454_v39, %v7454_v39  ;;  %18916 = vmatprep.subr.bf16.mxu1 %v20441_v0 }
0x1306   :  { %v20301_v53 = vpop.eup %20300 }
0x1307   :  { %v7456_v11 = vmul.f32 %v20301_v53, %v22118_v21  ;;  %18901 = vmatmul.mubr.msk.bf16.vlgmr.msra.gmra.mxu0 %vm1438_vm4, %v7465_v54 }
0x1308   :  { %18911 = vmatpush3.bf16.msra.mxu0 %v7757_v17  ;;  %18912 = vmatprep.mubr.msk.bf16.mxu0 %vm20442_vm1, %v20441_v0 }
0x1309   :  { %v7466_v40 = vpack.c.bf16 %v7456_v11, %v7456_v11  ;;  %18922 = vmatprep.subr.bf16.mxu0 %v20441_v0 }
0x130a   :  { %v20303_v55 = vpop.eup %20302 }
0x130b   :  { %v7458_v19 = vmul.f32 %v20303_v55, %v22122_v23  ;;  %18907 = vmatmul.mubr.msk.bf16.vlgmr.msra.gmra.mxu1 %vm1438_vm4, %v7466_v40  ;;  %v5785_v23 = vld [vmem:[%s23911_s16] sm:$0xf] }
0x130c   :  { %18917 = vmatpush3.bf16.msra.mxu1 %v7803_v20  ;;  %18918 = vmatprep.mubr.msk.bf16.mxu1 %vm20442_vm1, %v20441_v0  ;;  %v7857_v35 = vsel %vm1942_vm5, %v5785_v23, 0 }
0x130d   :  { %v7467_v21 = vpack.c.bf16 %v7458_v19, %v7458_v19  ;;  %18928 = vmatprep.subr.bf16.mxu1 %v20441_v0 }
0x130e   :  { %v20305_v47 = vpop.eup %20304 }
0x130f   :  { %v7460_v26 = vmul.f32 %v20305_v47, %v22126_v42  ;;  %18913 = vmatmul.mubr.msk.bf16.vlgmr.msra.gmra.mxu0 %vm1438_vm4, %v7467_v21  ;;  %v5786_v42 = vld [vmem:[%s23911_s16 + $0x4] sm:$0xf] }
0x1310   :  { %18924 = vmatprep.mubr.msk.bf16.mxu0 %vm20442_vm1, %v20441_v0  ;;  %18923 = vmatpush3.bf16.msra.mxu0 %v7857_v35  ;;  %v7946_v7 = vsel %vm1942_vm5, %v5786_v42, 0 }
0x1311   :  { %v7468_v32 = vpack.c.bf16 %v7460_v26, %v7460_v26  ;;  %18934 = vmatprep.subr.bf16.mxu0 %v20441_v0 }
0x1313   :  { %18919 = vmatmul.mubr.msk.bf16.vlgmr.msra.gmra.mxu1 %vm1438_vm4, %v7468_v32 }
0x1314   :  { %18930 = vmatprep.mubr.msk.bf16.mxu1 %vm20442_vm1, %v20441_v0  ;;  %18929 = vmatpush3.bf16.msra.mxu1 %v7857_v35 }
0x1315   :  { %18940 = vmatprep.subr.bf16.mxu1 %v20441_v0 }
0x13b7   :  { %v7517_v50 = vpop.f32.mrf.mxu0 }
0x13b8   :  { %v7845_v13 = vpack.c.bf16 %v7517_v50, %v7517_v50 }
0x13b9   :  { %v18878_v59 = vpop.f32.mrf.mxu0 }
0x13ba   :  { %18925 = vmatmul.mubr.msk.bf16.vlgmr.msra.gmra.mxu0 %vm1438_vm4, %v7845_v13 }
0x13bb   :  { %v7520_v30 = vpop.f32.mrf.mxu0  ;;  %v7563_v28 = vpop.f32.mrf.mxu1  ;;  %18935 = vmatpush3.bf16.msra.mxu0 %v7946_v7  ;;  %18936 = vmatprep.mubr.msk.bf16.mxu0 %vm20442_vm1, %v20441_v0 }
0x13bc   :  { %v7846_v38 = vpack.c.bf16 %v7563_v28, %v7563_v28  ;;  %18946 = vmatprep.subr.bf16.mxu0 %v20441_v0 }
0x13bd   :  { %v18879_v29 = vpop.f32.mrf.mxu0  ;;  %v18884_v24 = vpop.f32.mrf.mxu1 }
0x13be   :  { %18931 = vmatmul.mubr.msk.bf16.vlgmr.msra.gmra.mxu1 %vm1438_vm4, %v7846_v38 }
0x13bf   :  { %v7566_v2 = vpop.f32.mrf.mxu1  ;;  %v7609_v5 = vpop.f32.mrf.mxu0  ;;  %18941 = vmatpush3.bf16.msra.mxu1 %v7946_v7  ;;  %18942 = vmatprep.mubr.msk.bf16.mxu1 %vm20442_vm1, %v20441_v0 }
0x13c0   :  { %v7847_v61 = vpack.c.bf16 %v7609_v5, %v7609_v5  ;;  %18952 = vmatprep.subr.bf16.mxu1 %v20441_v0 }
0x13c1   :  { %v18885_v49 = vpop.f32.mrf.mxu1  ;;  %v18890_v43 = vpop.f32.mrf.mxu0 }
0x13c2   :  { %18937 = vmatmul.mubr.msk.bf16.vlgmr.msra.gmra.mxu0 %vm1438_vm4, %v7847_v61 }
0x13c3   :  { %v7612_v25 = vpop.f32.mrf.mxu0  ;;  %v7655_v27 = vpop.f32.mrf.mxu1  ;;  %18947 = vmatpush3.bf16.msra.mxu0 %v8035_v48  ;;  %18948 = vmatprep.mubr.msk.bf16.mxu0 %vm20442_vm1, %v20441_v0 }
0x13c4   :  { %v7848_v46 = vpack.c.bf16 %v7655_v27, %v7655_v27  ;;  %18958 = vmatprep.subr.bf16.mxu0 %v20441_v0 }
0x13c5   :  { %v18891_v12 = vpop.f32.mrf.mxu0  ;;  %v18896_v63 = vpop.f32.mrf.mxu1 }
0x13c6   :  { %18943 = vmatmul.mubr.msk.bf16.vlgmr.msra.gmra.mxu1 %vm1438_vm4, %v7848_v46  ;;  %v22240_v63 = vld [vmem:[%s23912_s23] sm:$0xff] }
0x13c7   :  { %v7658_v36 = vpop.f32.mrf.mxu1  ;;  %v7701_v37 = vpop.f32.mrf.mxu0  ;;  %18953 = vmatpush3.bf16.msra.mxu1 %v8035_v48  ;;  %18954 = vmatprep.mubr.msk.bf16.mxu1 %vm20442_vm1, %v20441_v0 }
0x13c8   :  { %v7849_v56 = vpack.c.bf16 %v7701_v37, %v7701_v37  ;;  %18964 = vmatprep.subr.bf16.mxu1 %v20441_v0 }
0x13c9   :  { %v18897_v44 = vpop.f32.mrf.mxu1  ;;  %v18902_v51 = vpop.f32.mrf.mxu0 }
0x13ca   :  { %18949 = vmatmul.mubr.msk.bf16.vlgmr.msra.gmra.mxu0 %vm1438_vm4, %v7849_v56 }
0x13cb   :  { %v7704_v4 = vpop.f32.mrf.mxu0  ;;  %v7747_v8 = vpop.f32.mrf.mxu1  ;;  %18959 = vmatpush3.bf16.msra.mxu0 %v8124_v52  ;;  %18960 = vmatprep.mubr.msk.bf16.mxu0 %vm20442_vm1, %v20441_v0 }
0x13cc   :  { %v7850_v62 = vpack.c.bf16 %v7747_v8, %v7747_v8  ;;  %18970 = vmatprep.subr.bf16.mxu0 %v20441_v0 }
0x13cd   :  { %v18903_v39 = vpop.f32.mrf.mxu0  ;;  %v18908_v54 = vpop.f32.mrf.mxu1 }
0x13ce   :  { %18955 = vmatmul.mubr.msk.bf16.vlgmr.msra.gmra.mxu1 %vm1438_vm4, %v7850_v62  ;;  %v8226_v62 = vrot.slane %v22240_v63, %v20612_v10 }
0x13cf   :  { %v7750_v53 = vpop.f32.mrf.mxu1  ;;  %v7793_v17 = vpop.f32.mrf.mxu0  ;;  %18965 = vmatpush3.bf16.msra.mxu1 %v8124_v52  ;;  %18966 = vmatprep.mubr.msk.bf16.mxu1 %vm20442_vm1, %v20441_v0  ;;  %v22246_v52 = vld [vmem:[%s23954_s30 + $0x8] sm:$0x3f]  ;;  %s23958_s30 = sld [smem:[#allocation14_spill]] }
0x13d0   :  { %v7851_v60 = vpack.c.bf16 %v7793_v17, %v7793_v17  ;;  %18978 = vmatprep.subr.bf16.mxu1 %v20441_v0  ;;  %v5559_v44 = vrot.slane %v22246_v52, %v21150_v33 }
0x13d1   :  { %v18909_v11 = vpop.f32.mrf.mxu1  ;;  %v18914_v40 = vpop.f32.mrf.mxu0 }
0x13d2   :  { %18961 = vmatmul.mubr.msk.bf16.vlgmr.msra.gmra.mxu0 %vm1438_vm4, %v7851_v60 }
0x13d3   :  { %v7796_v55 = vpop.f32.mrf.mxu0  ;;  %v7839_v20 = vpop.f32.mrf.mxu1  ;;  %18974 = vmatprep.mubr.msk.bf16.mxu0 %vm20442_vm1, %v20441_v0 }
0x13d4   :  { %v7852_v19 = vpack.c.bf16 %v7839_v20, %v7839_v20  ;;  %v5622_v55 = vadd.f32 %v21975_v58, %v5559_v44 }
0x13d5   :  { %v18915_v21 = vpop.f32.mrf.mxu0  ;;  %v18920_v47 = vpop.f32.mrf.mxu1 }
0x13d6   :  { %18967 = vmatmul.mubr.msk.bf16.vlgmr.msra.gmra.mxu1 %vm1438_vm4, %v7852_v19 }
0x13d7   :  { %v7842_v26 = vpop.f32.mrf.mxu1  ;;  %18982 = vmatprep.mubr.msk.bf16.mxu1 %vm20442_vm1, %v20441_v0 }
0x13d9   :  { %v18921_v32 = vpop.f32.mrf.mxu1 }
0x147a   :  { %v7893_v23 = vpop.f32.mrf.mxu0 }
0x147b   :  { %v8209_v46 = vsel %vm323_vm3, %v7893_v23, 0.0 }
0x147c   :  { %v18926_v35 = vpop.f32.mrf.mxu0 }
0x147e   :  { %v7896_v42 = vpop.f32.mrf.mxu0  ;;  %v7936_v50 = vpop.f32.mrf.mxu1 }
0x147f   :  { %v8216_v39 = vsel %vm323_vm3, %v7936_v50, 0.0  ;;  %v5625_v50 = vadd.f32 %v21977_v14, %v5559_v44 }
0x1480   :  { %v18927_v13 = vpop.f32.mrf.mxu0  ;;  %v18932_v7 = vpop.f32.mrf.mxu1 }
0x1482   :  { %v7939_v59 = vpop.f32.mrf.mxu1  ;;  %v7982_v30 = vpop.f32.mrf.mxu0 }
0x1483   :  { %v8210_v43 = vsel %vm323_vm3, %v7982_v30, 0.0  ;;  %v5628_v30 = vadd.f32 %v5622_v55, %v21690_v31 }
0x1484   :  { %v18933_v28 = vpop.f32.mrf.mxu1  ;;  %v18938_v38 = vpop.f32.mrf.mxu0  ;;  %v8211_v41 = vadd.f32 %v8210_v43, %v8209_v46 }
0x1486   :  { %v7985_v29 = vpop.f32.mrf.mxu0  ;;  %v8025_v24 = vpop.f32.mrf.mxu1 }
0x1487   :  { %v8217_v56 = vsel %vm323_vm3, %v8025_v24, 0.0  ;;  %v5630_v29 = vsel %vm323_vm3, %v5628_v30, 0.0  ;;  %v5629_v24 = vadd.f32 %v5625_v50, %v21692_v3 }
0x1488   :  { %v18939_v34 = vpop.f32.mrf.mxu0  ;;  %v18944_v2 = vpop.f32.mrf.mxu1  ;;  %v8218_v17 = vadd.f32 %v8217_v56, %v8216_v39 }
0x148a   :  { %v8028_v5 = vpop.f32.mrf.mxu1  ;;  %v8071_v61 = vpop.f32.mrf.mxu0 }
0x148b   :  { %v8212_v12 = vsel %vm323_vm3, %v8071_v61, 0.0 }
0x148c   :  { %v18945_v48 = vpop.f32.mrf.mxu1  ;;  %v18950_v49 = vpop.f32.mrf.mxu0  ;;  %v8213_v51 = vadd.f32 %v8212_v12, %v8211_v41 }
0x148e   :  { %v8074_v25 = vpop.f32.mrf.mxu0  ;;  %v8114_v27 = vpop.f32.mrf.mxu1 }
0x148f   :  { %v8219_v54 = vsel %vm323_vm3, %v8114_v27, 0.0 }
0x1490   :  { %v18951_v36 = vpop.f32.mrf.mxu0  ;;  %v18956_v37 = vpop.f32.mrf.mxu1  ;;  %v8220_v20 = vadd.f32 %v8219_v54, %v8218_v17 }
0x1492   :  { %v8117_v4 = vpop.f32.mrf.mxu1  ;;  %v8160_v8 = vpop.f32.mrf.mxu0 }
0x1493   :  { %v8214_v53 = vsel %vm323_vm3, %v8160_v8, 0.0  ;;  %v20113_v4 = vld [vmem:[%s23913_s17] sm:$0xff]  }
0x1494   :  { %v8215_v60 = vadd.f32 %v8214_v53, %v8213_v51  ;;  %v18957_v11 = vpop.f32.mrf.mxu1  ;;  %v18962_v40 = vpop.f32.mrf.mxu0  ;;  %v20112_v51 = vld [vmem:[%s23913_s17 + $0x8] sm:$0xff]  }
0x1495   :  { %18971 = vmatpush3.bf16.msra.mxu0 %v20112_v51  ;;  %18979 = vmatpush3.bf16.msra.mxu1 %v20112_v51  ;;  %v20130_v51 = vld [vmem:[%s23913_s17 + $0x98] sm:$0xff]  }
0x1496   :  { %v8227_v19 = vadd.f32 %v8226_v62, %v8215_v60  ;;  %v8163_v21 = vpop.f32.mrf.mxu0  ;;  %v8203_v47 = vpop.f32.mrf.mxu1  ;;  %18972 = vmatprep.subr.bf16.mxu0 %v20441_v0  ;;  %18980 = vmatprep.subr.bf16.mxu1 %v20441_v0  ;;  %v8260_v60 = vrot.slane %v22240_v63, %v21119_v57 }
0x1497   :  { %v8221_v26 = vsel %vm323_vm3, %v8203_v47, 0.0 }
0x1498   :  { %v8222_v32 = vadd.f32 %v8221_v26, %v8220_v20  ;;  %v18963_v23 = vpop.f32.mrf.mxu0  ;;  %v18968_v35 = vpop.f32.mrf.mxu1  ;;  %v8229_v42 = vadd.f32 %v8227_v19, %v21746_v45  ;;  %v5633_v45 = vsel %vm323_vm3, %v5629_v24, 0.0  ;;  %v8266_v20 = vrot.slane %v22240_v63, %v21124_v22 }
0x1499   :  { %18973 = vmatpush3.bf16.msra.mxu0 %v20113_v4  ;;  %18981 = vmatpush3.bf16.msra.mxu1 %v20113_v4  ;;  %v20114_v35 = vld [vmem:[%s23913_s17 + $0x18] sm:$0xff]   ;;  %v20131_v4 = vld [vmem:[%s23913_s17 + $0x90] sm:$0xff]  }
0x149a   :  { %v8228_v13 = vadd.f32 %v8226_v62, %v8222_v32  ;;  %v8206_v7 = vpop.f32.mrf.mxu1  ;;  %v8231_v59 = vsel %vm323_vm3, %v8229_v42, 0.0  ;;  %18986 = vmatprep.subr.bf16.mxu0 %v20441_v0  ;;  %18994 = vmatprep.subr.bf16.mxu1 %v20441_v0 }
0x149b   :  { %8232 = vadd.xlane.f32.xlu0 %v8231_v59  ;;  %v20115_v59 = vld [vmem:[%s23913_s17 + $0x10] sm:$0xff]  }
0x149c   :  { %v18969_v58 = vpop.f32.mrf.mxu1  ;;  %v8230_v28 = vadd.f32 %v8228_v13, %v21759_v1 }
0x149e   :  { %v8234_v38 = vsel %vm323_vm3, %v8230_v28, 0.0 }
0x149f   :  { %8235 = vadd.xlane.f32.xlu1 %v8234_v38  ;;  %5631 = vadd.xlane.f32.xlu0 %v5630_v29  ;;  %v20117_v38 = vld [vmem:[%s23913_s17 + $0x20] sm:$0xff]   ;;  %v20118_v29 = vld [vmem:[%s23913_s17 + $0x38] sm:$0xff]  }
0x14a3   :  { %5634 = vadd.xlane.f32.xlu1 %v5633_v45  ;;  %v20119_v45 = vld [vmem:[%s23913_s17 + $0x30] sm:$0xff]  }
0x1524   :  { %v8233_v14 = vpop.xlane.xlu0 %8232 }
0x1525   :  { %v8237_v34 = vmul.f32 0.03125, %v8233_v14  ;;  %v5659_v14 = vrot.slane %v22246_v52, %v21175_v15 }
0x1527   :  { %v8239_v2 = vsub.f32 %v8229_v42, %v8237_v34 }
0x1528   :  { %v8236_v5 = vpop.xlane.xlu1 %8235  ;;  %v5632_v31 = vpop.xlane.xlu0 %5631 }
0x1529   :  { %v8238_v61 = vmul.f32 0.03125, %v8236_v5  ;;  %v5636_v48 = vmul.f32 0.03125, %v5632_v31  ;;  %v8241_v49 = vmul.f32 %v8239_v2, %v8239_v2  ;;  %v20120_v5 = vld [vmem:[%s23913_s17 + $0x48] sm:$0xff]   ;;  %v5665_v31 = vrot.slane %v22246_v52, %v21178_v18 }
0x152b   :  { %v8240_v1 = vsub.f32 %v8230_v28, %v8238_v61  ;;  %v22266_v43 = vsub.f32 %v5628_v30, %v5636_v48  ;;  %v8243_v25 = vsel %vm323_vm3, %v8241_v49, 0.0  ;;  %v20116_v28 = vld [vmem:[%s23913_s17 + $0x28] sm:$0xff]   ;;  %v20121_v49 = vld [vmem:[%s23913_s17 + $0x40] sm:$0xff]  }
0x152c   :  { %v5635_v27 = vpop.xlane.xlu1 %5634  ;;  %8244 = vadd.xlane.f32.xlu0 %v8243_v25 }
0x152d   :  { %v5637_v3 = vmul.f32 0.03125, %v5635_v27  ;;  %v8242_v46 = vmul.f32 %v8240_v1, %v8240_v1  ;;  %v5640_v12 = vmul.f32 %v22266_v43, %v22266_v43 }
0x152f   :  { %v22271_v41 = vsub.f32 %v5629_v24, %v5637_v3  ;;  %v8246_v36 = vsel %vm323_vm3, %v8242_v46, 0.0  ;;  %v5642_v37 = vsel %vm323_vm3, %v5640_v12, 0.0  ;;  %v20123_v3 = vld [vmem:[%s23913_s17 + $0x50] sm:$0xff]   ;;  %v20124_v12 = vld [vmem:[%s23913_s17 + $0x68] sm:$0xff]  }
0x1530   :  { %8247 = vadd.xlane.f32.xlu1 %v8246_v36  ;;  %5643 = vadd.xlane.f32.xlu0 %v5642_v37  ;;  %v20126_v36 = vld [vmem:[%s23913_s17 + $0x78] sm:$0xff]   ;;  %v20127_v37 = vld [vmem:[%s23913_s17 + $0x70] sm:$0xff]  }
0x1531   :  { %v5641_v56 = vmul.f32 %v22271_v41, %v22271_v41 }
0x1533   :  { %v5645_v44 = vsel %vm323_vm3, %v5641_v56, 0.0  ;;  %v20128_v56 = vld [vmem:[%s23913_s17 + $0x88] sm:$0xff]  }
0x1534   :  { %5646 = vadd.xlane.f32.xlu1 %v5645_v44  ;;  %v20129_v44 = vld [vmem:[%s23913_s17 + $0x80] sm:$0xff]  }
0x15b5   :  { %v8245_v8 = vpop.xlane.xlu0 %8244 }
0x15b6   :  { %v8249_v62 = vmul.f32 0.03125, %v8245_v8  ;;  %v20132_v8 = vld [vmem:[%s23913_s17 + $0xa8] sm:$0xff]  }
0x15b8   :  { %v8251_v39 = vadd.f32 1e-05, %v8249_v62  ;;  %v20133_v62 = vld [vmem:[%s23913_s17 + $0xa0] sm:$0xff]  }
0x15b9   :  { %v8248_v54 = vpop.xlane.xlu1 %8247  ;;  %v5644_v40 = vpop.xlane.xlu0 %5643 }
0x15ba   :  { %20306 = vrsqrt.f32 %v8251_v39  ;;  %v8250_v53 = vmul.f32 0.03125, %v8248_v54  ;;  %v5648_v21 = vmul.f32 0.03125, %v5644_v40  ;;  %v20134_v39 = vld [vmem:[%s23913_s17 + $0xb8] sm:$0xff]   ;;  %v20135_v54 = vld [vmem:[%s23913_s17 + $0xb0] sm:$0xff]  }
0x15bc   :  { %v8252_v17 = vadd.f32 1e-05, %v8250_v53  ;;  %v5650_v50 = vadd.f32 1e-05, %v5648_v21 }
0x15bd   :  { %v5647_v26 = vpop.xlane.xlu1 %5646 }
0x15be   :  { %20308 = vrsqrt.f32 %v8252_v17  ;;  %v5649_v13 = vmul.f32 0.03125, %v5647_v26 }
0x15bf   :  { %20310 = vrsqrt.f32 %v5650_v50 }
0x15c0   :  { %v5651_v30 = vadd.f32 1e-05, %v5649_v13 }
0x15c2   :  { %20312 = vrsqrt.f32 %v5651_v30 }
0x15c7   :  { %v20307_v11 = vpop.eup %20306 }
0x15c8   :  { %v8255_v55 = vmul.f32 %v20307_v11, %v8239_v2 }
0x15ca   :  { %v8261_v19 = vmul.f32 %v8260_v60, %v8255_v55 }
0x15cb   :  { %v20309_v47 = vpop.eup %20308 }
0x15cc   :  { %v8256_v32 = vmul.f32 %v20309_v47, %v8240_v1  ;;  %v22292_v23 = vadd.f32 %v8266_v20, %v8261_v19  ;;  %v20311_v24 = vpop.eup %20310 }
0x15cd   :  { %v5654_v34 = vmul.f32 %v20311_v24, %v22266_v43  ;;  %v20122_v43 = vld [vmem:[%s23913_s17 + $0x58] sm:$0xff]  }
0x15ce   :  { %v8262_v42 = vmul.f32 %v8260_v60, %v8256_v32  ;;  %v8333_v7 = vpack.c.bf16 %v22292_v23, %v22292_v23 }
0x15cf   :  { %v20313_v2 = vpop.eup %20312  ;;  %v5660_v61 = vmul.f32 %v5659_v14, %v5654_v34 }
0x15d0   :  { %18975 = vmatmul.mubr.msk.bf16.vlgmr.msra.gmra.mxu0 %vm323_vm3, %v8333_v7  ;;  %v22300_v63 = vadd.f32 %v8266_v20, %v8262_v42  ;;  %v5655_v48 = vmul.f32 %v20313_v2, %v22271_v41  ;;  %v20125_v41 = vld [vmem:[%s23913_s17 + $0x60] sm:$0xff]  }
0x15d1   :  { %18987 = vmatpush3.bf16.msra.mxu0 %v20114_v35  ;;  %18990 = vmatprep.mubr.msk.bf16.mxu0 %vm20442_vm1, %v20441_v0  ;;  %v5666_v1 = vadd.f32 %v5665_v31, %v5660_v61  ;;  %v16752_v61 = vld [vmem:[%s23914_s18 + $0x4] ss:$0 sm:$0xff] }
0x15d2   :  { %v8334_v58 = vpack.c.bf16 %v22300_v63, %v22300_v63  ;;  %18988 = vmatprep.subr.bf16.mxu0 %v20441_v0  ;;  %v5661_v52 = vmul.f32 %v5659_v14, %v5655_v48 }
0x15d3   :  { %v22368_v25 = vpack.c.bf16 %v5666_v1, %v5666_v1 }
0x15d4   :  { %18983 = vmatmul.mubr.msk.bf16.vlgmr.msra.gmra.mxu1 %vm323_vm3, %v8334_v58  ;;  %v5667_v27 = vadd.f32 %v5665_v31, %v5661_v52 }
0x15d5   :  { %18989 = vmatpush3.bf16.msra.mxu0 %v20115_v59  ;;  %18995 = vmatpush3.bf16.msra.mxu1 %v20114_v35 }
0x15d6   :  { %18996 = vmatprep.subr.bf16.mxu1 %v20441_v0  ;;  %19002 = vmatprep.subr.bf16.mxu0 %v20441_v0  ;;  %v22379_v46 = vpack.c.bf16 %v5667_v27, %v5667_v27 }
0x15d7   :  { %18998 = vmatprep.mubr.msk.bf16.mxu1 %vm20442_vm1, %v20441_v0 }
0x15d8   :  { %18991 = vmatmul.mubr.msk.bf16.vlgmr.msra.gmra.mxu0 %vm323_vm3, %v8333_v7 }
0x15d9   :  { %18997 = vmatpush3.bf16.msra.mxu1 %v20115_v59  ;;  %19003 = vmatpush3.bf16.msra.mxu0 %v20116_v28 }
0x15da   :  { %19004 = vmatprep.subr.bf16.mxu0 %v20441_v0  ;;  %19010 = vmatprep.subr.bf16.mxu1 %v20441_v0 }
0x15db   :  { %19006 = vmatprep.mubr.msk.bf16.mxu0 %vm20442_vm1, %v20441_v0 }
0x15dc   :  { %18999 = vmatmul.mubr.msk.bf16.vlgmr.msra.gmra.mxu1 %vm323_vm3, %v8334_v58 }
0x15dd   :  { %19005 = vmatpush3.bf16.msra.mxu0 %v20117_v38  ;;  %19011 = vmatpush3.bf16.msra.mxu1 %v20116_v28 }
0x15de   :  { %19012 = vmatprep.subr.bf16.mxu1 %v20441_v0  ;;  %19018 = vmatprep.subr.bf16.mxu0 %v20441_v0 }
0x15df   :  { %19014 = vmatprep.mubr.msk.bf16.mxu1 %vm20442_vm1, %v20441_v0 }
0x15e0   :  { %19007 = vmatmul.mubr.msk.bf16.vlgmr.msra.gmra.mxu0 %vm323_vm3, %v8333_v7 }
0x15e1   :  { %19013 = vmatpush3.bf16.msra.mxu1 %v20117_v38  ;;  %19019 = vmatpush3.bf16.msra.mxu0 %v20118_v29 }
0x15e2   :  { %19020 = vmatprep.subr.bf16.mxu0 %v20441_v0  ;;  %19026 = vmatprep.subr.bf16.mxu1 %v20441_v0 }
0x15e3   :  { %19022 = vmatprep.mubr.msk.bf16.mxu0 %vm20442_vm1, %v20441_v0 }
0x15e4   :  { %19015 = vmatmul.mubr.msk.bf16.vlgmr.msra.gmra.mxu1 %vm323_vm3, %v8334_v58 }
0x15e5   :  { %19021 = vmatpush3.bf16.msra.mxu0 %v20119_v45  ;;  %19027 = vmatpush3.bf16.msra.mxu1 %v20118_v29 }
0x15e6   :  { %19028 = vmatprep.subr.bf16.mxu1 %v20441_v0  ;;  %19034 = vmatprep.subr.bf16.mxu0 %v20441_v0 }
0x15e7   :  { %19030 = vmatprep.mubr.msk.bf16.mxu1 %vm20442_vm1, %v20441_v0 }
0x15e8   :  { %19023 = vmatmul.mubr.msk.bf16.vlgmr.msra.gmra.mxu0 %vm323_vm3, %v8333_v7 }
0x15e9   :  { %19029 = vmatpush3.bf16.msra.mxu1 %v20119_v45  ;;  %19035 = vmatpush3.bf16.msra.mxu0 %v20120_v5 }
0x15ea   :  { %19036 = vmatprep.subr.bf16.mxu0 %v20441_v0  ;;  %19042 = vmatprep.subr.bf16.mxu1 %v20441_v0 }
0x15eb   :  { %19038 = vmatprep.mubr.msk.bf16.mxu0 %vm20442_vm1, %v20441_v0 }
0x15ec   :  { %19031 = vmatmul.mubr.msk.bf16.vlgmr.msra.gmra.mxu1 %vm323_vm3, %v8334_v58 }
0x15ed   :  { %19037 = vmatpush3.bf16.msra.mxu0 %v20121_v49  ;;  %19043 = vmatpush3.bf16.msra.mxu1 %v20120_v5 }
0x15ee   :  { %19044 = vmatprep.subr.bf16.mxu1 %v20441_v0  ;;  %19050 = vmatprep.subr.bf16.mxu0 %v20441_v0 }
0x15ef   :  { %19046 = vmatprep.mubr.msk.bf16.mxu1 %vm20442_vm1, %v20441_v0 }
0x15f0   :  { %19039 = vmatmul.mubr.msk.bf16.vlgmr.msra.gmra.mxu0 %vm323_vm3, %v22368_v25 }
0x15f1   :  { %19045 = vmatpush3.bf16.msra.mxu1 %v20121_v49  ;;  %19051 = vmatpush3.bf16.msra.mxu0 %v20122_v43 }
0x15f2   :  { %19052 = vmatprep.subr.bf16.mxu0 %v20441_v0  ;;  %19058 = vmatprep.subr.bf16.mxu1 %v20441_v0 }
0x15f3   :  { %19054 = vmatprep.mubr.msk.bf16.mxu0 %vm20442_vm1, %v20441_v0 }
0x15f4   :  { %19047 = vmatmul.mubr.msk.bf16.vlgmr.msra.gmra.mxu1 %vm323_vm3, %v22379_v46 }
0x15f5   :  { %19053 = vmatpush3.bf16.msra.mxu0 %v20123_v3  ;;  %19059 = vmatpush3.bf16.msra.mxu1 %v20122_v43 }
0x15f6   :  { %19060 = vmatprep.subr.bf16.mxu1 %v20441_v0  ;;  %19066 = vmatprep.subr.bf16.mxu0 %v20441_v0 }
0x15f7   :  { %19062 = vmatprep.mubr.msk.bf16.mxu1 %vm20442_vm1, %v20441_v0 }
0x15f8   :  { %19055 = vmatmul.mubr.msk.bf16.vlgmr.msra.gmra.mxu0 %vm323_vm3, %v22368_v25 }
0x15f9   :  { %19061 = vmatpush3.bf16.msra.mxu1 %v20123_v3  ;;  %19067 = vmatpush3.bf16.msra.mxu0 %v20124_v12  ;;  %v16732_v3 = vld [vmem:[%s23914_s18] ss:$0 sm:$0xff] }
0x15fa   :  { %19068 = vmatprep.subr.bf16.mxu0 %v20441_v0  ;;  %19074 = vmatprep.subr.bf16.mxu1 %v20441_v0 }
0x15fb   :  { %19070 = vmatprep.mubr.msk.bf16.mxu0 %vm20442_vm1, %v20441_v0 }
0x15fc   :  { %19063 = vmatmul.mubr.msk.bf16.vlgmr.msra.gmra.mxu1 %vm323_vm3, %v22379_v46 }
0x15fd   :  { %19069 = vmatpush3.bf16.msra.mxu0 %v20125_v41  ;;  %19075 = vmatpush3.bf16.msra.mxu1 %v20124_v12 }
0x15fe   :  { %19076 = vmatprep.subr.bf16.mxu1 %v20441_v0  ;;  %19082 = vmatprep.subr.bf16.mxu0 %v20441_v0 }
0x15ff   :  { %19078 = vmatprep.mubr.msk.bf16.mxu1 %vm20442_vm1, %v20441_v0 }
0x1600   :  { %19071 = vmatmul.mubr.msk.bf16.vlgmr.msra.gmra.mxu0 %vm323_vm3, %v22368_v25 }
0x1601   :  { %19077 = vmatpush3.bf16.msra.mxu1 %v20125_v41  ;;  %19083 = vmatpush3.bf16.msra.mxu0 %v20126_v36 }
0x1602   :  { %19084 = vmatprep.subr.bf16.mxu0 %v20441_v0  ;;  %19090 = vmatprep.subr.bf16.mxu1 %v20441_v0 }
0x1603   :  { %19086 = vmatprep.mubr.msk.bf16.mxu0 %vm20442_vm1, %v20441_v0 }
0x1604   :  { %19079 = vmatmul.mubr.msk.bf16.vlgmr.msra.gmra.mxu1 %vm323_vm3, %v22379_v46 }
0x1605   :  { %19085 = vmatpush3.bf16.msra.mxu0 %v20127_v37  ;;  %19091 = vmatpush3.bf16.msra.mxu1 %v20126_v36 }
0x1606   :  { %19092 = vmatprep.subr.bf16.mxu1 %v20441_v0  ;;  %19098 = vmatprep.subr.bf16.mxu0 %v20441_v0 }
0x1607   :  { %19094 = vmatprep.mubr.msk.bf16.mxu1 %vm20442_vm1, %v20441_v0 }
0x1608   :  { %19087 = vmatmul.mubr.msk.bf16.vlgmr.msra.gmra.mxu0 %vm323_vm3, %v22368_v25 }
0x1609   :  { %19093 = vmatpush3.bf16.msra.mxu1 %v20127_v37  ;;  %19099 = vmatpush3.bf16.msra.mxu0 %v20128_v56 }
0x160a   :  { %19100 = vmatprep.subr.bf16.mxu0 %v20441_v0  ;;  %19106 = vmatprep.subr.bf16.mxu1 %v20441_v0 }
0x160b   :  { %19102 = vmatprep.mubr.msk.bf16.mxu0 %vm20442_vm1, %v20441_v0 }
0x160c   :  { %19095 = vmatmul.mubr.msk.bf16.vlgmr.msra.gmra.mxu1 %vm323_vm3, %v22379_v46 }
0x160d   :  { %19101 = vmatpush3.bf16.msra.mxu0 %v20129_v44  ;;  %19107 = vmatpush3.bf16.msra.mxu1 %v20128_v56 }
0x160e   :  { %19108 = vmatprep.subr.bf16.mxu1 %v20441_v0  ;;  %19114 = vmatprep.subr.bf16.mxu0 %v20441_v0 }
0x160f   :  { %19110 = vmatprep.mubr.msk.bf16.mxu1 %vm20442_vm1, %v20441_v0 }
0x1610   :  { %19103 = vmatmul.mubr.msk.bf16.vlgmr.msra.gmra.mxu0 %vm323_vm3, %v22368_v25 }
0x1611   :  { %19109 = vmatpush3.bf16.msra.mxu1 %v20129_v44  ;;  %19115 = vmatpush3.bf16.msra.mxu0 %v20130_v51 }
0x1612   :  { %19116 = vmatprep.subr.bf16.mxu0 %v20441_v0  ;;  %19122 = vmatprep.subr.bf16.mxu1 %v20441_v0 }
0x1613   :  { %19118 = vmatprep.mubr.msk.bf16.mxu0 %vm20442_vm1, %v20441_v0 }
0x1614   :  { %19111 = vmatmul.mubr.msk.bf16.vlgmr.msra.gmra.mxu1 %vm323_vm3, %v22379_v46 }
0x1615   :  { %19117 = vmatpush3.bf16.msra.mxu0 %v20131_v4  ;;  %19123 = vmatpush3.bf16.msra.mxu1 %v20130_v51  ;;  %v16753_v51 = vld [vmem:[%s23914_s18 + $0x5] ss:$0 sm:$0xff] }
0x1616   :  { %19124 = vmatprep.subr.bf16.mxu1 %v20441_v0  ;;  %19130 = vmatprep.subr.bf16.mxu0 %v20441_v0 }
0x1617   :  { %19126 = vmatprep.mubr.msk.bf16.mxu1 %vm20442_vm1, %v20441_v0 }
0x1618   :  { %19119 = vmatmul.mubr.msk.bf16.vlgmr.msra.gmra.mxu0 %vm323_vm3, %v22368_v25 }
0x1619   :  { %19125 = vmatpush3.bf16.msra.mxu1 %v20131_v4  ;;  %19131 = vmatpush3.bf16.msra.mxu0 %v20132_v8 }
0x161a   :  { %19132 = vmatprep.subr.bf16.mxu0 %v20441_v0  ;;  %19138 = vmatprep.subr.bf16.mxu1 %v20441_v0 }
0x161b   :  { %19134 = vmatprep.mubr.msk.bf16.mxu0 %vm20442_vm1, %v20441_v0 }
0x161c   :  { %19127 = vmatmul.mubr.msk.bf16.vlgmr.msra.gmra.mxu1 %vm323_vm3, %v22379_v46 }
0x161d   :  { %19133 = vmatpush3.bf16.msra.mxu0 %v20133_v62  ;;  %19139 = vmatpush3.bf16.msra.mxu1 %v20132_v8 }
0x161e   :  { %19140 = vmatprep.subr.bf16.mxu1 %v20441_v0  ;;  %19146 = vmatprep.subr.bf16.mxu0 %v20441_v0 }
0x161f   :  { %19142 = vmatprep.mubr.msk.bf16.mxu1 %vm20442_vm1, %v20441_v0 }
0x1620   :  { %19135 = vmatmul.mubr.msk.bf16.vlgmr.msra.gmra.mxu0 %vm323_vm3, %v22368_v25 }
0x1621   :  { %19141 = vmatpush3.bf16.msra.mxu1 %v20133_v62  ;;  %19147 = vmatpush3.bf16.msra.mxu0 %v20134_v39 }
0x1622   :  { %19148 = vmatprep.subr.bf16.mxu0 %v20441_v0  ;;  %19154 = vmatprep.subr.bf16.mxu1 %v20441_v0 }
0x1623   :  { %19150 = vmatprep.mubr.msk.bf16.mxu0 %vm20442_vm1, %v20441_v0 }
0x1624   :  { %19143 = vmatmul.mubr.msk.bf16.vlgmr.msra.gmra.mxu1 %vm323_vm3, %v22379_v46 }
0x1625   :  { %19149 = vmatpush3.bf16.msra.mxu0 %v20135_v54  ;;  %19155 = vmatpush3.bf16.msra.mxu1 %v20134_v39 }
0x1626   :  { %19156 = vmatprep.subr.bf16.mxu1 %v20441_v0  ;;  %19158 = vmatprep.mubr.msk.bf16.mxu1 %vm20442_vm1, %v20441_v0 }
0x1627   :  { %19162 = vmatprep.subr.bf16.mxu0 %v20441_v0 }
0x1628   :  { %19151 = vmatmul.mubr.msk.bf16.vlgmr.msra.gmra.mxu0 %vm323_vm3, %v22368_v25 }
0x1629   :  { %19157 = vmatpush3.bf16.msra.mxu1 %v20135_v54  ;;  %19164 = vmatprep.mubr.msk.bf16.mxu0 %vm20442_vm1, %v20441_v0 }
0x162a   :  { %19168 = vmatprep.subr.bf16.mxu1 %v20441_v0 }
0x162c   :  { %19159 = vmatmul.mubr.msk.bf16.vlgmr.msra.gmra.mxu1 %vm323_vm3, %v22379_v46 }
0x162d   :  { %19170 = vmatprep.mubr.msk.bf16.mxu1 %vm20442_vm1, %v20441_v0 }
0x1690   :  { %v8408_v53 = vpop.f32.mrf.mxu0 }
0x1691   :  { %v8409_v4 = vadd.f32 %v16732_v3, %v8408_v53  ;;  %v16733_v53 = vld [vmem:[%s23914_s18 + $0x1] ss:$0 sm:$0xff] }
0x1692   :  { %v18976_v17 = vpop.f32.mrf.mxu0 }
0x1694   :  { %v8411_v60 = vpop.f32.mrf.mxu0  ;;  %v8451_v11 = vpop.f32.mrf.mxu1 }
0x1696   :  { %v18977_v40 = vpop.f32.mrf.mxu0  ;;  %v18984_v55 = vpop.f32.mrf.mxu1 }
0x1697   :  { %v9525_v55 = vpack.c.bf16 %v8409_v4, %v8409_v4 }
0x1698   :  { %v8454_v20 = vpop.f32.mrf.mxu1  ;;  %v22508_v19 = vpop.f32.mrf.mxu0 }
0x1699   :  { %v8452_v20 = vadd.f32 %v16732_v3, %v8451_v11  ;;  %v16754_v11 = vld [vmem:[%s23914_s18 + $0x6] ss:$0 sm:$0xff] }
0x169a   :  { %v18985_v21 = vpop.f32.mrf.mxu1  ;;  %v18992_v47 = vpop.f32.mrf.mxu0 }
0x169c   :  { %v8506_v26 = vpop.f32.mrf.mxu0  ;;  %v22510_v32 = vpop.f32.mrf.mxu1 }
0x169e   :  { %v18993_v35 = vpop.f32.mrf.mxu0  ;;  %v19000_v42 = vpop.f32.mrf.mxu1 }
0x16a0   :  { %v8546_v50 = vpop.f32.mrf.mxu1  ;;  %v22512_v13 = vpop.f32.mrf.mxu0 }
0x16a2   :  { %v19001_v7 = vpop.f32.mrf.mxu1  ;;  %v19008_v59 = vpop.f32.mrf.mxu0 }
0x16a3   :  { %v9526_v59 = vpack.c.bf16 %v8452_v20, %v8452_v20 }
0x16a4   :  { %v8598_v30 = vpop.f32.mrf.mxu0  ;;  %v22514_v58 = vpop.f32.mrf.mxu1 }
0x16a5   :  { %v8504_v30 = vadd.f32 %v16733_v53, %v22508_v19 }
0x16a6   :  { %v19009_v28 = vpop.f32.mrf.mxu0  ;;  %v19016_v38 = vpop.f32.mrf.mxu1 }
0x16a8   :  { %v8638_v29 = vpop.f32.mrf.mxu1  ;;  %v22516_v24 = vpop.f32.mrf.mxu0 }
0x16aa   :  { %v19017_v45 = vpop.f32.mrf.mxu1  ;;  %v19024_v14 = vpop.f32.mrf.mxu0 }
0x16ac   :  { %v8690_v34 = vpop.f32.mrf.mxu0  ;;  %v22518_v2 = vpop.f32.mrf.mxu1 }
0x16ae   :  { %v19025_v5 = vpop.f32.mrf.mxu0  ;;  %v19032_v31 = vpop.f32.mrf.mxu1 }
0x16af   :  { %v9527_v31 = vpack.c.bf16 %v8504_v30, %v8504_v30 }
0x16b0   :  { %v8730_v48 = vpop.f32.mrf.mxu1  ;;  %v8832_v49 = vpop.f32.mrf.mxu0 }
0x16b1   :  { %v8833_v1 = vadd.f32 %v16752_v61, %v8832_v49  ;;  %v16734_v48 = vld [vmem:[%s23914_s18 + $0x2] ss:$0 sm:$0xff] }
0x16b2   :  { %v19033_v52 = vpop.f32.mrf.mxu1  ;;  %v19040_v43 = vpop.f32.mrf.mxu0 }
0x16b3   :  { %v9533_v27 = vpack.c.bf16 %v8833_v1, %v8833_v1 }
0x16b4   :  { %v8835_v12 = vpop.f32.mrf.mxu0  ;;  %v8875_v41 = vpop.f32.mrf.mxu1 }
0x16b5   :  { %v9545_v36 = vsel %vm1438_vm4, %v9533_v27, 0  ;;  %v8876_v37 = vadd.f32 %v16752_v61, %v8875_v41  ;;  %v8544_v61 = vadd.f32 %v16733_v53, %v22510_v32  ;;  %v16755_v32 = vld [vmem:[%s23914_s18 + $0x7] ss:$0 sm:$0xff]  ;;  %v8596_v41 = vadd.f32 %v16734_v48, %v22512_v13 }
0x16b6   :  { %v19041_v56 = vpop.f32.mrf.mxu0  ;;  %v19048_v44 = vpop.f32.mrf.mxu1  ;;  %19163 = vmatpush3.bf16.xpose.msra.mxu0 %v9545_v36 }
0x16b7   :  { %v9534_v8 = vpack.c.bf16 %v8876_v37, %v8876_v37  ;;  %19174 = vmatprep.subr.bf16.mxu0 %v20441_v0  ;;  %v9528_v12 = vpack.c.bf16 %v8544_v61, %v8544_v61 }
0x16b8   :  { %v8878_v62 = vpop.f32.mrf.mxu1  ;;  %v8927_v39 = vpop.f32.mrf.mxu0 }
0x16b9   :  { %v9591_v54 = vsel %vm1438_vm4, %v9534_v8, 0  ;;  %v8928_v17 = vadd.f32 %v16753_v51, %v8927_v39  ;;  %v9529_v62 = vpack.c.bf16 %v8596_v41, %v8596_v41  ;;  %v8636_v39 = vadd.f32 %v16734_v48, %v22514_v58  ;;  %v16756_v58 = vld [vmem:[%s23914_s18 + $0x8] ss:$0 sm:$0xff] }
0x16ba   :  { %v19049_v60 = vpop.f32.mrf.mxu1  ;;  %v19056_v40 = vpop.f32.mrf.mxu0  ;;  %19169 = vmatpush3.bf16.xpose.msra.mxu1 %v9591_v54  ;;  %v16735_v54 = vld [vmem:[%s23914_s18 + $0x3] ss:$0 sm:$0xff] }
0x16bb   :  { %v9535_v21 = vpack.c.bf16 %v8928_v17, %v8928_v17  ;;  %19180 = vmatprep.subr.bf16.mxu1 %v20441_v0  ;;  %v9530_v53 = vpack.c.bf16 %v8636_v39, %v8636_v39 }
0x16bc   :  { %v8930_v47 = vpop.f32.mrf.mxu0  ;;  %v8967_v26 = vpop.f32.mrf.mxu1 }
0x16bd   :  { %v9637_v35 = vsel %vm1438_vm4, %v9535_v21, 0  ;;  %v8968_v42 = vadd.f32 %v16753_v51, %v8967_v26  ;;  %19165 = vmatmul.mubr.msk.bf16.vlgmr.msra.gmra.mxu0 %vm1438_vm4, %v9525_v55  ;;  %v8688_v47 = vadd.f32 %v16735_v54, %v22516_v24 }
0x16be   :  { %v19057_v50 = vpop.f32.mrf.mxu0  ;;  %v19064_v7 = vpop.f32.mrf.mxu1  ;;  %19175 = vmatpush3.bf16.xpose.msra.mxu0 %v9637_v35  ;;  %19176 = vmatprep.mubr.msk.bf16.mxu0 %vm20442_vm1, %v20441_v0 }
0x16bf   :  { %v9536_v28 = vpack.c.bf16 %v8968_v42, %v8968_v42  ;;  %19186 = vmatprep.subr.bf16.mxu0 %v20441_v0  ;;  %v9531_v30 = vpack.c.bf16 %v8688_v47, %v8688_v47 }
0x16c0   :  { %v8970_v38 = vpop.f32.mrf.mxu1  ;;  %v9019_v29 = vpop.f32.mrf.mxu0 }
0x16c1   :  { %v9683_v45 = vsel %vm1438_vm4, %v9536_v28, 0  ;;  %v9020_v14 = vadd.f32 %v16754_v11, %v9019_v29  ;;  %19171 = vmatmul.mubr.msk.bf16.vlgmr.msra.gmra.mxu1 %vm1438_vm4, %v9526_v59  ;;  %v8728_v28 = vadd.f32 %v16735_v54, %v22518_v2 }
0x16c2   :  { %v19065_v34 = vpop.f32.mrf.mxu1  ;;  %v19072_v5 = vpop.f32.mrf.mxu0  ;;  %19181 = vmatpush3.bf16.xpose.msra.mxu1 %v9683_v45  ;;  %19182 = vmatprep.mubr.msk.bf16.mxu1 %vm20442_vm1, %v20441_v0 }
0x16c3   :  { %v9537_v19 = vpack.c.bf16 %v9020_v14, %v9020_v14  ;;  %19192 = vmatprep.subr.bf16.mxu1 %v20441_v0 }
0x16c4   :  { %v9022_v49 = vpop.f32.mrf.mxu0  ;;  %v9059_v1 = vpop.f32.mrf.mxu1 }
0x16c5   :  { %v9729_v52 = vsel %vm1438_vm4, %v9537_v19, 0  ;;  %v9060_v43 = vadd.f32 %v16754_v11, %v9059_v1  ;;  %19177 = vmatmul.mubr.msk.bf16.vlgmr.msra.gmra.mxu0 %vm1438_vm4, %v9527_v31  ;;  %v9532_v31 = vpack.c.bf16 %v8728_v28, %v8728_v28 }
0x16c6   :  { %v19073_v27 = vpop.f32.mrf.mxu0  ;;  %v19080_v3 = vpop.f32.mrf.mxu1  ;;  %19187 = vmatpush3.bf16.xpose.msra.mxu0 %v9729_v52  ;;  %19188 = vmatprep.mubr.msk.bf16.mxu0 %vm20442_vm1, %v20441_v0 }
0x16c7   :  { %v9538_v36 = vpack.c.bf16 %v9060_v43, %v9060_v43  ;;  %19198 = vmatprep.subr.bf16.mxu0 %v20441_v0 }
0x16c8   :  { %v9062_v37 = vpop.f32.mrf.mxu1  ;;  %v9111_v56 = vpop.f32.mrf.mxu0 }
0x16c9   :  { %v9775_v44 = vsel %vm1438_vm4, %v9538_v36, 0  ;;  %v9112_v51 = vadd.f32 %v16755_v32, %v9111_v56  ;;  %19183 = vmatmul.mubr.msk.bf16.vlgmr.msra.gmra.mxu1 %vm1438_vm4, %v9528_v12 }
0x16ca   :  { %v19081_v4 = vpop.f32.mrf.mxu1  ;;  %v19088_v8 = vpop.f32.mrf.mxu0  ;;  %19193 = vmatpush3.bf16.xpose.msra.mxu1 %v9775_v44  ;;  %19194 = vmatprep.mubr.msk.bf16.mxu1 %vm20442_vm1, %v20441_v0 }
0x16cb   :  { %v9539_v13 = vpack.c.bf16 %v9112_v51, %v9112_v51  ;;  %19204 = vmatprep.subr.bf16.mxu1 %v20441_v0 }
0x16cc   :  { %v9114_v17 = vpop.f32.mrf.mxu0  ;;  %v9151_v60 = vpop.f32.mrf.mxu1 }
0x16cd   :  { %v9821_v40 = vsel %vm1438_vm4, %v9539_v13, 0  ;;  %v9152_v55 = vadd.f32 %v16755_v32, %v9151_v60  ;;  %19189 = vmatmul.mubr.msk.bf16.vlgmr.msra.gmra.mxu0 %vm1438_vm4, %v9529_v62 }
0x16ce   :  { %v19089_v20 = vpop.f32.mrf.mxu0  ;;  %v19096_v21 = vpop.f32.mrf.mxu1  ;;  %19199 = vmatpush3.bf16.xpose.msra.mxu0 %v9821_v40  ;;  %19200 = vmatprep.mubr.msk.bf16.mxu0 %vm20442_vm1, %v20441_v0 }
0x16cf   :  { %v9540_v26 = vpack.c.bf16 %v9152_v55, %v9152_v55  ;;  %19210 = vmatprep.subr.bf16.mxu0 %v20441_v0 }
0x16d0   :  { %v9154_v35 = vpop.f32.mrf.mxu1  ;;  %v9203_v42 = vpop.f32.mrf.mxu0 }
0x16d1   :  { %v9867_v50 = vsel %vm1438_vm4, %v9540_v26, 0  ;;  %v9204_v7 = vadd.f32 %v16756_v58, %v9203_v42  ;;  %19195 = vmatmul.mubr.msk.bf16.vlgmr.msra.gmra.mxu1 %vm1438_vm4, %v9530_v53  ;;  %v20435_v53 = vld [vmem:[%s23952_s8] ss:$0 sm:$0xff] }
0x16d2   :  { %v19097_v11 = vpop.f32.mrf.mxu1  ;;  %v19104_v59 = vpop.f32.mrf.mxu0  ;;  %19205 = vmatpush3.bf16.xpose.msra.mxu1 %v9867_v50  ;;  %19206 = vmatprep.mubr.msk.bf16.mxu1 %vm20442_vm1, %v20441_v0 }
0x16d3   :  { %v10021_v24 = vpack.c.bf16 %v9204_v7, %v9204_v7  ;;  %19216 = vmatprep.subr.bf16.mxu1 %v20441_v0  ;;  %v20436_v59 = vld [vmem:[%s23952_s8 + $0x1] ss:$0 sm:$0xff] }
0x16d4   :  { %v9206_v38 = vpop.f32.mrf.mxu0  ;;  %v9243_v29 = vpop.f32.mrf.mxu1 }
0x16d5   :  { %v10033_v45 = vsel %vm1942_vm5, %v10021_v24, 0  ;;  %v9244_v14 = vadd.f32 %v16756_v58, %v9243_v29  ;;  %19201 = vmatmul.mubr.msk.bf16.vlgmr.msra.gmra.mxu0 %vm1438_vm4, %v9531_v30 }
0x16d6   :  { %v19105_v34 = vpop.f32.mrf.mxu0  ;;  %v19112_v5 = vpop.f32.mrf.mxu1  ;;  %19211 = vmatpush3.bf16.msra.mxu0 %v10033_v45  ;;  %19212 = vmatprep.mubr.msk.bf16.mxu0 %vm20442_vm1, %v20441_v0 }
0x16d7   :  { %v10022_v61 = vpack.c.bf16 %v9244_v14, %v9244_v14  ;;  %19222 = vmatprep.subr.bf16.mxu0 %v20441_v0 }
0x16d8   :  { %v9246_v2 = vpop.f32.mrf.mxu1  ;;  %v22592_v19 = vpop.f32.mrf.mxu0 }
0x16d9   :  { %v10079_v48 = vsel %vm1942_vm5, %v10022_v61, 0  ;;  %19207 = vmatmul.mubr.msk.bf16.vlgmr.msra.gmra.mxu1 %vm1438_vm4, %v9532_v31 }
0x16da   :  { %v19113_v49 = vpop.f32.mrf.mxu1  ;;  %v19120_v1 = vpop.f32.mrf.mxu0  ;;  %19217 = vmatpush3.bf16.msra.mxu1 %v10079_v48  ;;  %19218 = vmatprep.mubr.msk.bf16.mxu1 %vm20442_vm1, %v20441_v0 }
0x16db   :  { %19228 = vmatprep.subr.bf16.mxu1 %v20441_v0 }
0x16dc   :  { %v9298_v52 = vpop.f32.mrf.mxu0  ;;  %v22599_v43 = vpop.f32.mrf.mxu1 }
0x16de   :  { %v19121_v27 = vpop.f32.mrf.mxu0  ;;  %v19128_v3 = vpop.f32.mrf.mxu1 }
0x16e0   :  { %v9338_v32 = vpop.f32.mrf.mxu1  ;;  %v22601_v12 = vpop.f32.mrf.mxu0 }
0x16e2   :  { %v19129_v41 = vpop.f32.mrf.mxu1  ;;  %v19136_v36 = vpop.f32.mrf.mxu0 }
0x16e4   :  { %v9390_v37 = vpop.f32.mrf.mxu0  ;;  %v22603_v56 = vpop.f32.mrf.mxu1 }
0x16e6   :  { %v19137_v44 = vpop.f32.mrf.mxu0  ;;  %v19144_v51 = vpop.f32.mrf.mxu1 }
0x16e8   :  { %v9430_v4 = vpop.f32.mrf.mxu1  ;;  %v22605_v8 = vpop.f32.mrf.mxu0 }
0x16ea   :  { %v19145_v62 = vpop.f32.mrf.mxu1  ;;  %v19152_v39 = vpop.f32.mrf.mxu0 }
0x16ec   :  { %v9482_v13 = vpop.f32.mrf.mxu0  ;;  %v22607_v54 = vpop.f32.mrf.mxu1 }
0x16ee   :  { %v19153_v17 = vpop.f32.mrf.mxu0  ;;  %v19160_v60 = vpop.f32.mrf.mxu1 }
0x16f0   :  { %v9522_v40 = vpop.f32.mrf.mxu1 }
0x16f2   :  { %v19161_v55 = vpop.f32.mrf.mxu1 }
0x177d   :  { %v9581_v20 = vpop.f32.mrf.mxu0 }
0x177e   :  { %v9909_v21 = vmul.f32 0.35355338, %v9581_v20 }
0x177f   :  { %v19166_v58 = vpop.f32.mrf.mxu0 }
0x1780   :  { %v22612_v47 = vadd.f32 %v20435_v53, %v9909_v21 }
0x1781   :  { %v9584_v26 = vpop.f32.mrf.mxu0  ;;  %v9627_v35 = vpop.f32.mrf.mxu1 }
0x1782   :  { %v9910_v42 = vmul.f32 0.35355338, %v9627_v35  ;;  %v9925_v50 = vsel %vm1438_vm4, %v22612_v47, -inf }
0x1783   :  { %v19172_v7 = vpop.f32.mrf.mxu1  ;;  %9926 = vmax.xlane.f32.xlu0 %v9925_v50  ;;  %v19167_v11 = vpop.f32.mrf.mxu0 }
0x1784   :  { %v9918_v30 = vadd.f32 %v20436_v59, %v9910_v42 }
0x1785   :  { %v9630_v28 = vpop.f32.mrf.mxu1  ;;  %v9673_v24 = vpop.f32.mrf.mxu0 }
0x1786   :  { %v9911_v38 = vmul.f32 0.35355338, %v9673_v24  ;;  %v9928_v29 = vsel %vm1438_vm4, %v9918_v30, -inf }
0x1787   :  { %9929 = vmax.xlane.f32.xlu1 %v9928_v29  ;;  %v19173_v45 = vpop.f32.mrf.mxu1  ;;  %v19178_v14 = vpop.f32.mrf.mxu0 }
0x1788   :  { %v9919_v34 = vadd.f32 %v20435_v53, %v9911_v38 }
0x1789   :  { %v9676_v5 = vpop.f32.mrf.mxu0  ;;  %v9719_v31 = vpop.f32.mrf.mxu1 }
0x178a   :  { %v9912_v61 = vmul.f32 0.35355338, %v9719_v31  ;;  %v9931_v2 = vsel %vm1438_vm4, %v9919_v34, -inf }
0x178b   :  { %v19184_v48 = vpop.f32.mrf.mxu1  ;;  %9932 = vmax.xlane.f32.xlu0 %v9931_v2  ;;  %v19179_v49 = vpop.f32.mrf.mxu0 }
0x178c   :  { %v9920_v1 = vadd.f32 %v20436_v59, %v9912_v61 }
0x178d   :  { %v9722_v52 = vpop.f32.mrf.mxu1  ;;  %v9765_v27 = vpop.f32.mrf.mxu0 }
0x178e   :  { %v9913_v3 = vmul.f32 0.35355338, %v9765_v27  ;;  %v9934_v32 = vsel %vm1438_vm4, %v9920_v1, -inf }
0x178f   :  { %9935 = vmax.xlane.f32.xlu1 %v9934_v32  ;;  %v19185_v41 = vpop.f32.mrf.mxu1  ;;  %v19190_v36 = vpop.f32.mrf.mxu0 }
0x1790   :  { %v9921_v37 = vadd.f32 %v20435_v53, %v9913_v3 }
0x1791   :  { %v9768_v44 = vpop.f32.mrf.mxu0  ;;  %v9811_v51 = vpop.f32.mrf.mxu1 }
0x1792   :  { %v9914_v4 = vmul.f32 0.35355338, %v9811_v51  ;;  %v9937_v62 = vsel %vm1438_vm4, %v9921_v37, -inf }
0x1793   :  { %v19196_v39 = vpop.f32.mrf.mxu1  ;;  %9938 = vmax.xlane.f32.xlu0 %v9937_v62  ;;  %v19191_v13 = vpop.f32.mrf.mxu0 }
0x1794   :  { %v9922_v17 = vadd.f32 %v20436_v59, %v9914_v4 }
0x1795   :  { %v9814_v60 = vpop.f32.mrf.mxu1  ;;  %v9857_v40 = vpop.f32.mrf.mxu0 }
0x1796   :  { %v9915_v55 = vmul.f32 0.35355338, %v9857_v40  ;;  %v9940_v20 = vsel %vm1438_vm4, %v9922_v17, -inf }
0x1797   :  { %9941 = vmax.xlane.f32.xlu1 %v9940_v20  ;;  %v19197_v21 = vpop.f32.mrf.mxu1  ;;  %v19202_v58 = vpop.f32.mrf.mxu0 }
0x1798   :  { %v9923_v26 = vadd.f32 %v20435_v53, %v9915_v55 }
0x1799   :  { %v9860_v35 = vpop.f32.mrf.mxu0  ;;  %v9903_v42 = vpop.f32.mrf.mxu1 }
0x179a   :  { %v9916_v50 = vmul.f32 0.35355338, %v9903_v42  ;;  %v9943_v7 = vsel %vm1438_vm4, %v9923_v26, -inf }
0x179b   :  { %v19208_v11 = vpop.f32.mrf.mxu1  ;;  %9944 = vmax.xlane.f32.xlu0 %v9943_v7  ;;  %v19203_v28 = vpop.f32.mrf.mxu0 }
0x179c   :  { %v9924_v24 = vadd.f32 %v20436_v59, %v9916_v50 }
0x179d   :  { %v9906_v38 = vpop.f32.mrf.mxu1 }
0x179e   :  { %v9946_v29 = vsel %vm1438_vm4, %v9924_v24, -inf }
0x179f   :  { %9947 = vmax.xlane.f32.xlu1 %v9946_v29  ;;  %v19209_v45 = vpop.f32.mrf.mxu1  ;;  %v16757_v29 = vld [vmem:[%s23914_s18 + $0x9] ss:$0 sm:$0xff] }
0x180c   :  { %v9927_v14 = vpop.xlane.xlu0 %9926 }
0x180d   :  { %v9949_v5 = vsub.f32 %v22612_v47, %v9927_v14  ;;  %v9296_v14 = vadd.f32 %v16757_v29, %v22592_v19 }
0x180f   :  { %v9957_v31 = vmul.f32 1.442695, %v9949_v5 }
0x1810   :  { %v9930_v61 = vpop.xlane.xlu1 %9929 }
0x1811   :  { %20314 = vpow2.f32 %v9957_v31  ;;  %v9950_v53 = vsub.f32 %v9918_v30, %v9930_v61  ;;  %v10023_v61 = vpack.c.bf16 %v9296_v14, %v9296_v14 }
0x1813   :  { %v9959_v2 = vmul.f32 1.442695, %v9950_v53  ;;  %v9336_v53 = vadd.f32 %v16757_v29, %v22599_v43 }
0x1814   :  { %v9933_v48 = vpop.xlane.xlu0 %9932 }
0x1815   :  { %20316 = vpow2.f32 %v9959_v2  ;;  %v9951_v49 = vsub.f32 %v9919_v34, %v9933_v48  ;;  %v16758_v48 = vld [vmem:[%s23914_s18 + $0xa] ss:$0 sm:$0xff] }
0x1816   :  { %v9388_v19 = vadd.f32 %v16758_v48, %v22601_v12  ;;  %v16759_v12 = vld [vmem:[%s23914_s18 + $0xb] ss:$0 sm:$0xff] }
0x1817   :  { %v9961_v52 = vmul.f32 1.442695, %v9951_v49 }
0x1818   :  { %v9936_v27 = vpop.xlane.xlu1 %9935 }
0x1819   :  { %20318 = vpow2.f32 %v9961_v52  ;;  %v9952_v59 = vsub.f32 %v9920_v1, %v9936_v27 }
0x181b   :  { %v9963_v3 = vmul.f32 1.442695, %v9952_v59  ;;  %v10125_v59 = vsel %vm1942_vm5, %v10023_v61, 0 }
0x181c   :  { %v9939_v32 = vpop.xlane.xlu0 %9938 }
0x181d   :  { %20320 = vpow2.f32 %v9963_v3  ;;  %v9953_v41 = vsub.f32 %v9921_v37, %v9939_v32  ;;  %v10024_v3 = vpack.c.bf16 %v9336_v53, %v9336_v53 }
0x181e   :  { %v20315_v36 = vpop.eup %20314 }
0x181f   :  { %v9965_v44 = vmul.f32 1.442695, %v9953_v41  ;;  %v9973_v47 = vsel %vm1438_vm4, %v20315_v36, 0.0 }
0x1820   :  { %v9942_v51 = vpop.xlane.xlu1 %9941  ;;  %9974 = vadd.xlane.f32.xlu0 %v9973_v47  ;;  %v10025_v47 = vpack.c.bf16 %v9388_v19, %v9388_v19 }
0x1821   :  { %20322 = vpow2.f32 %v9965_v44  ;;  %v9954_v30 = vsub.f32 %v9922_v17, %v9942_v51  ;;  %v10171_v44 = vsel %vm1942_vm5, %v10024_v3, 0  ;;  %v9428_v51 = vadd.f32 %v16758_v48, %v22603_v56  ;;  %v8331_v3 = vld [vmem:[%s23915_s19 + $0x8] sm:$0xf] }
0x1822   :  { %v20317_v4 = vpop.eup %20316 }
0x1823   :  { %v9967_v62 = vmul.f32 1.442695, %v9954_v30  ;;  %v9976_v34 = vsel %vm1438_vm4, %v20317_v4, 0.0  ;;  %v10026_v56 = vpack.c.bf16 %v9428_v51, %v9428_v51 }
0x1824   :  { %9977 = vadd.xlane.f32.xlu1 %v9976_v34  ;;  %v9945_v39 = vpop.xlane.xlu0 %9944 }
0x1825   :  { %20324 = vpow2.f32 %v9967_v62  ;;  %v9955_v1 = vsub.f32 %v9923_v26, %v9945_v39  ;;  %v10217_v39 = vsel %vm1942_vm5, %v10025_v47, 0 }
0x1826   :  { %v20319_v13 = vpop.eup %20318 }
0x1827   :  { %v9969_v60 = vmul.f32 1.442695, %v9955_v1  ;;  %v9979_v37 = vsel %vm1438_vm4, %v20319_v13, 0.0  ;;  %v9480_v1 = vadd.f32 %v16759_v12, %v22605_v8 }
0x1828   :  { %v9948_v40 = vpop.xlane.xlu1 %9947  ;;  %9980 = vadd.xlane.f32.xlu0 %v9979_v37 }
0x1829   :  { %20326 = vpow2.f32 %v9969_v60  ;;  %v9956_v55 = vsub.f32 %v9924_v24, %v9948_v40 }
0x182a   :  { %v22630_v20 = vpop.eup %20320 }
0x182b   :  { %v9971_v21 = vmul.f32 1.442695, %v9956_v55  ;;  %v9982_v17 = vsel %vm1438_vm4, %v22630_v20, 0.0  ;;  %v10263_v55 = vsel %vm1942_vm5, %v10026_v56, 0 }
0x182c   :  { %9983 = vadd.xlane.f32.xlu1 %v9982_v17  ;;  %v9520_v17 = vadd.f32 %v16759_v12, %v22607_v54 }
0x182d   :  { %20328 = vpow2.f32 %v9971_v21  ;;  %v10027_v21 = vpack.c.bf16 %v9480_v1, %v9480_v1 }
0x182e   :  { %v22634_v58 = vpop.eup %20322 }
0x182f   :  { %v9985_v26 = vsel %vm1438_vm4, %v22634_v58, 0.0 }
0x1830   :  { %9986 = vadd.xlane.f32.xlu0 %v9985_v26 }
0x1832   :  { %v22638_v35 = vpop.eup %20324 }
0x1833   :  { %v9988_v42 = vsel %vm1438_vm4, %v22638_v35, 0.0 }
0x1834   :  { %9989 = vadd.xlane.f32.xlu1 %v9988_v42  ;;  %v10309_v42 = vsel %vm1942_vm5, %v10027_v21, 0 }
0x1836   :  { %v22642_v50 = vpop.eup %20326 }
0x1837   :  { %v9991_v7 = vsel %vm1438_vm4, %v22642_v50, 0.0 }
0x1838   :  { %9992 = vadd.xlane.f32.xlu0 %v9991_v7  ;;  %v10028_v7 = vpack.c.bf16 %v9520_v17, %v9520_v17 }
0x183a   :  { %v22646_v11 = vpop.eup %20328 }
0x183b   :  { %v9994_v28 = vsel %vm1438_vm4, %v22646_v11, 0.0 }
0x183c   :  { %9995 = vadd.xlane.f32.xlu1 %v9994_v28 }
0x18a9   :  { %v9975_v24 = vpop.xlane.xlu0 %9974 }
0x18aa   :  { %20330 = vrcp.f32 %v9975_v24  ;;  %v10355_v24 = vsel %vm1942_vm5, %v10028_v7, 0 }
0x18ad   :  { %v9978_v38 = vpop.xlane.xlu1 %9977 }
0x18ae   :  { %20332 = vrcp.f32 %v9978_v38 }
0x18b1   :  { %v9981_v45 = vpop.xlane.xlu0 %9980 }
0x18b2   :  { %20334 = vrcp.f32 %v9981_v45 }
0x18b5   :  { %v9984_v5 = vpop.xlane.xlu1 %9983 }
0x18b6   :  { %20336 = vrcp.f32 %v9984_v5 }
0x18b7   :  { %v20331_v31 = vpop.eup %20330 }
0x18b8   :  { %v9998_v2 = vmul.f32 %v20331_v31, %v20315_v36 }
0x18b9   :  { %v9987_v49 = vpop.xlane.xlu0 %9986 }
0x18ba   :  { %v10013_v52 = vpack.c.bf16 %v9998_v2, %v9998_v2  ;;  %20338 = vrcp.f32 %v9987_v49 }
0x18bb   :  { %v20333_v27 = vpop.eup %20332 }
0x18bc   :  { %v10000_v32 = vmul.f32 %v20333_v27, %v20317_v4  ;;  %19213 = vmatmul.mubr.msk.bf16.vlgmr.msra.gmra.mxu0 %vm1438_vm4, %v10013_v52 }
0x18bd   :  { %19223 = vmatpush3.bf16.msra.mxu0 %v10125_v59  ;;  %v9990_v41 = vpop.xlane.xlu1 %9989  ;;  %19224 = vmatprep.mubr.msk.bf16.mxu0 %vm20442_vm1, %v20441_v0 }
0x18be   :  { %v10014_v43 = vpack.c.bf16 %v10000_v32, %v10000_v32  ;;  %20340 = vrcp.f32 %v9990_v41  ;;  %19234 = vmatprep.subr.bf16.mxu0 %v20441_v0 }
0x18bf   :  { %v20335_v36 = vpop.eup %20334 }
0x18c0   :  { %v10002_v30 = vmul.f32 %v20335_v36, %v20319_v13  ;;  %19219 = vmatmul.mubr.msk.bf16.vlgmr.msra.gmra.mxu1 %vm1438_vm4, %v10014_v43  ;;  %v10587_v43 = vsel %vm1942_vm5, %v8331_v3, 0 }
0x18c1   :  { %19229 = vmatpush3.bf16.msra.mxu1 %v10171_v44  ;;  %v9993_v4 = vpop.xlane.xlu0 %9992  ;;  %19230 = vmatprep.mubr.msk.bf16.mxu1 %vm20442_vm1, %v20441_v0 }
0x18c2   :  { %v10015_v62 = vpack.c.bf16 %v10002_v30, %v10002_v30  ;;  %20342 = vrcp.f32 %v9993_v4  ;;  %19240 = vmatprep.subr.bf16.mxu1 %v20441_v0 }
0x18c3   :  { %v20337_v34 = vpop.eup %20336 }
0x18c4   :  { %v10004_v13 = vmul.f32 %v20337_v34, %v22630_v20  ;;  %19225 = vmatmul.mubr.msk.bf16.vlgmr.msra.gmra.mxu0 %vm1438_vm4, %v10015_v62  ;;  %v8332_v62 = vld [vmem:[%s23915_s19 + $0xc] sm:$0xf] }
0x18c5   :  { %19235 = vmatpush3.bf16.msra.mxu0 %v10217_v39  ;;  %v9996_v60 = vpop.xlane.xlu1 %9995  ;;  %19236 = vmatprep.mubr.msk.bf16.mxu0 %vm20442_vm1, %v20441_v0  ;;  %v10676_v1 = vsel %vm1942_vm5, %v8332_v62, 0 }
0x18c6   :  { %v10016_v37 = vpack.c.bf16 %v10004_v13, %v10004_v13  ;;  %20344 = vrcp.f32 %v9996_v60  ;;  %19246 = vmatprep.subr.bf16.mxu0 %v20441_v0 }
0x18c7   :  { %v20339_v40 = vpop.eup %20338 }
0x18c8   :  { %v10006_v8 = vmul.f32 %v20339_v40, %v22634_v58  ;;  %19231 = vmatmul.mubr.msk.bf16.vlgmr.msra.gmra.mxu1 %vm1438_vm4, %v10016_v37 }
0x18c9   :  { %19241 = vmatpush3.bf16.msra.mxu1 %v10263_v55  ;;  %19242 = vmatprep.mubr.msk.bf16.mxu1 %vm20442_vm1, %v20441_v0 }
0x18ca   :  { %v10017_v20 = vpack.c.bf16 %v10006_v8, %v10006_v8  ;;  %19252 = vmatprep.subr.bf16.mxu1 %v20441_v0 }
0x18cb   :  { %v20341_v26 = vpop.eup %20340 }
0x18cc   :  { %v10008_v28 = vmul.f32 %v20341_v26, %v22638_v35  ;;  %19237 = vmatmul.mubr.msk.bf16.vlgmr.msra.gmra.mxu0 %vm1438_vm4, %v10017_v20 }
0x18cd   :  { %19247 = vmatpush3.bf16.msra.mxu0 %v10309_v42  ;;  %19248 = vmatprep.mubr.msk.bf16.mxu0 %vm20442_vm1, %v20441_v0 }
0x18ce   :  { %v10018_v54 = vpack.c.bf16 %v10008_v28, %v10008_v28  ;;  %19258 = vmatprep.subr.bf16.mxu0 %v20441_v0 }
0x18cf   :  { %v20343_v58 = vpop.eup %20342 }
0x18d0   :  { %v10010_v38 = vmul.f32 %v20343_v58, %v22642_v50  ;;  %19243 = vmatmul.mubr.msk.bf16.vlgmr.msra.gmra.mxu1 %vm1438_vm4, %v10018_v54  ;;  %v8329_v50 = vld [vmem:[%s23915_s19] sm:$0xf] }
0x18d1   :  { %19253 = vmatpush3.bf16.msra.mxu1 %v10355_v24  ;;  %19254 = vmatprep.mubr.msk.bf16.mxu1 %vm20442_vm1, %v20441_v0  ;;  %v10409_v5 = vsel %vm1942_vm5, %v8329_v50, 0 }
0x18d2   :  { %v10019_v35 = vpack.c.bf16 %v10010_v38, %v10010_v38  ;;  %19264 = vmatprep.subr.bf16.mxu1 %v20441_v0 }
0x18d3   :  { %v20345_v29 = vpop.eup %20344 }
0x18d4   :  { %v10012_v45 = vmul.f32 %v20345_v29, %v22646_v11  ;;  %19249 = vmatmul.mubr.msk.bf16.vlgmr.msra.gmra.mxu0 %vm1438_vm4, %v10019_v35  ;;  %v8330_v11 = vld [vmem:[%s23915_s19 + $0x4] sm:$0xf] }
0x18d5   :  { %19260 = vmatprep.mubr.msk.bf16.mxu0 %vm20442_vm1, %v20441_v0  ;;  %19259 = vmatpush3.bf16.msra.mxu0 %v10409_v5  ;;  %v10498_v53 = vsel %vm1942_vm5, %v8330_v11, 0 }
0x18d6   :  { %v10020_v14 = vpack.c.bf16 %v10012_v45, %v10012_v45  ;;  %19270 = vmatprep.subr.bf16.mxu0 %v20441_v0 }
0x18d8   :  { %19255 = vmatmul.mubr.msk.bf16.vlgmr.msra.gmra.mxu1 %vm1438_vm4, %v10020_v14 }
0x18d9   :  { %19266 = vmatprep.mubr.msk.bf16.mxu1 %vm20442_vm1, %v20441_v0  ;;  %19265 = vmatpush3.bf16.msra.mxu1 %v10409_v5 }
0x18da   :  { %19276 = vmatprep.subr.bf16.mxu1 %v20441_v0 }
0x197c   :  { %v10069_v31 = vpop.f32.mrf.mxu0 }
0x197d   :  { %v10397_v61 = vpack.c.bf16 %v10069_v31, %v10069_v31 }
0x197e   :  { %v19214_v2 = vpop.f32.mrf.mxu0 }
0x197f   :  { %19261 = vmatmul.mubr.msk.bf16.vlgmr.msra.gmra.mxu0 %vm1438_vm4, %v10397_v61 }
0x1980   :  { %v10072_v48 = vpop.f32.mrf.mxu0  ;;  %v10115_v49 = vpop.f32.mrf.mxu1  ;;  %19271 = vmatpush3.bf16.msra.mxu0 %v10498_v53  ;;  %19272 = vmatprep.mubr.msk.bf16.mxu0 %vm20442_vm1, %v20441_v0 }
0x1981   :  { %v10398_v52 = vpack.c.bf16 %v10115_v49, %v10115_v49  ;;  %19282 = vmatprep.subr.bf16.mxu0 %v20441_v0 }
0x1982   :  { %v19215_v27 = vpop.f32.mrf.mxu0  ;;  %v19220_v59 = vpop.f32.mrf.mxu1 }
0x1983   :  { %19267 = vmatmul.mubr.msk.bf16.vlgmr.msra.gmra.mxu1 %vm1438_vm4, %v10398_v52 }
0x1984   :  { %v10118_v19 = vpop.f32.mrf.mxu1  ;;  %v10161_v32 = vpop.f32.mrf.mxu0  ;;  %19277 = vmatpush3.bf16.msra.mxu1 %v10498_v53  ;;  %19278 = vmatprep.mubr.msk.bf16.mxu1 %vm20442_vm1, %v20441_v0 }
0x1985   :  { %v10399_v41 = vpack.c.bf16 %v10161_v32, %v10161_v32  ;;  %19288 = vmatprep.subr.bf16.mxu1 %v20441_v0 }
0x1986   :  { %v19221_v36 = vpop.f32.mrf.mxu1  ;;  %v19226_v44 = vpop.f32.mrf.mxu0 }
0x1987   :  { %19273 = vmatmul.mubr.msk.bf16.vlgmr.msra.gmra.mxu0 %vm1438_vm4, %v10399_v41 }
0x1988   :  { %v10164_v47 = vpop.f32.mrf.mxu0  ;;  %v10207_v51 = vpop.f32.mrf.mxu1  ;;  %19283 = vmatpush3.bf16.msra.mxu0 %v10587_v43  ;;  %19284 = vmatprep.mubr.msk.bf16.mxu0 %vm20442_vm1, %v20441_v0 }
0x1989   :  { %v10400_v30 = vpack.c.bf16 %v10207_v51, %v10207_v51  ;;  %19294 = vmatprep.subr.bf16.mxu0 %v20441_v0 }
0x198a   :  { %v19227_v12 = vpop.f32.mrf.mxu0  ;;  %v19232_v4 = vpop.f32.mrf.mxu1 }
0x198b   :  { %19279 = vmatmul.mubr.msk.bf16.vlgmr.msra.gmra.mxu1 %vm1438_vm4, %v10400_v30 }
0x198c   :  { %v10210_v34 = vpop.f32.mrf.mxu1  ;;  %v10253_v39 = vpop.f32.mrf.mxu0  ;;  %19289 = vmatpush3.bf16.msra.mxu1 %v10587_v43  ;;  %19290 = vmatprep.mubr.msk.bf16.mxu1 %vm20442_vm1, %v20441_v0 }
0x198d   :  { %v10401_v56 = vpack.c.bf16 %v10253_v39, %v10253_v39  ;;  %19300 = vmatprep.subr.bf16.mxu1 %v20441_v0 }
0x198e   :  { %v19233_v13 = vpop.f32.mrf.mxu1  ;;  %v19238_v60 = vpop.f32.mrf.mxu0 }
0x198f   :  { %19285 = vmatmul.mubr.msk.bf16.vlgmr.msra.gmra.mxu0 %vm1438_vm4, %v10401_v56 }
0x1990   :  { %v10256_v37 = vpop.f32.mrf.mxu0  ;;  %v10299_v40 = vpop.f32.mrf.mxu1  ;;  %19295 = vmatpush3.bf16.msra.mxu0 %v10676_v1  ;;  %19296 = vmatprep.mubr.msk.bf16.mxu0 %vm20442_vm1, %v20441_v0 }
0x1991   :  { %v10402_v55 = vpack.c.bf16 %v10299_v40, %v10299_v40  ;;  %19306 = vmatprep.subr.bf16.mxu0 %v20441_v0 }
0x1992   :  { %v19239_v21 = vpop.f32.mrf.mxu0  ;;  %v19244_v17 = vpop.f32.mrf.mxu1 }
0x1993   :  { %19291 = vmatmul.mubr.msk.bf16.vlgmr.msra.gmra.mxu1 %vm1438_vm4, %v10402_v55 }
0x1994   :  { %v10302_v8 = vpop.f32.mrf.mxu1  ;;  %v10345_v20 = vpop.f32.mrf.mxu0  ;;  %19301 = vmatpush3.bf16.msra.mxu1 %v10676_v1  ;;  %19302 = vmatprep.mubr.msk.bf16.mxu1 %vm20442_vm1, %v20441_v0  ;;  %v22761_v1 = vld [vmem:[%s23912_s23] sm:$0xff] }
0x1995   :  { %v10403_v26 = vpack.c.bf16 %v10345_v20, %v10345_v20  ;;  %19314 = vmatprep.subr.bf16.mxu1 %v20441_v0  ;;  %v10778_v13 = vrot.slane %v22761_v1, %v21150_v33 }
0x1996   :  { %v19245_v42 = vpop.f32.mrf.mxu1  ;;  %v19250_v7 = vpop.f32.mrf.mxu0 }
0x1997   :  { %19297 = vmatmul.mubr.msk.bf16.vlgmr.msra.gmra.mxu0 %vm1438_vm4, %v10403_v26 }
0x1998   :  { %v10348_v28 = vpop.f32.mrf.mxu0  ;;  %v10391_v54 = vpop.f32.mrf.mxu1  ;;  %19310 = vmatprep.mubr.msk.bf16.mxu0 %vm20442_vm1, %v20441_v0 }
0x1999   :  { %v10404_v58 = vpack.c.bf16 %v10391_v54, %v10391_v54 }
0x199a   :  { %v19251_v24 = vpop.f32.mrf.mxu0  ;;  %v19256_v38 = vpop.f32.mrf.mxu1 }
0x199b   :  { %19303 = vmatmul.mubr.msk.bf16.vlgmr.msra.gmra.mxu1 %vm1438_vm4, %v10404_v58 }
0x199c   :  { %v10394_v35 = vpop.f32.mrf.mxu1  ;;  %19322 = vmatprep.mubr.msk.bf16.mxu1 %vm20442_vm1, %v20441_v0 }
0x199e   :  { %v19257_v29 = vpop.f32.mrf.mxu1 }
0x1a3f   :  { %v10445_v45 = vpop.f32.mrf.mxu0 }
0x1a40   :  { %v10761_v47 = vsel %vm323_vm3, %v10445_v45, 0.0 }
0x1a41   :  { %v19262_v14 = vpop.f32.mrf.mxu0 }
0x1a43   :  { %v10448_v50 = vpop.f32.mrf.mxu0  ;;  %v10488_v5 = vpop.f32.mrf.mxu1 }
0x1a44   :  { %v10768_v60 = vsel %vm323_vm3, %v10488_v5, 0.0 }
0x1a45   :  { %v19263_v11 = vpop.f32.mrf.mxu0  ;;  %v19268_v31 = vpop.f32.mrf.mxu1 }
0x1a47   :  { %v10491_v61 = vpop.f32.mrf.mxu1  ;;  %v10534_v53 = vpop.f32.mrf.mxu0 }
0x1a48   :  { %v10762_v43 = vsel %vm323_vm3, %v10534_v53, 0.0 }
0x1a49   :  { %v19269_v2 = vpop.f32.mrf.mxu1  ;;  %v19274_v48 = vpop.f32.mrf.mxu0  ;;  %v10763_v30 = vadd.f32 %v10762_v43, %v10761_v47 }
0x1a4b   :  { %v10537_v49 = vpop.f32.mrf.mxu0  ;;  %v10577_v52 = vpop.f32.mrf.mxu1 }
0x1a4c   :  { %v10769_v62 = vsel %vm323_vm3, %v10577_v52, 0.0 }
0x1a4d   :  { %v19275_v27 = vpop.f32.mrf.mxu0  ;;  %v19280_v59 = vpop.f32.mrf.mxu1  ;;  %v10770_v55 = vadd.f32 %v10769_v62, %v10768_v60 }
0x1a4e   :  { %v20137_v59 = vld [vmem:[%s23916_s20] sm:$0xff]  }
0x1a4f   :  { %v10580_v3 = vpop.f32.mrf.mxu1  ;;  %v10623_v19 = vpop.f32.mrf.mxu0 }
0x1a50   :  { %v10764_v51 = vsel %vm323_vm3, %v10623_v19, 0.0  ;;  %v20138_v3 = vld [vmem:[%s23917_s22 + $0x18] sm:$0xff]  }
0x1a51   :  { %v19281_v32 = vpop.f32.mrf.mxu1  ;;  %v19286_v41 = vpop.f32.mrf.mxu0  ;;  %v10765_v34 = vadd.f32 %v10764_v51, %v10763_v30  ;;  %19315 = vmatpush3.bf16.msra.mxu1 %v20138_v3  ;;  %v10812_v51 = vrot.slane %v22761_v1, %v21175_v15 }
0x1a52   :  { %19316 = vmatprep.subr.bf16.mxu1 %v20441_v0 }
0x1a53   :  { %v10626_v36 = vpop.f32.mrf.mxu0  ;;  %v10666_v44 = vpop.f32.mrf.mxu1 }
0x1a54   :  { %v10771_v37 = vsel %vm323_vm3, %v10666_v44, 0.0 }
0x1a55   :  { %v19287_v12 = vpop.f32.mrf.mxu0  ;;  %v19292_v4 = vpop.f32.mrf.mxu1  ;;  %v10772_v20 = vadd.f32 %v10771_v37, %v10770_v55  ;;  %v20139_v37 = vld [vmem:[%s23917_s22 + $0x10] sm:$0xff]   ;;  %v20141_v55 = vld [vmem:[%s23917_s22] sm:$0xff]  }
0x1a56   :  { %19317 = vmatpush3.bf16.msra.mxu1 %v20139_v37 }
0x1a57   :  { %v10669_v39 = vpop.f32.mrf.mxu1  ;;  %v10712_v56 = vpop.f32.mrf.mxu0  ;;  %19318 = vmatprep.subr.bf16.mxu1 %v20441_v0 }
0x1a58   :  { %v10766_v40 = vsel %vm323_vm3, %v10712_v56, 0.0 }
0x1a59   :  { %v10767_v21 = vadd.f32 %v10766_v40, %v10765_v34  ;;  %v19293_v17 = vpop.f32.mrf.mxu1  ;;  %v19298_v8 = vpop.f32.mrf.mxu0  ;;  %v10818_v34 = vrot.slane %v22761_v1, %v21178_v18  ;;  %v20140_v40 = vld [vmem:[%s23917_s22 + $0x8] sm:$0xff]  }
0x1a5a   :  { %19319 = vmatpush3.bf16.msra.mxu1 %v20140_v40 }
0x1a5b   :  { %v10779_v26 = vadd.f32 %v10778_v13, %v10767_v21  ;;  %v10715_v42 = vpop.f32.mrf.mxu0  ;;  %v10755_v7 = vpop.f32.mrf.mxu1  ;;  %19320 = vmatprep.subr.bf16.mxu1 %v20441_v0  ;;  %v16816_v21 = vld [vmem:[%s23918_s21] ss:$0 sm:$0xff] }
0x1a5c   :  { %v10773_v28 = vsel %vm323_vm3, %v10755_v7, 0.0 }
0x1a5d   :  { %v10774_v54 = vadd.f32 %v10773_v28, %v10772_v20  ;;  %v19299_v58 = vpop.f32.mrf.mxu0  ;;  %v19304_v24 = vpop.f32.mrf.mxu1  ;;  %v10781_v38 = vadd.f32 %v10779_v26, %v22292_v23 }
0x1a5e   :  { %19321 = vmatpush3.bf16.msra.mxu1 %v20141_v55  ;;  %v10902_v24 = vsub.s32 6, %v20609_v9 }
0x1a5f   :  { %v10780_v35 = vadd.f32 %v10778_v13, %v10774_v54  ;;  %v10758_v29 = vpop.f32.mrf.mxu1  ;;  %v10783_v45 = vsel %vm323_vm3, %v10781_v38, 0.0  ;;  %19342 = vmatprep.subr.bf16.mxu1 %v20441_v0 }
0x1a60   :  { %10784 = vadd.xlane.f32.xlu0 %v10783_v45 }
0x1a61   :  { %v19305_v14 = vpop.f32.mrf.mxu1  ;;  %v10782_v50 = vadd.f32 %v10780_v35, %v22300_v63  ;;  %v20136_v63 = vld [vmem:[%s23916_s20 + $0x8] sm:$0xff]  }
0x1a62   :  { %19307 = vmatpush3.bf16.msra.mxu0 %v20136_v63 }
0x1a63   :  { %v10786_v5 = vsel %vm323_vm3, %v10782_v50, 0.0  ;;  %19308 = vmatprep.subr.bf16.mxu0 %v20441_v0 }
0x1a64   :  { %10787 = vadd.xlane.f32.xlu1 %v10786_v5 }
0x1a66   :  { %19309 = vmatpush3.bf16.msra.mxu0 %v20137_v59 }
0x1a67   :  { %19326 = vmatprep.subr.bf16.mxu0 %v20441_v0 }
0x1ae9   :  { %v10785_v11 = vpop.xlane.xlu0 %10784 }
0x1aea   :  { %v10789_v31 = vmul.f32 0.03125, %v10785_v11 }
0x1aec   :  { %v10791_v61 = vsub.f32 %v10781_v38, %v10789_v31  ;;  %v10903_v38 = vrot.slane %v22761_v1, %v10902_v24 }
0x1aed   :  { %v10788_v53 = vpop.xlane.xlu1 %10787 }
0x1aee   :  { %v10790_v2 = vmul.f32 0.03125, %v10788_v53  ;;  %v10793_v48 = vmul.f32 %v10791_v61, %v10791_v61 }
0x1af0   :  { %v10792_v49 = vsub.f32 %v10782_v50, %v10790_v2  ;;  %v10795_v23 = vsel %vm323_vm3, %v10793_v48, 0.0 }
0x1af1   :  { %10796 = vadd.xlane.f32.xlu0 %v10795_v23 }
0x1af2   :  { %v10794_v52 = vmul.f32 %v10792_v49, %v10792_v49 }
0x1af4   :  { %v10798_v27 = vsel %vm323_vm3, %v10794_v52, 0.0 }
0x1af5   :  { %10799 = vadd.xlane.f32.xlu1 %v10798_v27 }
0x1b7a   :  { %v10797_v19 = vpop.xlane.xlu0 %10796 }
0x1b7b   :  { %v10801_v32 = vmul.f32 0.03125, %v10797_v19 }
0x1b7d   :  { %v10803_v41 = vadd.f32 1e-05, %v10801_v32  ;;  %v20142_v32 = vld [vmem:[%s23909_s14 + $0xc8] sm:$0xff]  }
0x1b7e   :  { %v10800_v43 = vpop.xlane.xlu1 %10799 }
0x1b7f   :  { %20346 = vrsqrt.f32 %v10803_v41  ;;  %v10802_v36 = vmul.f32 0.03125, %v10800_v43  ;;  %v20143_v41 = vld [vmem:[%s23909_s14 + $0xd8] sm:$0xff]   ;;  %v20144_v43 = vld [vmem:[%s23909_s14 + $0xc0] sm:$0xff]  }
0x1b81   :  { %v10804_v44 = vadd.f32 1e-05, %v10802_v36  ;;  %v20145_v36 = vld [vmem:[%s23909_s14 + $0xd0] sm:$0xff]  }
0x1b83   :  { %20348 = vrsqrt.f32 %v10804_v44 }
0x1b8c   :  { %v20347_v47 = vpop.eup %20346 }
0x1b8d   :  { %v10807_v30 = vmul.f32 %v20347_v47, %v10791_v61 }
0x1b8f   :  { %v10813_v4 = vmul.f32 %v10812_v51, %v10807_v30 }
0x1b90   :  { %v20349_v12 = vpop.eup %20348 }
0x1b91   :  { %v10808_v62 = vmul.f32 %v20349_v12, %v10792_v49  ;;  %v10819_v56 = vadd.f32 %v10818_v34, %v10813_v4 }
0x1b93   :  { %v10814_v39 = vmul.f32 %v10812_v51, %v10808_v62  ;;  %v11002_v62 = vsub.s32 7, %v20609_v9 }
0x1b95   :  { %v10820_v13 = vadd.f32 %v10818_v34, %v10814_v39  ;;  %v11003_v34 = vrot.slane %v22761_v1, %v11002_v62 }
0x1b97   :  { %v10834_v60 = vpack.c.bf16 %v10820_v13, %v10819_v56 }
0x1b99   :  { %19311 = vmatmul.mubr.msk.bf16.vlgmr.msra.gmra.mxu0 %vm323_vm3, %v10834_v60 }
0x1b9a   :  { %19330 = vmatprep.mubr.msk.bf16.mxu0 %vm20442_vm1, %v20441_v0  ;;  %19327 = vmatpush3.bf16.msra.mxu0 %v20142_v32 }
0x1b9b   :  { %19328 = vmatprep.subr.bf16.mxu0 %v20441_v0 }
0x1b9e   :  { %19329 = vmatpush3.bf16.msra.mxu0 %v20144_v43 }
0x1b9f   :  { %19334 = vmatprep.subr.bf16.mxu0 %v20441_v0 }
0x1c59   :  { %v10890_v17 = vpop.f32.mrf.mxu0 }
0x1c5a   :  { %v10891_v20 = vadd.f32 %v16816_v21, %v10890_v17 }
0x1c5b   :  { %v19312_v8 = vpop.f32.mrf.mxu0 }
0x1c5c   :  { %v10897_v28 = vmax.f32 %v10891_v20, 0.0  ;;  %v20147_v8 = vld [vmem:[%s23909_s14 + $0xe0] sm:$0xff]  }
0x1c5d   :  { %v10893_v26 = vpop.f32.mrf.mxu0 }
0x1c5e   :  { %v10894_v42 = vadd.f32 %v16816_v21, %v10893_v26  ;;  %v20146_v21 = vld [vmem:[%s23909_s14 + $0xe8] sm:$0xff]   ;;  %v20148_v26 = vld [vmem:[%s23909_s14 + $0xf8] sm:$0xff]  }
0x1c5f   :  { %v19313_v7 = vpop.f32.mrf.mxu0 }
0x1c60   :  { %v10898_v54 = vmax.f32 %v10894_v42, 0.0  ;;  %v20149_v7 = vld [vmem:[%s23909_s14 + $0xf0] sm:$0xff]  }
0x1c62   :  { %v10899_v58 = vpack.c.bf16 %v10898_v54, %v10897_v28  ;;  %v20150_v28 = vld [vmem:[%s23909_s14 + $0x108] sm:$0xff]   ;;  %v20151_v54 = vld [vmem:[%s23909_s14 + $0x100] sm:$0xff]  }
0x1c64   :  { %19323 = vmatmul.mubr.msk.bf16.vlgmr.msra.gmra.mxu1 %vm2840_vm6, %v10899_v58  ;;  %v20152_v58 = vld [vmem:[%s23909_s14 + $0x118] sm:$0xff]  }
0x1c65   :  { %19346 = vmatprep.mubr.msk.bf16.mxu1 %vm20442_vm1, %v20441_v0  ;;  %19343 = vmatpush3.bf16.msra.mxu1 %v20143_v41 }
0x1c66   :  { %19344 = vmatprep.subr.bf16.mxu1 %v20441_v0 }
0x1c69   :  { %19345 = vmatpush3.bf16.msra.mxu1 %v20145_v36 }
0x1c6a   :  { %19358 = vmatprep.subr.bf16.mxu1 %v20441_v0 }
0x1d24   :  { %v10965_v35 = vpop.f32.mrf.mxu1 }
0x1d25   :  { %v10966_v29 = vadd.f32 %v10965_v35, %v10903_v38  ;;  %v20154_v35 = vld [vmem:[%s23909_s14 + $0x128] sm:$0xff]  }
0x1d26   :  { %v19324_v45 = vpop.f32.mrf.mxu1 }
0x1d27   :  { %v10972_v14 = vadd.f32 %v10966_v29, %v10819_v56  ;;  %v20155_v29 = vld [vmem:[%s23909_s14 + $0x120] sm:$0xff]   ;;  %v20156_v45 = vld [vmem:[%s23909_s14 + $0x138] sm:$0xff]  }
0x1d28   :  { %v10968_v50 = vpop.f32.mrf.mxu1 }
0x1d29   :  { %v10969_v5 = vadd.f32 %v10968_v50, %v10903_v38  ;;  %v10974_v11 = vsel %vm323_vm3, %v10972_v14, 0.0  ;;  %v20153_v38 = vld [vmem:[%s23909_s14 + $0x110] sm:$0xff]   ;;  %v20158_v50 = vld [vmem:[%s23909_s14 + $0x148] sm:$0xff]  }
0x1d2a   :  { %10975 = vadd.xlane.f32.xlu0 %v10974_v11  ;;  %v19325_v31 = vpop.f32.mrf.mxu1  ;;  %v20160_v11 = vld [vmem:[%s23909_s14 + $0x158] sm:$0xff]  }
0x1d2b   :  { %v10973_v61 = vadd.f32 %v10969_v5, %v10820_v13  ;;  %v16825_v13 = vld [vmem:[%s23912_s23 + $0x8] ss:$0 sm:$0xff]  ;;  %v20159_v5 = vld [vmem:[%s23909_s14 + $0x140] sm:$0xff]   ;;  %v20161_v31 = vld [vmem:[%s23909_s14 + $0x150] sm:$0xff]  }
0x1d2d   :  { %v10977_v53 = vsel %vm323_vm3, %v10973_v61, 0.0 }
0x1d2e   :  { %10978 = vadd.xlane.f32.xlu1 %v10977_v53  ;;  %v20163_v53 = vld [vmem:[%s23909_s14 + $0x160] sm:$0xff]  }
0x1db3   :  { %v10976_v2 = vpop.xlane.xlu0 %10975 }
0x1db4   :  { %v10980_v48 = vmul.f32 0.03125, %v10976_v2  ;;  %v20164_v2 = vld [vmem:[%s23909_s14 + $0x178] sm:$0xff]  }
0x1db6   :  { %v10982_v49 = vsub.f32 %v10972_v14, %v10980_v48  ;;  %v20157_v14 = vld [vmem:[%s23909_s14 + $0x130] sm:$0xff]  }
0x1db7   :  { %v10979_v23 = vpop.xlane.xlu1 %10978  ;;  %v20165_v48 = vld [vmem:[%s23909_s14 + $0x170] sm:$0xff]  }
0x1db8   :  { %v10981_v52 = vmul.f32 0.03125, %v10979_v23  ;;  %v10984_v27 = vmul.f32 %v10982_v49, %v10982_v49 }
0x1dba   :  { %v10983_v63 = vsub.f32 %v10973_v61, %v10981_v52  ;;  %v10986_v59 = vsel %vm323_vm3, %v10984_v27, 0.0  ;;  %v20162_v61 = vld [vmem:[%s23909_s14 + $0x168] sm:$0xff]   ;;  %s23957_s14 = sld [smem:[#allocation13_spill]] }
0x1dbb   :  { %10987 = vadd.xlane.f32.xlu0 %v10986_v59 }
0x1dbc   :  { %v10985_v3 = vmul.f32 %v10983_v63, %v10983_v63 }
0x1dbe   :  { %v10989_v19 = vsel %vm323_vm3, %v10985_v3, 0.0 }
0x1dbf   :  { %10990 = vadd.xlane.f32.xlu1 %v10989_v19 }
0x1dc0   :  { %v17147_v9 = vld [vmem:[%s23957_s14] ss:$0 sm:$0xff] }
0x1e44   :  { %v10988_v44 = vpop.xlane.xlu0 %10987 }
0x1e45   :  { %v10992_v47 = vmul.f32 0.03125, %v10988_v44 }
0x1e47   :  { %v10994_v51 = vadd.f32 1e-05, %v10992_v47 }
0x1e48   :  { %v10991_v30 = vpop.xlane.xlu1 %10990 }
0x1e49   :  { %20350 = vrsqrt.f32 %v10994_v51  ;;  %v10993_v12 = vmul.f32 0.03125, %v10991_v30 }
0x1e4b   :  { %v10995_v4 = vadd.f32 1e-05, %v10993_v12 }
0x1e4d   :  { %20352 = vrsqrt.f32 %v10995_v4 }
0x1e56   :  { %v20351_v39 = vpop.eup %20350 }
0x1e57   :  { %v10998_v56 = vmul.f32 %v20351_v39, %v10982_v49 }
0x1e59   :  { %v11004_v60 = vmul.f32 %v11003_v34, %v10998_v56 }
0x1e5a   :  { %v20353_v37 = vpop.eup %20352 }
0x1e5b   :  { %v22843_v40 = vadd.f32 %v16825_v13, %v11004_v60  ;;  %v10999_v55 = vmul.f32 %v20353_v37, %v10983_v63 }
0x1e5d   :  { %v22850_v17 = vpack.c.bf16 %v22843_v40, %v22843_v40  ;;  %v11005_v1 = vmul.f32 %v11003_v34, %v10999_v55  ;;  %v16896_v55 = vld [vmem:[%s23910_s15 + $0x10] ss:$0 sm:$0xff] }
0x1e5f   :  { %19331 = vmatmul.mubr.msk.bf16.vlgmr.msra.gmra.mxu0 %vm323_vm3, %v22850_v17  ;;  %19347 = vmatmul.mubr.msk.bf16.vlgmr.msra.gmra.mxu1 %vm323_vm3, %v22850_v17  ;;  %v22859_v20 = vadd.f32 %v16825_v13, %v11005_v1 }
0x1e60   :  { %19335 = vmatpush3.bf16.msra.mxu0 %v20142_v32  ;;  %19359 = vmatpush3.bf16.msra.mxu1 %v20146_v21 }
0x1e61   :  { %19336 = vmatprep.subr.bf16.mxu0 %v20441_v0  ;;  %19360 = vmatprep.subr.bf16.mxu1 %v20441_v0  ;;  %v22872_v42 = vpack.c.bf16 %v22859_v20, %v22859_v20 }
0x1e62   :  { %19338 = vmatprep.mubr.msk.bf16.mxu0 %vm20442_vm1, %v20441_v0  ;;  %19362 = vmatprep.mubr.msk.bf16.mxu1 %vm20442_vm1, %v20441_v0 }
0x1e64   :  { %19337 = vmatpush3.bf16.msra.mxu0 %v20144_v43  ;;  %19361 = vmatpush3.bf16.msra.mxu1 %v20147_v8 }
0x1e65   :  { %19350 = vmatprep.subr.bf16.mxu0 %v20441_v0  ;;  %19374 = vmatprep.subr.bf16.mxu1 %v20441_v0 }
0x1e67   :  { %19339 = vmatmul.mubr.msk.bf16.vlgmr.msra.gmra.mxu0 %vm323_vm3, %v22872_v42  ;;  %19363 = vmatmul.mubr.msk.bf16.vlgmr.msra.gmra.mxu1 %vm323_vm3, %v22850_v17 }
0x1e68   :  { %19351 = vmatpush3.bf16.msra.mxu0 %v20143_v41  ;;  %19375 = vmatpush3.bf16.msra.mxu1 %v20148_v26 }
0x1e69   :  { %19352 = vmatprep.subr.bf16.mxu0 %v20441_v0  ;;  %19376 = vmatprep.subr.bf16.mxu1 %v20441_v0 }
0x1e6a   :  { %19354 = vmatprep.mubr.msk.bf16.mxu0 %vm20442_vm1, %v20441_v0  ;;  %19378 = vmatprep.mubr.msk.bf16.mxu1 %vm20442_vm1, %v20441_v0 }
0x1e6c   :  { %19353 = vmatpush3.bf16.msra.mxu0 %v20145_v36  ;;  %19377 = vmatpush3.bf16.msra.mxu1 %v20149_v7 }
0x1e6d   :  { %19366 = vmatprep.subr.bf16.mxu0 %v20441_v0  ;;  %19390 = vmatprep.subr.bf16.mxu1 %v20441_v0 }
0x1e6f   :  { %19355 = vmatmul.mubr.msk.bf16.vlgmr.msra.gmra.mxu0 %vm323_vm3, %v22872_v42  ;;  %19379 = vmatmul.mubr.msk.bf16.vlgmr.msra.gmra.mxu1 %vm323_vm3, %v22850_v17 }
0x1e70   :  { %19367 = vmatpush3.bf16.msra.mxu0 %v20146_v21  ;;  %19391 = vmatpush3.bf16.msra.mxu1 %v20150_v28 }
0x1e71   :  { %19368 = vmatprep.subr.bf16.mxu0 %v20441_v0  ;;  %19392 = vmatprep.subr.bf16.mxu1 %v20441_v0 }
0x1e72   :  { %19370 = vmatprep.mubr.msk.bf16.mxu0 %vm20442_vm1, %v20441_v0  ;;  %19394 = vmatprep.mubr.msk.bf16.mxu1 %vm20442_vm1, %v20441_v0 }
0x1e74   :  { %19369 = vmatpush3.bf16.msra.mxu0 %v20147_v8  ;;  %19393 = vmatpush3.bf16.msra.mxu1 %v20151_v54 }
0x1e75   :  { %19382 = vmatprep.subr.bf16.mxu0 %v20441_v0  ;;  %19406 = vmatprep.subr.bf16.mxu1 %v20441_v0 }
0x1e77   :  { %19371 = vmatmul.mubr.msk.bf16.vlgmr.msra.gmra.mxu0 %vm323_vm3, %v22872_v42  ;;  %19395 = vmatmul.mubr.msk.bf16.vlgmr.msra.gmra.mxu1 %vm323_vm3, %v22850_v17 }
0x1e78   :  { %19383 = vmatpush3.bf16.msra.mxu0 %v20148_v26  ;;  %19407 = vmatpush3.bf16.msra.mxu1 %v20152_v58 }
0x1e79   :  { %19384 = vmatprep.subr.bf16.mxu0 %v20441_v0  ;;  %19408 = vmatprep.subr.bf16.mxu1 %v20441_v0 }
0x1e7a   :  { %19386 = vmatprep.mubr.msk.bf16.mxu0 %vm20442_vm1, %v20441_v0  ;;  %19410 = vmatprep.mubr.msk.bf16.mxu1 %vm20442_vm1, %v20441_v0 }
0x1e7c   :  { %19385 = vmatpush3.bf16.msra.mxu0 %v20149_v7  ;;  %19409 = vmatpush3.bf16.msra.mxu1 %v20153_v38  ;;  %v16892_v7 = vld [vmem:[%s23910_s15 + $0xc] ss:$0 sm:$0xff] }
0x1e7d   :  { %19398 = vmatprep.subr.bf16.mxu0 %v20441_v0  ;;  %19422 = vmatprep.subr.bf16.mxu1 %v20441_v0 }
0x1e7f   :  { %19387 = vmatmul.mubr.msk.bf16.vlgmr.msra.gmra.mxu0 %vm323_vm3, %v22872_v42  ;;  %19411 = vmatmul.mubr.msk.bf16.vlgmr.msra.gmra.mxu1 %vm323_vm3, %v22850_v17 }
0x1e80   :  { %19399 = vmatpush3.bf16.msra.mxu0 %v20150_v28  ;;  %19423 = vmatpush3.bf16.msra.mxu1 %v20154_v35 }
0x1e81   :  { %19400 = vmatprep.subr.bf16.mxu0 %v20441_v0  ;;  %19424 = vmatprep.subr.bf16.mxu1 %v20441_v0 }
0x1e82   :  { %19402 = vmatprep.mubr.msk.bf16.mxu0 %vm20442_vm1, %v20441_v0  ;;  %19426 = vmatprep.mubr.msk.bf16.mxu1 %vm20442_vm1, %v20441_v0 }
0x1e84   :  { %19401 = vmatpush3.bf16.msra.mxu0 %v20151_v54  ;;  %19425 = vmatpush3.bf16.msra.mxu1 %v20155_v29 }
0x1e85   :  { %19414 = vmatprep.subr.bf16.mxu0 %v20441_v0  ;;  %19438 = vmatprep.subr.bf16.mxu1 %v20441_v0 }
0x1e87   :  { %19403 = vmatmul.mubr.msk.bf16.vlgmr.msra.gmra.mxu0 %vm323_vm3, %v22872_v42  ;;  %19427 = vmatmul.mubr.msk.bf16.vlgmr.msra.gmra.mxu1 %vm323_vm3, %v22850_v17 }
0x1e88   :  { %19415 = vmatpush3.bf16.msra.mxu0 %v20152_v58  ;;  %19439 = vmatpush3.bf16.msra.mxu1 %v20156_v45 }
0x1e89   :  { %19416 = vmatprep.subr.bf16.mxu0 %v20441_v0  ;;  %19440 = vmatprep.subr.bf16.mxu1 %v20441_v0 }
0x1e8a   :  { %19418 = vmatprep.mubr.msk.bf16.mxu0 %vm20442_vm1, %v20441_v0  ;;  %19442 = vmatprep.mubr.msk.bf16.mxu1 %vm20442_vm1, %v20441_v0 }
0x1e8c   :  { %19417 = vmatpush3.bf16.msra.mxu0 %v20153_v38  ;;  %19441 = vmatpush3.bf16.msra.mxu1 %v20157_v14 }
0x1e8d   :  { %19430 = vmatprep.subr.bf16.mxu0 %v20441_v0  ;;  %19454 = vmatprep.subr.bf16.mxu1 %v20441_v0 }
0x1e8f   :  { %19419 = vmatmul.mubr.msk.bf16.vlgmr.msra.gmra.mxu0 %vm323_vm3, %v22872_v42  ;;  %19443 = vmatmul.mubr.msk.bf16.vlgmr.msra.gmra.mxu1 %vm323_vm3, %v22850_v17 }
0x1e90   :  { %19431 = vmatpush3.bf16.msra.mxu0 %v20154_v35  ;;  %19455 = vmatpush3.bf16.msra.mxu1 %v20158_v50 }
0x1e91   :  { %19432 = vmatprep.subr.bf16.mxu0 %v20441_v0  ;;  %19456 = vmatprep.subr.bf16.mxu1 %v20441_v0 }
0x1e92   :  { %19434 = vmatprep.mubr.msk.bf16.mxu0 %vm20442_vm1, %v20441_v0  ;;  %19458 = vmatprep.mubr.msk.bf16.mxu1 %vm20442_vm1, %v20441_v0 }
0x1e94   :  { %19433 = vmatpush3.bf16.msra.mxu0 %v20155_v29  ;;  %19457 = vmatpush3.bf16.msra.mxu1 %v20159_v5  ;;  %v16897_v29 = vld [vmem:[%s23910_s15 + $0x11] ss:$0 sm:$0xff] }
0x1e95   :  { %19446 = vmatprep.subr.bf16.mxu0 %v20441_v0  ;;  %19470 = vmatprep.subr.bf16.mxu1 %v20441_v0 }
0x1e97   :  { %19435 = vmatmul.mubr.msk.bf16.vlgmr.msra.gmra.mxu0 %vm323_vm3, %v22872_v42  ;;  %19459 = vmatmul.mubr.msk.bf16.vlgmr.msra.gmra.mxu1 %vm323_vm3, %v22850_v17 }
0x1e98   :  { %19447 = vmatpush3.bf16.msra.mxu0 %v20156_v45  ;;  %19471 = vmatpush3.bf16.msra.mxu1 %v20160_v11 }
0x1e99   :  { %19448 = vmatprep.subr.bf16.mxu0 %v20441_v0  ;;  %19472 = vmatprep.subr.bf16.mxu1 %v20441_v0 }
0x1e9a   :  { %19450 = vmatprep.mubr.msk.bf16.mxu0 %vm20442_vm1, %v20441_v0  ;;  %19474 = vmatprep.mubr.msk.bf16.mxu1 %vm20442_vm1, %v20441_v0 }
0x1e9c   :  { %19449 = vmatpush3.bf16.msra.mxu0 %v20157_v14  ;;  %19473 = vmatpush3.bf16.msra.mxu1 %v20161_v31 }
0x1e9d   :  { %19462 = vmatprep.subr.bf16.mxu0 %v20441_v0  ;;  %19486 = vmatprep.subr.bf16.mxu1 %v20441_v0 }
0x1e9f   :  { %19451 = vmatmul.mubr.msk.bf16.vlgmr.msra.gmra.mxu0 %vm323_vm3, %v22872_v42  ;;  %19475 = vmatmul.mubr.msk.bf16.vlgmr.msra.gmra.mxu1 %vm323_vm3, %v22850_v17 }
0x1ea0   :  { %19463 = vmatpush3.bf16.msra.mxu0 %v20158_v50  ;;  %19487 = vmatpush3.bf16.msra.mxu1 %v20162_v61 }
0x1ea1   :  { %19464 = vmatprep.subr.bf16.mxu0 %v20441_v0  ;;  %19488 = vmatprep.subr.bf16.mxu1 %v20441_v0 }
0x1ea2   :  { %19466 = vmatprep.mubr.msk.bf16.mxu0 %vm20442_vm1, %v20441_v0  ;;  %19490 = vmatprep.mubr.msk.bf16.mxu1 %vm20442_vm1, %v20441_v0 }
0x1ea4   :  { %19465 = vmatpush3.bf16.msra.mxu0 %v20159_v5  ;;  %19489 = vmatpush3.bf16.msra.mxu1 %v20163_v53 }
0x1ea5   :  { %19478 = vmatprep.subr.bf16.mxu0 %v20441_v0  ;;  %19502 = vmatprep.subr.bf16.mxu1 %v20441_v0 }
0x1ea7   :  { %19467 = vmatmul.mubr.msk.bf16.vlgmr.msra.gmra.mxu0 %vm323_vm3, %v22872_v42  ;;  %19491 = vmatmul.mubr.msk.bf16.vlgmr.msra.gmra.mxu1 %vm323_vm3, %v22850_v17 }
0x1ea8   :  { %19479 = vmatpush3.bf16.msra.mxu0 %v20160_v11  ;;  %19503 = vmatpush3.bf16.msra.mxu1 %v20164_v2 }
0x1ea9   :  { %19480 = vmatprep.subr.bf16.mxu0 %v20441_v0  ;;  %19504 = vmatprep.subr.bf16.mxu1 %v20441_v0 }
0x1eaa   :  { %19482 = vmatprep.mubr.msk.bf16.mxu0 %vm20442_vm1, %v20441_v0  ;;  %19506 = vmatprep.mubr.msk.bf16.mxu1 %vm20442_vm1, %v20441_v0 }
0x1eac   :  { %19481 = vmatpush3.bf16.msra.mxu0 %v20161_v31  ;;  %19505 = vmatpush3.bf16.msra.mxu1 %v20165_v48 }
0x1ead   :  { %19494 = vmatprep.subr.bf16.mxu0 %v20441_v0  ;;  %19518 = vmatprep.subr.bf16.mxu1 %v20441_v0 }
0x1eaf   :  { %19483 = vmatmul.mubr.msk.bf16.vlgmr.msra.gmra.mxu0 %vm323_vm3, %v22872_v42  ;;  %19507 = vmatmul.mubr.msk.bf16.vlgmr.msra.gmra.mxu1 %vm323_vm3, %v22850_v17 }
0x1eb0   :  { %19495 = vmatpush3.bf16.msra.mxu0 %v20162_v61  ;;  %19498 = vmatprep.mubr.msk.bf16.mxu0 %vm20442_vm1, %v20441_v0 }
0x1eb1   :  { %19496 = vmatprep.subr.bf16.mxu0 %v20441_v0  ;;  %19520 = vmatprep.mubr.msk.bf16.mxu1 %vm20442_vm1, %v20441_v0 }
0x1eb4   :  { %19497 = vmatpush3.bf16.msra.mxu0 %v20163_v53 }
0x1eb5   :  { %19510 = vmatprep.subr.bf16.mxu0 %v20441_v0 }
0x1eb7   :  { %19499 = vmatmul.mubr.msk.bf16.vlgmr.msra.gmra.mxu0 %vm323_vm3, %v22872_v42 }
0x1eb8   :  { %19511 = vmatpush3.bf16.msra.mxu0 %v20164_v2  ;;  %19514 = vmatprep.mubr.msk.bf16.mxu0 %vm20442_vm1, %v20441_v0  ;;  %v16893_v2 = vld [vmem:[%s23910_s15 + $0xd] ss:$0 sm:$0xff] }
0x1eb9   :  { %19512 = vmatprep.subr.bf16.mxu0 %v20441_v0 }
0x1ebc   :  { %19513 = vmatpush3.bf16.msra.mxu0 %v20165_v48 }
0x1ebd   :  { %19524 = vmatprep.subr.bf16.mxu0 %v20441_v0 }
0x1ebf   :  { %19515 = vmatmul.mubr.msk.bf16.vlgmr.msra.gmra.mxu0 %vm323_vm3, %v22872_v42 }
0x1ec0   :  { %19526 = vmatprep.mubr.msk.bf16.mxu0 %vm20442_vm1, %v20441_v0 }
0x1f1f   :  { %v11205_v49 = vpop.f32.mrf.mxu0  ;;  %v11300_v23 = vpop.f32.mrf.mxu1 }
0x1f20   :  { %v11206_v45 = vadd.f32 %v16892_v7, %v11205_v49 }
0x1f21   :  { %v19332_v52 = vpop.f32.mrf.mxu0  ;;  %v19348_v27 = vpop.f32.mrf.mxu1 }
0x1f22   :  { %v12266_v61 = vpack.c.bf16 %v11206_v45, %v11206_v45 }
0x1f23   :  { %v11208_v63 = vpop.f32.mrf.mxu0  ;;  %v11303_v59 = vpop.f32.mrf.mxu1 }
0x1f24   :  { %v16898_v59 = vld [vmem:[%s23910_s15 + $0x12] ss:$0 sm:$0xff] }
0x1f25   :  { %v19333_v3 = vpop.f32.mrf.mxu0  ;;  %v19349_v19 = vpop.f32.mrf.mxu1 }
0x1f26   :  { %v11301_v3 = vadd.f32 %v16893_v2, %v11300_v23 }
0x1f27   :  { %v23055_v32 = vpop.f32.mrf.mxu0  ;;  %v23057_v41 = vpop.f32.mrf.mxu1 }
0x1f29   :  { %v19340_v43 = vpop.f32.mrf.mxu0  ;;  %v19364_v36 = vpop.f32.mrf.mxu1 }
0x1f2b   :  { %v11251_v44 = vpop.f32.mrf.mxu0  ;;  %v11395_v47 = vpop.f32.mrf.mxu1 }
0x1f2d   :  { %v19341_v51 = vpop.f32.mrf.mxu0  ;;  %v19365_v30 = vpop.f32.mrf.mxu1 }
0x1f2e   :  { %v12268_v30 = vpack.c.bf16 %v11301_v3, %v11301_v3 }
0x1f2f   :  { %v23059_v12 = vpop.f32.mrf.mxu0  ;;  %v23061_v4 = vpop.f32.mrf.mxu1 }
0x1f31   :  { %v19356_v34 = vpop.f32.mrf.mxu0  ;;  %v19380_v39 = vpop.f32.mrf.mxu1 }
0x1f33   :  { %v11343_v56 = vpop.f32.mrf.mxu0  ;;  %v11487_v13 = vpop.f32.mrf.mxu1 }
0x1f34   :  { %v23092_v56 = vld [vmem:[%s23910_s15 + $0xe] ss:$0 sm:$0xff] }
0x1f35   :  { %v19357_v60 = vpop.f32.mrf.mxu0  ;;  %v19381_v37 = vpop.f32.mrf.mxu1 }
0x1f37   :  { %v23066_v21 = vpop.f32.mrf.mxu0  ;;  %v11576_v17 = vpop.f32.mrf.mxu1 }
0x1f38   :  { %v11577_v1 = vadd.f32 %v16896_v55, %v11576_v17 }
0x1f39   :  { %v19372_v8 = vpop.f32.mrf.mxu0  ;;  %v19396_v26 = vpop.f32.mrf.mxu1 }
0x1f3a   :  { %v12274_v42 = vpack.c.bf16 %v11577_v1, %v11577_v1  ;;  %v16899_v1 = vld [vmem:[%s23910_s15 + $0x13] ss:$0 sm:$0xff]  ;;  %v11249_v8 = vadd.f32 %v16892_v7, %v23055_v32  ;;  %v11393_v26 = vadd.f32 %v23092_v56, %v23057_v41  ;;  %v16895_v41 = vld [vmem:[%s23910_s15 + $0xf] ss:$0 sm:$0xff] }
0x1f3b   :  { %v11435_v28 = vpop.f32.mrf.mxu0  ;;  %v11579_v54 = vpop.f32.mrf.mxu1 }
0x1f3c   :  { %v12286_v58 = vsel %vm1438_vm4, %v12274_v42, 0  ;;  %v12267_v45 = vpack.c.bf16 %v11249_v8, %v11249_v8 }
0x1f3d   :  { %v19373_v38 = vpop.f32.mrf.mxu0  ;;  %v19397_v35 = vpop.f32.mrf.mxu1  ;;  %19519 = vmatpush3.bf16.xpose.msra.mxu1 %v12286_v58 }
0x1f3e   :  { %19530 = vmatprep.subr.bf16.mxu1 %v20441_v0 }
0x1f3f   :  { %v23076_v14 = vpop.f32.mrf.mxu0  ;;  %v11668_v50 = vpop.f32.mrf.mxu1 }
0x1f40   :  { %v11669_v5 = vadd.f32 %v16897_v29, %v11668_v50  ;;  %v12270_v50 = vpack.c.bf16 %v11393_v26, %v11393_v26 }
0x1f41   :  { %v19388_v11 = vpop.f32.mrf.mxu0  ;;  %v19412_v31 = vpop.f32.mrf.mxu1 }
0x1f42   :  { %v12276_v53 = vpack.c.bf16 %v11669_v5, %v11669_v5 }
0x1f43   :  { %v11527_v48 = vpop.f32.mrf.mxu0  ;;  %v11671_v52 = vpop.f32.mrf.mxu1 }
0x1f44   :  { %v12378_v27 = vsel %vm1438_vm4, %v12276_v53, 0  ;;  %19521 = vmatmul.mubr.msk.bf16.vlgmr.msra.gmra.mxu1 %vm1438_vm4, %v12266_v61  ;;  %v16900_v48 = vld [vmem:[%s23910_s15 + $0x14] ss:$0 sm:$0xff]  ;;  %v11341_v52 = vadd.f32 %v16893_v2, %v23059_v12 }
0x1f45   :  { %v19389_v49 = vpop.f32.mrf.mxu0  ;;  %v19413_v63 = vpop.f32.mrf.mxu1  ;;  %19531 = vmatpush3.bf16.xpose.msra.mxu1 %v12378_v27  ;;  %19532 = vmatprep.mubr.msk.bf16.mxu1 %vm20442_vm1, %v20441_v0  ;;  %v11485_v27 = vadd.f32 %v16895_v41, %v23061_v4 }
0x1f46   :  { %19542 = vmatprep.subr.bf16.mxu1 %v20441_v0 }
0x1f47   :  { %v11616_v19 = vpop.f32.mrf.mxu0  ;;  %v11760_v43 = vpop.f32.mrf.mxu1  ;;  %v12272_v12 = vpack.c.bf16 %v11485_v27, %v11485_v27 }
0x1f48   :  { %v11617_v36 = vadd.f32 %v16896_v55, %v11616_v19  ;;  %v11761_v44 = vadd.f32 %v16898_v59, %v11760_v43 }
0x1f49   :  { %v19404_v47 = vpop.f32.mrf.mxu0  ;;  %v19428_v51 = vpop.f32.mrf.mxu1 }
0x1f4a   :  { %v12275_v34 = vpack.c.bf16 %v11617_v36, %v11617_v36  ;;  %v12278_v39 = vpack.c.bf16 %v11761_v44, %v11761_v44  ;;  %v12269_v44 = vpack.c.bf16 %v11341_v52, %v11341_v52 }
0x1f4b   :  { %v11619_v13 = vpop.f32.mrf.mxu0  ;;  %v11763_v60 = vpop.f32.mrf.mxu1 }
0x1f4c   :  { %v12332_v23 = vsel %vm1438_vm4, %v12275_v34, 0  ;;  %v12470_v37 = vsel %vm1438_vm4, %v12278_v39, 0  ;;  %19533 = vmatmul.mubr.msk.bf16.vlgmr.msra.gmra.mxu1 %vm1438_vm4, %v12268_v30 }
0x1f4d   :  { %v19405_v55 = vpop.f32.mrf.mxu0  ;;  %v19429_v17 = vpop.f32.mrf.mxu1  ;;  %19525 = vmatpush3.bf16.xpose.msra.mxu0 %v12332_v23  ;;  %19543 = vmatpush3.bf16.xpose.msra.mxu1 %v12470_v37 }
0x1f4e   :  { %19544 = vmatprep.mubr.msk.bf16.mxu1 %vm20442_vm1, %v20441_v0  ;;  %19536 = vmatprep.subr.bf16.mxu0 %v20441_v0 }
0x1f4f   :  { %v11708_v42 = vpop.f32.mrf.mxu0  ;;  %v11852_v28 = vpop.f32.mrf.mxu1  ;;  %19554 = vmatprep.subr.bf16.mxu1 %v20441_v0 }
0x1f50   :  { %v11709_v54 = vadd.f32 %v16897_v29, %v11708_v42  ;;  %v11853_v58 = vadd.f32 %v16899_v1, %v11852_v28 }
0x1f51   :  { %v19420_v38 = vpop.f32.mrf.mxu0  ;;  %v19444_v35 = vpop.f32.mrf.mxu1 }
0x1f52   :  { %v12277_v5 = vpack.c.bf16 %v11709_v54, %v11709_v54  ;;  %v12280_v32 = vpack.c.bf16 %v11853_v58, %v11853_v58  ;;  %v11525_v58 = vadd.f32 %v16895_v41, %v23076_v14 }
0x1f53   :  { %v11711_v7 = vpop.f32.mrf.mxu0  ;;  %v11855_v11 = vpop.f32.mrf.mxu1 }
0x1f54   :  { %v12424_v31 = vsel %vm1438_vm4, %v12277_v5, 0  ;;  %v12562_v61 = vsel %vm1438_vm4, %v12280_v32, 0  ;;  %19527 = vmatmul.mubr.msk.bf16.vlgmr.msra.gmra.mxu0 %vm1438_vm4, %v12267_v45  ;;  %19545 = vmatmul.mubr.msk.bf16.vlgmr.msra.gmra.mxu1 %vm1438_vm4, %v12270_v50  ;;  %v12273_v5 = vpack.c.bf16 %v11525_v58, %v11525_v58 }
0x1f55   :  { %v19421_v29 = vpop.f32.mrf.mxu0  ;;  %v19445_v53 = vpop.f32.mrf.mxu1  ;;  %19537 = vmatpush3.bf16.xpose.msra.mxu0 %v12424_v31  ;;  %19555 = vmatpush3.bf16.xpose.msra.mxu1 %v12562_v61 }
0x1f56   :  { %19538 = vmatprep.mubr.msk.bf16.mxu0 %vm20442_vm1, %v20441_v0  ;;  %19556 = vmatprep.mubr.msk.bf16.mxu1 %vm20442_vm1, %v20441_v0 }
0x1f57   :  { %v11800_v49 = vpop.f32.mrf.mxu0  ;;  %v11944_v63 = vpop.f32.mrf.mxu1  ;;  %19548 = vmatprep.subr.bf16.mxu0 %v20441_v0  ;;  %19566 = vmatprep.subr.bf16.mxu1 %v20441_v0 }
0x1f58   :  { %v11801_v3 = vadd.f32 %v16898_v59, %v11800_v49  ;;  %v11945_v19 = vadd.f32 %v16900_v48, %v11944_v63  ;;  %v11433_v59 = vadd.f32 %v23092_v56, %v23066_v21 }
0x1f59   :  { %v19436_v43 = vpop.f32.mrf.mxu0  ;;  %v19460_v36 = vpop.f32.mrf.mxu1 }
0x1f5a   :  { %v12279_v2 = vpack.c.bf16 %v11801_v3, %v11801_v3  ;;  %v12762_v4 = vpack.c.bf16 %v11945_v19, %v11945_v19  ;;  %v12271_v8 = vpack.c.bf16 %v11433_v59, %v11433_v59 }
0x1f5b   :  { %v11803_v47 = vpop.f32.mrf.mxu0  ;;  %v11947_v51 = vpop.f32.mrf.mxu1 }
0x1f5c   :  { %v12516_v30 = vsel %vm1438_vm4, %v12279_v2, 0  ;;  %v12774_v34 = vsel %vm1942_vm5, %v12762_v4, 0  ;;  %19539 = vmatmul.mubr.msk.bf16.vlgmr.msra.gmra.mxu0 %vm1438_vm4, %v12269_v44  ;;  %19557 = vmatmul.mubr.msk.bf16.vlgmr.msra.gmra.mxu1 %vm1438_vm4, %v12272_v12 }
0x1f5d   :  { %v19437_v39 = vpop.f32.mrf.mxu0  ;;  %v19461_v13 = vpop.f32.mrf.mxu1  ;;  %19549 = vmatpush3.bf16.xpose.msra.mxu0 %v12516_v30  ;;  %19567 = vmatpush3.bf16.msra.mxu1 %v12774_v34 }
0x1f5e   :  { %19550 = vmatprep.mubr.msk.bf16.mxu0 %vm20442_vm1, %v20441_v0  ;;  %19560 = vmatprep.subr.bf16.mxu0 %v20441_v0 }
0x1f5f   :  { %v11892_v60 = vpop.f32.mrf.mxu0  ;;  %v23134_v23 = vpop.f32.mrf.mxu1  ;;  %19568 = vmatprep.mubr.msk.bf16.mxu1 %vm20442_vm1, %v20441_v0  ;;  %19578 = vmatprep.subr.bf16.mxu1 %v20441_v0 }
0x1f60   :  { %v11893_v37 = vadd.f32 %v16899_v1, %v11892_v60 }
0x1f61   :  { %v19452_v55 = vpop.f32.mrf.mxu0  ;;  %v19476_v17 = vpop.f32.mrf.mxu1 }
0x1f62   :  { %v12281_v26 = vpack.c.bf16 %v11893_v37, %v11893_v37 }
0x1f63   :  { %v11895_v42 = vpop.f32.mrf.mxu0  ;;  %v12039_v21 = vpop.f32.mrf.mxu1 }
0x1f64   :  { %v12608_v56 = vsel %vm1438_vm4, %v12281_v26, 0  ;;  %19551 = vmatmul.mubr.msk.bf16.vlgmr.msra.gmra.mxu0 %vm1438_vm4, %v12271_v8 }
0x1f65   :  { %v19453_v28 = vpop.f32.mrf.mxu0  ;;  %v19477_v54 = vpop.f32.mrf.mxu1  ;;  %19561 = vmatpush3.bf16.xpose.msra.mxu0 %v12608_v56  ;;  %19562 = vmatprep.mubr.msk.bf16.mxu0 %vm20442_vm1, %v20441_v0 }
0x1f66   :  { %19572 = vmatprep.subr.bf16.mxu0 %v20441_v0 }
0x1f67   :  { %v11984_v1 = vpop.f32.mrf.mxu0  ;;  %v23145_v38 = vpop.f32.mrf.mxu1 }
0x1f68   :  { %v11985_v35 = vadd.f32 %v16900_v48, %v11984_v1 }
0x1f69   :  { %v19468_v45 = vpop.f32.mrf.mxu0  ;;  %v19492_v50 = vpop.f32.mrf.mxu1 }
0x1f6a   :  { %v12763_v32 = vpack.c.bf16 %v11985_v35, %v11985_v35 }
0x1f6b   :  { %v11987_v7 = vpop.f32.mrf.mxu0  ;;  %v12131_v11 = vpop.f32.mrf.mxu1 }
0x1f6c   :  { %v12820_v31 = vsel %vm1942_vm5, %v12763_v32, 0  ;;  %19563 = vmatmul.mubr.msk.bf16.vlgmr.msra.gmra.mxu0 %vm1438_vm4, %v12273_v5 }
0x1f6d   :  { %v19469_v61 = vpop.f32.mrf.mxu0  ;;  %v19493_v29 = vpop.f32.mrf.mxu1  ;;  %19573 = vmatpush3.bf16.msra.mxu0 %v12820_v31  ;;  %19574 = vmatprep.mubr.msk.bf16.mxu0 %vm20442_vm1, %v20441_v0 }
0x1f6e   :  { %19584 = vmatprep.subr.bf16.mxu0 %v20441_v0 }
0x1f6f   :  { %v23152_v14 = vpop.f32.mrf.mxu0  ;;  %v23154_v41 = vpop.f32.mrf.mxu1 }
0x1f71   :  { %v19484_v53 = vpop.f32.mrf.mxu0  ;;  %v19508_v48 = vpop.f32.mrf.mxu1 }
0x1f73   :  { %v12079_v52 = vpop.f32.mrf.mxu0  ;;  %v12223_v27 = vpop.f32.mrf.mxu1 }
0x1f75   :  { %v19485_v49 = vpop.f32.mrf.mxu0  ;;  %v19509_v63 = vpop.f32.mrf.mxu1 }
0x1f77   :  { %v23156_v3 = vpop.f32.mrf.mxu0 }
0x1f79   :  { %v19500_v19 = vpop.f32.mrf.mxu0 }
0x1f7b   :  { %v12171_v43 = vpop.f32.mrf.mxu0 }
0x1f7d   :  { %v19501_v36 = vpop.f32.mrf.mxu0 }
0x1f7f   :  { %v23158_v44 = vpop.f32.mrf.mxu0 }
0x1f81   :  { %v19516_v12 = vpop.f32.mrf.mxu0 }
0x1f83   :  { %v12263_v2 = vpop.f32.mrf.mxu0 }
0x1f85   :  { %v19517_v4 = vpop.f32.mrf.mxu0 }
0x2004   :  { %v12322_v47 = vpop.f32.mrf.mxu1 }
0x2005   :  { %v12650_v51 = vmul.f32 0.35355338, %v12322_v47 }
0x2006   :  { %v19522_v30 = vpop.f32.mrf.mxu1 }
0x2007   :  { %v23161_v34 = vadd.f32 %v12650_v51, %v22083_v6 }
0x2008   :  { %v12325_v39 = vpop.f32.mrf.mxu1 }
0x2009   :  { %v12666_v13 = vsel %vm1438_vm4, %v23161_v34, -inf }
0x200a   :  { %12667 = vmax.xlane.f32.xlu0 %v12666_v13  ;;  %v19523_v59 = vpop.f32.mrf.mxu1 }
0x200c   :  { %v12414_v60 = vpop.f32.mrf.mxu1 }
0x200d   :  { %v12652_v37 = vmul.f32 0.35355338, %v12414_v60 }
0x200e   :  { %v19534_v55 = vpop.f32.mrf.mxu1 }
0x200f   :  { %v12660_v17 = vadd.f32 %v12652_v37, %v22083_v6 }
0x2010   :  { %v12417_v8 = vpop.f32.mrf.mxu1 }
0x2011   :  { %v12672_v26 = vsel %vm1438_vm4, %v12660_v17, -inf }
0x2012   :  { %12673 = vmax.xlane.f32.xlu0 %v12672_v26  ;;  %v19535_v42 = vpop.f32.mrf.mxu1 }
0x2014   :  { %v12368_v21 = vpop.f32.mrf.mxu0  ;;  %v12506_v56 = vpop.f32.mrf.mxu1 }
0x2015   :  { %v12651_v28 = vmul.f32 0.35355338, %v12368_v21  ;;  %v12654_v54 = vmul.f32 0.35355338, %v12506_v56 }
0x2016   :  { %v19528_v58 = vpop.f32.mrf.mxu0  ;;  %v19546_v1 = vpop.f32.mrf.mxu1 }
0x2017   :  { %v12662_v35 = vadd.f32 %v12654_v54, %v22083_v6  ;;  %v12659_v45 = vadd.f32 %v12651_v28, %v22085_v16 }
0x2018   :  { %v12371_v50 = vpop.f32.mrf.mxu0  ;;  %v12509_v5 = vpop.f32.mrf.mxu1 }
0x2019   :  { %v12678_v32 = vsel %vm1438_vm4, %v12662_v35, -inf  ;;  %v12669_v7 = vsel %vm1438_vm4, %v12659_v45, -inf }
0x201a   :  { %12679 = vmax.xlane.f32.xlu0 %v12678_v32  ;;  %v19547_v11 = vpop.f32.mrf.mxu1  ;;  %12670 = vmax.xlane.f32.xlu1 %v12669_v7  ;;  %v19529_v31 = vpop.f32.mrf.mxu0 }
0x201c   :  { %v12460_v61 = vpop.f32.mrf.mxu0  ;;  %v12598_v29 = vpop.f32.mrf.mxu1 }
0x201d   :  { %v12653_v53 = vmul.f32 0.35355338, %v12460_v61  ;;  %v12656_v48 = vmul.f32 0.35355338, %v12598_v29 }
0x201e   :  { %v19540_v52 = vpop.f32.mrf.mxu0  ;;  %v19558_v27 = vpop.f32.mrf.mxu1 }
0x201f   :  { %v12664_v49 = vadd.f32 %v12656_v48, %v22083_v6  ;;  %v12661_v63 = vadd.f32 %v12653_v53, %v22085_v16 }
0x2020   :  { %v12463_v19 = vpop.f32.mrf.mxu0  ;;  %v12601_v43 = vpop.f32.mrf.mxu1 }
0x2021   :  { %v12684_v36 = vsel %vm1438_vm4, %v12664_v49, -inf  ;;  %v12675_v12 = vsel %vm1438_vm4, %v12661_v63, -inf }
0x2022   :  { %12685 = vmax.xlane.f32.xlu0 %v12684_v36  ;;  %v19559_v2 = vpop.f32.mrf.mxu1  ;;  %12676 = vmax.xlane.f32.xlu1 %v12675_v12  ;;  %v19541_v4 = vpop.f32.mrf.mxu0 }
0x2024   :  { %v12552_v47 = vpop.f32.mrf.mxu0 }
0x2025   :  { %v12655_v51 = vmul.f32 0.35355338, %v12552_v47 }
0x2026   :  { %v19552_v30 = vpop.f32.mrf.mxu0 }
0x2027   :  { %v12663_v39 = vadd.f32 %v12655_v51, %v22085_v16 }
0x2028   :  { %v12555_v13 = vpop.f32.mrf.mxu0 }
0x2029   :  { %v12681_v6 = vsel %vm1438_vm4, %v12663_v39, -inf }
0x202a   :  { %12682 = vmax.xlane.f32.xlu1 %v12681_v6  ;;  %v19553_v59 = vpop.f32.mrf.mxu0 }
0x202c   :  { %v12644_v60 = vpop.f32.mrf.mxu0 }
0x202d   :  { %v12657_v37 = vmul.f32 0.35355338, %v12644_v60 }
0x202e   :  { %v19564_v55 = vpop.f32.mrf.mxu0 }
0x202f   :  { %v12665_v8 = vadd.f32 %v12657_v37, %v22085_v16 }
0x2030   :  { %v12647_v26 = vpop.f32.mrf.mxu0 }
0x2031   :  { %v12687_v42 = vsel %vm1438_vm4, %v12665_v8, -inf  ;;  %v16901_v26 = vld [vmem:[%s23910_s15 + $0x15] ss:$0 sm:$0xff] }
0x2032   :  { %12688 = vmax.xlane.f32.xlu1 %v12687_v42  ;;  %v19565_v21 = vpop.f32.mrf.mxu0 }
0x2033   :  { %v12037_v21 = vadd.f32 %v16901_v26, %v23134_v23 }
0x2093   :  { %v12668_v56 = vpop.xlane.xlu0 %12667 }
0x2094   :  { %v12690_v28 = vsub.f32 %v23161_v34, %v12668_v56 }
0x2096   :  { %v12698_v54 = vmul.f32 1.442695, %v12690_v28  ;;  %v12764_v28 = vpack.c.bf16 %v12037_v21, %v12037_v21 }
0x2098   :  { %20354 = vpow2.f32 %v12698_v54 }
0x209b   :  { %v12674_v58 = vpop.xlane.xlu0 %12673 }
0x209c   :  { %v12692_v1 = vsub.f32 %v12660_v17, %v12674_v58  ;;  %v16902_v58 = vld [vmem:[%s23910_s15 + $0x16] ss:$0 sm:$0xff] }
0x209e   :  { %v12702_v50 = vmul.f32 1.442695, %v12692_v1 }
0x20a0   :  { %20356 = vpow2.f32 %v12702_v50 }
0x20a3   :  { %v12680_v5 = vpop.xlane.xlu0 %12679  ;;  %v12671_v32 = vpop.xlane.xlu1 %12670 }
0x20a4   :  { %v12694_v7 = vsub.f32 %v12662_v35, %v12680_v5  ;;  %v12691_v11 = vsub.f32 %v12659_v45, %v12671_v32  ;;  %v12866_v32 = vsel %vm1942_vm5, %v12764_v28, 0 }
0x20a5   :  { %v20355_v31 = vpop.eup %20354 }
0x20a6   :  { %v12706_v16 = vmul.f32 1.442695, %v12694_v7  ;;  %v12700_v61 = vmul.f32 1.442695, %v12691_v11  ;;  %v12714_v29 = vsel %vm1438_vm4, %v20355_v31, 0.0  ;;  %v12129_v7 = vadd.f32 %v16902_v58, %v23145_v38 }
0x20a7   :  { %12715 = vadd.xlane.f32.xlu0 %v12714_v29 }
0x20a8   :  { %20358 = vpow2.f32 %v12706_v16  ;;  %v12766_v11 = vpack.c.bf16 %v12129_v7, %v12129_v7  ;;  %v16903_v16 = vld [vmem:[%s23910_s15 + $0x17] ss:$0 sm:$0xff]  ;;  %v16890_v7 = vld [vmem:[%s23911_s16 + $0x18] sm:$0xf] }
0x20a9   :  { %20360 = vpow2.f32 %v12700_v61 }
0x20aa   :  { %v12958_v38 = vsel %vm1942_vm5, %v12766_v11, 0 }
0x20ab   :  { %v12686_v53 = vpop.xlane.xlu0 %12685  ;;  %v12677_v34 = vpop.xlane.xlu1 %12676 }
0x20ac   :  { %v12696_v48 = vsub.f32 %v12664_v49, %v12686_v53  ;;  %v12693_v52 = vsub.f32 %v12661_v63, %v12677_v34  ;;  %v12221_v34 = vadd.f32 %v16903_v16, %v23154_v41 }
0x20ad   :  { %v20357_v27 = vpop.eup %20356 }
0x20ae   :  { %v12710_v17 = vmul.f32 1.442695, %v12696_v48  ;;  %v12704_v19 = vmul.f32 1.442695, %v12693_v52  ;;  %v12720_v43 = vsel %vm1438_vm4, %v20357_v27, 0.0  ;;  %v12077_v48 = vadd.f32 %v16901_v26, %v23152_v14 }
0x20af   :  { %12721 = vadd.xlane.f32.xlu0 %v12720_v43 }
0x20b0   :  { %20362 = vpow2.f32 %v12710_v17  ;;  %v12768_v17 = vpack.c.bf16 %v12221_v34, %v12221_v34  ;;  %v12765_v43 = vpack.c.bf16 %v12077_v48, %v12077_v48 }
0x20b1   :  { %20364 = vpow2.f32 %v12704_v19 }
0x20b2   :  { %v13050_v14 = vsel %vm1942_vm5, %v12768_v17, 0 }
0x20b3   :  { %v12683_v35 = vpop.xlane.xlu1 %12682 }
0x20b4   :  { %v12695_v45 = vsub.f32 %v12663_v39, %v12683_v35 }
0x20b5   :  { %v23182_v36 = vpop.eup %20358 }
0x20b6   :  { %v23184_v12 = vpop.eup %20360  ;;  %v12708_v2 = vmul.f32 1.442695, %v12695_v45  ;;  %v12726_v4 = vsel %vm1438_vm4, %v23182_v36, 0.0 }
0x20b7   :  { %12727 = vadd.xlane.f32.xlu0 %v12726_v4  ;;  %v12717_v49 = vsel %vm1438_vm4, %v23184_v12, 0.0  ;;  %v12912_v4 = vsel %vm1942_vm5, %v12765_v43, 0 }
0x20b8   :  { %20366 = vpow2.f32 %v12708_v2  ;;  %12718 = vadd.xlane.f32.xlu1 %v12717_v49  ;;  %v12169_v49 = vadd.f32 %v16902_v58, %v23156_v3 }
0x20bb   :  { %v12689_v63 = vpop.xlane.xlu1 %12688 }
0x20bc   :  { %v12697_v47 = vsub.f32 %v12665_v8, %v12689_v63 }
0x20bd   :  { %v23190_v51 = vpop.eup %20362 }
0x20be   :  { %v23192_v30 = vpop.eup %20364  ;;  %v12712_v39 = vmul.f32 1.442695, %v12697_v47  ;;  %v12732_v13 = vsel %vm1438_vm4, %v23190_v51, 0.0  ;;  %v12767_v47 = vpack.c.bf16 %v12169_v49, %v12169_v49 }
0x20bf   :  { %12733 = vadd.xlane.f32.xlu0 %v12732_v13  ;;  %v12723_v6 = vsel %vm1438_vm4, %v23192_v30, 0.0 }
0x20c0   :  { %20368 = vpow2.f32 %v12712_v39  ;;  %12724 = vadd.xlane.f32.xlu1 %v12723_v6 }
0x20c5   :  { %v23198_v59 = vpop.eup %20366 }
0x20c6   :  { %v12729_v60 = vsel %vm1438_vm4, %v23198_v59, 0.0 }
0x20c7   :  { %12730 = vadd.xlane.f32.xlu1 %v12729_v60  ;;  %v13004_v60 = vsel %vm1942_vm5, %v12767_v47, 0 }
0x20cd   :  { %v23202_v37 = vpop.eup %20368 }
0x20ce   :  { %v12735_v55 = vsel %vm1438_vm4, %v23202_v37, 0.0 }
0x20cf   :  { %12736 = vadd.xlane.f32.xlu1 %v12735_v55  ;;  %v12261_v55 = vadd.f32 %v16903_v16, %v23158_v44 }
0x2130   :  { %v12716_v8 = vpop.xlane.xlu0 %12715 }
0x2131   :  { %20370 = vrcp.f32 %v12716_v8  ;;  %v12769_v8 = vpack.c.bf16 %v12261_v55, %v12261_v55 }
0x2138   :  { %v12722_v42 = vpop.xlane.xlu0 %12721 }
0x2139   :  { %20372 = vrcp.f32 %v12722_v42  ;;  %v13096_v42 = vsel %vm1942_vm5, %v12769_v8, 0 }
0x213e   :  { %v20371_v56 = vpop.eup %20370 }
0x213f   :  { %v12739_v54 = vmul.f32 %v20371_v56, %v20355_v31 }
0x2140   :  { %v12728_v1 = vpop.xlane.xlu0 %12727 }
0x2141   :  { %v12754_v50 = vpack.c.bf16 %v12739_v54, %v12739_v54  ;;  %20374 = vrcp.f32 %v12728_v1  ;;  %v12719_v5 = vpop.xlane.xlu1 %12718 }
0x2142   :  { %20376 = vrcp.f32 %v12719_v5 }
0x2143   :  { %19569 = vmatmul.mubr.msk.bf16.vlgmr.msra.gmra.mxu1 %vm1438_vm4, %v12754_v50 }
0x2144   :  { %19579 = vmatpush3.bf16.msra.mxu1 %v12866_v32  ;;  %19580 = vmatprep.mubr.msk.bf16.mxu1 %vm20442_vm1, %v20441_v0 }
0x2145   :  { %19590 = vmatprep.subr.bf16.mxu1 %v20441_v0 }
0x2146   :  { %v20373_v23 = vpop.eup %20372 }
0x2147   :  { %v12743_v31 = vmul.f32 %v20373_v23, %v20357_v27 }
0x2148   :  { %v12734_v61 = vpop.xlane.xlu0 %12733 }
0x2149   :  { %v12756_v29 = vpack.c.bf16 %v12743_v31, %v12743_v31  ;;  %20378 = vrcp.f32 %v12734_v61  ;;  %v12725_v53 = vpop.xlane.xlu1 %12724  ;;  %v13328_v31 = vsel %vm1942_vm5, %v16890_v7, 0 }
0x214a   :  { %20380 = vrcp.f32 %v12725_v53  ;;  %v16891_v53 = vld [vmem:[%s23911_s16 + $0x1c] sm:$0xf] }
0x214b   :  { %19581 = vmatmul.mubr.msk.bf16.vlgmr.msra.gmra.mxu1 %vm1438_vm4, %v12756_v29 }
0x214c   :  { %19591 = vmatpush3.bf16.msra.mxu1 %v12958_v38  ;;  %19592 = vmatprep.mubr.msk.bf16.mxu1 %vm20442_vm1, %v20441_v0 }
0x214d   :  { %19602 = vmatprep.subr.bf16.mxu1 %v20441_v0 }
0x214e   :  { %v20375_v52 = vpop.eup %20374 }
0x214f   :  { %v20377_v27 = vpop.eup %20376  ;;  %v12747_v19 = vmul.f32 %v20375_v52, %v23182_v36  ;;  %v13417_v52 = vsel %vm1942_vm5, %v16891_v53, 0 }
0x2150   :  { %v12741_v35 = vmul.f32 %v20377_v27, %v23184_v12  ;;  %v12731_v45 = vpop.xlane.xlu1 %12730 }
0x2151   :  { %v12758_v41 = vpack.c.bf16 %v12747_v19, %v12747_v19  ;;  %20382 = vrcp.f32 %v12731_v45 }
0x2152   :  { %v12755_v2 = vpack.c.bf16 %v12741_v35, %v12741_v35 }
0x2153   :  { %19593 = vmatmul.mubr.msk.bf16.vlgmr.msra.gmra.mxu1 %vm1438_vm4, %v12758_v41 }
0x2154   :  { %19575 = vmatmul.mubr.msk.bf16.vlgmr.msra.gmra.mxu0 %vm1438_vm4, %v12755_v2  ;;  %19603 = vmatpush3.bf16.msra.mxu1 %v13050_v14 }
0x2155   :  { %19585 = vmatpush3.bf16.msra.mxu0 %v12912_v4  ;;  %19586 = vmatprep.mubr.msk.bf16.mxu0 %vm20442_vm1, %v20441_v0 }
0x2156   :  { %v20379_v36 = vpop.eup %20378  ;;  %19596 = vmatprep.subr.bf16.mxu0 %v20441_v0  ;;  %19604 = vmatprep.mubr.msk.bf16.mxu1 %vm20442_vm1, %v20441_v0 }
0x2157   :  { %v20381_v12 = vpop.eup %20380  ;;  %v12751_v63 = vmul.f32 %v20379_v36, %v23190_v51  ;;  %19614 = vmatprep.subr.bf16.mxu1 %v20441_v0 }
0x2158   :  { %v12745_v3 = vmul.f32 %v20381_v12, %v23192_v30  ;;  %v12737_v39 = vpop.xlane.xlu1 %12736 }
0x2159   :  { %v12760_v13 = vpack.c.bf16 %v12751_v63, %v12751_v63  ;;  %20384 = vrcp.f32 %v12737_v39 }
0x215a   :  { %v12757_v6 = vpack.c.bf16 %v12745_v3, %v12745_v3 }
0x215b   :  { %19605 = vmatmul.mubr.msk.bf16.vlgmr.msra.gmra.mxu1 %vm1438_vm4, %v12760_v13 }
0x215c   :  { %19587 = vmatmul.mubr.msk.bf16.vlgmr.msra.gmra.mxu0 %vm1438_vm4, %v12757_v6  ;;  %19616 = vmatprep.mubr.msk.bf16.mxu1 %vm20442_vm1, %v20441_v0 }
0x215d   :  { %19597 = vmatpush3.bf16.msra.mxu0 %v13004_v60  ;;  %19598 = vmatprep.mubr.msk.bf16.mxu0 %vm20442_vm1, %v20441_v0 }
0x215e   :  { %v20383_v51 = vpop.eup %20382  ;;  %19608 = vmatprep.subr.bf16.mxu0 %v20441_v0 }
0x215f   :  { %v12749_v30 = vmul.f32 %v20383_v51, %v23198_v59  ;;  %v16888_v59 = vld [vmem:[%s23911_s16 + $0x10] sm:$0xf] }
0x2160   :  { %v13150_v28 = vsel %vm1942_vm5, %v16888_v59, 0 }
0x2161   :  { %v12759_v26 = vpack.c.bf16 %v12749_v30, %v12749_v30  ;;  %19615 = vmatpush3.bf16.msra.mxu1 %v13150_v28 }
0x2162   :  { %19626 = vmatprep.subr.bf16.mxu1 %v20441_v0 }
0x2164   :  { %19599 = vmatmul.mubr.msk.bf16.vlgmr.msra.gmra.mxu0 %vm1438_vm4, %v12759_v26 }
0x2165   :  { %19609 = vmatpush3.bf16.msra.mxu0 %v13096_v42  ;;  %19610 = vmatprep.mubr.msk.bf16.mxu0 %vm20442_vm1, %v20441_v0 }
0x2166   :  { %v20385_v44 = vpop.eup %20384  ;;  %19620 = vmatprep.subr.bf16.mxu0 %v20441_v0 }
0x2167   :  { %v12753_v21 = vmul.f32 %v20385_v44, %v23202_v37  ;;  %v16889_v37 = vld [vmem:[%s23911_s16 + $0x14] sm:$0xf] }
0x2168   :  { %v13239_v1 = vsel %vm1942_vm5, %v16889_v37, 0 }
0x2169   :  { %v12761_v56 = vpack.c.bf16 %v12753_v21, %v12753_v21 }
0x216c   :  { %19611 = vmatmul.mubr.msk.bf16.vlgmr.msra.gmra.mxu0 %vm1438_vm4, %v12761_v56 }
0x216d   :  { %19622 = vmatprep.mubr.msk.bf16.mxu0 %vm20442_vm1, %v20441_v0  ;;  %19621 = vmatpush3.bf16.msra.mxu0 %v13150_v28 }
0x216e   :  { %19632 = vmatprep.subr.bf16.mxu0 %v20441_v0 }
0x2203   :  { %v12810_v54 = vpop.f32.mrf.mxu1 }
0x2204   :  { %v13138_v58 = vpack.c.bf16 %v12810_v54, %v12810_v54 }
0x2205   :  { %v19570_v50 = vpop.f32.mrf.mxu1 }
0x2206   :  { %19617 = vmatmul.mubr.msk.bf16.vlgmr.msra.gmra.mxu1 %vm1438_vm4, %v13138_v58 }
0x2207   :  { %v12813_v5 = vpop.f32.mrf.mxu1  ;;  %19627 = vmatpush3.bf16.msra.mxu1 %v13239_v1  ;;  %19628 = vmatprep.mubr.msk.bf16.mxu1 %vm20442_vm1, %v20441_v0 }
0x2208   :  { %19638 = vmatprep.subr.bf16.mxu1 %v20441_v0 }
0x2209   :  { %v19571_v32 = vpop.f32.mrf.mxu1 }
0x220b   :  { %v12902_v23 = vpop.f32.mrf.mxu1 }
0x220c   :  { %v13140_v11 = vpack.c.bf16 %v12902_v23, %v12902_v23 }
0x220d   :  { %v19582_v16 = vpop.f32.mrf.mxu1 }
0x220e   :  { %19629 = vmatmul.mubr.msk.bf16.vlgmr.msra.gmra.mxu1 %vm1438_vm4, %v13140_v11 }
0x220f   :  { %v12905_v61 = vpop.f32.mrf.mxu1  ;;  %19639 = vmatpush3.bf16.msra.mxu1 %v13328_v31  ;;  %19640 = vmatprep.mubr.msk.bf16.mxu1 %vm20442_vm1, %v20441_v0 }
0x2210   :  { %19650 = vmatprep.subr.bf16.mxu1 %v20441_v0 }
0x2211   :  { %v19583_v29 = vpop.f32.mrf.mxu1 }
0x2212   :  { %v23317_v29 = vld [vmem:[%s23912_s23 + $0x10] sm:$0xff] }
0x2213   :  { %v12994_v38 = vpop.f32.mrf.mxu1 }
0x2214   :  { %v12856_v34 = vpop.f32.mrf.mxu0  ;;  %v13142_v48 = vpack.c.bf16 %v12994_v38, %v12994_v38 }
0x2215   :  { %v13139_v27 = vpack.c.bf16 %v12856_v34, %v12856_v34  ;;  %v19594_v17 = vpop.f32.mrf.mxu1 }
0x2216   :  { %v19576_v19 = vpop.f32.mrf.mxu0  ;;  %19641 = vmatmul.mubr.msk.bf16.vlgmr.msra.gmra.mxu1 %vm1438_vm4, %v13142_v48 }
0x2217   :  { %19623 = vmatmul.mubr.msk.bf16.vlgmr.msra.gmra.mxu0 %vm1438_vm4, %v13139_v27  ;;  %v12997_v43 = vpop.f32.mrf.mxu1  ;;  %19651 = vmatpush3.bf16.msra.mxu1 %v13417_v52  ;;  %v13519_v27 = vrot.slane %v23317_v29, %v20612_v10 }
0x2218   :  { %v12859_v35 = vpop.f32.mrf.mxu0  ;;  %19633 = vmatpush3.bf16.msra.mxu0 %v13239_v1  ;;  %19634 = vmatprep.mubr.msk.bf16.mxu0 %vm20442_vm1, %v20441_v0 }
0x2219   :  { %v19595_v45 = vpop.f32.mrf.mxu1  ;;  %19652 = vmatprep.mubr.msk.bf16.mxu1 %vm20442_vm1, %v20441_v0  ;;  %19644 = vmatprep.subr.bf16.mxu0 %v20441_v0 }
0x221a   :  { %v19577_v41 = vpop.f32.mrf.mxu0  ;;  %19662 = vmatprep.subr.bf16.mxu1 %v20441_v0 }
0x221b   :  { %v13086_v2 = vpop.f32.mrf.mxu1 }
0x221c   :  { %v12948_v14 = vpop.f32.mrf.mxu0  ;;  %v13144_v4 = vpack.c.bf16 %v13086_v2, %v13086_v2 }
0x221d   :  { %v13141_v49 = vpack.c.bf16 %v12948_v14, %v12948_v14  ;;  %v19606_v36 = vpop.f32.mrf.mxu1 }
0x221e   :  { %v19588_v12 = vpop.f32.mrf.mxu0  ;;  %19653 = vmatmul.mubr.msk.bf16.vlgmr.msra.gmra.mxu1 %vm1438_vm4, %v13144_v4 }
0x221f   :  { %19635 = vmatmul.mubr.msk.bf16.vlgmr.msra.gmra.mxu0 %vm1438_vm4, %v13141_v49  ;;  %v13089_v63 = vpop.f32.mrf.mxu1  ;;  %19666 = vmatprep.mubr.msk.bf16.mxu1 %vm20442_vm1, %v20441_v0 }
0x2220   :  { %v12951_v47 = vpop.f32.mrf.mxu0  ;;  %19645 = vmatpush3.bf16.msra.mxu0 %v13328_v31  ;;  %19646 = vmatprep.mubr.msk.bf16.mxu0 %vm20442_vm1, %v20441_v0 }
0x2221   :  { %v19607_v3 = vpop.f32.mrf.mxu1  ;;  %19656 = vmatprep.subr.bf16.mxu0 %v20441_v0 }
0x2222   :  { %v19589_v39 = vpop.f32.mrf.mxu0 }
0x2224   :  { %v13040_v13 = vpop.f32.mrf.mxu0 }
0x2225   :  { %v13143_v6 = vpack.c.bf16 %v13040_v13, %v13040_v13 }
0x2226   :  { %v19600_v60 = vpop.f32.mrf.mxu0 }
0x2227   :  { %19647 = vmatmul.mubr.msk.bf16.vlgmr.msra.gmra.mxu0 %vm1438_vm4, %v13143_v6 }
0x2228   :  { %v13043_v55 = vpop.f32.mrf.mxu0  ;;  %19657 = vmatpush3.bf16.msra.mxu0 %v13417_v52  ;;  %19658 = vmatprep.mubr.msk.bf16.mxu0 %vm20442_vm1, %v20441_v0 }
0x2229   :  { %19670 = vmatprep.subr.bf16.mxu0 %v20441_v0 }
0x222a   :  { %v19601_v51 = vpop.f32.mrf.mxu0 }
0x222c   :  { %v13132_v30 = vpop.f32.mrf.mxu0 }
0x222d   :  { %v13145_v8 = vpack.c.bf16 %v13132_v30, %v13132_v30 }
0x222e   :  { %v19612_v26 = vpop.f32.mrf.mxu0 }
0x222f   :  { %19659 = vmatmul.mubr.msk.bf16.vlgmr.msra.gmra.mxu0 %vm1438_vm4, %v13145_v8 }
0x2230   :  { %v13135_v42 = vpop.f32.mrf.mxu0  ;;  %19674 = vmatprep.mubr.msk.bf16.mxu0 %vm20442_vm1, %v20441_v0 }
0x2232   :  { %v19613_v44 = vpop.f32.mrf.mxu0 }
0x22c6   :  { %v13186_v21 = vpop.f32.mrf.mxu1 }
0x22c7   :  { %v13502_v31 = vsel %vm323_vm3, %v13186_v21, 0.0 }
0x22c8   :  { %v19618_v56 = vpop.f32.mrf.mxu1 }
0x22ca   :  { %v13189_v59 = vpop.f32.mrf.mxu1 }
0x22cc   :  { %v19619_v28 = vpop.f32.mrf.mxu1 }
0x22ce   :  { %v13275_v37 = vpop.f32.mrf.mxu1 }
0x22cf   :  { %v13503_v7 = vsel %vm323_vm3, %v13275_v37, 0.0 }
0x22d0   :  { %v19630_v54 = vpop.f32.mrf.mxu1  ;;  %v13504_v53 = vadd.f32 %v13503_v7, %v13502_v31 }
0x22d2   :  { %v13278_v58 = vpop.f32.mrf.mxu1 }
0x22d4   :  { %v19631_v1 = vpop.f32.mrf.mxu1 }
0x22d6   :  { %v13364_v50 = vpop.f32.mrf.mxu1 }
0x22d7   :  { %v13229_v5 = vpop.f32.mrf.mxu0  ;;  %v13505_v16 = vsel %vm323_vm3, %v13364_v50, 0.0 }
0x22d8   :  { %v19642_v32 = vpop.f32.mrf.mxu1  ;;  %v13506_v48 = vadd.f32 %v13505_v16, %v13504_v53  ;;  %v13509_v39 = vsel %vm323_vm3, %v13229_v5, 0.0 }
0x22d9   :  { %v19624_v23 = vpop.f32.mrf.mxu0 }
0x22da   :  { %v13367_v11 = vpop.f32.mrf.mxu1  ;;  %v20167_v23 = vld [vmem:[%s23913_s17 + $0xc0] sm:$0xff]  }
0x22db   :  { %v13232_v61 = vpop.f32.mrf.mxu0 }
0x22dc   :  { %v19643_v38 = vpop.f32.mrf.mxu1  ;;  %v13553_v61 = vrot.slane %v23317_v29, %v21119_v57  ;;  %v20169_v57 = vld [vmem:[%s23913_s17 + $0xd0] sm:$0xff]  }
0x22dd   :  { %v19625_v34 = vpop.f32.mrf.mxu0 }
0x22de   :  { %v13453_v52 = vpop.f32.mrf.mxu1 }
0x22df   :  { %v13318_v17 = vpop.f32.mrf.mxu0  ;;  %v13507_v19 = vsel %vm323_vm3, %v13453_v52, 0.0  ;;  %v13559_v52 = vrot.slane %v23317_v29, %v21124_v22  ;;  %v20170_v22 = vld [vmem:[%s23913_s17 + $0xe8] sm:$0xff]  }
0x22e0   :  { %v13508_v43 = vadd.f32 %v13507_v19, %v13506_v48  ;;  %v19654_v35 = vpop.f32.mrf.mxu1  ;;  %v13510_v10 = vsel %vm323_vm3, %v13318_v17, 0.0 }
0x22e1   :  { %v19636_v45 = vpop.f32.mrf.mxu0  ;;  %v13511_v6 = vadd.f32 %v13510_v10, %v13509_v39  ;;  %v20177_v10 = vld [vmem:[%s23913_s17 + $0x110] sm:$0xff]   ;;  %v20179_v39 = vld [vmem:[%s23913_s17 + $0x120] sm:$0xff]  }
0x22e2   :  { %v13520_v41 = vadd.f32 %v13519_v27, %v13508_v43  ;;  %v13456_v2 = vpop.f32.mrf.mxu1  ;;  %v20168_v43 = vld [vmem:[%s23913_s17 + $0xd8] sm:$0xff]  }
0x22e3   :  { %v13321_v14 = vpop.f32.mrf.mxu0 }
0x22e4   :  { %v19655_v4 = vpop.f32.mrf.mxu1  ;;  %v13522_v49 = vadd.f32 %v13520_v41, %v22843_v40  ;;  %v20171_v41 = vld [vmem:[%s23913_s17 + $0xe0] sm:$0xff]  }
0x22e5   :  { %v19637_v36 = vpop.f32.mrf.mxu0  ;;  %v20172_v4 = vld [vmem:[%s23913_s17 + $0xf8] sm:$0xff]  }
0x22e6   :  { %v13524_v12 = vsel %vm323_vm3, %v13522_v49, 0.0  ;;  %v20173_v36 = vld [vmem:[%s23913_s17 + $0xf0] sm:$0xff]  }
0x22e7   :  { %v13407_v63 = vpop.f32.mrf.mxu0  ;;  %13525 = vadd.xlane.f32.xlu0 %v13524_v12  ;;  %v20174_v12 = vld [vmem:[%s23913_s17 + $0x108] sm:$0xff]  }
0x22e8   :  { %v13512_v13 = vsel %vm323_vm3, %v13407_v63, 0.0  ;;  %v20175_v63 = vld [vmem:[%s23913_s17 + $0x100] sm:$0xff]  }
0x22e9   :  { %v19648_v47 = vpop.f32.mrf.mxu0  ;;  %v13513_v55 = vadd.f32 %v13512_v13, %v13511_v6  ;;  %v20180_v13 = vld [vmem:[%s23913_s17 + $0x138] sm:$0xff]   ;;  %v20181_v6 = vld [vmem:[%s23913_s17 + $0x130] sm:$0xff]  }
0x22ea   :  { %v20176_v47 = vld [vmem:[%s23913_s17 + $0x118] sm:$0xff]  }
0x22eb   :  { %v13410_v3 = vpop.f32.mrf.mxu0 }
0x22ec   :  { %v20178_v3 = vld [vmem:[%s23913_s17 + $0x128] sm:$0xff]  }
0x22ed   :  { %v19649_v60 = vpop.f32.mrf.mxu0 }
0x22ee   :  { %v20182_v60 = vld [vmem:[%s23913_s17 + $0x148] sm:$0xff]  }
0x22ef   :  { %v13496_v51 = vpop.f32.mrf.mxu0 }
0x22f0   :  { %v13514_v30 = vsel %vm323_vm3, %v13496_v51, 0.0  ;;  %v20184_v51 = vld [vmem:[%s23913_s17 + $0x158] sm:$0xff]  }
0x22f1   :  { %v13515_v40 = vadd.f32 %v13514_v30, %v13513_v55  ;;  %v19660_v8 = vpop.f32.mrf.mxu0  ;;  %v20183_v55 = vld [vmem:[%s23913_s17 + $0x140] sm:$0xff]   ;;  %v20185_v30 = vld [vmem:[%s23913_s17 + $0x150] sm:$0xff]  }
0x22f2   :  { %v20187_v8 = vld [vmem:[%s23913_s17 + $0x160] sm:$0xff]  }
0x22f3   :  { %v13521_v26 = vadd.f32 %v13519_v27, %v13515_v40  ;;  %v13499_v42 = vpop.f32.mrf.mxu0  ;;  %v20186_v40 = vld [vmem:[%s23913_s17 + $0x168] sm:$0xff]  }
0x22f4   :  { %v20189_v42 = vld [vmem:[%s23913_s17 + $0x170] sm:$0xff]  }
0x22f5   :  { %v19661_v44 = vpop.f32.mrf.mxu0  ;;  %v13523_v21 = vadd.f32 %v13521_v26, %v22859_v20  ;;  %v20166_v20 = vld [vmem:[%s23913_s17 + $0xc8] sm:$0xff]   ;;  %v20188_v26 = vld [vmem:[%s23913_s17 + $0x178] sm:$0xff]  }
0x22f6   :  { %19663 = vmatpush3.bf16.msra.mxu1 %v20166_v20  ;;  %19671 = vmatpush3.bf16.msra.mxu0 %v20166_v20 }
0x22f7   :  { %v13527_v56 = vsel %vm323_vm3, %v13523_v21, 0.0  ;;  %19664 = vmatprep.subr.bf16.mxu1 %v20441_v0  ;;  %19672 = vmatprep.subr.bf16.mxu0 %v20441_v0 }
0x22f8   :  { %13528 = vadd.xlane.f32.xlu1 %v13527_v56 }
0x22fa   :  { %19665 = vmatpush3.bf16.msra.mxu1 %v20167_v23  ;;  %19673 = vmatpush3.bf16.msra.mxu0 %v20167_v23 }
0x22fb   :  { %19678 = vmatprep.subr.bf16.mxu1 %v20441_v0  ;;  %19686 = vmatprep.subr.bf16.mxu0 %v20441_v0 }
0x2370   :  { %v13526_v59 = vpop.xlane.xlu0 %13525 }
0x2371   :  { %v13530_v28 = vmul.f32 0.03125, %v13526_v59 }
0x2373   :  { %v13532_v37 = vsub.f32 %v13522_v49, %v13530_v28 }
0x2375   :  { %v13534_v54 = vmul.f32 %v13532_v37, %v13532_v37 }
0x2377   :  { %v13536_v58 = vsel %vm323_vm3, %v13534_v54, 0.0 }
0x2378   :  { %13537 = vadd.xlane.f32.xlu0 %v13536_v58 }
0x2381   :  { %v13529_v1 = vpop.xlane.xlu1 %13528 }
0x2382   :  { %v13531_v50 = vmul.f32 0.03125, %v13529_v1 }
0x2384   :  { %v13533_v5 = vsub.f32 %v13523_v21, %v13531_v50 }
0x2386   :  { %v13535_v32 = vmul.f32 %v13533_v5, %v13533_v5 }
0x2388   :  { %v13539_v7 = vsel %vm323_vm3, %v13535_v32, 0.0 }
0x2389   :  { %13540 = vadd.xlane.f32.xlu1 %v13539_v7 }
0x2401   :  { %v13538_v11 = vpop.xlane.xlu0 %13537 }
0x2402   :  { %v13542_v31 = vmul.f32 0.03125, %v13538_v11 }
0x2404   :  { %v13544_v16 = vadd.f32 1e-05, %v13542_v31 }
0x2406   :  { %20386 = vrsqrt.f32 %v13544_v16 }
0x2412   :  { %v13541_v53 = vpop.xlane.xlu1 %13540 }
0x2413   :  { %v20387_v38 = vpop.eup %20386  ;;  %v13543_v34 = vmul.f32 0.03125, %v13541_v53 }
0x2414   :  { %v13548_v48 = vmul.f32 %v20387_v38, %v13532_v37 }
0x2415   :  { %v13545_v27 = vadd.f32 1e-05, %v13543_v34  ;;  %v17060_v34 = vld [vmem:[%s23914_s18 + $0x10] ss:$0 sm:$0xff] }
0x2416   :  { %v13554_v17 = vmul.f32 %v13553_v61, %v13548_v48 }
0x2417   :  { %20388 = vrsqrt.f32 %v13545_v27 }
0x2418   :  { %v23346_v19 = vadd.f32 %v13559_v52, %v13554_v17 }
0x241a   :  { %v13629_v35 = vpack.c.bf16 %v23346_v19, %v23346_v19 }
0x241c   :  { %19667 = vmatmul.mubr.msk.bf16.vlgmr.msra.gmra.mxu1 %vm323_vm3, %v13629_v35 }
0x241d   :  { %19679 = vmatpush3.bf16.msra.mxu1 %v20168_v43  ;;  %19682 = vmatprep.mubr.msk.bf16.mxu1 %vm20442_vm1, %v20441_v0 }
0x241e   :  { %19680 = vmatprep.subr.bf16.mxu1 %v20441_v0 }
0x2421   :  { %19681 = vmatpush3.bf16.msra.mxu1 %v20169_v57 }
0x2422   :  { %19694 = vmatprep.subr.bf16.mxu1 %v20441_v0 }
0x2424   :  { %v20389_v29 = vpop.eup %20388  ;;  %19683 = vmatmul.mubr.msk.bf16.vlgmr.msra.gmra.mxu1 %vm323_vm3, %v13629_v35 }
0x2425   :  { %v13549_v45 = vmul.f32 %v20389_v29, %v13533_v5  ;;  %19695 = vmatpush3.bf16.msra.mxu1 %v20170_v22  ;;  %19698 = vmatprep.mubr.msk.bf16.mxu1 %vm20442_vm1, %v20441_v0 }
0x2426   :  { %19696 = vmatprep.subr.bf16.mxu1 %v20441_v0 }
0x2427   :  { %v13555_v2 = vmul.f32 %v13553_v61, %v13549_v45 }
0x2429   :  { %19697 = vmatpush3.bf16.msra.mxu1 %v20171_v41  ;;  %v23371_v14 = vadd.f32 %v13559_v52, %v13555_v2 }
0x242a   :  { %19710 = vmatprep.subr.bf16.mxu1 %v20441_v0 }
0x242b   :  { %v13630_v49 = vpack.c.bf16 %v23371_v14, %v23371_v14 }
0x242c   :  { %19699 = vmatmul.mubr.msk.bf16.vlgmr.msra.gmra.mxu1 %vm323_vm3, %v13629_v35 }
0x242d   :  { %19675 = vmatmul.mubr.msk.bf16.vlgmr.msra.gmra.mxu0 %vm323_vm3, %v13630_v49  ;;  %19711 = vmatpush3.bf16.msra.mxu1 %v20172_v4 }
0x242e   :  { %19687 = vmatpush3.bf16.msra.mxu0 %v20168_v43  ;;  %19712 = vmatprep.subr.bf16.mxu1 %v20441_v0 }
0x242f   :  { %19688 = vmatprep.subr.bf16.mxu0 %v20441_v0  ;;  %19690 = vmatprep.mubr.msk.bf16.mxu0 %vm20442_vm1, %v20441_v0 }
0x2430   :  { %19714 = vmatprep.mubr.msk.bf16.mxu1 %vm20442_vm1, %v20441_v0 }
0x2431   :  { %19713 = vmatpush3.bf16.msra.mxu1 %v20173_v36 }
0x2432   :  { %19689 = vmatpush3.bf16.msra.mxu0 %v20169_v57  ;;  %19726 = vmatprep.subr.bf16.mxu1 %v20441_v0 }
0x2433   :  { %19702 = vmatprep.subr.bf16.mxu0 %v20441_v0 }
0x2434   :  { %19715 = vmatmul.mubr.msk.bf16.vlgmr.msra.gmra.mxu1 %vm323_vm3, %v13629_v35 }
0x2435   :  { %19691 = vmatmul.mubr.msk.bf16.vlgmr.msra.gmra.mxu0 %vm323_vm3, %v13630_v49  ;;  %19727 = vmatpush3.bf16.msra.mxu1 %v20174_v12 }
0x2436   :  { %19703 = vmatpush3.bf16.msra.mxu0 %v20170_v22  ;;  %19728 = vmatprep.subr.bf16.mxu1 %v20441_v0  ;;  %v17040_v22 = vld [vmem:[%s23914_s18 + $0xc] ss:$0 sm:$0xff] }
0x2437   :  { %19704 = vmatprep.subr.bf16.mxu0 %v20441_v0  ;;  %19706 = vmatprep.mubr.msk.bf16.mxu0 %vm20442_vm1, %v20441_v0 }
0x2438   :  { %19730 = vmatprep.mubr.msk.bf16.mxu1 %vm20442_vm1, %v20441_v0 }
0x2439   :  { %19729 = vmatpush3.bf16.msra.mxu1 %v20175_v63 }
0x243a   :  { %19705 = vmatpush3.bf16.msra.mxu0 %v20171_v41  ;;  %19742 = vmatprep.subr.bf16.mxu1 %v20441_v0 }
0x243b   :  { %19718 = vmatprep.subr.bf16.mxu0 %v20441_v0 }
0x243c   :  { %19731 = vmatmul.mubr.msk.bf16.vlgmr.msra.gmra.mxu1 %vm323_vm3, %v22368_v25 }
0x243d   :  { %19707 = vmatmul.mubr.msk.bf16.vlgmr.msra.gmra.mxu0 %vm323_vm3, %v13630_v49  ;;  %19743 = vmatpush3.bf16.msra.mxu1 %v20176_v47 }
0x243e   :  { %19719 = vmatpush3.bf16.msra.mxu0 %v20172_v4  ;;  %19744 = vmatprep.subr.bf16.mxu1 %v20441_v0  ;;  %v17061_v4 = vld [vmem:[%s23914_s18 + $0x11] ss:$0 sm:$0xff] }
0x243f   :  { %19720 = vmatprep.subr.bf16.mxu0 %v20441_v0  ;;  %19722 = vmatprep.mubr.msk.bf16.mxu0 %vm20442_vm1, %v20441_v0 }
0x2440   :  { %19746 = vmatprep.mubr.msk.bf16.mxu1 %vm20442_vm1, %v20441_v0 }
0x2441   :  { %19745 = vmatpush3.bf16.msra.mxu1 %v20177_v10 }
0x2442   :  { %19721 = vmatpush3.bf16.msra.mxu0 %v20173_v36  ;;  %19758 = vmatprep.subr.bf16.mxu1 %v20441_v0 }
0x2443   :  { %19734 = vmatprep.subr.bf16.mxu0 %v20441_v0 }
0x2444   :  { %19747 = vmatmul.mubr.msk.bf16.vlgmr.msra.gmra.mxu1 %vm323_vm3, %v22368_v25 }
0x2445   :  { %19723 = vmatmul.mubr.msk.bf16.vlgmr.msra.gmra.mxu0 %vm323_vm3, %v13630_v49  ;;  %19759 = vmatpush3.bf16.msra.mxu1 %v20178_v3 }
0x2446   :  { %19735 = vmatpush3.bf16.msra.mxu0 %v20174_v12  ;;  %19760 = vmatprep.subr.bf16.mxu1 %v20441_v0 }
0x2447   :  { %19736 = vmatprep.subr.bf16.mxu0 %v20441_v0  ;;  %19738 = vmatprep.mubr.msk.bf16.mxu0 %vm20442_vm1, %v20441_v0 }
0x2448   :  { %19762 = vmatprep.mubr.msk.bf16.mxu1 %vm20442_vm1, %v20441_v0 }
0x2449   :  { %19761 = vmatpush3.bf16.msra.mxu1 %v20179_v39 }
0x244a   :  { %19737 = vmatpush3.bf16.msra.mxu0 %v20175_v63  ;;  %19774 = vmatprep.subr.bf16.mxu1 %v20441_v0 }
0x244b   :  { %19750 = vmatprep.subr.bf16.mxu0 %v20441_v0 }
0x244c   :  { %19763 = vmatmul.mubr.msk.bf16.vlgmr.msra.gmra.mxu1 %vm323_vm3, %v22368_v25 }
0x244d   :  { %19739 = vmatmul.mubr.msk.bf16.vlgmr.msra.gmra.mxu0 %vm323_vm3, %v22379_v46  ;;  %19775 = vmatpush3.bf16.msra.mxu1 %v20180_v13 }
0x244e   :  { %19751 = vmatpush3.bf16.msra.mxu0 %v20176_v47  ;;  %19776 = vmatprep.subr.bf16.mxu1 %v20441_v0 }
0x244f   :  { %19752 = vmatprep.subr.bf16.mxu0 %v20441_v0  ;;  %19754 = vmatprep.mubr.msk.bf16.mxu0 %vm20442_vm1, %v20441_v0 }
0x2450   :  { %19778 = vmatprep.mubr.msk.bf16.mxu1 %vm20442_vm1, %v20441_v0 }
0x2451   :  { %19777 = vmatpush3.bf16.msra.mxu1 %v20181_v6 }
0x2452   :  { %19753 = vmatpush3.bf16.msra.mxu0 %v20177_v10  ;;  %19790 = vmatprep.subr.bf16.mxu1 %v20441_v0 }
0x2453   :  { %19766 = vmatprep.subr.bf16.mxu0 %v20441_v0 }
0x2454   :  { %19779 = vmatmul.mubr.msk.bf16.vlgmr.msra.gmra.mxu1 %vm323_vm3, %v22368_v25 }
0x2455   :  { %19755 = vmatmul.mubr.msk.bf16.vlgmr.msra.gmra.mxu0 %vm323_vm3, %v22379_v46  ;;  %19791 = vmatpush3.bf16.msra.mxu1 %v20182_v60 }
0x2456   :  { %19767 = vmatpush3.bf16.msra.mxu0 %v20178_v3  ;;  %19792 = vmatprep.subr.bf16.mxu1 %v20441_v0 }
0x2457   :  { %19768 = vmatprep.subr.bf16.mxu0 %v20441_v0  ;;  %19770 = vmatprep.mubr.msk.bf16.mxu0 %vm20442_vm1, %v20441_v0 }
0x2458   :  { %19794 = vmatprep.mubr.msk.bf16.mxu1 %vm20442_vm1, %v20441_v0 }
0x2459   :  { %19793 = vmatpush3.bf16.msra.mxu1 %v20183_v55 }
0x245a   :  { %19769 = vmatpush3.bf16.msra.mxu0 %v20179_v39  ;;  %19806 = vmatprep.subr.bf16.mxu1 %v20441_v0 }
0x245b   :  { %19782 = vmatprep.subr.bf16.mxu0 %v20441_v0 }
0x245c   :  { %19795 = vmatmul.mubr.msk.bf16.vlgmr.msra.gmra.mxu1 %vm323_vm3, %v22368_v25 }
0x245d   :  { %19771 = vmatmul.mubr.msk.bf16.vlgmr.msra.gmra.mxu0 %vm323_vm3, %v22379_v46  ;;  %19807 = vmatpush3.bf16.msra.mxu1 %v20184_v51 }
0x245e   :  { %19783 = vmatpush3.bf16.msra.mxu0 %v20180_v13  ;;  %19808 = vmatprep.subr.bf16.mxu1 %v20441_v0 }
0x245f   :  { %19784 = vmatprep.subr.bf16.mxu0 %v20441_v0  ;;  %19786 = vmatprep.mubr.msk.bf16.mxu0 %vm20442_vm1, %v20441_v0 }
0x2460   :  { %19810 = vmatprep.mubr.msk.bf16.mxu1 %vm20442_vm1, %v20441_v0 }
0x2461   :  { %19809 = vmatpush3.bf16.msra.mxu1 %v20185_v30 }
0x2462   :  { %19785 = vmatpush3.bf16.msra.mxu0 %v20181_v6  ;;  %19822 = vmatprep.subr.bf16.mxu1 %v20441_v0  ;;  %v17041_v6 = vld [vmem:[%s23914_s18 + $0xd] ss:$0 sm:$0xff] }
0x2463   :  { %19798 = vmatprep.subr.bf16.mxu0 %v20441_v0 }
0x2464   :  { %19811 = vmatmul.mubr.msk.bf16.vlgmr.msra.gmra.mxu1 %vm323_vm3, %v22368_v25 }
0x2465   :  { %19787 = vmatmul.mubr.msk.bf16.vlgmr.msra.gmra.mxu0 %vm323_vm3, %v22379_v46  ;;  %19823 = vmatpush3.bf16.msra.mxu1 %v20186_v40 }
0x2466   :  { %19799 = vmatpush3.bf16.msra.mxu0 %v20182_v60  ;;  %19824 = vmatprep.subr.bf16.mxu1 %v20441_v0 }
0x2467   :  { %19800 = vmatprep.subr.bf16.mxu0 %v20441_v0  ;;  %19802 = vmatprep.mubr.msk.bf16.mxu0 %vm20442_vm1, %v20441_v0 }
0x2468   :  { %19826 = vmatprep.mubr.msk.bf16.mxu1 %vm20442_vm1, %v20441_v0 }
0x2469   :  { %19825 = vmatpush3.bf16.msra.mxu1 %v20187_v8 }
0x246a   :  { %19801 = vmatpush3.bf16.msra.mxu0 %v20183_v55  ;;  %19838 = vmatprep.subr.bf16.mxu1 %v20441_v0 }
0x246b   :  { %19814 = vmatprep.subr.bf16.mxu0 %v20441_v0 }
0x246c   :  { %19827 = vmatmul.mubr.msk.bf16.vlgmr.msra.gmra.mxu1 %vm323_vm3, %v22368_v25 }
0x246d   :  { %19803 = vmatmul.mubr.msk.bf16.vlgmr.msra.gmra.mxu0 %vm323_vm3, %v22379_v46  ;;  %19839 = vmatpush3.bf16.msra.mxu1 %v20188_v26 }
0x246e   :  { %19815 = vmatpush3.bf16.msra.mxu0 %v20184_v51  ;;  %19840 = vmatprep.subr.bf16.mxu1 %v20441_v0 }
0x246f   :  { %19816 = vmatprep.subr.bf16.mxu0 %v20441_v0  ;;  %19818 = vmatprep.mubr.msk.bf16.mxu0 %vm20442_vm1, %v20441_v0 }
0x2470   :  { %19842 = vmatprep.mubr.msk.bf16.mxu1 %vm20442_vm1, %v20441_v0 }
0x2471   :  { %19841 = vmatpush3.bf16.msra.mxu1 %v20189_v42 }
0x2472   :  { %19817 = vmatpush3.bf16.msra.mxu0 %v20185_v30  ;;  %19854 = vmatprep.subr.bf16.mxu1 %v20441_v0 }
0x2473   :  { %19830 = vmatprep.subr.bf16.mxu0 %v20441_v0 }
0x2474   :  { %19843 = vmatmul.mubr.msk.bf16.vlgmr.msra.gmra.mxu1 %vm323_vm3, %v22368_v25 }
0x2475   :  { %19819 = vmatmul.mubr.msk.bf16.vlgmr.msra.gmra.mxu0 %vm323_vm3, %v22379_v46  ;;  %19856 = vmatprep.mubr.msk.bf16.mxu1 %vm20442_vm1, %v20441_v0 }
0x2476   :  { %19831 = vmatpush3.bf16.msra.mxu0 %v20186_v40  ;;  %19834 = vmatprep.mubr.msk.bf16.mxu0 %vm20442_vm1, %v20441_v0  ;;  %v17062_v40 = vld [vmem:[%s23914_s18 + $0x12] ss:$0 sm:$0xff] }
0x2477   :  { %19832 = vmatprep.subr.bf16.mxu0 %v20441_v0 }
0x247a   :  { %19833 = vmatpush3.bf16.msra.mxu0 %v20187_v8 }
0x247b   :  { %19846 = vmatprep.subr.bf16.mxu0 %v20441_v0 }
0x247d   :  { %19835 = vmatmul.mubr.msk.bf16.vlgmr.msra.gmra.mxu0 %vm323_vm3, %v22379_v46 }
0x247e   :  { %19847 = vmatpush3.bf16.msra.mxu0 %v20188_v26  ;;  %19850 = vmatprep.mubr.msk.bf16.mxu0 %vm20442_vm1, %v20441_v0 }
0x247f   :  { %19848 = vmatprep.subr.bf16.mxu0 %v20441_v0 }
0x2482   :  { %19849 = vmatpush3.bf16.msra.mxu0 %v20189_v42 }
0x2483   :  { %19860 = vmatprep.subr.bf16.mxu0 %v20441_v0 }
0x2485   :  { %19851 = vmatmul.mubr.msk.bf16.vlgmr.msra.gmra.mxu0 %vm323_vm3, %v22379_v46 }
0x2486   :  { %19862 = vmatprep.mubr.msk.bf16.mxu0 %vm20442_vm1, %v20441_v0 }
0x24dc   :  { %v13704_v25 = vpop.f32.mrf.mxu1 }
0x24dd   :  { %v13705_v49 = vadd.f32 %v17040_v22, %v13704_v25 }
0x24de   :  { %v19668_v44 = vpop.f32.mrf.mxu1 }
0x24df   :  { %v14813_v3 = vpack.c.bf16 %v13705_v49, %v13705_v49  ;;  %v17064_v49 = vld [vmem:[%s23914_s18 + $0x14] ss:$0 sm:$0xff] }
0x24e0   :  { %v13707_v21 = vpop.f32.mrf.mxu1 }
0x24e2   :  { %v19669_v56 = vpop.f32.mrf.mxu1 }
0x24e4   :  { %v13799_v59 = vpop.f32.mrf.mxu1 }
0x24e5   :  { %v13800_v8 = vadd.f32 %v17041_v6, %v13799_v59 }
0x24e6   :  { %v19684_v28 = vpop.f32.mrf.mxu1 }
0x24e7   :  { %v14815_v28 = vpack.c.bf16 %v13800_v8, %v13800_v8 }
0x24e8   :  { %v13802_v37 = vpop.f32.mrf.mxu1 }
0x24ea   :  { %v19685_v54 = vpop.f32.mrf.mxu1 }
0x24ec   :  { %v23552_v58 = vpop.f32.mrf.mxu1 }
0x24ed   :  { %v23554_v1 = vpop.f32.mrf.mxu0 }
0x24ee   :  { %v19700_v50 = vpop.f32.mrf.mxu1 }
0x24ef   :  { %v19676_v5 = vpop.f32.mrf.mxu0  ;;  %v23589_v50 = vld [vmem:[%s23914_s18 + $0xe] ss:$0 sm:$0xff] }
0x24f0   :  { %v13894_v32 = vpop.f32.mrf.mxu1 }
0x24f1   :  { %v13750_v7 = vpop.f32.mrf.mxu0 }
0x24f2   :  { %v19701_v46 = vpop.f32.mrf.mxu1 }
0x24f3   :  { %v19677_v20 = vpop.f32.mrf.mxu0 }
0x24f4   :  { %v23556_v23 = vpop.f32.mrf.mxu1 }
0x24f5   :  { %v23558_v11 = vpop.f32.mrf.mxu0 }
0x24f6   :  { %v19716_v31 = vpop.f32.mrf.mxu1 }
0x24f7   :  { %v19692_v16 = vpop.f32.mrf.mxu0  ;;  %v23597_v31 = vld [vmem:[%s23914_s18 + $0x13] ss:$0 sm:$0xff] }
0x24f8   :  { %v13986_v61 = vpop.f32.mrf.mxu1  ;;  %v13892_v16 = vadd.f32 %v23589_v50, %v23552_v58  ;;  %v17043_v58 = vld [vmem:[%s23914_s18 + $0xf] ss:$0 sm:$0xff] }
0x24f9   :  { %v13842_v53 = vpop.f32.mrf.mxu0 }
0x24fa   :  { %v19717_v38 = vpop.f32.mrf.mxu1  ;;  %v13748_v53 = vadd.f32 %v17040_v22, %v23554_v1 }
0x24fb   :  { %v19693_v48 = vpop.f32.mrf.mxu0 }
0x24fc   :  { %v14123_v52 = vpop.f32.mrf.mxu1 }
0x24fd   :  { %v23563_v27 = vpop.f32.mrf.mxu0  ;;  %v14124_v17 = vadd.f32 %v17060_v34, %v14123_v52 }
0x24fe   :  { %v19732_v43 = vpop.f32.mrf.mxu1 }
0x24ff   :  { %v14821_v35 = vpack.c.bf16 %v14124_v17, %v14124_v17  ;;  %v19708_v57 = vpop.f32.mrf.mxu0  ;;  %v14817_v43 = vpack.c.bf16 %v13892_v16, %v13892_v16 }
0x2500   :  { %v14126_v29 = vpop.f32.mrf.mxu1 }
0x2501   :  { %v14833_v45 = vsel %vm1438_vm4, %v14821_v35, 0  ;;  %v13934_v41 = vpop.f32.mrf.mxu0  ;;  %v14814_v29 = vpack.c.bf16 %v13748_v53, %v13748_v53 }
0x2502   :  { %v19733_v2 = vpop.f32.mrf.mxu1  ;;  %19855 = vmatpush3.bf16.xpose.msra.mxu1 %v14833_v45 }
0x2503   :  { %v19709_v36 = vpop.f32.mrf.mxu0  ;;  %19866 = vmatprep.subr.bf16.mxu1 %v20441_v0 }
0x2504   :  { %v14215_v12 = vpop.f32.mrf.mxu1  ;;  %v13984_v36 = vadd.f32 %v17043_v58, %v23556_v23 }
0x2505   :  { %v23573_v63 = vpop.f32.mrf.mxu0  ;;  %v14216_v47 = vadd.f32 %v17061_v4, %v14215_v12 }
0x2506   :  { %v19748_v10 = vpop.f32.mrf.mxu1  ;;  %v14819_v23 = vpack.c.bf16 %v13984_v36, %v13984_v36 }
0x2507   :  { %v14823_v39 = vpack.c.bf16 %v14216_v47, %v14216_v47  ;;  %v19724_v13 = vpop.f32.mrf.mxu0  ;;  %v13840_v47 = vadd.f32 %v17041_v6, %v23558_v11 }
0x2508   :  { %v14218_v60 = vpop.f32.mrf.mxu1 }
0x2509   :  { %v14925_v55 = vsel %vm1438_vm4, %v14823_v39, 0  ;;  %v14026_v51 = vpop.f32.mrf.mxu0  ;;  %19857 = vmatmul.mubr.msk.bf16.vlgmr.msra.gmra.mxu1 %vm1438_vm4, %v14813_v3 }
0x250a   :  { %v19749_v30 = vpop.f32.mrf.mxu1  ;;  %19867 = vmatpush3.bf16.xpose.msra.mxu1 %v14925_v55  ;;  %19868 = vmatprep.mubr.msk.bf16.mxu1 %vm20442_vm1, %v20441_v0 }
0x250b   :  { %v19725_v26 = vpop.f32.mrf.mxu0  ;;  %19878 = vmatprep.subr.bf16.mxu1 %v20441_v0  ;;  %v14816_v30 = vpack.c.bf16 %v13840_v47, %v13840_v47 }
0x250c   :  { %v14307_v42 = vpop.f32.mrf.mxu1 }
0x250d   :  { %v14163_v25 = vpop.f32.mrf.mxu0  ;;  %v14308_v44 = vadd.f32 %v17062_v40, %v14307_v42 }
0x250e   :  { %v14164_v21 = vadd.f32 %v17060_v34, %v14163_v25  ;;  %v19764_v56 = vpop.f32.mrf.mxu1 }
0x250f   :  { %v14825_v37 = vpack.c.bf16 %v14308_v44, %v14308_v44  ;;  %v19740_v54 = vpop.f32.mrf.mxu0 }
0x2510   :  { %v14822_v5 = vpack.c.bf16 %v14164_v21, %v14164_v21  ;;  %v14310_v32 = vpop.f32.mrf.mxu1 }
0x2511   :  { %v15017_v59 = vsel %vm1438_vm4, %v14825_v37, 0  ;;  %v14166_v7 = vpop.f32.mrf.mxu0  ;;  %19869 = vmatmul.mubr.msk.bf16.vlgmr.msra.gmra.mxu1 %vm1438_vm4, %v14815_v28 }
0x2512   :  { %v14879_v46 = vsel %vm1438_vm4, %v14822_v5, 0  ;;  %v19765_v20 = vpop.f32.mrf.mxu1  ;;  %19879 = vmatpush3.bf16.xpose.msra.mxu1 %v15017_v59  ;;  %19880 = vmatprep.mubr.msk.bf16.mxu1 %vm20442_vm1, %v20441_v0 }
0x2513   :  { %v19741_v61 = vpop.f32.mrf.mxu0  ;;  %19861 = vmatpush3.bf16.xpose.msra.mxu0 %v14879_v46  ;;  %19890 = vmatprep.subr.bf16.mxu1 %v20441_v0  ;;  %v14024_v20 = vadd.f32 %v17043_v58, %v23573_v63 }
0x2514   :  { %v14399_v38 = vpop.f32.mrf.mxu1  ;;  %19872 = vmatprep.subr.bf16.mxu0 %v20441_v0 }
0x2515   :  { %v14255_v34 = vpop.f32.mrf.mxu0  ;;  %v14400_v48 = vadd.f32 %v23597_v31, %v14399_v38 }
0x2516   :  { %v14256_v52 = vadd.f32 %v17061_v4, %v14255_v34  ;;  %v19780_v17 = vpop.f32.mrf.mxu1  ;;  %v14820_v34 = vpack.c.bf16 %v14024_v20, %v14024_v20 }
0x2517   :  { %v14827_v35 = vpack.c.bf16 %v14400_v48, %v14400_v48  ;;  %v19756_v57 = vpop.f32.mrf.mxu0 }
0x2518   :  { %v14824_v45 = vpack.c.bf16 %v14256_v52, %v14256_v52  ;;  %v14402_v41 = vpop.f32.mrf.mxu1 }
0x2519   :  { %v15109_v1 = vsel %vm1438_vm4, %v14827_v35, 0  ;;  %v14258_v22 = vpop.f32.mrf.mxu0  ;;  %19881 = vmatmul.mubr.msk.bf16.vlgmr.msra.gmra.mxu1 %vm1438_vm4, %v14817_v43 }
0x251a   :  { %v14971_v2 = vsel %vm1438_vm4, %v14824_v45, 0  ;;  %19863 = vmatmul.mubr.msk.bf16.vlgmr.msra.gmra.mxu0 %vm1438_vm4, %v14814_v29  ;;  %v19781_v4 = vpop.f32.mrf.mxu1  ;;  %19891 = vmatpush3.bf16.xpose.msra.mxu1 %v15109_v1 }
0x251b   :  { %v19757_v12 = vpop.f32.mrf.mxu0  ;;  %19873 = vmatpush3.bf16.xpose.msra.mxu0 %v14971_v2  ;;  %19874 = vmatprep.mubr.msk.bf16.mxu0 %vm20442_vm1, %v20441_v0 }
0x251c   :  { %v14491_v10 = vpop.f32.mrf.mxu1  ;;  %19892 = vmatprep.mubr.msk.bf16.mxu1 %vm20442_vm1, %v20441_v0  ;;  %19884 = vmatprep.subr.bf16.mxu0 %v20441_v0 }
0x251d   :  { %v14347_v3 = vpop.f32.mrf.mxu0  ;;  %v14492_v39 = vadd.f32 %v17064_v49, %v14491_v10  ;;  %19902 = vmatprep.subr.bf16.mxu1 %v20441_v0 }
0x251e   :  { %v14348_v13 = vadd.f32 %v17062_v40, %v14347_v3  ;;  %v19796_v60 = vpop.f32.mrf.mxu1  ;;  %v13932_v40 = vadd.f32 %v23589_v50, %v23563_v27 }
0x251f   :  { %v15309_v55 = vpack.c.bf16 %v14492_v39, %v14492_v39  ;;  %v19772_v51 = vpop.f32.mrf.mxu0 }
0x2520   :  { %v14826_v8 = vpack.c.bf16 %v14348_v13, %v14348_v13  ;;  %v14494_v26 = vpop.f32.mrf.mxu1  ;;  %v14818_v5 = vpack.c.bf16 %v13932_v40, %v13932_v40 }
0x2521   :  { %v15321_v11 = vsel %vm1942_vm5, %v15309_v55, 0  ;;  %v14350_v6 = vpop.f32.mrf.mxu0  ;;  %19893 = vmatmul.mubr.msk.bf16.vlgmr.msra.gmra.mxu1 %vm1438_vm4, %v14819_v23  ;;  %v20438_v55 = vld [vmem:[%s23952_s8] ss:$0 sm:$0xff] }
0x2522   :  { %v15063_v42 = vsel %vm1438_vm4, %v14826_v8, 0  ;;  %19875 = vmatmul.mubr.msk.bf16.vlgmr.msra.gmra.mxu0 %vm1438_vm4, %v14816_v30  ;;  %v19797_v25 = vpop.f32.mrf.mxu1  ;;  %19903 = vmatpush3.bf16.msra.mxu1 %v15321_v11 }
0x2523   :  { %v19773_v44 = vpop.f32.mrf.mxu0  ;;  %19885 = vmatpush3.bf16.xpose.msra.mxu0 %v15063_v42  ;;  %19886 = vmatprep.mubr.msk.bf16.mxu0 %vm20442_vm1, %v20441_v0 }
0x2524   :  { %v23633_v21 = vpop.f32.mrf.mxu1  ;;  %19896 = vmatprep.subr.bf16.mxu0 %v20441_v0  ;;  %19904 = vmatprep.mubr.msk.bf16.mxu1 %vm20442_vm1, %v20441_v0 }
0x2525   :  { %v14439_v56 = vpop.f32.mrf.mxu0  ;;  %19914 = vmatprep.subr.bf16.mxu1 %v20441_v0 }
0x2526   :  { %v14440_v28 = vadd.f32 %v23597_v31, %v14439_v56  ;;  %v19812_v37 = vpop.f32.mrf.mxu1 }
0x2527   :  { %v19788_v54 = vpop.f32.mrf.mxu0 }
0x2528   :  { %v14828_v32 = vpack.c.bf16 %v14440_v28, %v14440_v28  ;;  %v14586_v59 = vpop.f32.mrf.mxu1 }
0x2529   :  { %v14442_v7 = vpop.f32.mrf.mxu0 }
0x252a   :  { %v15155_v27 = vsel %vm1438_vm4, %v14828_v32, 0  ;;  %19887 = vmatmul.mubr.msk.bf16.vlgmr.msra.gmra.mxu0 %vm1438_vm4, %v14818_v5  ;;  %v19813_v50 = vpop.f32.mrf.mxu1 }
0x252b   :  { %v19789_v46 = vpop.f32.mrf.mxu0  ;;  %19897 = vmatpush3.bf16.xpose.msra.mxu0 %v15155_v27  ;;  %19898 = vmatprep.mubr.msk.bf16.mxu0 %vm20442_vm1, %v20441_v0  ;;  %v20439_v27 = vld [vmem:[%s23952_s8 + $0x1] ss:$0 sm:$0xff] }
0x252c   :  { %v23645_v16 = vpop.f32.mrf.mxu1  ;;  %19908 = vmatprep.subr.bf16.mxu0 %v20441_v0 }
0x252d   :  { %v14531_v31 = vpop.f32.mrf.mxu0 }
0x252e   :  { %v14532_v61 = vadd.f32 %v17064_v49, %v14531_v31  ;;  %v19828_v53 = vpop.f32.mrf.mxu1 }
0x252f   :  { %v19804_v38 = vpop.f32.mrf.mxu0 }
0x2530   :  { %v15310_v48 = vpack.c.bf16 %v14532_v61, %v14532_v61  ;;  %v14678_v52 = vpop.f32.mrf.mxu1 }
0x2531   :  { %v14534_v17 = vpop.f32.mrf.mxu0 }
0x2532   :  { %v15367_v43 = vsel %vm1942_vm5, %v15310_v48, 0  ;;  %19899 = vmatmul.mubr.msk.bf16.vlgmr.msra.gmra.mxu0 %vm1438_vm4, %v14820_v34  ;;  %v19829_v35 = vpop.f32.mrf.mxu1 }
0x2533   :  { %v19805_v57 = vpop.f32.mrf.mxu0  ;;  %19909 = vmatpush3.bf16.msra.mxu0 %v15367_v43  ;;  %19910 = vmatprep.mubr.msk.bf16.mxu0 %vm20442_vm1, %v20441_v0 }
0x2534   :  { %v23652_v63 = vpop.f32.mrf.mxu1  ;;  %19920 = vmatprep.subr.bf16.mxu0 %v20441_v0 }
0x2535   :  { %v23655_v29 = vpop.f32.mrf.mxu0 }
0x2536   :  { %v19844_v58 = vpop.f32.mrf.mxu1 }
0x2537   :  { %v19820_v45 = vpop.f32.mrf.mxu0 }
0x2538   :  { %v14770_v41 = vpop.f32.mrf.mxu1 }
0x2539   :  { %v14626_v1 = vpop.f32.mrf.mxu0 }
0x253a   :  { %v19845_v22 = vpop.f32.mrf.mxu1 }
0x253b   :  { %v19821_v2 = vpop.f32.mrf.mxu0 }
0x253d   :  { %v23657_v4 = vpop.f32.mrf.mxu0 }
0x253f   :  { %v19836_v49 = vpop.f32.mrf.mxu0 }
0x2541   :  { %v14718_v36 = vpop.f32.mrf.mxu0 }
0x2543   :  { %v19837_v12 = vpop.f32.mrf.mxu0 }
0x2545   :  { %v23659_v47 = vpop.f32.mrf.mxu0 }
0x2547   :  { %v19852_v10 = vpop.f32.mrf.mxu0 }
0x2549   :  { %v14810_v3 = vpop.f32.mrf.mxu0 }
0x254b   :  { %v19853_v39 = vpop.f32.mrf.mxu0 }
0x25c9   :  { %v14869_v13 = vpop.f32.mrf.mxu1 }
0x25ca   :  { %v15197_v60 = vmul.f32 0.35355338, %v14869_v13 }
0x25cb   :  { %v19858_v23 = vpop.f32.mrf.mxu1 }
0x25cc   :  { %v23664_v51 = vadd.f32 %v20438_v55, %v15197_v60 }
0x25cd   :  { %v14872_v30 = vpop.f32.mrf.mxu1 }
0x25ce   :  { %v15213_v8 = vsel %vm1438_vm4, %v23664_v51, -inf }
0x25cf   :  { %15214 = vmax.xlane.f32.xlu0 %v15213_v8  ;;  %v19859_v26 = vpop.f32.mrf.mxu1 }
0x25d1   :  { %v14961_v11 = vpop.f32.mrf.mxu1 }
0x25d2   :  { %v15199_v6 = vmul.f32 0.35355338, %v14961_v11 }
0x25d3   :  { %v19870_v42 = vpop.f32.mrf.mxu1 }
0x25d4   :  { %v15207_v25 = vadd.f32 %v20438_v55, %v15199_v6 }
0x25d5   :  { %v14964_v44 = vpop.f32.mrf.mxu1 }
0x25d6   :  { %v15219_v40 = vsel %vm1438_vm4, %v15207_v25, -inf }
0x25d7   :  { %15220 = vmax.xlane.f32.xlu0 %v15219_v40  ;;  %v19871_v56 = vpop.f32.mrf.mxu1 }
0x25d9   :  { %v15053_v28 = vpop.f32.mrf.mxu1 }
0x25da   :  { %v14915_v37 = vpop.f32.mrf.mxu0  ;;  %v15201_v54 = vmul.f32 0.35355338, %v15053_v28 }
0x25db   :  { %v15198_v5 = vmul.f32 0.35355338, %v14915_v37  ;;  %v19882_v32 = vpop.f32.mrf.mxu1 }
0x25dc   :  { %v15209_v59 = vadd.f32 %v20438_v55, %v15201_v54  ;;  %v19864_v7 = vpop.f32.mrf.mxu0 }
0x25dd   :  { %v15206_v50 = vadd.f32 %v20439_v27, %v15198_v5  ;;  %v15056_v46 = vpop.f32.mrf.mxu1 }
0x25de   :  { %v14918_v20 = vpop.f32.mrf.mxu0  ;;  %v15225_v31 = vsel %vm1438_vm4, %v15209_v59, -inf }
0x25df   :  { %15226 = vmax.xlane.f32.xlu0 %v15225_v31  ;;  %v19883_v61 = vpop.f32.mrf.mxu1  ;;  %v15216_v53 = vsel %vm1438_vm4, %v15206_v50, -inf }
0x25e0   :  { %15217 = vmax.xlane.f32.xlu1 %v15216_v53  ;;  %v19865_v38 = vpop.f32.mrf.mxu0 }
0x25e1   :  { %v15145_v34 = vpop.f32.mrf.mxu1 }
0x25e2   :  { %v15007_v48 = vpop.f32.mrf.mxu0  ;;  %v15203_v52 = vmul.f32 0.35355338, %v15145_v34 }
0x25e3   :  { %v15200_v17 = vmul.f32 0.35355338, %v15007_v48  ;;  %v19894_v43 = vpop.f32.mrf.mxu1 }
0x25e4   :  { %v15211_v35 = vadd.f32 %v20438_v55, %v15203_v52  ;;  %v19876_v57 = vpop.f32.mrf.mxu0 }
0x25e5   :  { %v15208_v58 = vadd.f32 %v20439_v27, %v15200_v17  ;;  %v15148_v45 = vpop.f32.mrf.mxu1 }
0x25e6   :  { %v15010_v41 = vpop.f32.mrf.mxu0  ;;  %v15231_v1 = vsel %vm1438_vm4, %v15211_v35, -inf }
0x25e7   :  { %15232 = vmax.xlane.f32.xlu0 %v15231_v1  ;;  %v19895_v22 = vpop.f32.mrf.mxu1  ;;  %v15222_v2 = vsel %vm1438_vm4, %v15208_v58, -inf }
0x25e8   :  { %15223 = vmax.xlane.f32.xlu1 %v15222_v2  ;;  %v19877_v49 = vpop.f32.mrf.mxu0 }
0x25ea   :  { %v15099_v36 = vpop.f32.mrf.mxu0 }
0x25eb   :  { %v15202_v12 = vmul.f32 0.35355338, %v15099_v36 }
0x25ec   :  { %v19888_v10 = vpop.f32.mrf.mxu0 }
0x25ed   :  { %v15210_v3 = vadd.f32 %v20439_v27, %v15202_v12 }
0x25ee   :  { %v15102_v39 = vpop.f32.mrf.mxu0 }
0x25ef   :  { %v15228_v13 = vsel %vm1438_vm4, %v15210_v3, -inf }
0x25f0   :  { %15229 = vmax.xlane.f32.xlu1 %v15228_v13  ;;  %v19889_v60 = vpop.f32.mrf.mxu0 }
0x25f1   :  { %v17065_v60 = vld [vmem:[%s23914_s18 + $0x15] ss:$0 sm:$0xff] }
0x25f2   :  { %v15191_v23 = vpop.f32.mrf.mxu0 }
0x25f3   :  { %v15204_v55 = vmul.f32 0.35355338, %v15191_v23 }
0x25f4   :  { %v19900_v30 = vpop.f32.mrf.mxu0 }
0x25f5   :  { %v15212_v8 = vadd.f32 %v20439_v27, %v15204_v55  ;;  %v14584_v55 = vadd.f32 %v17065_v60, %v23633_v21 }
0x25f6   :  { %v15194_v26 = vpop.f32.mrf.mxu0 }
0x25f7   :  { %v15234_v11 = vsel %vm1438_vm4, %v15212_v8, -inf }
0x25f8   :  { %15235 = vmax.xlane.f32.xlu1 %v15234_v11  ;;  %v19901_v6 = vpop.f32.mrf.mxu0  ;;  %v17066_v11 = vld [vmem:[%s23914_s18 + $0x16] ss:$0 sm:$0xff] }
0x2658   :  { %v15215_v42 = vpop.xlane.xlu0 %15214 }
0x2659   :  { %v15237_v44 = vsub.f32 %v23664_v51, %v15215_v42 }
0x265b   :  { %v15245_v40 = vmul.f32 1.442695, %v15237_v44 }
0x265d   :  { %20390 = vpow2.f32 %v15245_v40 }
0x2660   :  { %v15221_v56 = vpop.xlane.xlu0 %15220 }
0x2661   :  { %v15239_v28 = vsub.f32 %v15207_v25, %v15221_v56  ;;  %v14676_v56 = vadd.f32 %v17066_v11, %v23645_v16 }
0x2663   :  { %v15249_v37 = vmul.f32 1.442695, %v15239_v28  ;;  %v15313_v28 = vpack.c.bf16 %v14676_v56, %v14676_v56 }
0x2665   :  { %20392 = vpow2.f32 %v15249_v37  ;;  %v15505_v16 = vsel %vm1942_vm5, %v15313_v28, 0  ;;  %v17039_v28 = vld [vmem:[%s23915_s19 + $0x1c] sm:$0xf] }
0x2668   :  { %v15227_v54 = vpop.xlane.xlu0 %15226 }
0x2669   :  { %v15241_v5 = vsub.f32 %v15209_v59, %v15227_v54  ;;  %v15218_v32 = vpop.xlane.xlu1 %15217  ;;  %v17067_v54 = vld [vmem:[%s23914_s18 + $0x17] ss:$0 sm:$0xff] }
0x266a   :  { %v20391_v7 = vpop.eup %20390  ;;  %v15238_v46 = vsub.f32 %v15206_v50, %v15218_v32 }
0x266b   :  { %v15253_v27 = vmul.f32 1.442695, %v15241_v5  ;;  %v15261_v20 = vsel %vm1438_vm4, %v20391_v7, 0.0 }
0x266c   :  { %v15247_v31 = vmul.f32 1.442695, %v15238_v46  ;;  %15262 = vadd.xlane.f32.xlu0 %v15261_v20  ;;  %v14768_v46 = vadd.f32 %v17067_v54, %v23652_v63 }
0x266d   :  { %20394 = vpow2.f32 %v15253_v27  ;;  %v14624_v27 = vadd.f32 %v17065_v60, %v23655_v29 }
0x266e   :  { %20396 = vpow2.f32 %v15247_v31 }
0x2670   :  { %v15233_v61 = vpop.xlane.xlu0 %15232 }
0x2671   :  { %v15243_v51 = vsub.f32 %v15211_v35, %v15233_v61  ;;  %v15224_v53 = vpop.xlane.xlu1 %15223  ;;  %v15315_v61 = vpack.c.bf16 %v14768_v46, %v14768_v46 }
0x2672   :  { %v20393_v38 = vpop.eup %20392  ;;  %v15240_v34 = vsub.f32 %v15208_v58, %v15224_v53  ;;  %v15312_v53 = vpack.c.bf16 %v14624_v27, %v14624_v27 }
0x2673   :  { %v15257_v25 = vmul.f32 1.442695, %v15243_v51  ;;  %v15267_v48 = vsel %vm1438_vm4, %v20393_v38, 0.0  ;;  %v15597_v29 = vsel %vm1942_vm5, %v15315_v61, 0 }
0x2674   :  { %v15251_v52 = vmul.f32 1.442695, %v15240_v34  ;;  %15268 = vadd.xlane.f32.xlu0 %v15267_v48  ;;  %v15459_v48 = vsel %vm1942_vm5, %v15312_v53, 0 }
0x2675   :  { %20398 = vpow2.f32 %v15257_v25 }
0x2676   :  { %20400 = vpow2.f32 %v15251_v52  ;;  %v14716_v52 = vadd.f32 %v17066_v11, %v23657_v4  ;;  %v17038_v11 = vld [vmem:[%s23915_s19 + $0x18] sm:$0xf] }
0x2679   :  { %v15230_v59 = vpop.xlane.xlu1 %15229 }
0x267a   :  { %v23681_v50 = vpop.eup %20394  ;;  %v15242_v17 = vsub.f32 %v15210_v3, %v15230_v59 }
0x267b   :  { %v23683_v43 = vpop.eup %20396  ;;  %v15273_v57 = vsel %vm1438_vm4, %v23681_v50, 0.0 }
0x267c   :  { %v15255_v35 = vmul.f32 1.442695, %v15242_v17  ;;  %15274 = vadd.xlane.f32.xlu0 %v15273_v57  ;;  %v15264_v58 = vsel %vm1438_vm4, %v23683_v43, 0.0 }
0x267d   :  { %15265 = vadd.xlane.f32.xlu1 %v15264_v58 }
0x267e   :  { %20402 = vpow2.f32 %v15255_v35 }
0x2681   :  { %v15236_v45 = vpop.xlane.xlu1 %15235 }
0x2682   :  { %v23689_v41 = vpop.eup %20398  ;;  %v15244_v1 = vsub.f32 %v15212_v8, %v15236_v45  ;;  %v15311_v8 = vpack.c.bf16 %v14584_v55, %v14584_v55 }
0x2683   :  { %v23691_v22 = vpop.eup %20400  ;;  %v15279_v2 = vsel %vm1438_vm4, %v23689_v41, 0.0 }
0x2684   :  { %v15259_v49 = vmul.f32 1.442695, %v15244_v1  ;;  %15280 = vadd.xlane.f32.xlu0 %v15279_v2  ;;  %v15270_v36 = vsel %vm1438_vm4, %v23691_v22, 0.0  ;;  %v15413_v40 = vsel %vm1942_vm5, %v15311_v8, 0  ;;  %v14808_v1 = vadd.f32 %v17067_v54, %v23659_v47 }
0x2685   :  { %15271 = vadd.xlane.f32.xlu1 %v15270_v36 }
0x2686   :  { %20404 = vpow2.f32 %v15259_v49 }
0x268b   :  { %v23697_v12 = vpop.eup %20402 }
0x268c   :  { %v15276_v10 = vsel %vm1438_vm4, %v23697_v12, 0.0 }
0x268d   :  { %15277 = vadd.xlane.f32.xlu1 %v15276_v10 }
0x2693   :  { %v23701_v3 = vpop.eup %20404 }
0x2694   :  { %v15282_v39 = vsel %vm1438_vm4, %v23701_v3, 0.0 }
0x2695   :  { %15283 = vadd.xlane.f32.xlu1 %v15282_v39 }
0x26f5   :  { %v15263_v13 = vpop.xlane.xlu0 %15262 }
0x26f6   :  { %20406 = vrcp.f32 %v15263_v13 }
0x26fd   :  { %v15269_v23 = vpop.xlane.xlu0 %15268 }
0x26fe   :  { %20408 = vrcp.f32 %v15269_v23 }
0x2703   :  { %v20407_v30 = vpop.eup %20406 }
0x2704   :  { %v15286_v26 = vmul.f32 %v20407_v30, %v20391_v7 }
0x2705   :  { %v15275_v6 = vpop.xlane.xlu0 %15274 }
0x2706   :  { %v15301_v42 = vpack.c.bf16 %v15286_v26, %v15286_v26  ;;  %20410 = vrcp.f32 %v15275_v6  ;;  %v15266_v44 = vpop.xlane.xlu1 %15265 }
0x2707   :  { %20412 = vrcp.f32 %v15266_v44  ;;  %v15875_v44 = vsel %vm1942_vm5, %v17038_v11, 0 }
0x2708   :  { %19905 = vmatmul.mubr.msk.bf16.vlgmr.msra.gmra.mxu1 %vm1438_vm4, %v15301_v42 }
0x2709   :  { %19915 = vmatpush3.bf16.msra.mxu1 %v15413_v40  ;;  %19916 = vmatprep.mubr.msk.bf16.mxu1 %vm20442_vm1, %v20441_v0 }
0x270a   :  { %19926 = vmatprep.subr.bf16.mxu1 %v20441_v0 }
0x270b   :  { %v20409_v21 = vpop.eup %20408 }
0x270c   :  { %v15290_v37 = vmul.f32 %v20409_v21, %v20393_v38 }
0x270d   :  { %v15281_v5 = vpop.xlane.xlu0 %15280 }
0x270e   :  { %v15303_v32 = vpack.c.bf16 %v15290_v37, %v15290_v37  ;;  %20414 = vrcp.f32 %v15281_v5  ;;  %v15272_v7 = vpop.xlane.xlu1 %15271 }
0x270f   :  { %20416 = vrcp.f32 %v15272_v7 }
0x2710   :  { %19917 = vmatmul.mubr.msk.bf16.vlgmr.msra.gmra.mxu1 %vm1438_vm4, %v15303_v32  ;;  %v15964_v32 = vsel %vm1942_vm5, %v17039_v28, 0 }
0x2711   :  { %19927 = vmatpush3.bf16.msra.mxu1 %v15505_v16  ;;  %19928 = vmatprep.mubr.msk.bf16.mxu1 %vm20442_vm1, %v20441_v0 }
0x2712   :  { %19938 = vmatprep.subr.bf16.mxu1 %v20441_v0 }
0x2713   :  { %v20411_v20 = vpop.eup %20410 }
0x2714   :  { %v20413_v31 = vpop.eup %20412  ;;  %v15294_v51 = vmul.f32 %v20411_v20, %v23681_v50 }
0x2715   :  { %v15288_v38 = vmul.f32 %v20413_v31, %v23683_v43  ;;  %v15314_v43 = vpack.c.bf16 %v14716_v52, %v14716_v52 }
0x2716   :  { %v15305_v34 = vpack.c.bf16 %v15294_v51, %v15294_v51  ;;  %v15278_v63 = vpop.xlane.xlu1 %15277 }
0x2717   :  { %v15302_v25 = vpack.c.bf16 %v15288_v38, %v15288_v38  ;;  %20418 = vrcp.f32 %v15278_v63  ;;  %v15551_v45 = vsel %vm1942_vm5, %v15314_v43, 0 }
0x2718   :  { %19929 = vmatmul.mubr.msk.bf16.vlgmr.msra.gmra.mxu1 %vm1438_vm4, %v15305_v34 }
0x2719   :  { %19911 = vmatmul.mubr.msk.bf16.vlgmr.msra.gmra.mxu0 %vm1438_vm4, %v15302_v25  ;;  %19939 = vmatpush3.bf16.msra.mxu1 %v15597_v29 }
0x271a   :  { %19921 = vmatpush3.bf16.msra.mxu0 %v15459_v48  ;;  %19922 = vmatprep.mubr.msk.bf16.mxu0 %vm20442_vm1, %v20441_v0 }
0x271b   :  { %v20415_v59 = vpop.eup %20414  ;;  %19932 = vmatprep.subr.bf16.mxu0 %v20441_v0  ;;  %19940 = vmatprep.mubr.msk.bf16.mxu1 %vm20442_vm1, %v20441_v0 }
0x271c   :  { %v20417_v50 = vpop.eup %20416  ;;  %v15298_v17 = vmul.f32 %v20415_v59, %v23689_v41  ;;  %19950 = vmatprep.subr.bf16.mxu1 %v20441_v0 }
0x271d   :  { %v15292_v4 = vmul.f32 %v20417_v50, %v23691_v22  ;;  %v15316_v22 = vpack.c.bf16 %v14808_v1, %v14808_v1 }
0x271e   :  { %v15307_v57 = vpack.c.bf16 %v15298_v17, %v15298_v17  ;;  %v15284_v35 = vpop.xlane.xlu1 %15283 }
0x271f   :  { %v15304_v58 = vpack.c.bf16 %v15292_v4, %v15292_v4  ;;  %20420 = vrcp.f32 %v15284_v35  ;;  %v15643_v36 = vsel %vm1942_vm5, %v15316_v22, 0 }
0x2720   :  { %19941 = vmatmul.mubr.msk.bf16.vlgmr.msra.gmra.mxu1 %vm1438_vm4, %v15307_v57 }
0x2721   :  { %19923 = vmatmul.mubr.msk.bf16.vlgmr.msra.gmra.mxu0 %vm1438_vm4, %v15304_v58  ;;  %19952 = vmatprep.mubr.msk.bf16.mxu1 %vm20442_vm1, %v20441_v0 }
0x2722   :  { %19933 = vmatpush3.bf16.msra.mxu0 %v15551_v45  ;;  %19934 = vmatprep.mubr.msk.bf16.mxu0 %vm20442_vm1, %v20441_v0 }
0x2723   :  { %19944 = vmatprep.subr.bf16.mxu0 %v20441_v0 }
0x2724   :  { %v20419_v41 = vpop.eup %20418 }
0x2725   :  { %v15296_v2 = vmul.f32 %v20419_v41, %v23697_v12  ;;  %v17036_v12 = vld [vmem:[%s23915_s19 + $0x10] sm:$0xf] }
0x2726   :  { %v15697_v13 = vsel %vm1942_vm5, %v17036_v12, 0 }
0x2727   :  { %v15306_v49 = vpack.c.bf16 %v15296_v2, %v15296_v2  ;;  %19951 = vmatpush3.bf16.msra.mxu1 %v15697_v13 }
0x2728   :  { %19962 = vmatprep.subr.bf16.mxu1 %v20441_v0 }
0x2729   :  { %19935 = vmatmul.mubr.msk.bf16.vlgmr.msra.gmra.mxu0 %vm1438_vm4, %v15306_v49 }
0x272a   :  { %19945 = vmatpush3.bf16.msra.mxu0 %v15643_v36  ;;  %19946 = vmatprep.mubr.msk.bf16.mxu0 %vm20442_vm1, %v20441_v0 }
0x272b   :  { %19956 = vmatprep.subr.bf16.mxu0 %v20441_v0 }
0x272c   :  { %v20421_v47 = vpop.eup %20420 }
0x272d   :  { %v15300_v10 = vmul.f32 %v20421_v47, %v23701_v3  ;;  %v17037_v3 = vld [vmem:[%s23915_s19 + $0x14] sm:$0xf] }
0x272e   :  { %v15786_v55 = vsel %vm1942_vm5, %v17037_v3, 0 }
0x272f   :  { %v15308_v39 = vpack.c.bf16 %v15300_v10, %v15300_v10 }
0x2731   :  { %19947 = vmatmul.mubr.msk.bf16.vlgmr.msra.gmra.mxu0 %vm1438_vm4, %v15308_v39 }
0x2732   :  { %19958 = vmatprep.mubr.msk.bf16.mxu0 %vm20442_vm1, %v20441_v0  ;;  %19957 = vmatpush3.bf16.msra.mxu0 %v15697_v13 }
0x2733   :  { %19968 = vmatprep.subr.bf16.mxu0 %v20441_v0 }
0x27c8   :  { %v15357_v60 = vpop.f32.mrf.mxu1 }
0x27c9   :  { %v15685_v23 = vpack.c.bf16 %v15357_v60, %v15357_v60 }
0x27ca   :  { %v19906_v30 = vpop.f32.mrf.mxu1 }
0x27cb   :  { %19953 = vmatmul.mubr.msk.bf16.vlgmr.msra.gmra.mxu1 %vm1438_vm4, %v15685_v23 }
0x27cc   :  { %v15360_v8 = vpop.f32.mrf.mxu1  ;;  %19963 = vmatpush3.bf16.msra.mxu1 %v15786_v55  ;;  %19964 = vmatprep.mubr.msk.bf16.mxu1 %vm20442_vm1, %v20441_v0 }
0x27cd   :  { %19974 = vmatprep.subr.bf16.mxu1 %v20441_v0 }
0x27ce   :  { %v19907_v26 = vpop.f32.mrf.mxu1 }
0x27d0   :  { %v15449_v6 = vpop.f32.mrf.mxu1 }
0x27d1   :  { %v15687_v42 = vpack.c.bf16 %v15449_v6, %v15449_v6 }
0x27d2   :  { %v19918_v40 = vpop.f32.mrf.mxu1 }
0x27d3   :  { %19965 = vmatmul.mubr.msk.bf16.vlgmr.msra.gmra.mxu1 %vm1438_vm4, %v15687_v42 }
0x27d4   :  { %v15452_v56 = vpop.f32.mrf.mxu1  ;;  %19975 = vmatpush3.bf16.msra.mxu1 %v15875_v44  ;;  %19976 = vmatprep.mubr.msk.bf16.mxu1 %vm20442_vm1, %v20441_v0 }
0x27d5   :  { %19986 = vmatprep.subr.bf16.mxu1 %v20441_v0 }
0x27d6   :  { %v19919_v21 = vpop.f32.mrf.mxu1 }
0x27d7   :  { %v23816_v21 = vld [vmem:[%s23912_s23 + $0x10] sm:$0xff] }
0x27d8   :  { %v15541_v37 = vpop.f32.mrf.mxu1  ;;  %v16066_v28 = vrot.slane %v23816_v21, %v21150_v33 }
0x27d9   :  { %v15403_v54 = vpop.f32.mrf.mxu0  ;;  %v15689_v5 = vpack.c.bf16 %v15541_v37, %v15541_v37 }
0x27da   :  { %v15686_v7 = vpack.c.bf16 %v15403_v54, %v15403_v54  ;;  %v19930_v16 = vpop.f32.mrf.mxu1 }
0x27db   :  { %v19912_v46 = vpop.f32.mrf.mxu0  ;;  %19977 = vmatmul.mubr.msk.bf16.vlgmr.msra.gmra.mxu1 %vm1438_vm4, %v15689_v5 }
0x27dc   :  { %19959 = vmatmul.mubr.msk.bf16.vlgmr.msra.gmra.mxu0 %vm1438_vm4, %v15686_v7  ;;  %v15544_v27 = vpop.f32.mrf.mxu1  ;;  %19987 = vmatpush3.bf16.msra.mxu1 %v15964_v32 }
0x27dd   :  { %v15406_v20 = vpop.f32.mrf.mxu0  ;;  %19969 = vmatpush3.bf16.msra.mxu0 %v15786_v55  ;;  %19970 = vmatprep.mubr.msk.bf16.mxu0 %vm20442_vm1, %v20441_v0 }
0x27de   :  { %v19931_v31 = vpop.f32.mrf.mxu1  ;;  %19988 = vmatprep.mubr.msk.bf16.mxu1 %vm20442_vm1, %v20441_v0  ;;  %19980 = vmatprep.subr.bf16.mxu0 %v20441_v0 }
0x27df   :  { %v19913_v61 = vpop.f32.mrf.mxu0  ;;  %19998 = vmatprep.subr.bf16.mxu1 %v20441_v0 }
0x27e0   :  { %v15633_v51 = vpop.f32.mrf.mxu1 }
0x27e1   :  { %v15495_v53 = vpop.f32.mrf.mxu0  ;;  %v15691_v38 = vpack.c.bf16 %v15633_v51, %v15633_v51 }
0x27e2   :  { %v15688_v34 = vpack.c.bf16 %v15495_v53, %v15495_v53  ;;  %v19942_v63 = vpop.f32.mrf.mxu1 }
0x27e3   :  { %v19924_v25 = vpop.f32.mrf.mxu0  ;;  %19989 = vmatmul.mubr.msk.bf16.vlgmr.msra.gmra.mxu1 %vm1438_vm4, %v15691_v38 }
0x27e4   :  { %19971 = vmatmul.mubr.msk.bf16.vlgmr.msra.gmra.mxu0 %vm1438_vm4, %v15688_v34  ;;  %v15636_v29 = vpop.f32.mrf.mxu1  ;;  %20002 = vmatprep.mubr.msk.bf16.mxu1 %vm20442_vm1, %v20441_v0 }
0x27e5   :  { %v15498_v48 = vpop.f32.mrf.mxu0  ;;  %19981 = vmatpush3.bf16.msra.mxu0 %v15875_v44  ;;  %19982 = vmatprep.mubr.msk.bf16.mxu0 %vm20442_vm1, %v20441_v0 }
0x27e6   :  { %v19943_v52 = vpop.f32.mrf.mxu1  ;;  %19992 = vmatprep.subr.bf16.mxu0 %v20441_v0 }
0x27e7   :  { %v19925_v59 = vpop.f32.mrf.mxu0 }
0x27e9   :  { %v15587_v50 = vpop.f32.mrf.mxu0 }
0x27ea   :  { %v15690_v17 = vpack.c.bf16 %v15587_v50, %v15587_v50 }
0x27eb   :  { %v19936_v43 = vpop.f32.mrf.mxu0 }
0x27ec   :  { %19983 = vmatmul.mubr.msk.bf16.vlgmr.msra.gmra.mxu0 %vm1438_vm4, %v15690_v17 }
0x27ed   :  { %v15590_v4 = vpop.f32.mrf.mxu0  ;;  %19993 = vmatpush3.bf16.msra.mxu0 %v15964_v32  ;;  %19994 = vmatprep.mubr.msk.bf16.mxu0 %vm20442_vm1, %v20441_v0 }
0x27ee   :  { %20006 = vmatprep.subr.bf16.mxu0 %v20441_v0 }
0x27ef   :  { %v19937_v57 = vpop.f32.mrf.mxu0 }
0x27f1   :  { %v15679_v35 = vpop.f32.mrf.mxu0 }
0x27f2   :  { %v15692_v58 = vpack.c.bf16 %v15679_v35, %v15679_v35 }
0x27f3   :  { %v19948_v45 = vpop.f32.mrf.mxu0 }
0x27f4   :  { %19995 = vmatmul.mubr.msk.bf16.vlgmr.msra.gmra.mxu0 %vm1438_vm4, %v15692_v58 }
0x27f5   :  { %v15682_v1 = vpop.f32.mrf.mxu0  ;;  %20014 = vmatprep.mubr.msk.bf16.mxu0 %vm20442_vm1, %v20441_v0 }
0x27f7   :  { %v19949_v41 = vpop.f32.mrf.mxu0 }
0x288b   :  { %v15733_v22 = vpop.f32.mrf.mxu1 }
0x288c   :  { %v16049_v8 = vsel %vm323_vm3, %v15733_v22, 0.0 }
0x288d   :  { %v19954_v2 = vpop.f32.mrf.mxu1 }
0x288f   :  { %v15736_v49 = vpop.f32.mrf.mxu1 }
0x2891   :  { %v19955_v36 = vpop.f32.mrf.mxu1 }
0x2893   :  { %v15822_v47 = vpop.f32.mrf.mxu1 }
0x2894   :  { %v16050_v23 = vsel %vm323_vm3, %v15822_v47, 0.0 }
0x2895   :  { %v19966_v10 = vpop.f32.mrf.mxu1  ;;  %v16051_v6 = vadd.f32 %v16050_v23, %v16049_v8 }
0x2897   :  { %v15825_v39 = vpop.f32.mrf.mxu1 }
0x2899   :  { %v19967_v12 = vpop.f32.mrf.mxu1 }
0x289a   :  { %v20191_v12 = vld [vmem:[%s23916_s20 + $0x10] sm:$0xff]  }
0x289b   :  { %v15911_v13 = vpop.f32.mrf.mxu1 }
0x289c   :  { %v15776_v3 = vpop.f32.mrf.mxu0  ;;  %v16052_v26 = vsel %vm323_vm3, %v15911_v13, 0.0  ;;  %v20192_v13 = vld [vmem:[%s23917_s22 + $0x38] sm:$0xff]  }
0x289d   :  { %v19978_v60 = vpop.f32.mrf.mxu1  ;;  %v16053_v40 = vadd.f32 %v16052_v26, %v16051_v6  ;;  %v16056_v63 = vsel %vm323_vm3, %v15776_v3, 0.0  ;;  %20007 = vmatpush3.bf16.msra.mxu0 %v20192_v13 }
0x289e   :  { %v19960_v55 = vpop.f32.mrf.mxu0  ;;  %20008 = vmatprep.subr.bf16.mxu0 %v20441_v0 }
0x289f   :  { %v15914_v30 = vpop.f32.mrf.mxu1 }
0x28a0   :  { %v15779_v11 = vpop.f32.mrf.mxu0 }
0x28a1   :  { %v19979_v42 = vpop.f32.mrf.mxu1  ;;  %v16100_v11 = vrot.slane %v23816_v21, %v21175_v15  ;;  %v20193_v15 = vld [vmem:[%s23917_s22 + $0x30] sm:$0xff]  }
0x28a2   :  { %v19961_v44 = vpop.f32.mrf.mxu0  ;;  %20009 = vmatpush3.bf16.msra.mxu0 %v20193_v15 }
0x28a3   :  { %v16000_v56 = vpop.f32.mrf.mxu1  ;;  %20010 = vmatprep.subr.bf16.mxu0 %v20441_v0 }
0x28a4   :  { %v15865_v37 = vpop.f32.mrf.mxu0  ;;  %v16054_v54 = vsel %vm323_vm3, %v16000_v56, 0.0  ;;  %v16106_v56 = vrot.slane %v23816_v21, %v21178_v18  ;;  %v20194_v18 = vld [vmem:[%s23917_s22 + $0x28] sm:$0xff]  }
0x28a5   :  { %v16055_v5 = vadd.f32 %v16054_v54, %v16053_v40  ;;  %v19990_v32 = vpop.f32.mrf.mxu1  ;;  %v16057_v33 = vsel %vm323_vm3, %v15865_v37, 0.0 }
0x28a6   :  { %v19972_v7 = vpop.f32.mrf.mxu0  ;;  %v16058_v29 = vadd.f32 %v16057_v33, %v16056_v63  ;;  %20011 = vmatpush3.bf16.msra.mxu0 %v20194_v18  ;;  %v20195_v32 = vld [vmem:[%s23917_s22 + $0x20] sm:$0xff]   ;;  %v16194_v33 = vrot.slane %v23816_v21, %v10902_v24 }
0x28a7   :  { %v16067_v16 = vadd.f32 %v16066_v28, %v16055_v5  ;;  %v16003_v46 = vpop.f32.mrf.mxu1  ;;  %20012 = vmatprep.subr.bf16.mxu0 %v20441_v0  ;;  %v17137_v7 = vld [vmem:[%s23918_s21 + $0x1] ss:$0 sm:$0xff] }
0x28a8   :  { %v15868_v27 = vpop.f32.mrf.mxu0 }
0x28a9   :  { %v19991_v20 = vpop.f32.mrf.mxu1  ;;  %v16069_v31 = vadd.f32 %v16067_v16, %v23346_v19 }
0x28aa   :  { %v19973_v61 = vpop.f32.mrf.mxu0  ;;  %20013 = vmatpush3.bf16.msra.mxu0 %v20195_v32 }
0x28ab   :  { %v16071_v51 = vsel %vm323_vm3, %v16069_v31, 0.0 }
0x28ac   :  { %v15954_v53 = vpop.f32.mrf.mxu0  ;;  %16072 = vadd.xlane.f32.xlu0 %v16071_v51 }
0x28ad   :  { %v16059_v25 = vsel %vm323_vm3, %v15954_v53, 0.0 }
0x28ae   :  { %v19984_v38 = vpop.f32.mrf.mxu0  ;;  %v16060_v52 = vadd.f32 %v16059_v25, %v16058_v29 }
0x28b0   :  { %v15957_v34 = vpop.f32.mrf.mxu0 }
0x28b2   :  { %v19985_v48 = vpop.f32.mrf.mxu0 }
0x28b4   :  { %v16043_v59 = vpop.f32.mrf.mxu0 }
0x28b5   :  { %v16061_v50 = vsel %vm323_vm3, %v16043_v59, 0.0 }
0x28b6   :  { %v16062_v19 = vadd.f32 %v16061_v50, %v16060_v52  ;;  %v19996_v17 = vpop.f32.mrf.mxu0 }
0x28b8   :  { %v16068_v43 = vadd.f32 %v16066_v28, %v16062_v19  ;;  %v16046_v4 = vpop.f32.mrf.mxu0 }
0x28ba   :  { %v19997_v57 = vpop.f32.mrf.mxu0  ;;  %v16070_v35 = vadd.f32 %v16068_v43, %v23371_v14  ;;  %v20190_v14 = vld [vmem:[%s23916_s20 + $0x18] sm:$0xff]  }
0x28bb   :  { %19999 = vmatpush3.bf16.msra.mxu1 %v20190_v14 }
0x28bc   :  { %v16074_v58 = vsel %vm323_vm3, %v16070_v35, 0.0  ;;  %20000 = vmatprep.subr.bf16.mxu1 %v20441_v0 }
0x28bd   :  { %16075 = vadd.xlane.f32.xlu1 %v16074_v58 }
0x28bf   :  { %20001 = vmatpush3.bf16.msra.mxu1 %v20191_v12 }
0x28c0   :  { %20018 = vmatprep.subr.bf16.mxu1 %v20441_v0 }
0x2935   :  { %v16073_v45 = vpop.xlane.xlu0 %16072 }
0x2936   :  { %v16077_v1 = vmul.f32 0.03125, %v16073_v45 }
0x2938   :  { %v16079_v41 = vsub.f32 %v16069_v31, %v16077_v1 }
0x293a   :  { %v16081_v22 = vmul.f32 %v16079_v41, %v16079_v41 }
0x293c   :  { %v16083_v2 = vsel %vm323_vm3, %v16081_v22, 0.0 }
0x293d   :  { %16084 = vadd.xlane.f32.xlu0 %v16083_v2  ;;  %v20196_v2 = vld [vmem:[%s23919_s24 + $0x8] sm:$0xff]  }
0x2946   :  { %v16076_v49 = vpop.xlane.xlu1 %16075 }
0x2947   :  { %v16078_v36 = vmul.f32 0.03125, %v16076_v49  ;;  %v20197_v49 = vld [vmem:[%s23919_s24] sm:$0xff]  }
0x2949   :  { %v16080_v47 = vsub.f32 %v16070_v35, %v16078_v36 }
0x294b   :  { %v16082_v10 = vmul.f32 %v16080_v47, %v16080_v47 }
0x294d   :  { %v16086_v39 = vsel %vm323_vm3, %v16082_v10, 0.0 }
0x294e   :  { %16087 = vadd.xlane.f32.xlu1 %v16086_v39 }
0x29c6   :  { %v16085_v3 = vpop.xlane.xlu0 %16084 }
0x29c7   :  { %v16089_v60 = vmul.f32 0.03125, %v16085_v3  ;;  %v16294_v3 = vrot.slane %v23816_v21, %v11002_v62 }
0x29c9   :  { %v16091_v23 = vadd.f32 1e-05, %v16089_v60 }
0x29cb   :  { %20422 = vrsqrt.f32 %v16091_v23 }
0x29d7   :  { %v16088_v55 = vpop.xlane.xlu1 %16087 }
0x29d8   :  { %v16090_v30 = vmul.f32 0.03125, %v16088_v55  ;;  %v20423_v26 = vpop.eup %20422 }
0x29d9   :  { %v16095_v6 = vmul.f32 %v20423_v26, %v16079_v41 }
0x29da   :  { %v16092_v8 = vadd.f32 1e-05, %v16090_v30  ;;  %v17146_v30 = vld [vmem:[%s23912_s23 + $0x18] ss:$0 sm:$0xff] }
0x29db   :  { %v16101_v44 = vmul.f32 %v16100_v11, %v16095_v6 }
0x29dc   :  { %20424 = vrsqrt.f32 %v16092_v8 }
0x29dd   :  { %v16107_v37 = vadd.f32 %v16106_v56, %v16101_v44 }
0x29e9   :  { %v20425_v42 = vpop.eup %20424 }
0x29ea   :  { %v16096_v40 = vmul.f32 %v20425_v42, %v16080_v47 }
0x29ec   :  { %v16102_v28 = vmul.f32 %v16100_v11, %v16096_v40 }
0x29ee   :  { %v16108_v54 = vadd.f32 %v16106_v56, %v16102_v28 }
0x29f0   :  { %v16125_v5 = vpack.c.bf16 %v16108_v54, %v16107_v37 }
0x29f2   :  { %20003 = vmatmul.mubr.msk.bf16.vlgmr.msra.gmra.mxu1 %vm323_vm3, %v16125_v5 }
0x29f3   :  { %20022 = vmatprep.mubr.msk.bf16.mxu1 %vm20442_vm1, %v20441_v0  ;;  %20019 = vmatpush3.bf16.msra.mxu1 %v20196_v2 }
0x29f4   :  { %20020 = vmatprep.subr.bf16.mxu1 %v20441_v0 }
0x29f7   :  { %20021 = vmatpush3.bf16.msra.mxu1 %v20197_v49 }
0x2ab2   :  { %v16181_v16 = vpop.f32.mrf.mxu1 }
0x2ab3   :  { %v16182_v27 = vadd.f32 %v17137_v7, %v16181_v16 }
0x2ab4   :  { %v20004_v46 = vpop.f32.mrf.mxu1 }
0x2ab5   :  { %v16188_v51 = vmax.f32 %v16182_v27, 0.0 }
0x2ab6   :  { %v16184_v20 = vpop.f32.mrf.mxu1 }
0x2ab7   :  { %v16185_v31 = vadd.f32 %v17137_v7, %v16184_v20 }
0x2ab8   :  { %v20005_v61 = vpop.f32.mrf.mxu1 }
0x2ab9   :  { %v16189_v53 = vmax.f32 %v16185_v31, 0.0 }
0x2abb   :  { %v16190_v38 = vpack.c.bf16 %v16189_v53, %v16188_v51 }
0x2abd   :  { %20015 = vmatmul.mubr.msk.bf16.vlgmr.msra.gmra.mxu0 %vm2840_vm6, %v16190_v38 }
0x2b7d   :  { %v16256_v34 = vpop.f32.mrf.mxu0 }
0x2b7e   :  { %v16257_v63 = vadd.f32 %v16256_v34, %v16194_v33 }
0x2b7f   :  { %v20016_v25 = vpop.f32.mrf.mxu0 }
0x2b80   :  { %v16263_v29 = vadd.f32 %v16257_v63, %v16107_v37 }
0x2b81   :  { %v16259_v48 = vpop.f32.mrf.mxu0 }
0x2b82   :  { %v16260_v52 = vadd.f32 %v16259_v48, %v16194_v33  ;;  %v16265_v59 = vsel %vm323_vm3, %v16263_v29, 0.0 }
0x2b83   :  { %16266 = vadd.xlane.f32.xlu0 %v16265_v59  ;;  %v20017_v50 = vpop.f32.mrf.mxu0 }
0x2b84   :  { %v16264_v19 = vadd.f32 %v16260_v52, %v16108_v54 }
0x2b86   :  { %v16268_v17 = vsel %vm323_vm3, %v16264_v19, 0.0 }
0x2b87   :  { %16269 = vadd.xlane.f32.xlu1 %v16268_v17 }
0x2c0c   :  { %v16267_v43 = vpop.xlane.xlu0 %16266 }
0x2c0d   :  { %v16271_v4 = vmul.f32 0.03125, %v16267_v43 }
0x2c0f   :  { %v16273_v57 = vsub.f32 %v16263_v29, %v16271_v4 }
0x2c10   :  { %v16270_v35 = vpop.xlane.xlu1 %16269 }
0x2c11   :  { %v16272_v58 = vmul.f32 0.03125, %v16270_v35  ;;  %v16275_v24 = vmul.f32 %v16273_v57, %v16273_v57 }
0x2c13   :  { %v16274_v45 = vsub.f32 %v16264_v19, %v16272_v58  ;;  %v16277_v1 = vsel %vm323_vm3, %v16275_v24, 0.0 }
0x2c14   :  { %16278 = vadd.xlane.f32.xlu0 %v16277_v1 }
0x2c15   :  { %v16276_v41 = vmul.f32 %v16274_v45, %v16274_v45 }
0x2c17   :  { %v16280_v22 = vsel %vm323_vm3, %v16276_v41, 0.0 }
0x2c18   :  { %16281 = vadd.xlane.f32.xlu1 %v16280_v22 }
0x2c9d   :  { %v16279_v36 = vpop.xlane.xlu0 %16278 }
0x2c9e   :  { %v16283_v47 = vmul.f32 0.03125, %v16279_v36 }
0x2ca0   :  { %v16285_v10 = vadd.f32 1e-05, %v16283_v47 }
0x2ca1   :  { %v16282_v39 = vpop.xlane.xlu1 %16281 }
0x2ca2   :  { %20426 = vrsqrt.f32 %v16285_v10  ;;  %v16284_v14 = vmul.f32 0.03125, %v16282_v39 }
0x2ca4   :  { %v16286_v12 = vadd.f32 1e-05, %v16284_v14 }
0x2ca6   :  { %20428 = vrsqrt.f32 %v16286_v12 }
0x2caf   :  { %v20427_v13 = vpop.eup %20426 }
0x2cb0   :  { %v16289_v60 = vmul.f32 %v20427_v13, %v16273_v57 }
0x2cb2   :  { %v16295_v23 = vmul.f32 %v16294_v3, %v16289_v60 }
0x2cb3   :  { %v20429_v0 = vpop.eup %20428 }
0x2cb4   :  { %v16290_v55 = vmul.f32 %v20429_v0, %v16274_v45  ;;  %v16301_v26 = vadd.f32 %v17146_v30, %v16295_v23 }
0x2cb6   :  { %v16296_v8 = vmul.f32 %v16294_v3, %v16290_v55 }
0x2cb8   :  { %v16302_v11 = vadd.f32 %v17146_v30, %v16296_v8 }
0x2cba   :  { %v16303_v6 = vpack.c.bf16 %v16302_v11, %v16301_v26 }
0x2cbc   :  { %20023 = vmatmul.mubr.msk.bf16.vlgmr.msra.gmra.mxu1 %vm323_vm3, %v16303_v6 }
0x2d7c   :  { %v16364_v42 = vpop.f32.mrf.mxu1 }
0x2d7d   :  { %v16365_v62 = vadd.f32 %v17147_v9, %v16364_v42 }
0x2d7e   :  { %v20024_v21 = vpop.f32.mrf.mxu1 }
0x2d7f   :  { %16371 = vst [vmem:[%s23958_s30] sm:$0xff] %v16365_v62 }
0x2d80   :  { %v16367_v44 = vpop.f32.mrf.mxu1 }
0x2d81   :  { %v16368_v40 = vadd.f32 %v17147_v9, %v16367_v44 }
0x2d82   :  { %v20025_v56 = vpop.f32.mrf.mxu1 }
0x2d83   :  { %16372 = vst [vmem:[%s23958_s30 + $0x8] sm:$0xff] %v16368_v40 }

</bundles_post_ra>
